<compile_context>
chip_gen: v7x
topology: tpu7x:2x2x1
jax: 0.10.0
libtpu: 0.0.40
codegen_flags: <defaults>
</compile_context>

<pallas_src>
import numpy as np
import jax
import jax.numpy as jnp
from jax.experimental import pallas as pl
from jax.experimental.pallas import tpu as pltpu

NEG_SLOPE = 0.01   # F.leaky_relu default negative_slope
LANE = 128         # one feature-map row (or 4 packed rows for layer 1) per 128-lane stripe

# (H, W, Cin, Cout) of each conv layer's *input* feature map.
_LAYERS = ((28, 28, 1, 4), (14, 14, 4, 8), (7, 7, 8, 16))


# ---------------------------------------------------------------------------
# Fused kernel: conv1..3 (+leaky_relu+maxpool) + fc1 + relu + fc2 + log_softmax
# ---------------------------------------------------------------------------
def _cnn_fused_kernel(x_ref, r1_ref, bl1_ref, r2_ref, bl2_ref, r3_ref, bl3_ref,
                      w1_ref, b1_ref, w2_ref, b2_ref,
                      o_ref,
                      act2_ref, act3_ref, actf_ref):
    tb = x_ref.shape[0]
    zero_stripe = jnp.zeros((tb, LANE), dtype=act2_ref.dtype)
    # Only the never-written padding-ring stripes need zeroing (interiors are fully
    # 128-lane overwritten every step before being read).  Zeroed every step (3
    # stripes, cheap) so it stays correct if the parallel axis is split across TCs.
    act2_ref[:, 0 * LANE:1 * LANE] = zero_stripe
    act2_ref[:, 15 * LANE:16 * LANE] = zero_stripe
    act3_ref[:, 0 * LANE:1 * LANE] = zero_stripe

    def conv_lrelu_pool(src_ref, r_ref, bias_ref, layer, packed_rows, dst_ref, dst_off):
        H, W, Cin, Cout = layer
        Ho = H // 2
        r = r_ref[...]                                               # stays in VMEM (bf16)
        bias = jnp.broadcast_to(bias_ref[...], (tb, LANE))           # hoisted broadcast (f32)
        for ho in range(Ho):                                         # static unroll (<=14)
            if packed_rows:                                          # layer 1: 4 rows / stripe
                lhs = src_ref[:, ho * LANE:(ho + 1) * LANE]          # (tb, 128) bf16
            else:                                                    # padded layout, 4-stripe window
                a = 2 * ho * LANE
                lhs = src_ref[:, a:a + 4 * LANE]                     # (tb, 512) bf16
            y = jnp.dot(lhs, r, preferred_element_type=jnp.float32)  # (tb, 4*128) f32
            # max over the four (dy, dx) pooling phases, THEN bias + leaky_relu
            p = jnp.maximum(jnp.maximum(y[:, 0 * LANE:1 * LANE], y[:, 1 * LANE:2 * LANE]),
                            jnp.maximum(y[:, 2 * LANE:3 * LANE], y[:, 3 * LANE:4 * LANE]))
            p = p + bias
            p = jnp.maximum(p, NEG_SLOPE * p)                        # leaky_relu (slope in (0,1))
            off = (ho + dst_off) * LANE
            dst_ref[:, off:off + LANE] = p.astype(dst_ref.dtype)     # full 128-lane store

    conv_lrelu_pool(x_ref,    r1_ref, bl1_ref, _LAYERS[0], True,  act2_ref, 1)
    conv_lrelu_pool(act2_ref, r2_ref, bl2_ref, _LAYERS[1], False, act3_ref, 1)
    conv_lrelu_pool(act3_ref, r3_ref, bl3_ref, _LAYERS[2], False, actf_ref, 0)

    # fc1 + relu (+Dropout(p=0.2): identity in eval mode) -> fc2 -> log_softmax
    # TODO(synk): a training-mode forward would need pltpu.prng_seed/prng_random_bits masking.
    h = jnp.dot(actf_ref[...], w1_ref[...], preferred_element_type=jnp.float32)
    h = jnp.maximum(h + b1_ref[...], 0.0)
    logits = jnp.dot(h, w2_ref[...], preferred_element_type=jnp.float32) + b2_ref[...]
    mx = jnp.max(logits, axis=1, keepdims=True)
    s = logits - mx
    lse = jnp.log(jnp.sum(jnp.exp(s), axis=1, keepdims=True))
    o_ref[...] = (s - lse).astype(o_ref.dtype)


# ---------------------------------------------------------------------------
# Wrapper-side weight lifting (pure layout work, runs once under jit)
# ---------------------------------------------------------------------------
def _lift_conv(w_torch, b_torch, layer, packed_rows=False):
    """Lift (Cout, Cin, 3, 3) conv weights into a matrix that maps a 4-row input
    window (either 4 stripes, or 4 rows packed into 1 stripe for layer 1) to all
    four (dy, dx) pooling phases of one pooled output row (each LANE wide)."""
    H, W, Cin, Cout = layer
    Wo = W // 2
    w = jnp.transpose(w_torch, (2, 3, 1, 0))                 # (ky, kx, Cin, Cout)
    # Placement: tap (ky,kx) of phase (dy,dx), output column wo reads the input at
    # window-row sy = dy+ky, column wi = 2*wo+dx+kx-1 (out-of-range wi = zero pad).
    M = np.zeros((3, 3, 4, W, 2, 2, Wo), np.float32)         # (ky,kx,sy,wi,dy,dx,wo)
    for ky in range(3):
        for kx in range(3):
            for dy in range(2):
                for dx in range(2):
                    for wo in range(Wo):
                        wi = 2 * wo + dx + kx - 1
                        if 0 <= wi < W:
                            M[ky, kx, dy + ky, wi, dy, dx, wo] = 1.0
    R = jnp.einsum('yxic,yxvwedo->vwiedoc', w, jnp.asarray(M))   # (4, W, Cin, 2, 2, Wo, Cout)
    R = R.reshape(4, W * Cin, 4, Wo * Cout)
    if packed_rows:                                          # layer 1: lane = sy*W*Cin + wi
        R = R.reshape(4 * W * Cin, 4, Wo * Cout)
        R = jnp.pad(R, ((0, LANE - 4 * W * Cin), (0, 0), (0, LANE - Wo * Cout)))
        R = R.reshape(LANE, 4 * LANE)
    else:                                                    # lane = sy*LANE + wi*Cin + ci
        R = jnp.pad(R, ((0, 0), (0, LANE - W * Cin), (0, 0), (0, LANE - Wo * Cout)))
        R = R.reshape(4 * LANE, 4 * LANE)
    bias = jnp.pad(jnp.tile(b_torch, Wo), (0, LANE - Wo * Cout)).reshape(1, LANE)
    return R.astype(jnp.bfloat16), bias.astype(jnp.float32)


def _lift_fc1(fc1_w):
    """PyTorch flattens NCHW (index = c*9 + h*3 + w); our activation is striped
    as lane = h*128 + w*16 + c, so permute + re-stride the fc1 weight."""
    w1 = jnp.transpose(fc1_w.reshape(50, 16, 3, 3), (2, 3, 1, 0))   # (h, w, c, 50)
    w1 = w1.reshape(3, 48, 50)
    w1 = jnp.pad(w1, ((0, 0), (0, LANE - 48), (0, 0)))
    return w1.reshape(3 * LANE, 50).astype(jnp.bfloat16)


def _round_up(n, m):
    return ((n + m - 1) // m) * m


@jax.jit
def cnn_forward(x, params):
    """x: (B, 28, 28) float32 -> (B, 10) log-probabilities (mirrors CNN.forward)."""
    B, H, W = x.shape
    # Batch tile: fill the MXU M dimension for real batches; round small demo
    # batches up to one bf16 sublane tile.  (TB=128 keeps >=2 grid steps on v7x
    # megacore for batches >= 256.)
    TB = 128 if B >= 128 else _round_up(B, 16)
    nb = pl.cdiv(B, TB)
    B_pad = nb * TB
    Ho1 = H // 2                                            # 14 packed layer-1 stripes

    # Layer-1 packed input: stripe ho holds vertically-padded rows 2ho..2ho+3,
    # each W columns wide, packed at stride W within the 128-lane stripe.
    xpad = jnp.pad(x.astype(jnp.float32), ((0, B_pad - B), (1, 1), (0, 0)))   # (B_pad, H+2, W)
    rows = (np.arange(Ho1, dtype=np.int32)[:, None] * 2
            + np.arange(4, dtype=np.int32)[None, :])                          # (Ho1, 4)
    xin = xpad[:, rows, :].reshape(B_pad, Ho1, 4 * W)
    xin = jnp.pad(xin, ((0, 0), (0, 0), (0, LANE - 4 * W)))
    xin = xin.reshape(B_pad, Ho1 * LANE).astype(jnp.bfloat16)

    r1, bl1 = _lift_conv(params["cl1_w"], params["cl1_b"], _LAYERS[0], packed_rows=True)
    r2, bl2 = _lift_conv(params["cl2_w"], params["cl2_b"], _LAYERS[1])
    r3, bl3 = _lift_conv(params["cl3_w"], params["cl3_b"], _LAYERS[2])
    w1 = _lift_fc1(params["fc1_w"])
    b1 = params["fc1_b"].reshape(1, 50).astype(jnp.float32)
    w2 = params["fc2_w"].T.astype(jnp.float32)
    b2 = params["fc2_b"].reshape(1, 10).astype(jnp.float32)

    def whole(arr):  # whole-array block; block index constant -> fetched once
        return pl.BlockSpec(arr.shape, lambda b: (0,) * arr.ndim)

    out = pl.pallas_call(
        _cnn_fused_kernel,
        out_shape=jax.ShapeDtypeStruct((B_pad, 10), jnp.float32),
        grid=(nb,),
        in_specs=[
            pl.BlockSpec((TB, Ho1 * LANE), lambda b: (b, 0)),
            whole(r1), whole(bl1), whole(r2), whole(bl2), whole(r3), whole(bl3),
            whole(w1), whole(b1), whole(w2), whole(b2),
        ],
        out_specs=pl.BlockSpec((TB, 10), lambda b: (b, 0)),
        scratch_shapes=[
            pltpu.VMEM((TB, 16 * LANE), jnp.bfloat16),   # conv1 out / conv2 in (padded ring)
            pltpu.VMEM((TB, 9 * LANE), jnp.bfloat16),    # conv2 out / conv3 in (padded ring)
            pltpu.VMEM((TB, 3 * LANE), jnp.bfloat16),    # conv3 out / fc1 in (striped)
        ],
        compiler_params=pltpu.CompilerParams(
            dimension_semantics=("parallel",),
        ),
    )(xin, r1, bl1, r2, bl2, r3, bl3, w1, b1, w2, b2)
    return out[:B]


# ---------------------------------------------------------------------------
# Pure-JAX (XLA) reference with PyTorch semantics, for self-checking
# ---------------------------------------------------------------------------
def _reference_forward(x, params):
    hp = jax.lax.Precision.HIGHEST

    def conv(h, w, b):
        out = jax.lax.conv_general_dilated(
            h, w, window_strides=(1, 1), padding=((1, 1), (1, 1)),
            dimension_numbers=('NCHW', 'OIHW', 'NCHW'), precision=hp)
        return out + b[None, :, None, None]

    def pool(h):
        B_, C_, H_, W_ = h.shape
        Ho_, Wo_ = H_ // 2, W_ // 2
        h = h[:, :, :2 * Ho_, :2 * Wo_].reshape(B_, C_, Ho_, 2, Wo_, 2)
        return h.max(axis=(3, 5))

    h = x[:, None, :, :]
    for i in (1, 2, 3):
        h = conv(h, params[f"cl{i}_w"], params[f"cl{i}_b"])
        h = jnp.where(h > 0, h, NEG_SLOPE * h)
        h = pool(h)
    h = h.reshape(h.shape[0], -1)
    h = jnp.maximum(jnp.dot(h, params["fc1_w"].T, precision=hp) + params["fc1_b"], 0.0)
    logits = jnp.dot(h, params["fc2_w"].T, precision=hp) + params["fc2_b"]
    return jax.nn.log_softmax(logits, axis=1)


# ---------------------------------------------------------------------------
# Deterministic parameter init + demo run
# ---------------------------------------------------------------------------
def init_params(key):
    ks = jax.random.split(key, 10)
    n = lambda k, shape, scale: scale * jax.random.normal(k, shape, jnp.float32)
    return {
        "cl1_w": n(ks[0], (4, 1, 3, 3), 0.3),   "cl1_b": n(ks[1], (4,), 0.05),
        "cl2_w": n(ks[2], (8, 4, 3, 3), 0.15),  "cl2_b": n(ks[3], (8,), 0.05),
        "cl3_w": n(ks[4], (16, 8, 3, 3), 0.1),  "cl3_b": n(ks[5], (16,), 0.05),
        "fc1_w": n(ks[6], (50, 144), 0.05),     "fc1_b": n(ks[7], (50,), 0.05),
        "fc2_w": n(ks[8], (10, 50), 0.1),       "fc2_b": n(ks[9], (10,), 0.05),
    }


if __name__ == "__main__":
    key = jax.random.PRNGKey(0)
    pkey, xkey = jax.random.split(key)
    params = init_params(pkey)
    # fc1 in_features=144 = 16*3*3 => 28x28 input (28 -> 14 -> 7 -> 3 via floor pooling)
    x = jax.random.normal(xkey, (2, 28, 28), jnp.float32)

    out = jax.block_until_ready(cnn_forward(x, params))
    assert out.shape == (2, 10), out.shape
    # log_softmax sanity: rows should sum to ~1 after exp
    assert bool(jnp.all(jnp.abs(jnp.sum(jnp.exp(out), axis=1) - 1.0) < 1e-3))
    # matches the pure-JAX/XLA f32 reference of the PyTorch module
    # (tolerance widened slightly vs. the all-f32 version because conv/fc1
    #  weights and activations are bf16 with f32 accumulation)
    ref = _reference_forward(x, params)
    assert bool(jnp.allclose(out, ref, atol=5e-2, rtol=5e-2)), \
        float(jnp.max(jnp.abs(out - ref)))
    print("KERNEL_OK")
</pallas_src>

<mosaic_0001>
module attributes {stable_mosaic.version = 11 : i64} {
  func.func @_cnn_fused_kernel(%arg0: i32, %arg1: memref<16x1792xbf16, #tpu.memory_space<vmem>>, %arg2: memref<128x512xbf16, #tpu.memory_space<vmem>>, %arg3: memref<1x128xf32, #tpu.memory_space<vmem>>, %arg4: memref<512x512xbf16, #tpu.memory_space<vmem>>, %arg5: memref<1x128xf32, #tpu.memory_space<vmem>>, %arg6: memref<512x512xbf16, #tpu.memory_space<vmem>>, %arg7: memref<1x128xf32, #tpu.memory_space<vmem>>, %arg8: memref<384x50xbf16, #tpu.memory_space<vmem>>, %arg9: memref<1x50xf32, #tpu.memory_space<vmem>>, %arg10: memref<50x10xf32, #tpu.memory_space<vmem>>, %arg11: memref<1x10xf32, #tpu.memory_space<vmem>>, %arg12: memref<16x10xf32, #tpu.memory_space<vmem>>, %arg13: memref<16x2048xbf16, #tpu.memory_space<vmem>>, %arg14: memref<16x1152xbf16, #tpu.memory_space<vmem>>, %arg15: memref<16x384xbf16, #tpu.memory_space<vmem>>) attributes {dimension_semantics = [#tpu.dimension_semantics<parallel>], iteration_bounds = array<i64: 1>, scalar_prefetch = 0 : i64, scratch_operands = 3 : i64, tpu.core_type = #tpu.core_type<tc>, window_params = [{transform_indices = @transform_0, window_bounds = array<i64: 16, 1792>}, {pipeline_mode = #tpu.pipeline_mode<synchronous>, transform_indices = @transform_1, window_bounds = array<i64: 128, 512>}, {pipeline_mode = #tpu.pipeline_mode<synchronous>, transform_indices = @transform_2, window_bounds = array<i64: 1, 128>}, {pipeline_mode = #tpu.pipeline_mode<synchronous>, transform_indices = @transform_3, window_bounds = array<i64: 512, 512>}, {pipeline_mode = #tpu.pipeline_mode<synchronous>, transform_indices = @transform_4, window_bounds = array<i64: 1, 128>}, {pipeline_mode = #tpu.pipeline_mode<synchronous>, transform_indices = @transform_5, window_bounds = array<i64: 512, 512>}, {pipeline_mode = #tpu.pipeline_mode<synchronous>, transform_indices = @transform_6, window_bounds = array<i64: 1, 128>}, {pipeline_mode = #tpu.pipeline_mode<synchronous>, transform_indices = @transform_7, window_bounds = array<i64: 384, 50>}, {pipeline_mode = #tpu.pipeline_mode<synchronous>, transform_indices = @transform_8, window_bounds = array<i64: 1, 50>}, {pipeline_mode = #tpu.pipeline_mode<synchronous>, transform_indices = @transform_9, window_bounds = array<i64: 50, 10>}, {pipeline_mode = #tpu.pipeline_mode<synchronous>, transform_indices = @transform_10, window_bounds = array<i64: 1, 10>}, {transform_indices = @transform_11, window_bounds = array<i64: 16, 10>}]} {
    %cst = arith.constant 0.000000e+00 : bf16
    %0 = vector.broadcast %cst : bf16 to vector<16x128xbf16>
    %c0 = arith.constant 0 : index
    %c0_0 = arith.constant 0 : index
    %1 = vector.load %arg13[%c0, %c0_0] : memref<16x2048xbf16, #tpu.memory_space<vmem>>, vector<16x128xbf16>
    tpu.vector_store %arg13[%c0, %c0_0], %0 {strides = array<i32>} : memref<16x2048xbf16, #tpu.memory_space<vmem>>, vector<16x128xbf16>,
    %c0_1 = arith.constant 0 : index
    %c1920 = arith.constant 1920 : index
    %2 = vector.load %arg13[%c0_1, %c1920] : memref<16x2048xbf16, #tpu.memory_space<vmem>>, vector<16x128xbf16>
    tpu.vector_store %arg13[%c0_1, %c1920], %0 {strides = array<i32>} : memref<16x2048xbf16, #tpu.memory_space<vmem>>, vector<16x128xbf16>,
    %c0_2 = arith.constant 0 : index
    %c0_3 = arith.constant 0 : index
    %3 = vector.load %arg14[%c0_2, %c0_3] : memref<16x1152xbf16, #tpu.memory_space<vmem>>, vector<16x128xbf16>
    tpu.vector_store %arg14[%c0_2, %c0_3], %0 {strides = array<i32>} : memref<16x1152xbf16, #tpu.memory_space<vmem>>, vector<16x128xbf16>,
    %c0_4 = arith.constant 0 : index
    %c0_5 = arith.constant 0 : index
    %4 = vector.load %arg2[%c0_4, %c0_5] : memref<128x512xbf16, #tpu.memory_space<vmem>>, vector<128x512xbf16>
    %c0_6 = arith.constant 0 : index
    %c0_7 = arith.constant 0 : index
    %5 = vector.load %arg3[%c0_6, %c0_7] : memref<1x128xf32, #tpu.memory_space<vmem>>, vector<1x128xf32>
    %6 = vector.shape_cast %5 : vector<1x128xf32> to vector<1x128xf32>
    %7 = vector.broadcast %6 : vector<1x128xf32> to vector<16x128xf32>
    %c0_8 = arith.constant 0 : index
    %c0_9 = arith.constant 0 : index
    %8 = vector.load %arg1[%c0_8, %c0_9] : memref<16x1792xbf16, #tpu.memory_space<vmem>>, vector<16x128xbf16>
    %cst_10 = arith.constant dense<0.000000e+00> : vector<16x512xf32>
    %9 = tpu.matmul %8, %4, %cst_10 {dimension_numbers = #tpu.dot_dimension_numbers<[1], [0], [0], [1], [0, 0, 1, 1], [], []>} : vector<16x128xbf16>, vector<128x512xbf16>, vector<16x512xf32> -> vector<16x512xf32>
    %10 = vector.extract_strided_slice %9 {offsets = [0, 0], sizes = [16, 128], strides = [1, 1]} : vector<16x512xf32> to vector<16x128xf32>
    %11 = vector.extract_strided_slice %9 {offsets = [0, 128], sizes = [16, 128], strides = [1, 1]} : vector<16x512xf32> to vector<16x128xf32>
    %12 = arith.maximumf %10, %11 : vector<16x128xf32>
    %13 = vector.extract_strided_slice %9 {offsets = [0, 256], sizes = [16, 128], strides = [1, 1]} : vector<16x512xf32> to vector<16x128xf32>
    %14 = vector.extract_strided_slice %9 {offsets = [0, 384], sizes = [16, 128], strides = [1, 1]} : vector<16x512xf32> to vector<16x128xf32>
    %15 = arith.maximumf %13, %14 : vector<16x128xf32>
    %16 = arith.maximumf %12, %15 : vector<16x128xf32>
    %17 = arith.addf %16, %7 : vector<16x128xf32>
    %cst_11 = arith.constant 0.00999999977 : f32
    %18 = vector.broadcast %cst_11 : f32 to vector<16x128xf32>
    %19 = arith.mulf %18, %17 : vector<16x128xf32>
    %20 = arith.maximumf %17, %19 : vector<16x128xf32>
    %21 = arith.truncf %20 : vector<16x128xf32> to vector<16x128xbf16>
    %c0_12 = arith.constant 0 : index
    %c128 = arith.constant 128 : index
    %22 = vector.load %arg13[%c0_12, %c128] : memref<16x2048xbf16, #tpu.memory_space<vmem>>, vector<16x128xbf16>
    tpu.vector_store %arg13[%c0_12, %c128], %21 {strides = array<i32>} : memref<16x2048xbf16, #tpu.memory_space<vmem>>, vector<16x128xbf16>,
    %c0_13 = arith.constant 0 : index
    %c128_14 = arith.constant 128 : index
    %23 = vector.load %arg1[%c0_13, %c128_14] : memref<16x1792xbf16, #tpu.memory_space<vmem>>, vector<16x128xbf16>
    %cst_15 = arith.constant dense<0.000000e+00> : vector<16x512xf32>
    %24 = tpu.matmul %23, %4, %cst_15 {dimension_numbers = #tpu.dot_dimension_numbers<[1], [0], [0], [1], [0, 0, 1, 1], [], []>} : vector<16x128xbf16>, vector<128x512xbf16>, vector<16x512xf32> -> vector<16x512xf32>
    %25 = vector.extract_strided_slice %24 {offsets = [0, 0], sizes = [16, 128], strides = [1, 1]} : vector<16x512xf32> to vector<16x128xf32>
    %26 = vector.extract_strided_slice %24 {offsets = [0, 128], sizes = [16, 128], strides = [1, 1]} : vector<16x512xf32> to vector<16x128xf32>
    %27 = arith.maximumf %25, %26 : vector<16x128xf32>
    %28 = vector.extract_strided_slice %24 {offsets = [0, 256], sizes = [16, 128], strides = [1, 1]} : vector<16x512xf32> to vector<16x128xf32>
    %29 = vector.extract_strided_slice %24 {offsets = [0, 384], sizes = [16, 128], strides = [1, 1]} : vector<16x512xf32> to vector<16x128xf32>
    %30 = arith.maximumf %28, %29 : vector<16x128xf32>
    %31 = arith.maximumf %27, %30 : vector<16x128xf32>
    %32 = arith.addf %31, %7 : vector<16x128xf32>
    %cst_16 = arith.constant 0.00999999977 : f32
    %33 = vector.broadcast %cst_16 : f32 to vector<16x128xf32>
    %34 = arith.mulf %33, %32 : vector<16x128xf32>
    %35 = arith.maximumf %32, %34 : vector<16x128xf32>
    %36 = arith.truncf %35 : vector<16x128xf32> to vector<16x128xbf16>
    %c0_17 = arith.constant 0 : index
    %c256 = arith.constant 256 : index
    %37 = vector.load %arg13[%c0_17, %c256] : memref<16x2048xbf16, #tpu.memory_space<vmem>>, vector<16x128xbf16>
    tpu.vector_store %arg13[%c0_17, %c256], %36 {strides = array<i32>} : memref<16x2048xbf16, #tpu.memory_space<vmem>>, vector<16x128xbf16>,
    %c0_18 = arith.constant 0 : index
    %c256_19 = arith.constant 256 : index
    %38 = vector.load %arg1[%c0_18, %c256_19] : memref<16x1792xbf16, #tpu.memory_space<vmem>>, vector<16x128xbf16>
    %cst_20 = arith.constant dense<0.000000e+00> : vector<16x512xf32>
    %39 = tpu.matmul %38, %4, %cst_20 {dimension_numbers = #tpu.dot_dimension_numbers<[1], [0], [0], [1], [0, 0, 1, 1], [], []>} : vector<16x128xbf16>, vector<128x512xbf16>, vector<16x512xf32> -> vector<16x512xf32>
    %40 = vector.extract_strided_slice %39 {offsets = [0, 0], sizes = [16, 128], strides = [1, 1]} : vector<16x512xf32> to vector<16x128xf32>
    %41 = vector.extract_strided_slice %39 {offsets = [0, 128], sizes = [16, 128], strides = [1, 1]} : vector<16x512xf32> to vector<16x128xf32>
    %42 = arith.maximumf %40, %41 : vector<16x128xf32>
    %43 = vector.extract_strided_slice %39 {offsets = [0, 256], sizes = [16, 128], strides = [1, 1]} : vector<16x512xf32> to vector<16x128xf32>
    %44 = vector.extract_strided_slice %39 {offsets = [0, 384], sizes = [16, 128], strides = [1, 1]} : vector<16x512xf32> to vector<16x128xf32>
    %45 = arith.maximumf %43, %44 : vector<16x128xf32>
    %46 = arith.maximumf %42, %45 : vector<16x128xf32>
    %47 = arith.addf %46, %7 : vector<16x128xf32>
    %cst_21 = arith.constant 0.00999999977 : f32
    %48 = vector.broadcast %cst_21 : f32 to vector<16x128xf32>
    %49 = arith.mulf %48, %47 : vector<16x128xf32>
    %50 = arith.maximumf %47, %49 : vector<16x128xf32>
    %51 = arith.truncf %50 : vector<16x128xf32> to vector<16x128xbf16>
    %c0_22 = arith.constant 0 : index
    %c384 = arith.constant 384 : index
    %52 = vector.load %arg13[%c0_22, %c384] : memref<16x2048xbf16, #tpu.memory_space<vmem>>, vector<16x128xbf16>
    tpu.vector_store %arg13[%c0_22, %c384], %51 {strides = array<i32>} : memref<16x2048xbf16, #tpu.memory_space<vmem>>, vector<16x128xbf16>,
    %c0_23 = arith.constant 0 : index
    %c384_24 = arith.constant 384 : index
    %53 = vector.load %arg1[%c0_23, %c384_24] : memref<16x1792xbf16, #tpu.memory_space<vmem>>, vector<16x128xbf16>
    %cst_25 = arith.constant dense<0.000000e+00> : vector<16x512xf32>
    %54 = tpu.matmul %53, %4, %cst_25 {dimension_numbers = #tpu.dot_dimension_numbers<[1], [0], [0], [1], [0, 0, 1, 1], [], []>} : vector<16x128xbf16>, vector<128x512xbf16>, vector<16x512xf32> -> vector<16x512xf32>
    %55 = vector.extract_strided_slice %54 {offsets = [0, 0], sizes = [16, 128], strides = [1, 1]} : vector<16x512xf32> to vector<16x128xf32>
    %56 = vector.extract_strided_slice %54 {offsets = [0, 128], sizes = [16, 128], strides = [1, 1]} : vector<16x512xf32> to vector<16x128xf32>
    %57 = arith.maximumf %55, %56 : vector<16x128xf32>
    %58 = vector.extract_strided_slice %54 {offsets = [0, 256], sizes = [16, 128], strides = [1, 1]} : vector<16x512xf32> to vector<16x128xf32>
    %59 = vector.extract_strided_slice %54 {offsets = [0, 384], sizes = [16, 128], strides = [1, 1]} : vector<16x512xf32> to vector<16x128xf32>
    %60 = arith.maximumf %58, %59 : vector<16x128xf32>
    %61 = arith.maximumf %57, %60 : vector<16x128xf32>
    %62 = arith.addf %61, %7 : vector<16x128xf32>
    %cst_26 = arith.constant 0.00999999977 : f32
    %63 = vector.broadcast %cst_26 : f32 to vector<16x128xf32>
    %64 = arith.mulf %63, %62 : vector<16x128xf32>
    %65 = arith.maximumf %62, %64 : vector<16x128xf32>
    %66 = arith.truncf %65 : vector<16x128xf32> to vector<16x128xbf16>
    %c0_27 = arith.constant 0 : index
    %c512 = arith.constant 512 : index
    %67 = vector.load %arg13[%c0_27, %c512] : memref<16x2048xbf16, #tpu.memory_space<vmem>>, vector<16x128xbf16>
    tpu.vector_store %arg13[%c0_27, %c512], %66 {strides = array<i32>} : memref<16x2048xbf16, #tpu.memory_space<vmem>>, vector<16x128xbf16>,
    %c0_28 = arith.constant 0 : index
    %c512_29 = arith.constant 512 : index
    %68 = vector.load %arg1[%c0_28, %c512_29] : memref<16x1792xbf16, #tpu.memory_space<vmem>>, vector<16x128xbf16>
    %cst_30 = arith.constant dense<0.000000e+00> : vector<16x512xf32>
    %69 = tpu.matmul %68, %4, %cst_30 {dimension_numbers = #tpu.dot_dimension_numbers<[1], [0], [0], [1], [0, 0, 1, 1], [], []>} : vector<16x128xbf16>, vector<128x512xbf16>, vector<16x512xf32> -> vector<16x512xf32>
    %70 = vector.extract_strided_slice %69 {offsets = [0, 0], sizes = [16, 128], strides = [1, 1]} : vector<16x512xf32> to vector<16x128xf32>
    %71 = vector.extract_strided_slice %69 {offsets = [0, 128], sizes = [16, 128], strides = [1, 1]} : vector<16x512xf32> to vector<16x128xf32>
    %72 = arith.maximumf %70, %71 : vector<16x128xf32>
    %73 = vector.extract_strided_slice %69 {offsets = [0, 256], sizes = [16, 128], strides = [1, 1]} : vector<16x512xf32> to vector<16x128xf32>
    %74 = vector.extract_strided_slice %69 {offsets = [0, 384], sizes = [16, 128], strides = [1, 1]} : vector<16x512xf32> to vector<16x128xf32>
    %75 = arith.maximumf %73, %74 : vector<16x128xf32>
    %76 = arith.maximumf %72, %75 : vector<16x128xf32>
    %77 = arith.addf %76, %7 : vector<16x128xf32>
    %cst_31 = arith.constant 0.00999999977 : f32
    %78 = vector.broadcast %cst_31 : f32 to vector<16x128xf32>
    %79 = arith.mulf %78, %77 : vector<16x128xf32>
    %80 = arith.maximumf %77, %79 : vector<16x128xf32>
    %81 = arith.truncf %80 : vector<16x128xf32> to vector<16x128xbf16>
    %c0_32 = arith.constant 0 : index
    %c640 = arith.constant 640 : index
    %82 = vector.load %arg13[%c0_32, %c640] : memref<16x2048xbf16, #tpu.memory_space<vmem>>, vector<16x128xbf16>
    tpu.vector_store %arg13[%c0_32, %c640], %81 {strides = array<i32>} : memref<16x2048xbf16, #tpu.memory_space<vmem>>, vector<16x128xbf16>,
    %c0_33 = arith.constant 0 : index
    %c640_34 = arith.constant 640 : index
    %83 = vector.load %arg1[%c0_33, %c640_34] : memref<16x1792xbf16, #tpu.memory_space<vmem>>, vector<16x128xbf16>
    %cst_35 = arith.constant dense<0.000000e+00> : vector<16x512xf32>
    %84 = tpu.matmul %83, %4, %cst_35 {dimension_numbers = #tpu.dot_dimension_numbers<[1], [0], [0], [1], [0, 0, 1, 1], [], []>} : vector<16x128xbf16>, vector<128x512xbf16>, vector<16x512xf32> -> vector<16x512xf32>
    %85 = vector.extract_strided_slice %84 {offsets = [0, 0], sizes = [16, 128], strides = [1, 1]} : vector<16x512xf32> to vector<16x128xf32>
    %86 = vector.extract_strided_slice %84 {offsets = [0, 128], sizes = [16, 128], strides = [1, 1]} : vector<16x512xf32> to vector<16x128xf32>
    %87 = arith.maximumf %85, %86 : vector<16x128xf32>
    %88 = vector.extract_strided_slice %84 {offsets = [0, 256], sizes = [16, 128], strides = [1, 1]} : vector<16x512xf32> to vector<16x128xf32>
    %89 = vector.extract_strided_slice %84 {offsets = [0, 384], sizes = [16, 128], strides = [1, 1]} : vector<16x512xf32> to vector<16x128xf32>
    %90 = arith.maximumf %88, %89 : vector<16x128xf32>
    %91 = arith.maximumf %87, %90 : vector<16x128xf32>
    %92 = arith.addf %91, %7 : vector<16x128xf32>
    %cst_36 = arith.constant 0.00999999977 : f32
    %93 = vector.broadcast %cst_36 : f32 to vector<16x128xf32>
    %94 = arith.mulf %93, %92 : vector<16x128xf32>
    %95 = arith.maximumf %92, %94 : vector<16x128xf32>
    %96 = arith.truncf %95 : vector<16x128xf32> to vector<16x128xbf16>
    %c0_37 = arith.constant 0 : index
    %c768 = arith.constant 768 : index
    %97 = vector.load %arg13[%c0_37, %c768] : memref<16x2048xbf16, #tpu.memory_space<vmem>>, vector<16x128xbf16>
    tpu.vector_store %arg13[%c0_37, %c768], %96 {strides = array<i32>} : memref<16x2048xbf16, #tpu.memory_space<vmem>>, vector<16x128xbf16>,
    %c0_38 = arith.constant 0 : index
    %c768_39 = arith.constant 768 : index
    %98 = vector.load %arg1[%c0_38, %c768_39] : memref<16x1792xbf16, #tpu.memory_space<vmem>>, vector<16x128xbf16>
    %cst_40 = arith.constant dense<0.000000e+00> : vector<16x512xf32>
    %99 = tpu.matmul %98, %4, %cst_40 {dimension_numbers = #tpu.dot_dimension_numbers<[1], [0], [0], [1], [0, 0, 1, 1], [], []>} : vector<16x128xbf16>, vector<128x512xbf16>, vector<16x512xf32> -> vector<16x512xf32>
    %100 = vector.extract_strided_slice %99 {offsets = [0, 0], sizes = [16, 128], strides = [1, 1]} : vector<16x512xf32> to vector<16x128xf32>
    %101 = vector.extract_strided_slice %99 {offsets = [0, 128], sizes = [16, 128], strides = [1, 1]} : vector<16x512xf32> to vector<16x128xf32>
    %102 = arith.maximumf %100, %101 : vector<16x128xf32>
    %103 = vector.extract_strided_slice %99 {offsets = [0, 256], sizes = [16, 128], strides = [1, 1]} : vector<16x512xf32> to vector<16x128xf32>
    %104 = vector.extract_strided_slice %99 {offsets = [0, 384], sizes = [16, 128], strides = [1, 1]} : vector<16x512xf32> to vector<16x128xf32>
    %105 = arith.maximumf %103, %104 : vector<16x128xf32>
    %106 = arith.maximumf %102, %105 : vector<16x128xf32>
    %107 = arith.addf %106, %7 : vector<16x128xf32>
    %cst_41 = arith.constant 0.00999999977 : f32
    %108 = vector.broadcast %cst_41 : f32 to vector<16x128xf32>
    %109 = arith.mulf %108, %107 : vector<16x128xf32>
    %110 = arith.maximumf %107, %109 : vector<16x128xf32>
    %111 = arith.truncf %110 : vector<16x128xf32> to vector<16x128xbf16>
    %c0_42 = arith.constant 0 : index
    %c896 = arith.constant 896 : index
    %112 = vector.load %arg13[%c0_42, %c896] : memref<16x2048xbf16, #tpu.memory_space<vmem>>, vector<16x128xbf16>
    tpu.vector_store %arg13[%c0_42, %c896], %111 {strides = array<i32>} : memref<16x2048xbf16, #tpu.memory_space<vmem>>, vector<16x128xbf16>,
    %c0_43 = arith.constant 0 : index
    %c896_44 = arith.constant 896 : index
    %113 = vector.load %arg1[%c0_43, %c896_44] : memref<16x1792xbf16, #tpu.memory_space<vmem>>, vector<16x128xbf16>
    %cst_45 = arith.constant dense<0.000000e+00> : vector<16x512xf32>
    %114 = tpu.matmul %113, %4, %cst_45 {dimension_numbers = #tpu.dot_dimension_numbers<[1], [0], [0], [1], [0, 0, 1, 1], [], []>} : vector<16x128xbf16>, vector<128x512xbf16>, vector<16x512xf32> -> vector<16x512xf32>
    %115 = vector.extract_strided_slice %114 {offsets = [0, 0], sizes = [16, 128], strides = [1, 1]} : vector<16x512xf32> to vector<16x128xf32>
    %116 = vector.extract_strided_slice %114 {offsets = [0, 128], sizes = [16, 128], strides = [1, 1]} : vector<16x512xf32> to vector<16x128xf32>
    %117 = arith.maximumf %115, %116 : vector<16x128xf32>
    %118 = vector.extract_strided_slice %114 {offsets = [0, 256], sizes = [16, 128], strides = [1, 1]} : vector<16x512xf32> to vector<16x128xf32>
    %119 = vector.extract_strided_slice %114 {offsets = [0, 384], sizes = [16, 128], strides = [1, 1]} : vector<16x512xf32> to vector<16x128xf32>
    %120 = arith.maximumf %118, %119 : vector<16x128xf32>
    %121 = arith.maximumf %117, %120 : vector<16x128xf32>
    %122 = arith.addf %121, %7 : vector<16x128xf32>
    %cst_46 = arith.constant 0.00999999977 : f32
    %123 = vector.broadcast %cst_46 : f32 to vector<16x128xf32>
    %124 = arith.mulf %123, %122 : vector<16x128xf32>
    %125 = arith.maximumf %122, %124 : vector<16x128xf32>
    %126 = arith.truncf %125 : vector<16x128xf32> to vector<16x128xbf16>
    %c0_47 = arith.constant 0 : index
    %c1024 = arith.constant 1024 : index
    %127 = vector.load %arg13[%c0_47, %c1024] : memref<16x2048xbf16, #tpu.memory_space<vmem>>, vector<16x128xbf16>
    tpu.vector_store %arg13[%c0_47, %c1024], %126 {strides = array<i32>} : memref<16x2048xbf16, #tpu.memory_space<vmem>>, vector<16x128xbf16>,
    %c0_48 = arith.constant 0 : index
    %c1024_49 = arith.constant 1024 : index
    %128 = vector.load %arg1[%c0_48, %c1024_49] : memref<16x1792xbf16, #tpu.memory_space<vmem>>, vector<16x128xbf16>
    %cst_50 = arith.constant dense<0.000000e+00> : vector<16x512xf32>
    %129 = tpu.matmul %128, %4, %cst_50 {dimension_numbers = #tpu.dot_dimension_numbers<[1], [0], [0], [1], [0, 0, 1, 1], [], []>} : vector<16x128xbf16>, vector<128x512xbf16>, vector<16x512xf32> -> vector<16x512xf32>
    %130 = vector.extract_strided_slice %129 {offsets = [0, 0], sizes = [16, 128], strides = [1, 1]} : vector<16x512xf32> to vector<16x128xf32>
    %131 = vector.extract_strided_slice %129 {offsets = [0, 128], sizes = [16, 128], strides = [1, 1]} : vector<16x512xf32> to vector<16x128xf32>
    %132 = arith.maximumf %130, %131 : vector<16x128xf32>
    %133 = vector.extract_strided_slice %129 {offsets = [0, 256], sizes = [16, 128], strides = [1, 1]} : vector<16x512xf32> to vector<16x128xf32>
    %134 = vector.extract_strided_slice %129 {offsets = [0, 384], sizes = [16, 128], strides = [1, 1]} : vector<16x512xf32> to vector<16x128xf32>
    %135 = arith.maximumf %133, %134 : vector<16x128xf32>
    %136 = arith.maximumf %132, %135 : vector<16x128xf32>
    %137 = arith.addf %136, %7 : vector<16x128xf32>
    %cst_51 = arith.constant 0.00999999977 : f32
    %138 = vector.broadcast %cst_51 : f32 to vector<16x128xf32>
    %139 = arith.mulf %138, %137 : vector<16x128xf32>
    %140 = arith.maximumf %137, %139 : vector<16x128xf32>
    %141 = arith.truncf %140 : vector<16x128xf32> to vector<16x128xbf16>
    %c0_52 = arith.constant 0 : index
    %c1152 = arith.constant 1152 : index
    %142 = vector.load %arg13[%c0_52, %c1152] : memref<16x2048xbf16, #tpu.memory_space<vmem>>, vector<16x128xbf16>
    tpu.vector_store %arg13[%c0_52, %c1152], %141 {strides = array<i32>} : memref<16x2048xbf16, #tpu.memory_space<vmem>>, vector<16x128xbf16>,
    %c0_53 = arith.constant 0 : index
    %c1152_54 = arith.constant 1152 : index
    %143 = vector.load %arg1[%c0_53, %c1152_54] : memref<16x1792xbf16, #tpu.memory_space<vmem>>, vector<16x128xbf16>
    %cst_55 = arith.constant dense<0.000000e+00> : vector<16x512xf32>
    %144 = tpu.matmul %143, %4, %cst_55 {dimension_numbers = #tpu.dot_dimension_numbers<[1], [0], [0], [1], [0, 0, 1, 1], [], []>} : vector<16x128xbf16>, vector<128x512xbf16>, vector<16x512xf32> -> vector<16x512xf32>
    %145 = vector.extract_strided_slice %144 {offsets = [0, 0], sizes = [16, 128], strides = [1, 1]} : vector<16x512xf32> to vector<16x128xf32>
    %146 = vector.extract_strided_slice %144 {offsets = [0, 128], sizes = [16, 128], strides = [1, 1]} : vector<16x512xf32> to vector<16x128xf32>
    %147 = arith.maximumf %145, %146 : vector<16x128xf32>
    %148 = vector.extract_strided_slice %144 {offsets = [0, 256], sizes = [16, 128], strides = [1, 1]} : vector<16x512xf32> to vector<16x128xf32>
    %149 = vector.extract_strided_slice %144 {offsets = [0, 384], sizes = [16, 128], strides = [1, 1]} : vector<16x512xf32> to vector<16x128xf32>
    %150 = arith.maximumf %148, %149 : vector<16x128xf32>
    %151 = arith.maximumf %147, %150 : vector<16x128xf32>
    %152 = arith.addf %151, %7 : vector<16x128xf32>
    %cst_56 = arith.constant 0.00999999977 : f32
    %153 = vector.broadcast %cst_56 : f32 to vector<16x128xf32>
    %154 = arith.mulf %153, %152 : vector<16x128xf32>
    %155 = arith.maximumf %152, %154 : vector<16x128xf32>
    %156 = arith.truncf %155 : vector<16x128xf32> to vector<16x128xbf16>
    %c0_57 = arith.constant 0 : index
    %c1280 = arith.constant 1280 : index
    %157 = vector.load %arg13[%c0_57, %c1280] : memref<16x2048xbf16, #tpu.memory_space<vmem>>, vector<16x128xbf16>
    tpu.vector_store %arg13[%c0_57, %c1280], %156 {strides = array<i32>} : memref<16x2048xbf16, #tpu.memory_space<vmem>>, vector<16x128xbf16>,
    %c0_58 = arith.constant 0 : index
    %c1280_59 = arith.constant 1280 : index
    %158 = vector.load %arg1[%c0_58, %c1280_59] : memref<16x1792xbf16, #tpu.memory_space<vmem>>, vector<16x128xbf16>
    %cst_60 = arith.constant dense<0.000000e+00> : vector<16x512xf32>
    %159 = tpu.matmul %158, %4, %cst_60 {dimension_numbers = #tpu.dot_dimension_numbers<[1], [0], [0], [1], [0, 0, 1, 1], [], []>} : vector<16x128xbf16>, vector<128x512xbf16>, vector<16x512xf32> -> vector<16x512xf32>
    %160 = vector.extract_strided_slice %159 {offsets = [0, 0], sizes = [16, 128], strides = [1, 1]} : vector<16x512xf32> to vector<16x128xf32>
    %161 = vector.extract_strided_slice %159 {offsets = [0, 128], sizes = [16, 128], strides = [1, 1]} : vector<16x512xf32> to vector<16x128xf32>
    %162 = arith.maximumf %160, %161 : vector<16x128xf32>
    %163 = vector.extract_strided_slice %159 {offsets = [0, 256], sizes = [16, 128], strides = [1, 1]} : vector<16x512xf32> to vector<16x128xf32>
    %164 = vector.extract_strided_slice %159 {offsets = [0, 384], sizes = [16, 128], strides = [1, 1]} : vector<16x512xf32> to vector<16x128xf32>
    %165 = arith.maximumf %163, %164 : vector<16x128xf32>
    %166 = arith.maximumf %162, %165 : vector<16x128xf32>
    %167 = arith.addf %166, %7 : vector<16x128xf32>
    %cst_61 = arith.constant 0.00999999977 : f32
    %168 = vector.broadcast %cst_61 : f32 to vector<16x128xf32>
    %169 = arith.mulf %168, %167 : vector<16x128xf32>
    %170 = arith.maximumf %167, %169 : vector<16x128xf32>
    %171 = arith.truncf %170 : vector<16x128xf32> to vector<16x128xbf16>
    %c0_62 = arith.constant 0 : index
    %c1408 = arith.constant 1408 : index
    %172 = vector.load %arg13[%c0_62, %c1408] : memref<16x2048xbf16, #tpu.memory_space<vmem>>, vector<16x128xbf16>
    tpu.vector_store %arg13[%c0_62, %c1408], %171 {strides = array<i32>} : memref<16x2048xbf16, #tpu.memory_space<vmem>>, vector<16x128xbf16>,
    %c0_63 = arith.constant 0 : index
    %c1408_64 = arith.constant 1408 : index
    %173 = vector.load %arg1[%c0_63, %c1408_64] : memref<16x1792xbf16, #tpu.memory_space<vmem>>, vector<16x128xbf16>
    %cst_65 = arith.constant dense<0.000000e+00> : vector<16x512xf32>
    %174 = tpu.matmul %173, %4, %cst_65 {dimension_numbers = #tpu.dot_dimension_numbers<[1], [0], [0], [1], [0, 0, 1, 1], [], []>} : vector<16x128xbf16>, vector<128x512xbf16>, vector<16x512xf32> -> vector<16x512xf32>
    %175 = vector.extract_strided_slice %174 {offsets = [0, 0], sizes = [16, 128], strides = [1, 1]} : vector<16x512xf32> to vector<16x128xf32>
    %176 = vector.extract_strided_slice %174 {offsets = [0, 128], sizes = [16, 128], strides = [1, 1]} : vector<16x512xf32> to vector<16x128xf32>
    %177 = arith.maximumf %175, %176 : vector<16x128xf32>
    %178 = vector.extract_strided_slice %174 {offsets = [0, 256], sizes = [16, 128], strides = [1, 1]} : vector<16x512xf32> to vector<16x128xf32>
    %179 = vector.extract_strided_slice %174 {offsets = [0, 384], sizes = [16, 128], strides = [1, 1]} : vector<16x512xf32> to vector<16x128xf32>
    %180 = arith.maximumf %178, %179 : vector<16x128xf32>
    %181 = arith.maximumf %177, %180 : vector<16x128xf32>
    %182 = arith.addf %181, %7 : vector<16x128xf32>
    %cst_66 = arith.constant 0.00999999977 : f32
    %183 = vector.broadcast %cst_66 : f32 to vector<16x128xf32>
    %184 = arith.mulf %183, %182 : vector<16x128xf32>
    %185 = arith.maximumf %182, %184 : vector<16x128xf32>
    %186 = arith.truncf %185 : vector<16x128xf32> to vector<16x128xbf16>
    %c0_67 = arith.constant 0 : index
    %c1536 = arith.constant 1536 : index
    %187 = vector.load %arg13[%c0_67, %c1536] : memref<16x2048xbf16, #tpu.memory_space<vmem>>, vector<16x128xbf16>
    tpu.vector_store %arg13[%c0_67, %c1536], %186 {strides = array<i32>} : memref<16x2048xbf16, #tpu.memory_space<vmem>>, vector<16x128xbf16>,
    %c0_68 = arith.constant 0 : index
    %c1536_69 = arith.constant 1536 : index
    %188 = vector.load %arg1[%c0_68, %c1536_69] : memref<16x1792xbf16, #tpu.memory_space<vmem>>, vector<16x128xbf16>
    %cst_70 = arith.constant dense<0.000000e+00> : vector<16x512xf32>
    %189 = tpu.matmul %188, %4, %cst_70 {dimension_numbers = #tpu.dot_dimension_numbers<[1], [0], [0], [1], [0, 0, 1, 1], [], []>} : vector<16x128xbf16>, vector<128x512xbf16>, vector<16x512xf32> -> vector<16x512xf32>
    %190 = vector.extract_strided_slice %189 {offsets = [0, 0], sizes = [16, 128], strides = [1, 1]} : vector<16x512xf32> to vector<16x128xf32>
    %191 = vector.extract_strided_slice %189 {offsets = [0, 128], sizes = [16, 128], strides = [1, 1]} : vector<16x512xf32> to vector<16x128xf32>
    %192 = arith.maximumf %190, %191 : vector<16x128xf32>
    %193 = vector.extract_strided_slice %189 {offsets = [0, 256], sizes = [16, 128], strides = [1, 1]} : vector<16x512xf32> to vector<16x128xf32>
    %194 = vector.extract_strided_slice %189 {offsets = [0, 384], sizes = [16, 128], strides = [1, 1]} : vector<16x512xf32> to vector<16x128xf32>
    %195 = arith.maximumf %193, %194 : vector<16x128xf32>
    %196 = arith.maximumf %192, %195 : vector<16x128xf32>
    %197 = arith.addf %196, %7 : vector<16x128xf32>
    %cst_71 = arith.constant 0.00999999977 : f32
    %198 = vector.broadcast %cst_71 : f32 to vector<16x128xf32>
    %199 = arith.mulf %198, %197 : vector<16x128xf32>
    %200 = arith.maximumf %197, %199 : vector<16x128xf32>
    %201 = arith.truncf %200 : vector<16x128xf32> to vector<16x128xbf16>
    %c0_72 = arith.constant 0 : index
    %c1664 = arith.constant 1664 : index
    %202 = vector.load %arg13[%c0_72, %c1664] : memref<16x2048xbf16, #tpu.memory_space<vmem>>, vector<16x128xbf16>
    tpu.vector_store %arg13[%c0_72, %c1664], %201 {strides = array<i32>} : memref<16x2048xbf16, #tpu.memory_space<vmem>>, vector<16x128xbf16>,
    %c0_73 = arith.constant 0 : index
    %c1664_74 = arith.constant 1664 : index
    %203 = vector.load %arg1[%c0_73, %c1664_74] : memref<16x1792xbf16, #tpu.memory_space<vmem>>, vector<16x128xbf16>
    %cst_75 = arith.constant dense<0.000000e+00> : vector<16x512xf32>
    %204 = tpu.matmul %203, %4, %cst_75 {dimension_numbers = #tpu.dot_dimension_numbers<[1], [0], [0], [1], [0, 0, 1, 1], [], []>} : vector<16x128xbf16>, vector<128x512xbf16>, vector<16x512xf32> -> vector<16x512xf32>
    %205 = vector.extract_strided_slice %204 {offsets = [0, 0], sizes = [16, 128], strides = [1, 1]} : vector<16x512xf32> to vector<16x128xf32>
    %206 = vector.extract_strided_slice %204 {offsets = [0, 128], sizes = [16, 128], strides = [1, 1]} : vector<16x512xf32> to vector<16x128xf32>
    %207 = arith.maximumf %205, %206 : vector<16x128xf32>
    %208 = vector.extract_strided_slice %204 {offsets = [0, 256], sizes = [16, 128], strides = [1, 1]} : vector<16x512xf32> to vector<16x128xf32>
    %209 = vector.extract_strided_slice %204 {offsets = [0, 384], sizes = [16, 128], strides = [1, 1]} : vector<16x512xf32> to vector<16x128xf32>
    %210 = arith.maximumf %208, %209 : vector<16x128xf32>
    %211 = arith.maximumf %207, %210 : vector<16x128xf32>
    %212 = arith.addf %211, %7 : vector<16x128xf32>
    %cst_76 = arith.constant 0.00999999977 : f32
    %213 = vector.broadcast %cst_76 : f32 to vector<16x128xf32>
    %214 = arith.mulf %213, %212 : vector<16x128xf32>
    %215 = arith.maximumf %212, %214 : vector<16x128xf32>
    %216 = arith.truncf %215 : vector<16x128xf32> to vector<16x128xbf16>
    %c0_77 = arith.constant 0 : index
    %c1792 = arith.constant 1792 : index
    %217 = vector.load %arg13[%c0_77, %c1792] : memref<16x2048xbf16, #tpu.memory_space<vmem>>, vector<16x128xbf16>
    tpu.vector_store %arg13[%c0_77, %c1792], %216 {strides = array<i32>} : memref<16x2048xbf16, #tpu.memory_space<vmem>>, vector<16x128xbf16>,
    %c0_78 = arith.constant 0 : index
    %c0_79 = arith.constant 0 : index
    %218 = vector.load %arg4[%c0_78, %c0_79] : memref<512x512xbf16, #tpu.memory_space<vmem>>, vector<512x512xbf16>
    %c0_80 = arith.constant 0 : index
    %c0_81 = arith.constant 0 : index
    %219 = vector.load %arg5[%c0_80, %c0_81] : memref<1x128xf32, #tpu.memory_space<vmem>>, vector<1x128xf32>
    %220 = vector.shape_cast %219 : vector<1x128xf32> to vector<1x128xf32>
    %221 = vector.broadcast %220 : vector<1x128xf32> to vector<16x128xf32>
    %c0_82 = arith.constant 0 : index
    %c0_83 = arith.constant 0 : index
    %222 = vector.load %arg13[%c0_82, %c0_83] : memref<16x2048xbf16, #tpu.memory_space<vmem>>, vector<16x512xbf16>
    %cst_84 = arith.constant dense<0.000000e+00> : vector<16x512xf32>
    %223 = tpu.matmul %222, %218, %cst_84 {dimension_numbers = #tpu.dot_dimension_numbers<[1], [0], [0], [1], [0, 0, 1, 1], [], []>} : vector<16x512xbf16>, vector<512x512xbf16>, vector<16x512xf32> -> vector<16x512xf32>
    %224 = vector.extract_strided_slice %223 {offsets = [0, 0], sizes = [16, 128], strides = [1, 1]} : vector<16x512xf32> to vector<16x128xf32>
    %225 = vector.extract_strided_slice %223 {offsets = [0, 128], sizes = [16, 128], strides = [1, 1]} : vector<16x512xf32> to vector<16x128xf32>
    %226 = arith.maximumf %224, %225 : vector<16x128xf32>
    %227 = vector.extract_strided_slice %223 {offsets = [0, 256], sizes = [16, 128], strides = [1, 1]} : vector<16x512xf32> to vector<16x128xf32>
    %228 = vector.extract_strided_slice %223 {offsets = [0, 384], sizes = [16, 128], strides = [1, 1]} : vector<16x512xf32> to vector<16x128xf32>
    %229 = arith.maximumf %227, %228 : vector<16x128xf32>
    %230 = arith.maximumf %226, %229 : vector<16x128xf32>
    %231 = arith.addf %230, %221 : vector<16x128xf32>
    %cst_85 = arith.constant 0.00999999977 : f32
    %232 = vector.broadcast %cst_85 : f32 to vector<16x128xf32>
    %233 = arith.mulf %232, %231 : vector<16x128xf32>
    %234 = arith.maximumf %231, %233 : vector<16x128xf32>
    %235 = arith.truncf %234 : vector<16x128xf32> to vector<16x128xbf16>
    %c0_86 = arith.constant 0 : index
    %c128_87 = arith.constant 128 : index
    %236 = vector.load %arg14[%c0_86, %c128_87] : memref<16x1152xbf16, #tpu.memory_space<vmem>>, vector<16x128xbf16>
    tpu.vector_store %arg14[%c0_86, %c128_87], %235 {strides = array<i32>} : memref<16x1152xbf16, #tpu.memory_space<vmem>>, vector<16x128xbf16>,
    %c0_88 = arith.constant 0 : index
    %c256_89 = arith.constant 256 : index
    %237 = vector.load %arg13[%c0_88, %c256_89] : memref<16x2048xbf16, #tpu.memory_space<vmem>>, vector<16x512xbf16>
    %cst_90 = arith.constant dense<0.000000e+00> : vector<16x512xf32>
    %238 = tpu.matmul %237, %218, %cst_90 {dimension_numbers = #tpu.dot_dimension_numbers<[1], [0], [0], [1], [0, 0, 1, 1], [], []>} : vector<16x512xbf16>, vector<512x512xbf16>, vector<16x512xf32> -> vector<16x512xf32>
    %239 = vector.extract_strided_slice %238 {offsets = [0, 0], sizes = [16, 128], strides = [1, 1]} : vector<16x512xf32> to vector<16x128xf32>
    %240 = vector.extract_strided_slice %238 {offsets = [0, 128], sizes = [16, 128], strides = [1, 1]} : vector<16x512xf32> to vector<16x128xf32>
    %241 = arith.maximumf %239, %240 : vector<16x128xf32>
    %242 = vector.extract_strided_slice %238 {offsets = [0, 256], sizes = [16, 128], strides = [1, 1]} : vector<16x512xf32> to vector<16x128xf32>
    %243 = vector.extract_strided_slice %238 {offsets = [0, 384], sizes = [16, 128], strides = [1, 1]} : vector<16x512xf32> to vector<16x128xf32>
    %244 = arith.maximumf %242, %243 : vector<16x128xf32>
    %245 = arith.maximumf %241, %244 : vector<16x128xf32>
    %246 = arith.addf %245, %221 : vector<16x128xf32>
    %cst_91 = arith.constant 0.00999999977 : f32
    %247 = vector.broadcast %cst_91 : f32 to vector<16x128xf32>
    %248 = arith.mulf %247, %246 : vector<16x128xf32>
    %249 = arith.maximumf %246, %248 : vector<16x128xf32>
    %250 = arith.truncf %249 : vector<16x128xf32> to vector<16x128xbf16>
    %c0_92 = arith.constant 0 : index
    %c256_93 = arith.constant 256 : index
    %251 = vector.load %arg14[%c0_92, %c256_93] : memref<16x1152xbf16, #tpu.memory_space<vmem>>, vector<16x128xbf16>
    tpu.vector_store %arg14[%c0_92, %c256_93], %250 {strides = array<i32>} : memref<16x1152xbf16, #tpu.memory_space<vmem>>, vector<16x128xbf16>,
    %c0_94 = arith.constant 0 : index
    %c512_95 = arith.constant 512 : index
    %252 = vector.load %arg13[%c0_94, %c512_95] : memref<16x2048xbf16, #tpu.memory_space<vmem>>, vector<16x512xbf16>
    %cst_96 = arith.constant dense<0.000000e+00> : vector<16x512xf32>
    %253 = tpu.matmul %252, %218, %cst_96 {dimension_numbers = #tpu.dot_dimension_numbers<[1], [0], [0], [1], [0, 0, 1, 1], [], []>} : vector<16x512xbf16>, vector<512x512xbf16>, vector<16x512xf32> -> vector<16x512xf32>
    %254 = vector.extract_strided_slice %253 {offsets = [0, 0], sizes = [16, 128], strides = [1, 1]} : vector<16x512xf32> to vector<16x128xf32>
    %255 = vector.extract_strided_slice %253 {offsets = [0, 128], sizes = [16, 128], strides = [1, 1]} : vector<16x512xf32> to vector<16x128xf32>
    %256 = arith.maximumf %254, %255 : vector<16x128xf32>
    %257 = vector.extract_strided_slice %253 {offsets = [0, 256], sizes = [16, 128], strides = [1, 1]} : vector<16x512xf32> to vector<16x128xf32>
    %258 = vector.extract_strided_slice %253 {offsets = [0, 384], sizes = [16, 128], strides = [1, 1]} : vector<16x512xf32> to vector<16x128xf32>
    %259 = arith.maximumf %257, %258 : vector<16x128xf32>
    %260 = arith.maximumf %256, %259 : vector<16x128xf32>
    %261 = arith.addf %260, %221 : vector<16x128xf32>
    %cst_97 = arith.constant 0.00999999977 : f32
    %262 = vector.broadcast %cst_97 : f32 to vector<16x128xf32>
    %263 = arith.mulf %262, %261 : vector<16x128xf32>
    %264 = arith.maximumf %261, %263 : vector<16x128xf32>
    %265 = arith.truncf %264 : vector<16x128xf32> to vector<16x128xbf16>
    %c0_98 = arith.constant 0 : index
    %c384_99 = arith.constant 384 : index
    %266 = vector.load %arg14[%c0_98, %c384_99] : memref<16x1152xbf16, #tpu.memory_space<vmem>>, vector<16x128xbf16>
    tpu.vector_store %arg14[%c0_98, %c384_99], %265 {strides = array<i32>} : memref<16x1152xbf16, #tpu.memory_space<vmem>>, vector<16x128xbf16>,
    %c0_100 = arith.constant 0 : index
    %c768_101 = arith.constant 768 : index
    %267 = vector.load %arg13[%c0_100, %c768_101] : memref<16x2048xbf16, #tpu.memory_space<vmem>>, vector<16x512xbf16>
    %cst_102 = arith.constant dense<0.000000e+00> : vector<16x512xf32>
    %268 = tpu.matmul %267, %218, %cst_102 {dimension_numbers = #tpu.dot_dimension_numbers<[1], [0], [0], [1], [0, 0, 1, 1], [], []>} : vector<16x512xbf16>, vector<512x512xbf16>, vector<16x512xf32> -> vector<16x512xf32>
    %269 = vector.extract_strided_slice %268 {offsets = [0, 0], sizes = [16, 128], strides = [1, 1]} : vector<16x512xf32> to vector<16x128xf32>
    %270 = vector.extract_strided_slice %268 {offsets = [0, 128], sizes = [16, 128], strides = [1, 1]} : vector<16x512xf32> to vector<16x128xf32>
    %271 = arith.maximumf %269, %270 : vector<16x128xf32>
    %272 = vector.extract_strided_slice %268 {offsets = [0, 256], sizes = [16, 128], strides = [1, 1]} : vector<16x512xf32> to vector<16x128xf32>
    %273 = vector.extract_strided_slice %268 {offsets = [0, 384], sizes = [16, 128], strides = [1, 1]} : vector<16x512xf32> to vector<16x128xf32>
    %274 = arith.maximumf %272, %273 : vector<16x128xf32>
    %275 = arith.maximumf %271, %274 : vector<16x128xf32>
    %276 = arith.addf %275, %221 : vector<16x128xf32>
    %cst_103 = arith.constant 0.00999999977 : f32
    %277 = vector.broadcast %cst_103 : f32 to vector<16x128xf32>
    %278 = arith.mulf %277, %276 : vector<16x128xf32>
    %279 = arith.maximumf %276, %278 : vector<16x128xf32>
    %280 = arith.truncf %279 : vector<16x128xf32> to vector<16x128xbf16>
    %c0_104 = arith.constant 0 : index
    %c512_105 = arith.constant 512 : index
    %281 = vector.load %arg14[%c0_104, %c512_105] : memref<16x1152xbf16, #tpu.memory_space<vmem>>, vector<16x128xbf16>
    tpu.vector_store %arg14[%c0_104, %c512_105], %280 {strides = array<i32>} : memref<16x1152xbf16, #tpu.memory_space<vmem>>, vector<16x128xbf16>,
    %c0_106 = arith.constant 0 : index
    %c1024_107 = arith.constant 1024 : index
    %282 = vector.load %arg13[%c0_106, %c1024_107] : memref<16x2048xbf16, #tpu.memory_space<vmem>>, vector<16x512xbf16>
    %cst_108 = arith.constant dense<0.000000e+00> : vector<16x512xf32>
    %283 = tpu.matmul %282, %218, %cst_108 {dimension_numbers = #tpu.dot_dimension_numbers<[1], [0], [0], [1], [0, 0, 1, 1], [], []>} : vector<16x512xbf16>, vector<512x512xbf16>, vector<16x512xf32> -> vector<16x512xf32>
    %284 = vector.extract_strided_slice %283 {offsets = [0, 0], sizes = [16, 128], strides = [1, 1]} : vector<16x512xf32> to vector<16x128xf32>
    %285 = vector.extract_strided_slice %283 {offsets = [0, 128], sizes = [16, 128], strides = [1, 1]} : vector<16x512xf32> to vector<16x128xf32>
    %286 = arith.maximumf %284, %285 : vector<16x128xf32>
    %287 = vector.extract_strided_slice %283 {offsets = [0, 256], sizes = [16, 128], strides = [1, 1]} : vector<16x512xf32> to vector<16x128xf32>
    %288 = vector.extract_strided_slice %283 {offsets = [0, 384], sizes = [16, 128], strides = [1, 1]} : vector<16x512xf32> to vector<16x128xf32>
    %289 = arith.maximumf %287, %288 : vector<16x128xf32>
    %290 = arith.maximumf %286, %289 : vector<16x128xf32>
    %291 = arith.addf %290, %221 : vector<16x128xf32>
    %cst_109 = arith.constant 0.00999999977 : f32
    %292 = vector.broadcast %cst_109 : f32 to vector<16x128xf32>
    %293 = arith.mulf %292, %291 : vector<16x128xf32>
    %294 = arith.maximumf %291, %293 : vector<16x128xf32>
    %295 = arith.truncf %294 : vector<16x128xf32> to vector<16x128xbf16>
    %c0_110 = arith.constant 0 : index
    %c640_111 = arith.constant 640 : index
    %296 = vector.load %arg14[%c0_110, %c640_111] : memref<16x1152xbf16, #tpu.memory_space<vmem>>, vector<16x128xbf16>
    tpu.vector_store %arg14[%c0_110, %c640_111], %295 {strides = array<i32>} : memref<16x1152xbf16, #tpu.memory_space<vmem>>, vector<16x128xbf16>,
    %c0_112 = arith.constant 0 : index
    %c1280_113 = arith.constant 1280 : index
    %297 = vector.load %arg13[%c0_112, %c1280_113] : memref<16x2048xbf16, #tpu.memory_space<vmem>>, vector<16x512xbf16>
    %cst_114 = arith.constant dense<0.000000e+00> : vector<16x512xf32>
    %298 = tpu.matmul %297, %218, %cst_114 {dimension_numbers = #tpu.dot_dimension_numbers<[1], [0], [0], [1], [0, 0, 1, 1], [], []>} : vector<16x512xbf16>, vector<512x512xbf16>, vector<16x512xf32> -> vector<16x512xf32>
    %299 = vector.extract_strided_slice %298 {offsets = [0, 0], sizes = [16, 128], strides = [1, 1]} : vector<16x512xf32> to vector<16x128xf32>
    %300 = vector.extract_strided_slice %298 {offsets = [0, 128], sizes = [16, 128], strides = [1, 1]} : vector<16x512xf32> to vector<16x128xf32>
    %301 = arith.maximumf %299, %300 : vector<16x128xf32>
    %302 = vector.extract_strided_slice %298 {offsets = [0, 256], sizes = [16, 128], strides = [1, 1]} : vector<16x512xf32> to vector<16x128xf32>
    %303 = vector.extract_strided_slice %298 {offsets = [0, 384], sizes = [16, 128], strides = [1, 1]} : vector<16x512xf32> to vector<16x128xf32>
    %304 = arith.maximumf %302, %303 : vector<16x128xf32>
    %305 = arith.maximumf %301, %304 : vector<16x128xf32>
    %306 = arith.addf %305, %221 : vector<16x128xf32>
    %cst_115 = arith.constant 0.00999999977 : f32
    %307 = vector.broadcast %cst_115 : f32 to vector<16x128xf32>
    %308 = arith.mulf %307, %306 : vector<16x128xf32>
    %309 = arith.maximumf %306, %308 : vector<16x128xf32>
    %310 = arith.truncf %309 : vector<16x128xf32> to vector<16x128xbf16>
    %c0_116 = arith.constant 0 : index
    %c768_117 = arith.constant 768 : index
    %311 = vector.load %arg14[%c0_116, %c768_117] : memref<16x1152xbf16, #tpu.memory_space<vmem>>, vector<16x128xbf16>
    tpu.vector_store %arg14[%c0_116, %c768_117], %310 {strides = array<i32>} : memref<16x1152xbf16, #tpu.memory_space<vmem>>, vector<16x128xbf16>,
    %c0_118 = arith.constant 0 : index
    %c1536_119 = arith.constant 1536 : index
    %312 = vector.load %arg13[%c0_118, %c1536_119] : memref<16x2048xbf16, #tpu.memory_space<vmem>>, vector<16x512xbf16>
    %cst_120 = arith.constant dense<0.000000e+00> : vector<16x512xf32>
    %313 = tpu.matmul %312, %218, %cst_120 {dimension_numbers = #tpu.dot_dimension_numbers<[1], [0], [0], [1], [0, 0, 1, 1], [], []>} : vector<16x512xbf16>, vector<512x512xbf16>, vector<16x512xf32> -> vector<16x512xf32>
    %314 = vector.extract_strided_slice %313 {offsets = [0, 0], sizes = [16, 128], strides = [1, 1]} : vector<16x512xf32> to vector<16x128xf32>
    %315 = vector.extract_strided_slice %313 {offsets = [0, 128], sizes = [16, 128], strides = [1, 1]} : vector<16x512xf32> to vector<16x128xf32>
    %316 = arith.maximumf %314, %315 : vector<16x128xf32>
    %317 = vector.extract_strided_slice %313 {offsets = [0, 256], sizes = [16, 128], strides = [1, 1]} : vector<16x512xf32> to vector<16x128xf32>
    %318 = vector.extract_strided_slice %313 {offsets = [0, 384], sizes = [16, 128], strides = [1, 1]} : vector<16x512xf32> to vector<16x128xf32>
    %319 = arith.maximumf %317, %318 : vector<16x128xf32>
    %320 = arith.maximumf %316, %319 : vector<16x128xf32>
    %321 = arith.addf %320, %221 : vector<16x128xf32>
    %cst_121 = arith.constant 0.00999999977 : f32
    %322 = vector.broadcast %cst_121 : f32 to vector<16x128xf32>
    %323 = arith.mulf %322, %321 : vector<16x128xf32>
    %324 = arith.maximumf %321, %323 : vector<16x128xf32>
    %325 = arith.truncf %324 : vector<16x128xf32> to vector<16x128xbf16>
    %c0_122 = arith.constant 0 : index
    %c896_123 = arith.constant 896 : index
    %326 = vector.load %arg14[%c0_122, %c896_123] : memref<16x1152xbf16, #tpu.memory_space<vmem>>, vector<16x128xbf16>
    tpu.vector_store %arg14[%c0_122, %c896_123], %325 {strides = array<i32>} : memref<16x1152xbf16, #tpu.memory_space<vmem>>, vector<16x128xbf16>,
    %c0_124 = arith.constant 0 : index
    %c0_125 = arith.constant 0 : index
    %327 = vector.load %arg6[%c0_124, %c0_125] : memref<512x512xbf16, #tpu.memory_space<vmem>>, vector<512x512xbf16>
    %c0_126 = arith.constant 0 : index
    %c0_127 = arith.constant 0 : index
    %328 = vector.load %arg7[%c0_126, %c0_127] : memref<1x128xf32, #tpu.memory_space<vmem>>, vector<1x128xf32>
    %329 = vector.shape_cast %328 : vector<1x128xf32> to vector<1x128xf32>
    %330 = vector.broadcast %329 : vector<1x128xf32> to vector<16x128xf32>
    %c0_128 = arith.constant 0 : index
    %c0_129 = arith.constant 0 : index
    %331 = vector.load %arg14[%c0_128, %c0_129] : memref<16x1152xbf16, #tpu.memory_space<vmem>>, vector<16x512xbf16>
    %cst_130 = arith.constant dense<0.000000e+00> : vector<16x512xf32>
    %332 = tpu.matmul %331, %327, %cst_130 {dimension_numbers = #tpu.dot_dimension_numbers<[1], [0], [0], [1], [0, 0, 1, 1], [], []>} : vector<16x512xbf16>, vector<512x512xbf16>, vector<16x512xf32> -> vector<16x512xf32>
    %333 = vector.extract_strided_slice %332 {offsets = [0, 0], sizes = [16, 128], strides = [1, 1]} : vector<16x512xf32> to vector<16x128xf32>
    %334 = vector.extract_strided_slice %332 {offsets = [0, 128], sizes = [16, 128], strides = [1, 1]} : vector<16x512xf32> to vector<16x128xf32>
    %335 = arith.maximumf %333, %334 : vector<16x128xf32>
    %336 = vector.extract_strided_slice %332 {offsets = [0, 256], sizes = [16, 128], strides = [1, 1]} : vector<16x512xf32> to vector<16x128xf32>
    %337 = vector.extract_strided_slice %332 {offsets = [0, 384], sizes = [16, 128], strides = [1, 1]} : vector<16x512xf32> to vector<16x128xf32>
    %338 = arith.maximumf %336, %337 : vector<16x128xf32>
    %339 = arith.maximumf %335, %338 : vector<16x128xf32>
    %340 = arith.addf %339, %330 : vector<16x128xf32>
    %cst_131 = arith.constant 0.00999999977 : f32
    %341 = vector.broadcast %cst_131 : f32 to vector<16x128xf32>
    %342 = arith.mulf %341, %340 : vector<16x128xf32>
    %343 = arith.maximumf %340, %342 : vector<16x128xf32>
    %344 = arith.truncf %343 : vector<16x128xf32> to vector<16x128xbf16>
    %c0_132 = arith.constant 0 : index
    %c0_133 = arith.constant 0 : index
    %345 = vector.load %arg15[%c0_132, %c0_133] : memref<16x384xbf16, #tpu.memory_space<vmem>>, vector<16x128xbf16>
    tpu.vector_store %arg15[%c0_132, %c0_133], %344 {strides = array<i32>} : memref<16x384xbf16, #tpu.memory_space<vmem>>, vector<16x128xbf16>,
    %c0_134 = arith.constant 0 : index
    %c256_135 = arith.constant 256 : index
    %346 = vector.load %arg14[%c0_134, %c256_135] : memref<16x1152xbf16, #tpu.memory_space<vmem>>, vector<16x512xbf16>
    %cst_136 = arith.constant dense<0.000000e+00> : vector<16x512xf32>
    %347 = tpu.matmul %346, %327, %cst_136 {dimension_numbers = #tpu.dot_dimension_numbers<[1], [0], [0], [1], [0, 0, 1, 1], [], []>} : vector<16x512xbf16>, vector<512x512xbf16>, vector<16x512xf32> -> vector<16x512xf32>
    %348 = vector.extract_strided_slice %347 {offsets = [0, 0], sizes = [16, 128], strides = [1, 1]} : vector<16x512xf32> to vector<16x128xf32>
    %349 = vector.extract_strided_slice %347 {offsets = [0, 128], sizes = [16, 128], strides = [1, 1]} : vector<16x512xf32> to vector<16x128xf32>
    %350 = arith.maximumf %348, %349 : vector<16x128xf32>
    %351 = vector.extract_strided_slice %347 {offsets = [0, 256], sizes = [16, 128], strides = [1, 1]} : vector<16x512xf32> to vector<16x128xf32>
    %352 = vector.extract_strided_slice %347 {offsets = [0, 384], sizes = [16, 128], strides = [1, 1]} : vector<16x512xf32> to vector<16x128xf32>
    %353 = arith.maximumf %351, %352 : vector<16x128xf32>
    %354 = arith.maximumf %350, %353 : vector<16x128xf32>
    %355 = arith.addf %354, %330 : vector<16x128xf32>
    %cst_137 = arith.constant 0.00999999977 : f32
    %356 = vector.broadcast %cst_137 : f32 to vector<16x128xf32>
    %357 = arith.mulf %356, %355 : vector<16x128xf32>
    %358 = arith.maximumf %355, %357 : vector<16x128xf32>
    %359 = arith.truncf %358 : vector<16x128xf32> to vector<16x128xbf16>
    %c0_138 = arith.constant 0 : index
    %c128_139 = arith.constant 128 : index
    %360 = vector.load %arg15[%c0_138, %c128_139] : memref<16x384xbf16, #tpu.memory_space<vmem>>, vector<16x128xbf16>
    tpu.vector_store %arg15[%c0_138, %c128_139], %359 {strides = array<i32>} : memref<16x384xbf16, #tpu.memory_space<vmem>>, vector<16x128xbf16>,
    %c0_140 = arith.constant 0 : index
    %c512_141 = arith.constant 512 : index
    %361 = vector.load %arg14[%c0_140, %c512_141] : memref<16x1152xbf16, #tpu.memory_space<vmem>>, vector<16x512xbf16>
    %cst_142 = arith.constant dense<0.000000e+00> : vector<16x512xf32>
    %362 = tpu.matmul %361, %327, %cst_142 {dimension_numbers = #tpu.dot_dimension_numbers<[1], [0], [0], [1], [0, 0, 1, 1], [], []>} : vector<16x512xbf16>, vector<512x512xbf16>, vector<16x512xf32> -> vector<16x512xf32>
    %363 = vector.extract_strided_slice %362 {offsets = [0, 0], sizes = [16, 128], strides = [1, 1]} : vector<16x512xf32> to vector<16x128xf32>
    %364 = vector.extract_strided_slice %362 {offsets = [0, 128], sizes = [16, 128], strides = [1, 1]} : vector<16x512xf32> to vector<16x128xf32>
    %365 = arith.maximumf %363, %364 : vector<16x128xf32>
    %366 = vector.extract_strided_slice %362 {offsets = [0, 256], sizes = [16, 128], strides = [1, 1]} : vector<16x512xf32> to vector<16x128xf32>
    %367 = vector.extract_strided_slice %362 {offsets = [0, 384], sizes = [16, 128], strides = [1, 1]} : vector<16x512xf32> to vector<16x128xf32>
    %368 = arith.maximumf %366, %367 : vector<16x128xf32>
    %369 = arith.maximumf %365, %368 : vector<16x128xf32>
    %370 = arith.addf %369, %330 : vector<16x128xf32>
    %cst_143 = arith.constant 0.00999999977 : f32
    %371 = vector.broadcast %cst_143 : f32 to vector<16x128xf32>
    %372 = arith.mulf %371, %370 : vector<16x128xf32>
    %373 = arith.maximumf %370, %372 : vector<16x128xf32>
    %374 = arith.truncf %373 : vector<16x128xf32> to vector<16x128xbf16>
    %c0_144 = arith.constant 0 : index
    %c256_145 = arith.constant 256 : index
    %375 = vector.load %arg15[%c0_144, %c256_145] : memref<16x384xbf16, #tpu.memory_space<vmem>>, vector<16x128xbf16>
    tpu.vector_store %arg15[%c0_144, %c256_145], %374 {strides = array<i32>} : memref<16x384xbf16, #tpu.memory_space<vmem>>, vector<16x128xbf16>,
    %c0_146 = arith.constant 0 : index
    %c0_147 = arith.constant 0 : index
    %376 = vector.load %arg15[%c0_146, %c0_147] : memref<16x384xbf16, #tpu.memory_space<vmem>>, vector<16x384xbf16>
    %c0_148 = arith.constant 0 : index
    %c0_149 = arith.constant 0 : index
    %377 = vector.load %arg8[%c0_148, %c0_149] : memref<384x50xbf16, #tpu.memory_space<vmem>>, vector<384x50xbf16>
    %cst_150 = arith.constant dense<0.000000e+00> : vector<16x50xf32>
    %378 = tpu.matmul %376, %377, %cst_150 {dimension_numbers = #tpu.dot_dimension_numbers<[1], [0], [0], [1], [0, 0, 1, 1], [], []>} : vector<16x384xbf16>, vector<384x50xbf16>, vector<16x50xf32> -> vector<16x50xf32>
    %c0_151 = arith.constant 0 : index
    %c0_152 = arith.constant 0 : index
    %379 = vector.load %arg9[%c0_151, %c0_152] : memref<1x50xf32, #tpu.memory_space<vmem>>, vector<1x50xf32>
    %380 = vector.broadcast %379 : vector<1x50xf32> to vector<16x50xf32>
    %381 = arith.addf %378, %380 : vector<16x50xf32>
    %cst_153 = arith.constant 0.000000e+00 : f32
    %382 = vector.broadcast %cst_153 : f32 to vector<16x50xf32>
    %383 = arith.maximumf %381, %382 : vector<16x50xf32>
    %c0_154 = arith.constant 0 : index
    %c0_155 = arith.constant 0 : index
    %384 = vector.load %arg10[%c0_154, %c0_155] : memref<50x10xf32, #tpu.memory_space<vmem>>, vector<50x10xf32>
    %cst_156 = arith.constant dense<0.000000e+00> : vector<16x10xf32>
    %385 = tpu.matmul %383, %384, %cst_156 {dimension_numbers = #tpu.dot_dimension_numbers<[1], [0], [0], [1], [0, 0, 1, 1], [], []>} : vector<16x50xf32>, vector<50x10xf32>, vector<16x10xf32> -> vector<16x10xf32>
    %c0_157 = arith.constant 0 : index
    %c0_158 = arith.constant 0 : index
    %386 = vector.load %arg11[%c0_157, %c0_158] : memref<1x10xf32, #tpu.memory_space<vmem>>, vector<1x10xf32>
    %387 = vector.broadcast %386 : vector<1x10xf32> to vector<16x10xf32>
    %388 = arith.addf %385, %387 : vector<16x10xf32>
    %cst_159 = arith.constant dense<0xFF800000> : vector<16xf32>
    %389 = vector.multi_reduction <maximumf>, %388, %cst_159 [1] : vector<16x10xf32> to vector<16xf32>
    %390 = vector.shape_cast %389 : vector<16xf32> to vector<16x1xf32>
    %391 = vector.broadcast %390 : vector<16x1xf32> to vector<16x10xf32>
    %392 = arith.subf %388, %391 : vector<16x10xf32>
    %393 = math.exp %392 : vector<16x10xf32>
    %cst_160 = arith.constant dense<0.000000e+00> : vector<16xf32>
    %394 = vector.multi_reduction <add>, %393, %cst_160 [1] : vector<16x10xf32> to vector<16xf32>
    %395 = vector.shape_cast %394 : vector<16xf32> to vector<16x1xf32>
    %396 = math.log %395 : vector<16x1xf32>
    %397 = vector.broadcast %396 : vector<16x1xf32> to vector<16x10xf32>
    %398 = arith.subf %392, %397 : vector<16x10xf32>
    %c0_161 = arith.constant 0 : index
    %c0_162 = arith.constant 0 : index
    %399 = vector.load %arg12[%c0_161, %c0_162] : memref<16x10xf32, #tpu.memory_space<vmem>>, vector<16x10xf32>
    tpu.vector_store %arg12[%c0_161, %c0_162], %398 {strides = array<i32>} : memref<16x10xf32, #tpu.memory_space<vmem>>, vector<16x10xf32>,
    return
  }
  func.func @transform_0(%arg0: i32) -> (i32, i32) {
    %c0_i32 = arith.constant 0 : i32
    %c0_i32_0 = arith.constant 0 : i32
    return %arg0, %c0_i32 : i32, i32
  }
  func.func @transform_1(%arg0: i32) -> (i32, i32) {
    %c0_i32 = arith.constant 0 : i32
    %c0_i32_0 = arith.constant 0 : i32
    %c0_i32_1 = arith.constant 0 : i32
    return %c0_i32, %c0_i32_0 : i32, i32
  }
  func.func @transform_2(%arg0: i32) -> (i32, i32) {
    %c0_i32 = arith.constant 0 : i32
    %c0_i32_0 = arith.constant 0 : i32
    %c0_i32_1 = arith.constant 0 : i32
    return %c0_i32, %c0_i32_0 : i32, i32
  }
  func.func @transform_3(%arg0: i32) -> (i32, i32) {
    %c0_i32 = arith.constant 0 : i32
    %c0_i32_0 = arith.constant 0 : i32
    %c0_i32_1 = arith.constant 0 : i32
    return %c0_i32, %c0_i32_0 : i32, i32
  }
  func.func @transform_4(%arg0: i32) -> (i32, i32) {
    %c0_i32 = arith.constant 0 : i32
    %c0_i32_0 = arith.constant 0 : i32
    %c0_i32_1 = arith.constant 0 : i32
    return %c0_i32, %c0_i32_0 : i32, i32
  }
  func.func @transform_5(%arg0: i32) -> (i32, i32) {
    %c0_i32 = arith.constant 0 : i32
    %c0_i32_0 = arith.constant 0 : i32
    %c0_i32_1 = arith.constant 0 : i32
    return %c0_i32, %c0_i32_0 : i32, i32
  }
  func.func @transform_6(%arg0: i32) -> (i32, i32) {
    %c0_i32 = arith.constant 0 : i32
    %c0_i32_0 = arith.constant 0 : i32
    %c0_i32_1 = arith.constant 0 : i32
    return %c0_i32, %c0_i32_0 : i32, i32
  }
  func.func @transform_7(%arg0: i32) -> (i32, i32) {
    %c0_i32 = arith.constant 0 : i32
    %c0_i32_0 = arith.constant 0 : i32
    %c0_i32_1 = arith.constant 0 : i32
    return %c0_i32, %c0_i32_0 : i32, i32
  }
  func.func @transform_8(%arg0: i32) -> (i32, i32) {
    %c0_i32 = arith.constant 0 : i32
    %c0_i32_0 = arith.constant 0 : i32
    %c0_i32_1 = arith.constant 0 : i32
    return %c0_i32, %c0_i32_0 : i32, i32
  }
  func.func @transform_9(%arg0: i32) -> (i32, i32) {
    %c0_i32 = arith.constant 0 : i32
    %c0_i32_0 = arith.constant 0 : i32
    %c0_i32_1 = arith.constant 0 : i32
    return %c0_i32, %c0_i32_0 : i32, i32
  }
  func.func @transform_10(%arg0: i32) -> (i32, i32) {
    %c0_i32 = arith.constant 0 : i32
    %c0_i32_0 = arith.constant 0 : i32
    %c0_i32_1 = arith.constant 0 : i32
    return %c0_i32, %c0_i32_0 : i32, i32
  }
  func.func @transform_11(%arg0: i32) -> (i32, i32) {
    %c0_i32 = arith.constant 0 : i32
    %c0_i32_0 = arith.constant 0 : i32
    return %arg0, %c0_i32 : i32, i32
  }
}

</mosaic_0001>

<bundles_post_ra>
// kernel: tile.23
= control target key start
LH: loop header
LB: loop body
LE: loop exit
PB: predicated region body
PF: predicated region fallthrough
CT: control target
= control target key end

     0   :  { %s22_s0 = inlined_call_operand.vmem [shape: f32[8], index: 0, kind: input, shape index: {}]   ;;  %s23_s1 = inlined_call_operand.vmem [shape: f32[7,8], index: 1, kind: output, shape index: {}]  }
   0x1   :  { %v4_v0 = vld [vmem:[%s22_s0] ss:$0 sm:$0xff] }
   0x2   :  { %5 = vst [vmem:[%s23_s1] sm:$0xff] %v4_v0 }

// kernel: tile.24
= control target key start
LH: loop header
LB: loop body
LE: loop exit
PB: predicated region body
PF: predicated region fallthrough
CT: control target
= control target key end

     0   :  { %s59_s10 = smov 48   ;;  %s60_s11 = smov 32   ;;  %vm3_vm0 = vcmask 64512   ;;  %vm9_vm1 = vcmask 458112   ;;  %vm15_vm2 = vcmask 392512   ;;  %vm21_vm3 = vcmask 326912   ;;  %s99_s0 = inlined_call_operand.vmem [shape: f32[7,8], index: 0, kind: input, shape index: {}]   ;;  %s100_s1 = inlined_call_operand.vmem [shape: f32[56], index: 1, kind: output, shape index: {}]  }
   0x1   :  { %v47_v0 = vld [vmem:[%s99_s0 + $0x6] sm:$0x1]   ;;  %v49_v1 = vld [vmem:[%s99_s0 + $0x4] sm:$0x1]   ;;  %v48_v2 = vld [vmem:[%s99_s0 + $0x5] sm:$0x1]  }
   0x2   :  { %7 = vrot.lane.b32.xlu0 %v47_v0, %s59_s10  ;;  %19 = vrot.lane.b32.xlu1 %v49_v1, %s60_s11  ;;  %v50_v3 = vld [vmem:[%s99_s0 + $0x3] sm:$0x1]   ;;  %v2_v4 = vld [vmem:[%s99_s0] sm:$0x1]   ;;  %s61_s18 = smov 40   ;;  %s62_s19 = smov 24  }
   0x3   :  { %4 = vst.msk [vmem:[#allocation0] sm:$0x1] %vm3_vm0, %v2_v4   ;;  %v51_v5 = vld [vmem:[%s99_s0 + $0x2] sm:$0x1]   ;;  %v52_v6 = vld [vmem:[%s99_s0 + $0x1] sm:$0x1]  }
   0x4   :  { %s63_s0 = smov 16   ;;  %s64_s24 = smov 8   ;;  %vm27_vm4 = vcmask 261312   ;;  %vm33_vm5 = vcmask 195712   ;;  %vm39_vm6 = vcmask 130112  }
   0x6   :  { %13 = vrot.lane.b32.xlu0 %v48_v2, %s61_s18  ;;  %25 = vrot.lane.b32.xlu1 %v50_v3, %s62_s19 }
   0xa   :  { %31 = vrot.lane.b32.xlu0 %v51_v5, %s63_s0  ;;  %37 = vrot.lane.b32.xlu1 %v52_v6, %s64_s24 }
  0x74   :  { %v8_v7 = vpop.permute.xlu0 %7   ;;  %v20_v8 = vpop.permute.xlu1 %19  }
  0x75   :  { %10 = vst.msk [vmem:[#allocation0] sm:$0x1] %vm9_vm1, %v8_v7  }
  0x78   :  { %v14_v9 = vpop.permute.xlu0 %13   ;;  %v26_v10 = vpop.permute.xlu1 %25  }
  0x79   :  { %16 = vst.msk [vmem:[#allocation0] sm:$0x1] %vm15_vm2, %v14_v9  }
  0x7a   :  { %22 = vst.msk [vmem:[#allocation0] sm:$0x1] %vm21_vm3, %v20_v8  }
  0x7b   :  { %28 = vst.msk [vmem:[#allocation0] sm:$0x1] %vm27_vm4, %v26_v10  }
  0x7c   :  { %v32_v11 = vpop.permute.xlu0 %31   ;;  %v38_v12 = vpop.permute.xlu1 %37  }
  0x7d   :  { %34 = vst.msk [vmem:[#allocation0] sm:$0x1] %vm33_vm5, %v32_v11  }
  0x7e   :  { %40 = vst.msk [vmem:[#allocation0] sm:$0x1] %vm39_vm6, %v38_v12  }
  0x85   :  { %v44_v13 = vld [vmem:[#allocation0] sm:$0x1] }
  0x86   :  { %46 = vst [vmem:[%s100_s1] sm:$0x1] %v44_v13 }

// kernel: tile.28
= control target key start
LH: loop header
LB: loop body
LE: loop exit
PB: predicated region body
PF: predicated region fallthrough
CT: control target
= control target key end

     0   :  { %s22_s0 = inlined_call_operand.vmem [shape: f32[16], index: 0, kind: input, shape index: {}]   ;;  %s23_s1 = inlined_call_operand.vmem [shape: f32[3,16], index: 1, kind: output, shape index: {}]  }
   0x1   :  { %v4_v0 = vld [vmem:[%s22_s0] ss:$0 sm:$0xff] }
   0x2   :  { %5 = vst [vmem:[%s23_s1] sm:$0xf] %v4_v0 }

// kernel: tile.29
= control target key start
LH: loop header
LB: loop body
LE: loop exit
PB: predicated region body
PF: predicated region fallthrough
CT: control target
= control target key end

     0   :  { %vm7_vm0 = vcmask 130048   ;;  %s30_s8 = smov 16   ;;  %vm13_vm1 = vcmask 392448   ;;  %vm19_vm2 = vcmask 261248   ;;  %s47_s0 = inlined_call_operand.vmem [shape: f32[3,16], index: 0, kind: input, shape index: {}]   ;;  %s48_s1 = inlined_call_operand.vmem [shape: f32[48], index: 1, kind: output, shape index: {}]  }
   0x1   :  { %v4_v0 = vld [vmem:[%s47_s0] sm:$0xf]  ;;  %s29_s0 = smov 32  }
   0x2   :  { %5 = vst [vmem:[#allocation1] sm:$0xf] %v4_v0 }
   0x9   :  { %v10_v1 = vld [vmem:[#allocation1 + $0x2] sm:$0x1]   ;;  %v6_v2 = vld [vmem:[#allocation1] sm:$0x1]   ;;  %v16_v3 = vld [vmem:[#allocation1 + $0x1] sm:$0x1]  }
   0xa   :  { %11 = vrot.lane.b32.xlu0 %v10_v1, %s29_s0  ;;  %8 = vst.msk [vmem:[#allocation0] sm:$0x1] %vm7_vm0, %v6_v2  }
   0xe   :  { %17 = vrot.lane.b32.xlu0 %v16_v3, %s30_s8 }
  0x7c   :  { %v12_v4 = vpop.permute.xlu0 %11  }
  0x7d   :  { %14 = vst.msk [vmem:[#allocation0] sm:$0x1] %vm13_vm1, %v12_v4  }
  0x80   :  { %v18_v5 = vpop.permute.xlu0 %17  }
  0x81   :  { %20 = vst.msk [vmem:[#allocation0] sm:$0x1] %vm19_vm2, %v18_v5  }
  0x88   :  { %v24_v6 = vld [vmem:[#allocation0] sm:$0x1] }
  0x89   :  { %26 = vst [vmem:[%s48_s1] sm:$0x1] %v24_v6 }

// kernel: tile.18
= control target key start
LH: loop header
LB: loop body
LE: loop exit
PB: predicated region body
PF: predicated region fallthrough
CT: control target
= control target key end

     0   :  { %s28_s0 = inlined_call_operand.vmem [shape: f32[4], index: 0, kind: input, shape index: {}]   ;;  %s29_s1 = inlined_call_operand.vmem [shape: f32[14,4], index: 1, kind: output, shape index: {}]  }
   0x1   :  { %v4_v0 = vld [vmem:[%s28_s0] ss:$0 sm:$0xff] }
   0x2   :  { %5 = vst [vmem:[%s29_s1] sm:$0xff] %v4_v0  ;;  %8 = vst [vmem:[%s29_s1 + $0x8] sm:$0xff] %v4_v0 }

// kernel: tile.19
= control target key start
LH: loop header
LB: loop body
LE: loop exit
PB: predicated region body
PF: predicated region fallthrough
CT: control target
= control target key end

     0   :  { %s115_s10 = smov 52   ;;  %s116_s11 = smov 44   ;;  %vm3_vm0 = vcmask 31744   ;;  %vm9_vm1 = vcmask 458144   ;;  %vm15_vm2 = vcmask 425344   ;;  %vm21_vm3 = vcmask 392544   ;;  %s183_s0 = inlined_call_operand.vmem [shape: f32[14,4], index: 0, kind: input, shape index: {}]   ;;  %s184_s1 = inlined_call_operand.vmem [shape: f32[56], index: 1, kind: output, shape index: {}]  }
   0x1   :  { %v89_v0 = vld [vmem:[%s183_s0 + $0xd] sm:$0x1]   ;;  %v91_v1 = vld [vmem:[%s183_s0 + $0xb] sm:$0x1]   ;;  %v90_v2 = vld [vmem:[%s183_s0 + $0xc] sm:$0x1]  }
   0x2   :  { %7 = vrot.lane.b32.xlu0 %v89_v0, %s115_s10  ;;  %19 = vrot.lane.b32.xlu1 %v91_v1, %s116_s11  ;;  %v92_v3 = vld [vmem:[%s183_s0 + $0xa] sm:$0x1]   ;;  %s117_s16 = smov 48   ;;  %s118_s17 = smov 40   ;;  %v93_v4 = vld [vmem:[%s183_s0 + $0x9] sm:$0x1]  }
   0x3   :  { %v94_v5 = vld [vmem:[%s183_s0 + $0x8] sm:$0x1]   ;;  %v2_v6 = vld [vmem:[%s183_s0] sm:$0x1]   ;;  %s119_s24 = smov 36   ;;  %s120_s25 = smov 32  }
   0x4   :  { %4 = vst.msk [vmem:[#allocation0] sm:$0x1] %vm3_vm0, %v2_v6   ;;  %v95_v7 = vld [vmem:[%s183_s0 + $0x7] sm:$0x1]   ;;  %v96_v8 = vld [vmem:[%s183_s0 + $0x6] sm:$0x1]  }
   0x5   :  { %s121_s30 = smov 28   ;;  %s122_s2 = smov 24   ;;  %v97_v9 = vld [vmem:[%s183_s0 + $0x5] sm:$0x1]   ;;  %v98_v10 = vld [vmem:[%s183_s0 + $0x4] sm:$0x1]  }
   0x6   :  { %13 = vrot.lane.b32.xlu0 %v90_v2, %s117_s16  ;;  %25 = vrot.lane.b32.xlu1 %v92_v3, %s118_s17  ;;  %s123_s7 = smov 20   ;;  %s124_s8 = smov 16   ;;  %v99_v11 = vld [vmem:[%s183_s0 + $0x3] sm:$0x1]   ;;  %v100_v12 = vld [vmem:[%s183_s0 + $0x2] sm:$0x1]  }
   0x7   :  { %s125_s13 = smov 12   ;;  %s126_s14 = smov 8   ;;  %v101_v13 = vld [vmem:[%s183_s0 + $0x1] sm:$0x1]   ;;  %vm27_vm4 = vcmask 359744   ;;  %vm33_vm5 = vcmask 326944  }
   0x8   :  { %s127_s0 = smov 4   ;;  %vm39_vm6 = vcmask 294144   ;;  %vm45_vm7 = vcmask 261344   ;;  %vm51_vm8 = vcmask 228544   ;;  %vm57_vm9 = vcmask 195744  }
   0x9   :  { %vm63_vm10 = vcmask 162944   ;;  %vm69_vm11 = vcmask 130144   ;;  %vm75_vm12 = vcmask 97344   ;;  %vm81_vm13 = vcmask 64544  }
   0xa   :  { %31 = vrot.lane.b32.xlu0 %v93_v4, %s119_s24  ;;  %37 = vrot.lane.b32.xlu1 %v94_v5, %s120_s25 }
   0xe   :  { %43 = vrot.lane.b32.xlu0 %v95_v7, %s121_s30  ;;  %49 = vrot.lane.b32.xlu1 %v96_v8, %s122_s2 }
  0x12   :  { %55 = vrot.lane.b32.xlu0 %v97_v9, %s123_s7  ;;  %61 = vrot.lane.b32.xlu1 %v98_v10, %s124_s8 }
  0x16   :  { %67 = vrot.lane.b32.xlu0 %v99_v11, %s125_s13  ;;  %73 = vrot.lane.b32.xlu1 %v100_v12, %s126_s14 }
  0x1a   :  { %79 = vrot.lane.b32.xlu0 %v101_v13, %s127_s0 }
  0x74   :  { %v8_v14 = vpop.permute.xlu0 %7   ;;  %v20_v15 = vpop.permute.xlu1 %19  }
  0x75   :  { %10 = vst.msk [vmem:[#allocation0] sm:$0x1] %vm9_vm1, %v8_v14  }
  0x78   :  { %v14_v16 = vpop.permute.xlu0 %13   ;;  %v26_v17 = vpop.permute.xlu1 %25  }
  0x79   :  { %16 = vst.msk [vmem:[#allocation0] sm:$0x1] %vm15_vm2, %v14_v16  }
  0x7a   :  { %22 = vst.msk [vmem:[#allocation0] sm:$0x1] %vm21_vm3, %v20_v15  }
  0x7b   :  { %28 = vst.msk [vmem:[#allocation0] sm:$0x1] %vm27_vm4, %v26_v17  }
  0x7c   :  { %v32_v18 = vpop.permute.xlu0 %31   ;;  %v38_v19 = vpop.permute.xlu1 %37  }
  0x7d   :  { %34 = vst.msk [vmem:[#allocation0] sm:$0x1] %vm33_vm5, %v32_v18  }
  0x7e   :  { %40 = vst.msk [vmem:[#allocation0] sm:$0x1] %vm39_vm6, %v38_v19  }
  0x80   :  { %v44_v20 = vpop.permute.xlu0 %43   ;;  %v50_v21 = vpop.permute.xlu1 %49  }
  0x81   :  { %46 = vst.msk [vmem:[#allocation0] sm:$0x1] %vm45_vm7, %v44_v20  }
  0x82   :  { %52 = vst.msk [vmem:[#allocation0] sm:$0x1] %vm51_vm8, %v50_v21  }
  0x84   :  { %v56_v22 = vpop.permute.xlu0 %55   ;;  %v62_v23 = vpop.permute.xlu1 %61  }
  0x85   :  { %58 = vst.msk [vmem:[#allocation0] sm:$0x1] %vm57_vm9, %v56_v22  }
  0x86   :  { %64 = vst.msk [vmem:[#allocation0] sm:$0x1] %vm63_vm10, %v62_v23  }
  0x88   :  { %v68_v24 = vpop.permute.xlu0 %67   ;;  %v74_v25 = vpop.permute.xlu1 %73  }
  0x89   :  { %70 = vst.msk [vmem:[#allocation0] sm:$0x1] %vm69_vm11, %v68_v24  }
  0x8a   :  { %76 = vst.msk [vmem:[#allocation0] sm:$0x1] %vm75_vm12, %v74_v25  }
  0x8c   :  { %v80_v26 = vpop.permute.xlu0 %79  }
  0x8d   :  { %82 = vst.msk [vmem:[#allocation0] sm:$0x1] %vm81_vm13, %v80_v26  }
  0x94   :  { %v86_v27 = vld [vmem:[#allocation0] sm:$0x1] }
  0x95   :  { %88 = vst [vmem:[%s184_s1] sm:$0x1] %v86_v27 }

// kernel: cnn_forward.1
= control target key start
LH: loop header
LB: loop body
LE: loop exit
PB: predicated region body
PF: predicated region fallthrough
CT: control target
= control target key end

     0   :  { %v11581_v1 = vmov 0   ;;  %vm6896_vm0 = vmmov 0   ;;  %vm5510_vm1 = vcmask 1041408   ;;  %vm5503_vm2 = vcmask 408576   ;;  %s11569_s1 = inlined_call_operand.vmem [shape: bf16[128,512], index: 1, kind: input, shape index: {}]   ;;  %s11570_s0 = inlined_call_operand.vmem [shape: bf16[16,1792], index: 0, kind: input, shape index: {}]   ;;  %s11571_s2 = inlined_call_operand.vmem [shape: f32[1,128], index: 2, kind: input, shape index: {}]   ;;  %s11572_s3 = inlined_call_operand.vmem [shape: bf16[512,512], index: 3, kind: input, shape index: {}]   ;;  %s11573_s4 = inlined_call_operand.vmem [shape: f32[1,128], index: 4, kind: input, shape index: {}]   ;;  %s11574_s5 = inlined_call_operand.vmem [shape: bf16[512,512], index: 5, kind: input, shape index: {}]   ;;  %s11575_s7 = inlined_call_operand.vmem [shape: bf16[384,50], index: 7, kind: input, shape index: {}]   ;;  %s11576_s6 = inlined_call_operand.vmem [shape: f32[1,128], index: 6, kind: input, shape index: {}]   ;;  %s11577_s9 = inlined_call_operand.vmem [shape: f32[50,10], index: 9, kind: input, shape index: {}]   ;;  %s11578_s8 = inlined_call_operand.vmem [shape: f32[1,50], index: 8, kind: input, shape index: {}]   ;;  %s11579_s10 = inlined_call_operand.vmem [shape: f32[1,10], index: 10, kind: input, shape index: {}]   ;;  %s11580_s11 = inlined_call_operand.vmem [shape: f32[16,10], index: 11, kind: output, shape index: {}]  }
   0x1   :  { %v6960_v0 = vld [vmem:[%s11569_s1 + $0x4] ss:$16 sps:$4 sm:$0xff]   ;;  %281 = vmatprep.mubr.bf16.mxu0 %v11581_v1  ;;  %324 = vmatprep.mubr.bf16.mxu1 %v11581_v1  ;;  %v6967_v2 = vld [vmem:[%s11569_s1 + $0xc] ss:$16 sps:$4 sm:$0xff]   ;;  %v6973_v3 = vld [vmem:[%s11569_s1] ss:$16 sps:$4 sm:$0xff]  }
   0x2   :  { %249 = vmatprep.subr.bf16.mxu0 %v6960_v0  ;;  %v6978_v4 = vld [vmem:[%s11569_s1 + $0x8] ss:$16 sps:$4 sm:$0xff]   ;;  %292 = vmatprep.subr.bf16.mxu1 %v6967_v2  ;;  %v6984_v5 = vld [vmem:[%s11569_s1 + $0x24] ss:$16 sps:$4 sm:$0xff]   ;;  %v6991_v6 = vld [vmem:[%s11569_s1 + $0x2c] ss:$16 sps:$4 sm:$0xff]  }
   0x3   :  { %250 = vmatpush1.bf16.msra.mxu0 %v6973_v3  ;;  %293 = vmatpush1.bf16.msra.mxu1 %v6978_v4  ;;  %v6996_v7 = vld [vmem:[%s11569_s1 + $0x20] ss:$16 sps:$4 sm:$0xff]   ;;  %v7002_v8 = vld [vmem:[%s11569_s1 + $0x28] ss:$16 sps:$4 sm:$0xff]   ;;  %v7008_v9 = vld [vmem:[%s11569_s1 + $0x44] ss:$16 sps:$4 sm:$0xff]  }
   0x4   :  { %251 = vmatprep.subr.bf16.mxu0 %v6984_v5  ;;  %294 = vmatprep.subr.bf16.mxu1 %v6991_v6  ;;  %v7013_v10 = vld [vmem:[%s11569_s1 + $0x4c] ss:$16 sps:$4 sm:$0xff]   ;;  %v7018_v11 = vld [vmem:[%s11569_s1 + $0x40] ss:$16 sps:$4 sm:$0xff]   ;;  %v7023_v12 = vld [vmem:[%s11569_s1 + $0x48] ss:$16 sps:$4 sm:$0xff]  }
   0x5   :  { %v7030_v13 = vld [vmem:[%s11569_s1 + $0x64] ss:$16 sps:$4 sm:$0xff]   ;;  %v7037_v14 = vld [vmem:[%s11569_s1 + $0x6c] ss:$16 sps:$4 sm:$0xff]   ;;  %v7042_v15 = vld [vmem:[%s11569_s1 + $0x60] ss:$16 sps:$4 sm:$0xff]  }
   0x6   :  { %v7049_v16 = vld [vmem:[%s11569_s1 + $0x68] ss:$16 sps:$4 sm:$0xff]   ;;  %v7054_v17 = vld [vmem:[%s11569_s1 + $0x84] ss:$16 sps:$4 sm:$0xff]   ;;  %v7061_v18 = vld [vmem:[%s11569_s1 + $0x8c] ss:$16 sps:$4 sm:$0xff]  }
   0x7   :  { %252 = vmatpush1.bf16.msra.mxu0 %v6996_v7  ;;  %295 = vmatpush1.bf16.msra.mxu1 %v7002_v8  ;;  %v7066_v19 = vld [vmem:[%s11569_s1 + $0x80] ss:$16 sps:$4 sm:$0xff]   ;;  %v7071_v20 = vld [vmem:[%s11569_s1 + $0x88] ss:$16 sps:$4 sm:$0xff]   ;;  %v7078_v21 = vld [vmem:[%s11569_s1 + $0xa4] ss:$16 sps:$4 sm:$0xff]  }
   0x8   :  { %253 = vmatprep.subr.bf16.mxu0 %v7008_v9  ;;  %296 = vmatprep.subr.bf16.mxu1 %v7013_v10  ;;  %v7085_v22 = vld [vmem:[%s11569_s1 + $0xac] ss:$16 sps:$4 sm:$0xff]   ;;  %v7090_v23 = vld [vmem:[%s11569_s1 + $0xa0] ss:$16 sps:$4 sm:$0xff]   ;;  %v7097_v24 = vld [vmem:[%s11569_s1 + $0xa8] ss:$16 sps:$4 sm:$0xff]  }
   0x9   :  { %v7102_v25 = vld [vmem:[%s11569_s1 + $0xc4] ss:$16 sps:$4 sm:$0xff]   ;;  %v7109_v26 = vld [vmem:[%s11569_s1 + $0xcc] ss:$16 sps:$4 sm:$0xff]   ;;  %v7114_v27 = vld [vmem:[%s11569_s1 + $0xc0] ss:$16 sps:$4 sm:$0xff]  }
   0xa   :  { %v7119_v28 = vld [vmem:[%s11569_s1 + $0xc8] ss:$16 sps:$4 sm:$0xff]   ;;  %v7126_v29 = vld [vmem:[%s11569_s1 + $0xe4] ss:$16 sps:$4 sm:$0xff]   ;;  %v7133_v30 = vld [vmem:[%s11569_s1 + $0xec] ss:$16 sps:$4 sm:$0xff]  }
   0xb   :  { %254 = vmatpush1.bf16.msra.mxu0 %v7018_v11  ;;  %297 = vmatpush1.bf16.msra.mxu1 %v7023_v12  ;;  %v7138_v31 = vld [vmem:[%s11569_s1 + $0xe0] ss:$16 sps:$4 sm:$0xff]   ;;  %v7143_v32 = vld [vmem:[%s11569_s1 + $0xe8] ss:$16 sps:$4 sm:$0xff]   ;;  %v6175_v34 = vld [vmem:[%s11570_s0 + $0x4] ss:$56 sps:$4 sm:$0xff]  }
   0xc   :  { %255 = vmatprep.subr.bf16.mxu0 %v7030_v13  ;;  %298 = vmatprep.subr.bf16.mxu1 %v7037_v14  ;;  %v6174_v33 = vld [vmem:[%s11570_s0] ss:$56 sps:$4 sm:$0xff]   ;;  %v6177_v36 = vld [vmem:[%s11570_s0 + $0xc] ss:$56 sps:$4 sm:$0xff]   ;;  %v6178_v37 = vld [vmem:[%s11570_s0 + $0x10] ss:$56 sps:$4 sm:$0xff]  }
   0xd   :  { %v6176_v35 = vld [vmem:[%s11570_s0 + $0x8] ss:$56 sps:$4 sm:$0xff]   ;;  %v6179_v38 = vld [vmem:[%s11570_s0 + $0x14] ss:$56 sps:$4 sm:$0xff]   ;;  %v6180_v39 = vld [vmem:[%s11570_s0 + $0x18] ss:$56 sps:$4 sm:$0xff]  }
   0xe   :  { %v7405_v48 = vld [vmem:[%s11571_s2] ss:$0 sm:$0xff]  ;;  %v6181_v58 = vld [vmem:[%s11570_s0 + $0x1c] ss:$56 sps:$4 sm:$0xff]   ;;  %vm5589_vm3 = vcmask 80896  }
   0xf   :  { %256 = vmatpush1.bf16.msra.mxu0 %v7042_v15  ;;  %299 = vmatpush1.bf16.msra.mxu1 %v7049_v16 }
  0x10   :  { %257 = vmatprep.subr.bf16.mxu0 %v7054_v17  ;;  %300 = vmatprep.subr.bf16.mxu1 %v7061_v18 }
  0x13   :  { %258 = vmatpush1.bf16.msra.mxu0 %v7066_v19  ;;  %301 = vmatpush1.bf16.msra.mxu1 %v7071_v20 }
  0x14   :  { %259 = vmatprep.subr.bf16.mxu0 %v7078_v21  ;;  %302 = vmatprep.subr.bf16.mxu1 %v7085_v22 }
  0x17   :  { %260 = vmatpush1.bf16.msra.mxu0 %v7090_v23  ;;  %303 = vmatpush1.bf16.msra.mxu1 %v7097_v24 }
  0x18   :  { %261 = vmatprep.subr.bf16.mxu0 %v7102_v25  ;;  %304 = vmatprep.subr.bf16.mxu1 %v7109_v26 }
  0x1b   :  { %262 = vmatpush1.bf16.msra.mxu0 %v7114_v27  ;;  %305 = vmatpush1.bf16.msra.mxu1 %v7119_v28 }
  0x1c   :  { %263 = vmatprep.subr.bf16.mxu0 %v7126_v29  ;;  %306 = vmatprep.subr.bf16.mxu1 %v7133_v30 }
  0x1f   :  { %264 = vmatpush1.bf16.msra.mxu0 %v7138_v31  ;;  %307 = vmatpush1.bf16.msra.mxu1 %v7143_v32 }
  0x20   :  { %357 = vmatprep.subr.bf16.mxu0 %v6960_v0  ;;  %400 = vmatprep.subr.bf16.mxu1 %v6967_v2 }
  0x22   :  { %282 = vmatmul.mubr.bf16.vlgmr.msra.gmra.mrb[0].mxu0 %v6174_v33  ;;  %325 = vmatmul.mubr.bf16.vlgmr.msra.gmra.mrb[0].mxu1 %v6174_v33 }
  0x23   :  { %358 = vmatpush1.bf16.msra.mxu0 %v6973_v3  ;;  %401 = vmatpush1.bf16.msra.mxu1 %v6978_v4 }
  0x24   :  { %359 = vmatprep.subr.bf16.mxu0 %v6984_v5  ;;  %402 = vmatprep.subr.bf16.mxu1 %v6991_v6 }
  0x25   :  { %389 = vmatprep.mubr.bf16.mxu0 %v11581_v1  ;;  %432 = vmatprep.mubr.bf16.mxu1 %v11581_v1 }
  0x27   :  { %360 = vmatpush1.bf16.msra.mxu0 %v6996_v7  ;;  %403 = vmatpush1.bf16.msra.mxu1 %v7002_v8 }
  0x28   :  { %361 = vmatprep.subr.bf16.mxu0 %v7008_v9  ;;  %404 = vmatprep.subr.bf16.mxu1 %v7013_v10 }
  0x2b   :  { %362 = vmatpush1.bf16.msra.mxu0 %v7018_v11  ;;  %405 = vmatpush1.bf16.msra.mxu1 %v7023_v12 }
  0x2c   :  { %363 = vmatprep.subr.bf16.mxu0 %v7030_v13  ;;  %406 = vmatprep.subr.bf16.mxu1 %v7037_v14 }
  0x2f   :  { %364 = vmatpush1.bf16.msra.mxu0 %v7042_v15  ;;  %407 = vmatpush1.bf16.msra.mxu1 %v7049_v16 }
  0x30   :  { %365 = vmatprep.subr.bf16.mxu0 %v7054_v17  ;;  %408 = vmatprep.subr.bf16.mxu1 %v7061_v18 }
  0x33   :  { %366 = vmatpush1.bf16.msra.mxu0 %v7066_v19  ;;  %409 = vmatpush1.bf16.msra.mxu1 %v7071_v20 }
  0x34   :  { %367 = vmatprep.subr.bf16.mxu0 %v7078_v21  ;;  %410 = vmatprep.subr.bf16.mxu1 %v7085_v22 }
  0x37   :  { %368 = vmatpush1.bf16.msra.mxu0 %v7090_v23  ;;  %411 = vmatpush1.bf16.msra.mxu1 %v7097_v24 }
  0x38   :  { %369 = vmatprep.subr.bf16.mxu0 %v7102_v25  ;;  %412 = vmatprep.subr.bf16.mxu1 %v7109_v26 }
  0x3b   :  { %370 = vmatpush1.bf16.msra.mxu0 %v7114_v27  ;;  %413 = vmatpush1.bf16.msra.mxu1 %v7119_v28 }
  0x3c   :  { %371 = vmatprep.subr.bf16.mxu0 %v7126_v29  ;;  %414 = vmatprep.subr.bf16.mxu1 %v7133_v30 }
  0x3f   :  { %372 = vmatpush1.bf16.msra.mxu0 %v7138_v31  ;;  %415 = vmatpush1.bf16.msra.mxu1 %v7143_v32 }
  0x40   :  { %465 = vmatprep.subr.bf16.mxu0 %v6960_v0  ;;  %508 = vmatprep.subr.bf16.mxu1 %v6967_v2 }
  0x42   :  { %390 = vmatmul.mubr.bf16.vlgmr.msra.gmra.mrb[4].mxu0 %v6175_v34  ;;  %433 = vmatmul.mubr.bf16.vlgmr.msra.gmra.mrb[4].mxu1 %v6175_v34 }
  0x43   :  { %466 = vmatpush1.bf16.msra.mxu0 %v6973_v3  ;;  %509 = vmatpush1.bf16.msra.mxu1 %v6978_v4 }
  0x44   :  { %467 = vmatprep.subr.bf16.mxu0 %v6984_v5  ;;  %510 = vmatprep.subr.bf16.mxu1 %v6991_v6 }
  0x45   :  { %497 = vmatprep.mubr.bf16.mxu0 %v11581_v1  ;;  %540 = vmatprep.mubr.bf16.mxu1 %v11581_v1 }
  0x47   :  { %468 = vmatpush1.bf16.msra.mxu0 %v6996_v7  ;;  %511 = vmatpush1.bf16.msra.mxu1 %v7002_v8 }
  0x48   :  { %469 = vmatprep.subr.bf16.mxu0 %v7008_v9  ;;  %512 = vmatprep.subr.bf16.mxu1 %v7013_v10 }
  0x4b   :  { %470 = vmatpush1.bf16.msra.mxu0 %v7018_v11  ;;  %513 = vmatpush1.bf16.msra.mxu1 %v7023_v12 }
  0x4c   :  { %471 = vmatprep.subr.bf16.mxu0 %v7030_v13  ;;  %514 = vmatprep.subr.bf16.mxu1 %v7037_v14 }
  0x4f   :  { %472 = vmatpush1.bf16.msra.mxu0 %v7042_v15  ;;  %515 = vmatpush1.bf16.msra.mxu1 %v7049_v16 }
  0x50   :  { %473 = vmatprep.subr.bf16.mxu0 %v7054_v17  ;;  %516 = vmatprep.subr.bf16.mxu1 %v7061_v18 }
  0x53   :  { %474 = vmatpush1.bf16.msra.mxu0 %v7066_v19  ;;  %517 = vmatpush1.bf16.msra.mxu1 %v7071_v20 }
  0x54   :  { %475 = vmatprep.subr.bf16.mxu0 %v7078_v21  ;;  %518 = vmatprep.subr.bf16.mxu1 %v7085_v22 }
  0x57   :  { %476 = vmatpush1.bf16.msra.mxu0 %v7090_v23  ;;  %519 = vmatpush1.bf16.msra.mxu1 %v7097_v24 }
  0x58   :  { %477 = vmatprep.subr.bf16.mxu0 %v7102_v25  ;;  %520 = vmatprep.subr.bf16.mxu1 %v7109_v26 }
  0x5b   :  { %478 = vmatpush1.bf16.msra.mxu0 %v7114_v27  ;;  %521 = vmatpush1.bf16.msra.mxu1 %v7119_v28 }
  0x5c   :  { %479 = vmatprep.subr.bf16.mxu0 %v7126_v29  ;;  %522 = vmatprep.subr.bf16.mxu1 %v7133_v30 }
  0x5f   :  { %480 = vmatpush1.bf16.msra.mxu0 %v7138_v31  ;;  %523 = vmatpush1.bf16.msra.mxu1 %v7143_v32 }
  0x60   :  { %573 = vmatprep.subr.bf16.mxu0 %v6960_v0  ;;  %616 = vmatprep.subr.bf16.mxu1 %v6967_v2 }
  0x62   :  { %498 = vmatmul.mubr.bf16.vlgmr.msra.gmra.mrb[8].mxu0 %v6176_v35  ;;  %541 = vmatmul.mubr.bf16.vlgmr.msra.gmra.mrb[8].mxu1 %v6176_v35 }
  0x63   :  { %574 = vmatpush1.bf16.msra.mxu0 %v6973_v3  ;;  %617 = vmatpush1.bf16.msra.mxu1 %v6978_v4 }
  0x64   :  { %575 = vmatprep.subr.bf16.mxu0 %v6984_v5  ;;  %618 = vmatprep.subr.bf16.mxu1 %v6991_v6 }
  0x65   :  { %605 = vmatprep.mubr.bf16.mxu0 %v11581_v1  ;;  %648 = vmatprep.mubr.bf16.mxu1 %v11581_v1 }
  0x67   :  { %576 = vmatpush1.bf16.msra.mxu0 %v6996_v7  ;;  %619 = vmatpush1.bf16.msra.mxu1 %v7002_v8 }
  0x68   :  { %577 = vmatprep.subr.bf16.mxu0 %v7008_v9  ;;  %620 = vmatprep.subr.bf16.mxu1 %v7013_v10 }
  0x6b   :  { %578 = vmatpush1.bf16.msra.mxu0 %v7018_v11  ;;  %621 = vmatpush1.bf16.msra.mxu1 %v7023_v12 }
  0x6c   :  { %579 = vmatprep.subr.bf16.mxu0 %v7030_v13  ;;  %622 = vmatprep.subr.bf16.mxu1 %v7037_v14 }
  0x6f   :  { %580 = vmatpush1.bf16.msra.mxu0 %v7042_v15  ;;  %623 = vmatpush1.bf16.msra.mxu1 %v7049_v16 }
  0x70   :  { %581 = vmatprep.subr.bf16.mxu0 %v7054_v17  ;;  %624 = vmatprep.subr.bf16.mxu1 %v7061_v18 }
  0x73   :  { %582 = vmatpush1.bf16.msra.mxu0 %v7066_v19  ;;  %625 = vmatpush1.bf16.msra.mxu1 %v7071_v20 }
  0x74   :  { %583 = vmatprep.subr.bf16.mxu0 %v7078_v21  ;;  %626 = vmatprep.subr.bf16.mxu1 %v7085_v22 }
  0x77   :  { %584 = vmatpush1.bf16.msra.mxu0 %v7090_v23  ;;  %627 = vmatpush1.bf16.msra.mxu1 %v7097_v24 }
  0x78   :  { %585 = vmatprep.subr.bf16.mxu0 %v7102_v25  ;;  %628 = vmatprep.subr.bf16.mxu1 %v7109_v26 }
  0x7b   :  { %586 = vmatpush1.bf16.msra.mxu0 %v7114_v27  ;;  %629 = vmatpush1.bf16.msra.mxu1 %v7119_v28 }
  0x7c   :  { %587 = vmatprep.subr.bf16.mxu0 %v7126_v29  ;;  %630 = vmatprep.subr.bf16.mxu1 %v7133_v30 }
  0x7f   :  { %588 = vmatpush1.bf16.msra.mxu0 %v7138_v31  ;;  %631 = vmatpush1.bf16.msra.mxu1 %v7143_v32 }
  0x80   :  { %681 = vmatprep.subr.bf16.mxu0 %v6960_v0  ;;  %724 = vmatprep.subr.bf16.mxu1 %v6967_v2 }
  0x82   :  { %606 = vmatmul.mubr.bf16.vlgmr.msra.gmra.mrb[12].mxu0 %v6177_v36  ;;  %649 = vmatmul.mubr.bf16.vlgmr.msra.gmra.mrb[12].mxu1 %v6177_v36 }
  0x83   :  { %682 = vmatpush1.bf16.msra.mxu0 %v6973_v3  ;;  %725 = vmatpush1.bf16.msra.mxu1 %v6978_v4 }
  0x84   :  { %683 = vmatprep.subr.bf16.mxu0 %v6984_v5  ;;  %726 = vmatprep.subr.bf16.mxu1 %v6991_v6 }
  0x85   :  { %713 = vmatprep.mubr.bf16.mxu0 %v11581_v1  ;;  %756 = vmatprep.mubr.bf16.mxu1 %v11581_v1 }
  0x87   :  { %684 = vmatpush1.bf16.msra.mxu0 %v6996_v7  ;;  %727 = vmatpush1.bf16.msra.mxu1 %v7002_v8 }
  0x88   :  { %685 = vmatprep.subr.bf16.mxu0 %v7008_v9  ;;  %728 = vmatprep.subr.bf16.mxu1 %v7013_v10 }
  0x8b   :  { %686 = vmatpush1.bf16.msra.mxu0 %v7018_v11  ;;  %729 = vmatpush1.bf16.msra.mxu1 %v7023_v12 }
  0x8c   :  { %687 = vmatprep.subr.bf16.mxu0 %v7030_v13  ;;  %730 = vmatprep.subr.bf16.mxu1 %v7037_v14 }
  0x8f   :  { %688 = vmatpush1.bf16.msra.mxu0 %v7042_v15  ;;  %731 = vmatpush1.bf16.msra.mxu1 %v7049_v16 }
  0x90   :  { %689 = vmatprep.subr.bf16.mxu0 %v7054_v17  ;;  %732 = vmatprep.subr.bf16.mxu1 %v7061_v18 }
  0x93   :  { %690 = vmatpush1.bf16.msra.mxu0 %v7066_v19  ;;  %733 = vmatpush1.bf16.msra.mxu1 %v7071_v20 }
  0x94   :  { %691 = vmatprep.subr.bf16.mxu0 %v7078_v21  ;;  %734 = vmatprep.subr.bf16.mxu1 %v7085_v22 }
  0x97   :  { %692 = vmatpush1.bf16.msra.mxu0 %v7090_v23  ;;  %735 = vmatpush1.bf16.msra.mxu1 %v7097_v24 }
  0x98   :  { %693 = vmatprep.subr.bf16.mxu0 %v7102_v25  ;;  %736 = vmatprep.subr.bf16.mxu1 %v7109_v26 }
  0x9b   :  { %694 = vmatpush1.bf16.msra.mxu0 %v7114_v27  ;;  %737 = vmatpush1.bf16.msra.mxu1 %v7119_v28 }
  0x9c   :  { %695 = vmatprep.subr.bf16.mxu0 %v7126_v29  ;;  %738 = vmatprep.subr.bf16.mxu1 %v7133_v30 }
  0x9f   :  { %696 = vmatpush1.bf16.msra.mxu0 %v7138_v31  ;;  %739 = vmatpush1.bf16.msra.mxu1 %v7143_v32 }
  0xa0   :  { %789 = vmatprep.subr.bf16.mxu0 %v6960_v0  ;;  %832 = vmatprep.subr.bf16.mxu1 %v6967_v2 }
  0xa2   :  { %714 = vmatmul.mubr.bf16.vlgmr.msra.gmra.mrb[16].mxu0 %v6178_v37  ;;  %757 = vmatmul.mubr.bf16.vlgmr.msra.gmra.mrb[16].mxu1 %v6178_v37 }
  0xa3   :  { %790 = vmatpush1.bf16.msra.mxu0 %v6973_v3  ;;  %833 = vmatpush1.bf16.msra.mxu1 %v6978_v4 }
  0xa4   :  { %791 = vmatprep.subr.bf16.mxu0 %v6984_v5  ;;  %834 = vmatprep.subr.bf16.mxu1 %v6991_v6 }
  0xa5   :  { %821 = vmatprep.mubr.bf16.mxu0 %v11581_v1  ;;  %864 = vmatprep.mubr.bf16.mxu1 %v11581_v1 }
  0xa7   :  { %792 = vmatpush1.bf16.msra.mxu0 %v6996_v7  ;;  %835 = vmatpush1.bf16.msra.mxu1 %v7002_v8 }
  0xa8   :  { %793 = vmatprep.subr.bf16.mxu0 %v7008_v9  ;;  %836 = vmatprep.subr.bf16.mxu1 %v7013_v10 }
  0xab   :  { %794 = vmatpush1.bf16.msra.mxu0 %v7018_v11  ;;  %837 = vmatpush1.bf16.msra.mxu1 %v7023_v12 }
  0xac   :  { %795 = vmatprep.subr.bf16.mxu0 %v7030_v13  ;;  %838 = vmatprep.subr.bf16.mxu1 %v7037_v14 }
  0xaf   :  { %796 = vmatpush1.bf16.msra.mxu0 %v7042_v15  ;;  %839 = vmatpush1.bf16.msra.mxu1 %v7049_v16 }
  0xb0   :  { %797 = vmatprep.subr.bf16.mxu0 %v7054_v17  ;;  %840 = vmatprep.subr.bf16.mxu1 %v7061_v18 }
  0xb3   :  { %798 = vmatpush1.bf16.msra.mxu0 %v7066_v19  ;;  %841 = vmatpush1.bf16.msra.mxu1 %v7071_v20 }
  0xb4   :  { %799 = vmatprep.subr.bf16.mxu0 %v7078_v21  ;;  %842 = vmatprep.subr.bf16.mxu1 %v7085_v22 }
  0xb7   :  { %800 = vmatpush1.bf16.msra.mxu0 %v7090_v23  ;;  %843 = vmatpush1.bf16.msra.mxu1 %v7097_v24 }
  0xb8   :  { %801 = vmatprep.subr.bf16.mxu0 %v7102_v25  ;;  %844 = vmatprep.subr.bf16.mxu1 %v7109_v26 }
  0xbb   :  { %802 = vmatpush1.bf16.msra.mxu0 %v7114_v27  ;;  %845 = vmatpush1.bf16.msra.mxu1 %v7119_v28 }
  0xbc   :  { %803 = vmatprep.subr.bf16.mxu0 %v7126_v29  ;;  %846 = vmatprep.subr.bf16.mxu1 %v7133_v30 }
  0xbf   :  { %804 = vmatpush1.bf16.msra.mxu0 %v7138_v31  ;;  %847 = vmatpush1.bf16.msra.mxu1 %v7143_v32 }
  0xc0   :  { %897 = vmatprep.subr.bf16.mxu0 %v6960_v0  ;;  %940 = vmatprep.subr.bf16.mxu1 %v6967_v2 }
  0xc2   :  { %822 = vmatmul.mubr.bf16.vlgmr.msra.gmra.mrb[20].mxu0 %v6179_v38  ;;  %865 = vmatmul.mubr.bf16.vlgmr.msra.gmra.mrb[20].mxu1 %v6179_v38 }
  0xc3   :  { %898 = vmatpush1.bf16.msra.mxu0 %v6973_v3  ;;  %941 = vmatpush1.bf16.msra.mxu1 %v6978_v4 }
  0xc4   :  { %899 = vmatprep.subr.bf16.mxu0 %v6984_v5  ;;  %942 = vmatprep.subr.bf16.mxu1 %v6991_v6 }
  0xc5   :  { %929 = vmatprep.mubr.bf16.mxu0 %v11581_v1  ;;  %972 = vmatprep.mubr.bf16.mxu1 %v11581_v1 }
  0xc7   :  { %900 = vmatpush1.bf16.msra.mxu0 %v6996_v7  ;;  %943 = vmatpush1.bf16.msra.mxu1 %v7002_v8 }
  0xc8   :  { %901 = vmatprep.subr.bf16.mxu0 %v7008_v9  ;;  %944 = vmatprep.subr.bf16.mxu1 %v7013_v10 }
  0xcb   :  { %902 = vmatpush1.bf16.msra.mxu0 %v7018_v11  ;;  %945 = vmatpush1.bf16.msra.mxu1 %v7023_v12 }
  0xcc   :  { %903 = vmatprep.subr.bf16.mxu0 %v7030_v13  ;;  %946 = vmatprep.subr.bf16.mxu1 %v7037_v14 }
  0xcf   :  { %904 = vmatpush1.bf16.msra.mxu0 %v7042_v15  ;;  %947 = vmatpush1.bf16.msra.mxu1 %v7049_v16 }
  0xd0   :  { %905 = vmatprep.subr.bf16.mxu0 %v7054_v17  ;;  %948 = vmatprep.subr.bf16.mxu1 %v7061_v18 }
  0xd3   :  { %906 = vmatpush1.bf16.msra.mxu0 %v7066_v19  ;;  %949 = vmatpush1.bf16.msra.mxu1 %v7071_v20 }
  0xd4   :  { %907 = vmatprep.subr.bf16.mxu0 %v7078_v21  ;;  %950 = vmatprep.subr.bf16.mxu1 %v7085_v22 }
  0xd7   :  { %908 = vmatpush1.bf16.msra.mxu0 %v7090_v23  ;;  %951 = vmatpush1.bf16.msra.mxu1 %v7097_v24 }
  0xd8   :  { %909 = vmatprep.subr.bf16.mxu0 %v7102_v25  ;;  %952 = vmatprep.subr.bf16.mxu1 %v7109_v26 }
  0xdb   :  { %910 = vmatpush1.bf16.msra.mxu0 %v7114_v27  ;;  %953 = vmatpush1.bf16.msra.mxu1 %v7119_v28 }
  0xdc   :  { %911 = vmatprep.subr.bf16.mxu0 %v7126_v29  ;;  %954 = vmatprep.subr.bf16.mxu1 %v7133_v30 }
  0xdf   :  { %912 = vmatpush1.bf16.msra.mxu0 %v7138_v31  ;;  %955 = vmatpush1.bf16.msra.mxu1 %v7143_v32 }
  0xe0   :  { %1005 = vmatprep.subr.bf16.mxu0 %v6960_v0  ;;  %1048 = vmatprep.subr.bf16.mxu1 %v6967_v2 }
  0xe2   :  { %930 = vmatmul.mubr.bf16.vlgmr.msra.gmra.mrb[24].mxu0 %v6180_v39  ;;  %973 = vmatmul.mubr.bf16.vlgmr.msra.gmra.mrb[24].mxu1 %v6180_v39 }
  0xe3   :  { %1006 = vmatpush1.bf16.msra.mxu0 %v6973_v3  ;;  %1049 = vmatpush1.bf16.msra.mxu1 %v6978_v4 }
  0xe4   :  { %1007 = vmatprep.subr.bf16.mxu0 %v6984_v5  ;;  %1050 = vmatprep.subr.bf16.mxu1 %v6991_v6 }
  0xe5   :  { %1037 = vmatprep.mubr.bf16.mxu0 %v11581_v1  ;;  %1080 = vmatprep.mubr.bf16.mxu1 %v11581_v1 }
  0xe7   :  { %1008 = vmatpush1.bf16.msra.mxu0 %v6996_v7  ;;  %1051 = vmatpush1.bf16.msra.mxu1 %v7002_v8 }
  0xe8   :  { %1009 = vmatprep.subr.bf16.mxu0 %v7008_v9  ;;  %1052 = vmatprep.subr.bf16.mxu1 %v7013_v10 }
  0xeb   :  { %1010 = vmatpush1.bf16.msra.mxu0 %v7018_v11  ;;  %1053 = vmatpush1.bf16.msra.mxu1 %v7023_v12 }
  0xec   :  { %1011 = vmatprep.subr.bf16.mxu0 %v7030_v13  ;;  %1054 = vmatprep.subr.bf16.mxu1 %v7037_v14 }
  0xef   :  { %1012 = vmatpush1.bf16.msra.mxu0 %v7042_v15  ;;  %1055 = vmatpush1.bf16.msra.mxu1 %v7049_v16 }
  0xf0   :  { %1013 = vmatprep.subr.bf16.mxu0 %v7054_v17  ;;  %1056 = vmatprep.subr.bf16.mxu1 %v7061_v18 }
  0xf3   :  { %1014 = vmatpush1.bf16.msra.mxu0 %v7066_v19  ;;  %1057 = vmatpush1.bf16.msra.mxu1 %v7071_v20 }
  0xf4   :  { %1015 = vmatprep.subr.bf16.mxu0 %v7078_v21  ;;  %1058 = vmatprep.subr.bf16.mxu1 %v7085_v22 }
  0xf5   :  { %v283_v40 = vpop.f32.mrb[0].mxu0  ;;  %v326_v41 = vpop.f32.mrb[0].mxu1 }
  0xf6   :  { %v285_v42 = vpop.f32.mrb[1].mxu0  ;;  %v328_v43 = vpop.f32.mrb[1].mxu1 }
  0xf7   :  { %v335_v44 = vmax.f32 %v283_v40, %v285_v42  ;;  %v337_v45 = vmax.f32 %v326_v41, %v328_v43  ;;  %v287_v46 = vpop.f32.mrb[2].mxu0  ;;  %v330_v47 = vpop.f32.mrb[2].mxu1  ;;  %1016 = vmatpush1.bf16.msra.mxu0 %v7090_v23  ;;  %1059 = vmatpush1.bf16.msra.mxu1 %v7097_v24 }
  0xf8   :  { %v289_v49 = vpop.f32.mrb[3].mxu0  ;;  %v332_v50 = vpop.f32.mrb[3].mxu1  ;;  %1017 = vmatprep.subr.bf16.mxu0 %v7102_v25  ;;  %1060 = vmatprep.subr.bf16.mxu1 %v7109_v26 }
  0xf9   :  { %v339_v51 = vmax.f32 %v335_v44, %v337_v45  ;;  %v336_v52 = vmax.f32 %v287_v46, %v289_v49  ;;  %v338_v53 = vmax.f32 %v330_v47, %v332_v50  ;;  %v6182_v50 = vld [vmem:[%s11570_s0 + $0x20] ss:$56 sps:$4 sm:$0xff]  }
  0xfb   :  { %v341_v54 = vadd.f32 %v7405_v48, %v339_v51  ;;  %v340_v55 = vmax.f32 %v336_v52, %v338_v53  ;;  %1018 = vmatpush1.bf16.msra.mxu0 %v7114_v27  ;;  %1061 = vmatpush1.bf16.msra.mxu1 %v7119_v28 }
  0xfc   :  { %1019 = vmatprep.subr.bf16.mxu0 %v7126_v29  ;;  %1062 = vmatprep.subr.bf16.mxu1 %v7133_v30 }
  0xfd   :  { %v343_v56 = vmul.f32 0.01, %v341_v54  ;;  %v342_v57 = vadd.f32 %v7405_v48, %v340_v55  ;;  %v7569_v55 = vld [vmem:[%s11569_s1 + $0x40] ss:$16 sps:$4 sm:$0xff]  }
  0xff   :  { %v344_v59 = vmul.f32 0.01, %v342_v57  ;;  %1020 = vmatpush1.bf16.msra.mxu0 %v7138_v31  ;;  %1063 = vmatpush1.bf16.msra.mxu1 %v7143_v32  ;;  %v345_v60 = vmax.f32 %v341_v54, %v343_v56  ;;  %v7575_v56 = vld [vmem:[%s11569_s1 + $0x48] ss:$16 sps:$4 sm:$0xff]  }
 0x100   :  { %1113 = vmatprep.subr.bf16.mxu0 %v6960_v0  ;;  %1156 = vmatprep.subr.bf16.mxu1 %v6967_v2 }
 0x101   :  { %v346_v61 = vmax.f32 %v342_v57, %v344_v59  ;;  %v7581_v57 = vld [vmem:[%s11569_s1 + $0x64] ss:$16 sps:$4 sm:$0xff]   ;;  %v7593_v59 = vld [vmem:[%s11569_s1 + $0x60] ss:$16 sps:$4 sm:$0xff]  }
 0x102   :  { %1038 = vmatmul.mubr.bf16.vlgmr.msra.gmra.mrb[28].mxu0 %v6181_v58  ;;  %1081 = vmatmul.mubr.bf16.vlgmr.msra.gmra.mrb[28].mxu1 %v6181_v58  ;;  %v7587_v58 = vld [vmem:[%s11569_s1 + $0x6c] ss:$16 sps:$4 sm:$0xff]  }
 0x103   :  { %1114 = vmatpush1.bf16.msra.mxu0 %v6973_v3  ;;  %1157 = vmatpush1.bf16.msra.mxu1 %v6978_v4  ;;  %v7424_v62 = vpack.c.bf16 %v346_v61, %v345_v60  ;;  %v7599_v60 = vld [vmem:[%s11569_s1 + $0x68] ss:$16 sps:$4 sm:$0xff]   ;;  %v7605_v61 = vld [vmem:[%s11569_s1 + $0x84] ss:$16 sps:$4 sm:$0xff]  }
 0x104   :  { %1115 = vmatprep.subr.bf16.mxu0 %v6984_v5  ;;  %1158 = vmatprep.subr.bf16.mxu1 %v6991_v6 }
 0x105   :  { %1145 = vmatprep.mubr.bf16.mxu0 %v11581_v1  ;;  %1188 = vmatprep.mubr.bf16.mxu1 %v11581_v1 }
 0x107   :  { %1116 = vmatpush1.bf16.msra.mxu0 %v6996_v7  ;;  %1159 = vmatpush1.bf16.msra.mxu1 %v7002_v8 }
 0x108   :  { %1117 = vmatprep.subr.bf16.mxu0 %v7008_v9  ;;  %1160 = vmatprep.subr.bf16.mxu1 %v7013_v10 }
 0x10b   :  { %1118 = vmatpush1.bf16.msra.mxu0 %v7018_v11  ;;  %1161 = vmatpush1.bf16.msra.mxu1 %v7023_v12 }
 0x10c   :  { %1119 = vmatprep.subr.bf16.mxu0 %v7030_v13  ;;  %1162 = vmatprep.subr.bf16.mxu1 %v7037_v14 }
 0x10f   :  { %1120 = vmatpush1.bf16.msra.mxu0 %v7042_v15  ;;  %1163 = vmatpush1.bf16.msra.mxu1 %v7049_v16 }
 0x110   :  { %1121 = vmatprep.subr.bf16.mxu0 %v7054_v17  ;;  %1164 = vmatprep.subr.bf16.mxu1 %v7061_v18 }
 0x113   :  { %1122 = vmatpush1.bf16.msra.mxu0 %v7066_v19  ;;  %1165 = vmatpush1.bf16.msra.mxu1 %v7071_v20 }
 0x114   :  { %1123 = vmatprep.subr.bf16.mxu0 %v7078_v21  ;;  %1166 = vmatprep.subr.bf16.mxu1 %v7085_v22 }
 0x115   :  { %v391_v63 = vpop.f32.mrb[4].mxu0  ;;  %v434_v33 = vpop.f32.mrb[4].mxu1 }
 0x116   :  { %v393_v34 = vpop.f32.mrb[5].mxu0  ;;  %v436_v35 = vpop.f32.mrb[5].mxu1 }
 0x117   :  { %v443_v36 = vmax.f32 %v391_v63, %v393_v34  ;;  %v445_v37 = vmax.f32 %v434_v33, %v436_v35  ;;  %v395_v38 = vpop.f32.mrb[6].mxu0  ;;  %v438_v39 = vpop.f32.mrb[6].mxu1  ;;  %1124 = vmatpush1.bf16.msra.mxu0 %v7090_v23  ;;  %1167 = vmatpush1.bf16.msra.mxu1 %v7097_v24  ;;  %v7611_v63 = vld [vmem:[%s11569_s1 + $0x8c] ss:$16 sps:$4 sm:$0xff]   ;;  %v7617_v33 = vld [vmem:[%s11569_s1 + $0x80] ss:$16 sps:$4 sm:$0xff]  }
 0x118   :  { %v397_v40 = vpop.f32.mrb[7].mxu0  ;;  %v440_v41 = vpop.f32.mrb[7].mxu1  ;;  %1125 = vmatprep.subr.bf16.mxu0 %v7102_v25  ;;  %1168 = vmatprep.subr.bf16.mxu1 %v7109_v26  ;;  %v7623_v34 = vld [vmem:[%s11569_s1 + $0x88] ss:$16 sps:$4 sm:$0xff]   ;;  %v7629_v35 = vld [vmem:[%s11569_s1 + $0xa4] ss:$16 sps:$4 sm:$0xff]  }
 0x119   :  { %v447_v42 = vmax.f32 %v443_v36, %v445_v37  ;;  %v444_v43 = vmax.f32 %v395_v38, %v397_v40  ;;  %v446_v44 = vmax.f32 %v438_v39, %v440_v41  ;;  %v7635_v36 = vld [vmem:[%s11569_s1 + $0xac] ss:$16 sps:$4 sm:$0xff]  }
 0x11b   :  { %v449_v45 = vadd.f32 %v7405_v48, %v447_v42  ;;  %v448_v46 = vmax.f32 %v444_v43, %v446_v44  ;;  %1126 = vmatpush1.bf16.msra.mxu0 %v7114_v27  ;;  %1169 = vmatpush1.bf16.msra.mxu1 %v7119_v28 }
 0x11c   :  { %1127 = vmatprep.subr.bf16.mxu0 %v7126_v29  ;;  %1170 = vmatprep.subr.bf16.mxu1 %v7133_v30 }
 0x11d   :  { %v451_v47 = vmul.f32 0.01, %v449_v45  ;;  %v450_v49 = vadd.f32 %v7405_v48, %v448_v46  ;;  %v7647_v46 = vld [vmem:[%s11569_s1 + $0xa8] ss:$16 sps:$4 sm:$0xff]  }
 0x11f   :  { %v452_v51 = vmul.f32 0.01, %v450_v49  ;;  %1128 = vmatpush1.bf16.msra.mxu0 %v7138_v31  ;;  %1171 = vmatpush1.bf16.msra.mxu1 %v7143_v32  ;;  %v453_v52 = vmax.f32 %v449_v45, %v451_v47  ;;  %v7641_v45 = vld [vmem:[%s11569_s1 + $0xa0] ss:$16 sps:$4 sm:$0xff]  }
 0x120   :  { %1221 = vmatprep.subr.bf16.mxu0 %v6960_v0  ;;  %1264 = vmatprep.subr.bf16.mxu1 %v6967_v2 }
 0x121   :  { %v454_v53 = vmax.f32 %v450_v49, %v452_v51  ;;  %v7659_v51 = vld [vmem:[%s11569_s1 + $0xcc] ss:$16 sps:$4 sm:$0xff]  }
 0x122   :  { %1146 = vmatmul.mubr.bf16.vlgmr.msra.gmra.mrb[32].mxu0 %v6182_v50  ;;  %1189 = vmatmul.mubr.bf16.vlgmr.msra.gmra.mrb[32].mxu1 %v6182_v50  ;;  %v7653_v50 = vld [vmem:[%s11569_s1 + $0xc4] ss:$16 sps:$4 sm:$0xff]  }
 0x123   :  { %1222 = vmatpush1.bf16.msra.mxu0 %v6973_v3  ;;  %1265 = vmatpush1.bf16.msra.mxu1 %v6978_v4  ;;  %v7465_v54 = vpack.c.bf16 %v454_v53, %v453_v52 }
 0x124   :  { %1223 = vmatprep.subr.bf16.mxu0 %v6984_v5  ;;  %1266 = vmatprep.subr.bf16.mxu1 %v6991_v6 }
 0x125   :  { %1253 = vmatprep.mubr.bf16.mxu0 %v11581_v1  ;;  %1296 = vmatprep.mubr.bf16.mxu1 %v11581_v1 }
 0x127   :  { %1224 = vmatpush1.bf16.msra.mxu0 %v6996_v7  ;;  %1267 = vmatpush1.bf16.msra.mxu1 %v7002_v8 }
 0x128   :  { %1225 = vmatprep.subr.bf16.mxu0 %v7008_v9  ;;  %1268 = vmatprep.subr.bf16.mxu1 %v7013_v10 }
 0x12b   :  { %1226 = vmatpush1.bf16.msra.mxu0 %v7018_v11  ;;  %1269 = vmatpush1.bf16.msra.mxu1 %v7023_v12 }
 0x12c   :  { %1227 = vmatprep.subr.bf16.mxu0 %v7030_v13  ;;  %1270 = vmatprep.subr.bf16.mxu1 %v7037_v14 }
 0x12f   :  { %1228 = vmatpush1.bf16.msra.mxu0 %v7042_v15  ;;  %1271 = vmatpush1.bf16.msra.mxu1 %v7049_v16 }
 0x130   :  { %1229 = vmatprep.subr.bf16.mxu0 %v7054_v17  ;;  %1272 = vmatprep.subr.bf16.mxu1 %v7061_v18  ;;  %v6183_v18 = vld [vmem:[%s11570_s0 + $0x24] ss:$56 sps:$4 sm:$0xff]  }
 0x133   :  { %1230 = vmatpush1.bf16.msra.mxu0 %v7066_v19  ;;  %1273 = vmatpush1.bf16.msra.mxu1 %v7071_v20  ;;  %v7505_v20 = vld [vmem:[%s11569_s1 + $0x4] ss:$16 sps:$4 sm:$0xff]  }
 0x134   :  { %1231 = vmatprep.subr.bf16.mxu0 %v7078_v21  ;;  %1274 = vmatprep.subr.bf16.mxu1 %v7085_v22  ;;  %v7511_v21 = vld [vmem:[%s11569_s1 + $0xc] ss:$16 sps:$4 sm:$0xff]  }
 0x135   :  { %v499_v0 = vpop.f32.mrb[8].mxu0  ;;  %v542_v2 = vpop.f32.mrb[8].mxu1 }
 0x136   :  { %v501_v3 = vpop.f32.mrb[9].mxu0  ;;  %v544_v4 = vpop.f32.mrb[9].mxu1 }
 0x137   :  { %v551_v5 = vmax.f32 %v499_v0, %v501_v3  ;;  %v553_v6 = vmax.f32 %v542_v2, %v544_v4  ;;  %v503_v7 = vpop.f32.mrb[10].mxu0  ;;  %v546_v8 = vpop.f32.mrb[10].mxu1  ;;  %1232 = vmatpush1.bf16.msra.mxu0 %v7090_v23  ;;  %1275 = vmatpush1.bf16.msra.mxu1 %v7097_v24  ;;  %v7517_v24 = vld [vmem:[%s11569_s1] ss:$16 sps:$4 sm:$0xff]  }
 0x138   :  { %v505_v9 = vpop.f32.mrb[11].mxu0  ;;  %v548_v10 = vpop.f32.mrb[11].mxu1  ;;  %1233 = vmatprep.subr.bf16.mxu0 %v7102_v25  ;;  %1276 = vmatprep.subr.bf16.mxu1 %v7109_v26  ;;  %v7523_v25 = vld [vmem:[%s11569_s1 + $0x8] ss:$16 sps:$4 sm:$0xff]   ;;  %v7666_v4 = vld [vmem:[%s11569_s1 + $0xc0] ss:$16 sps:$4 sm:$0xff]  }
 0x139   :  { %v555_v11 = vmax.f32 %v551_v5, %v553_v6  ;;  %v552_v12 = vmax.f32 %v503_v7, %v505_v9  ;;  %v554_v13 = vmax.f32 %v546_v8, %v548_v10  ;;  %v7672_v5 = vld [vmem:[%s11569_s1 + $0xc8] ss:$16 sps:$4 sm:$0xff]   ;;  %v7678_v6 = vld [vmem:[%s11569_s1 + $0xe4] ss:$16 sps:$4 sm:$0xff]   ;;  %v7684_v7 = vld [vmem:[%s11569_s1 + $0xec] ss:$16 sps:$4 sm:$0xff]  }
 0x13a   :  { %v6184_v10 = vld [vmem:[%s11570_s0 + $0x28] ss:$56 sps:$4 sm:$0xff]  }
 0x13b   :  { %v557_v14 = vadd.f32 %v7405_v48, %v555_v11  ;;  %v556_v15 = vmax.f32 %v552_v12, %v554_v13  ;;  %1234 = vmatpush1.bf16.msra.mxu0 %v7114_v27  ;;  %1277 = vmatpush1.bf16.msra.mxu1 %v7119_v28  ;;  %v7531_v27 = vld [vmem:[%s11569_s1 + $0x24] ss:$16 sps:$4 sm:$0xff]   ;;  %v7537_v28 = vld [vmem:[%s11569_s1 + $0x2c] ss:$16 sps:$4 sm:$0xff]   ;;  %v7694_v12 = vld [vmem:[%s11569_s1 + $0xe0] ss:$16 sps:$4 sm:$0xff]  }
 0x13c   :  { %1235 = vmatprep.subr.bf16.mxu0 %v7126_v29  ;;  %1278 = vmatprep.subr.bf16.mxu1 %v7133_v30  ;;  %v7545_v29 = vld [vmem:[%s11569_s1 + $0x20] ss:$16 sps:$4 sm:$0xff]   ;;  %v7551_v30 = vld [vmem:[%s11569_s1 + $0x28] ss:$16 sps:$4 sm:$0xff]  }
 0x13d   :  { %v559_v16 = vmul.f32 0.01, %v557_v14  ;;  %v558_v17 = vadd.f32 %v7405_v48, %v556_v15  ;;  %v7700_v13 = vld [vmem:[%s11569_s1 + $0xe8] ss:$16 sps:$4 sm:$0xff]  }
 0x13f   :  { %v560_v19 = vmul.f32 0.01, %v558_v17  ;;  %1236 = vmatpush1.bf16.msra.mxu0 %v7138_v31  ;;  %1279 = vmatpush1.bf16.msra.mxu1 %v7143_v32  ;;  %v561_v22 = vmax.f32 %v557_v14, %v559_v16  ;;  %v7557_v31 = vld [vmem:[%s11569_s1 + $0x44] ss:$16 sps:$4 sm:$0xff]   ;;  %v7563_v32 = vld [vmem:[%s11569_s1 + $0x4c] ss:$16 sps:$4 sm:$0xff]  }
 0x140   :  { %1329 = vmatprep.subr.bf16.mxu0 %v7505_v20  ;;  %1372 = vmatprep.subr.bf16.mxu1 %v7511_v21 }
 0x141   :  { %v562_v23 = vmax.f32 %v558_v17, %v560_v19 }
 0x142   :  { %1254 = vmatmul.mubr.bf16.vlgmr.msra.gmra.mrb[36].mxu0 %v6183_v18  ;;  %1297 = vmatmul.mubr.bf16.vlgmr.msra.gmra.mrb[36].mxu1 %v6183_v18 }
 0x143   :  { %1330 = vmatpush1.bf16.msra.mxu0 %v7517_v24  ;;  %1373 = vmatpush1.bf16.msra.mxu1 %v7523_v25  ;;  %v7526_v26 = vpack.c.bf16 %v562_v23, %v561_v22 }
 0x144   :  { %1331 = vmatprep.subr.bf16.mxu0 %v7531_v27  ;;  %1374 = vmatprep.subr.bf16.mxu1 %v7537_v28 }
 0x145   :  { %1361 = vmatprep.mubr.bf16.mxu0 %v11581_v1  ;;  %1404 = vmatprep.mubr.bf16.mxu1 %v11581_v1 }
 0x147   :  { %1332 = vmatpush1.bf16.msra.mxu0 %v7545_v29  ;;  %1375 = vmatpush1.bf16.msra.mxu1 %v7551_v30 }
 0x148   :  { %1333 = vmatprep.subr.bf16.mxu0 %v7557_v31  ;;  %1376 = vmatprep.subr.bf16.mxu1 %v7563_v32 }
 0x14b   :  { %1334 = vmatpush1.bf16.msra.mxu0 %v7569_v55  ;;  %1377 = vmatpush1.bf16.msra.mxu1 %v7575_v56 }
 0x14c   :  { %1335 = vmatprep.subr.bf16.mxu0 %v7581_v57  ;;  %1378 = vmatprep.subr.bf16.mxu1 %v7587_v58 }
 0x14f   :  { %1336 = vmatpush1.bf16.msra.mxu0 %v7593_v59  ;;  %1379 = vmatpush1.bf16.msra.mxu1 %v7599_v60 }
 0x150   :  { %1337 = vmatprep.subr.bf16.mxu0 %v7605_v61  ;;  %1380 = vmatprep.subr.bf16.mxu1 %v7611_v63 }
 0x153   :  { %1338 = vmatpush1.bf16.msra.mxu0 %v7617_v33  ;;  %1381 = vmatpush1.bf16.msra.mxu1 %v7623_v34 }
 0x154   :  { %1339 = vmatprep.subr.bf16.mxu0 %v7629_v35  ;;  %1382 = vmatprep.subr.bf16.mxu1 %v7635_v36 }
 0x155   :  { %v607_v37 = vpop.f32.mrb[12].mxu0  ;;  %v650_v38 = vpop.f32.mrb[12].mxu1 }
 0x156   :  { %v609_v39 = vpop.f32.mrb[13].mxu0  ;;  %v652_v40 = vpop.f32.mrb[13].mxu1 }
 0x157   :  { %v659_v41 = vmax.f32 %v607_v37, %v609_v39  ;;  %v661_v42 = vmax.f32 %v650_v38, %v652_v40  ;;  %v611_v43 = vpop.f32.mrb[14].mxu0  ;;  %v654_v44 = vpop.f32.mrb[14].mxu1  ;;  %1340 = vmatpush1.bf16.msra.mxu0 %v7641_v45  ;;  %1383 = vmatpush1.bf16.msra.mxu1 %v7647_v46 }
 0x158   :  { %v613_v47 = vpop.f32.mrb[15].mxu0  ;;  %v656_v49 = vpop.f32.mrb[15].mxu1  ;;  %1341 = vmatprep.subr.bf16.mxu0 %v7653_v50  ;;  %1384 = vmatprep.subr.bf16.mxu1 %v7659_v51 }
 0x159   :  { %v663_v52 = vmax.f32 %v659_v41, %v661_v42  ;;  %v660_v53 = vmax.f32 %v611_v43, %v613_v47  ;;  %v662_v0 = vmax.f32 %v654_v44, %v656_v49 }
 0x15b   :  { %v665_v2 = vadd.f32 %v7405_v48, %v663_v52  ;;  %v664_v3 = vmax.f32 %v660_v53, %v662_v0  ;;  %1342 = vmatpush1.bf16.msra.mxu0 %v7666_v4  ;;  %1385 = vmatpush1.bf16.msra.mxu1 %v7672_v5  ;;  %v6185_v0 = vld [vmem:[%s11570_s0 + $0x2c] ss:$56 sps:$4 sm:$0xff]  }
 0x15c   :  { %1343 = vmatprep.subr.bf16.mxu0 %v7678_v6  ;;  %1386 = vmatprep.subr.bf16.mxu1 %v7684_v7 }
 0x15d   :  { %v667_v8 = vmul.f32 0.01, %v665_v2  ;;  %v666_v9 = vadd.f32 %v7405_v48, %v664_v3 }
 0x15f   :  { %v668_v11 = vmul.f32 0.01, %v666_v9  ;;  %1344 = vmatpush1.bf16.msra.mxu0 %v7694_v12  ;;  %1387 = vmatpush1.bf16.msra.mxu1 %v7700_v13  ;;  %v669_v14 = vmax.f32 %v665_v2, %v667_v8 }
 0x160   :  { %1437 = vmatprep.subr.bf16.mxu0 %v7505_v20  ;;  %1480 = vmatprep.subr.bf16.mxu1 %v7511_v21 }
 0x161   :  { %v670_v15 = vmax.f32 %v666_v9, %v668_v11 }
 0x162   :  { %1362 = vmatmul.mubr.bf16.vlgmr.msra.gmra.mrb[40].mxu0 %v6184_v10  ;;  %1405 = vmatmul.mubr.bf16.vlgmr.msra.gmra.mrb[40].mxu1 %v6184_v10 }
 0x163   :  { %1438 = vmatpush1.bf16.msra.mxu0 %v7517_v24  ;;  %1481 = vmatpush1.bf16.msra.mxu1 %v7523_v25  ;;  %v7707_v16 = vpack.c.bf16 %v670_v15, %v669_v14 }
 0x164   :  { %1439 = vmatprep.subr.bf16.mxu0 %v7531_v27  ;;  %1482 = vmatprep.subr.bf16.mxu1 %v7537_v28 }
 0x165   :  { %12111 = vst [vmem:[#allocation5_spill] sm:$0xff] %v7707_v16  ;;  %1469 = vmatprep.mubr.bf16.mxu0 %v11581_v1  ;;  %1512 = vmatprep.mubr.bf16.mxu1 %v11581_v1  ;;  %v8181_v16 = vld [vmem:[%s11572_s3 + $0x1cc] ss:$16 sps:$4 sm:$0xff]  }
 0x166   :  { %12129 = vst [vmem:[#allocation23_spill] sm:$0xff] %v8181_v16 }
 0x167   :  { %1440 = vmatpush1.bf16.msra.mxu0 %v7545_v29  ;;  %1483 = vmatpush1.bf16.msra.mxu1 %v7551_v30 }
 0x168   :  { %1441 = vmatprep.subr.bf16.mxu0 %v7557_v31  ;;  %1484 = vmatprep.subr.bf16.mxu1 %v7563_v32 }
 0x16b   :  { %1442 = vmatpush1.bf16.msra.mxu0 %v7569_v55  ;;  %1485 = vmatpush1.bf16.msra.mxu1 %v7575_v56 }
 0x16c   :  { %1443 = vmatprep.subr.bf16.mxu0 %v7581_v57  ;;  %1486 = vmatprep.subr.bf16.mxu1 %v7587_v58 }
 0x16f   :  { %1444 = vmatpush1.bf16.msra.mxu0 %v7593_v59  ;;  %1487 = vmatpush1.bf16.msra.mxu1 %v7599_v60 }
 0x170   :  { %1445 = vmatprep.subr.bf16.mxu0 %v7605_v61  ;;  %1488 = vmatprep.subr.bf16.mxu1 %v7611_v63 }
 0x173   :  { %1446 = vmatpush1.bf16.msra.mxu0 %v7617_v33  ;;  %1489 = vmatpush1.bf16.msra.mxu1 %v7623_v34 }
 0x174   :  { %1447 = vmatprep.subr.bf16.mxu0 %v7629_v35  ;;  %1490 = vmatprep.subr.bf16.mxu1 %v7635_v36 }
 0x175   :  { %v715_v17 = vpop.f32.mrb[16].mxu0  ;;  %v758_v18 = vpop.f32.mrb[16].mxu1 }
 0x176   :  { %v717_v19 = vpop.f32.mrb[17].mxu0  ;;  %v760_v22 = vpop.f32.mrb[17].mxu1 }
 0x177   :  { %v767_v23 = vmax.f32 %v715_v17, %v717_v19  ;;  %v769_v37 = vmax.f32 %v758_v18, %v760_v22  ;;  %v719_v38 = vpop.f32.mrb[18].mxu0  ;;  %v762_v39 = vpop.f32.mrb[18].mxu1  ;;  %1448 = vmatpush1.bf16.msra.mxu0 %v7641_v45  ;;  %1491 = vmatpush1.bf16.msra.mxu1 %v7647_v46 }
 0x178   :  { %v721_v40 = vpop.f32.mrb[19].mxu0  ;;  %v764_v41 = vpop.f32.mrb[19].mxu1  ;;  %1449 = vmatprep.subr.bf16.mxu0 %v7653_v50  ;;  %1492 = vmatprep.subr.bf16.mxu1 %v7659_v51 }
 0x179   :  { %v771_v42 = vmax.f32 %v767_v23, %v769_v37  ;;  %v768_v43 = vmax.f32 %v719_v38, %v721_v40  ;;  %v770_v44 = vmax.f32 %v762_v39, %v764_v41 }
 0x17b   :  { %v773_v47 = vadd.f32 %v7405_v48, %v771_v42  ;;  %v772_v49 = vmax.f32 %v768_v43, %v770_v44  ;;  %1450 = vmatpush1.bf16.msra.mxu0 %v7666_v4  ;;  %1493 = vmatpush1.bf16.msra.mxu1 %v7672_v5 }
 0x17c   :  { %1451 = vmatprep.subr.bf16.mxu0 %v7678_v6  ;;  %1494 = vmatprep.subr.bf16.mxu1 %v7684_v7 }
 0x17d   :  { %v775_v52 = vmul.f32 0.01, %v773_v47  ;;  %v774_v53 = vadd.f32 %v7405_v48, %v772_v49 }
 0x17f   :  { %v776_v2 = vmul.f32 0.01, %v774_v53  ;;  %1452 = vmatpush1.bf16.msra.mxu0 %v7694_v12  ;;  %1495 = vmatpush1.bf16.msra.mxu1 %v7700_v13  ;;  %v777_v3 = vmax.f32 %v773_v47, %v775_v52  ;;  %v6186_v47 = vld [vmem:[%s11570_s0 + $0x30] ss:$56 sps:$4 sm:$0xff]  }
 0x180   :  { %1545 = vmatprep.subr.bf16.mxu0 %v7505_v20  ;;  %1588 = vmatprep.subr.bf16.mxu1 %v7511_v21 }
 0x181   :  { %v778_v8 = vmax.f32 %v774_v53, %v776_v2  ;;  %v7902_v2 = vld [vmem:[%s11572_s3 + $0x64] ss:$16 sps:$4 sm:$0xff]  }
 0x182   :  { %1470 = vmatmul.mubr.bf16.vlgmr.msra.gmra.mrb[44].mxu0 %v6185_v0  ;;  %1513 = vmatmul.mubr.bf16.vlgmr.msra.gmra.mrb[44].mxu1 %v6185_v0 }
 0x183   :  { %1546 = vmatpush1.bf16.msra.mxu0 %v7517_v24  ;;  %1589 = vmatpush1.bf16.msra.mxu1 %v7523_v25  ;;  %v7748_v9 = vpack.c.bf16 %v778_v8, %v777_v3  ;;  %v7908_v3 = vld [vmem:[%s11572_s3 + $0x6c] ss:$16 sps:$4 sm:$0xff]   ;;  %v7914_v8 = vld [vmem:[%s11572_s3 + $0x60] ss:$16 sps:$4 sm:$0xff]  }
 0x184   :  { %1547 = vmatprep.subr.bf16.mxu0 %v7531_v27  ;;  %1590 = vmatprep.subr.bf16.mxu1 %v7537_v28 }
 0x185   :  { %12112 = vst [vmem:[#allocation6_spill] sm:$0xff] %v7748_v9  ;;  %1577 = vmatprep.mubr.bf16.mxu0 %v11581_v1  ;;  %1620 = vmatprep.mubr.bf16.mxu1 %v11581_v1 }
 0x187   :  { %1548 = vmatpush1.bf16.msra.mxu0 %v7545_v29  ;;  %1591 = vmatpush1.bf16.msra.mxu1 %v7551_v30 }
 0x188   :  { %1549 = vmatprep.subr.bf16.mxu0 %v7557_v31  ;;  %1592 = vmatprep.subr.bf16.mxu1 %v7563_v32 }
 0x18b   :  { %1550 = vmatpush1.bf16.msra.mxu0 %v7569_v55  ;;  %1593 = vmatpush1.bf16.msra.mxu1 %v7575_v56 }
 0x18c   :  { %1551 = vmatprep.subr.bf16.mxu0 %v7581_v57  ;;  %1594 = vmatprep.subr.bf16.mxu1 %v7587_v58 }
 0x18f   :  { %1552 = vmatpush1.bf16.msra.mxu0 %v7593_v59  ;;  %1595 = vmatpush1.bf16.msra.mxu1 %v7599_v60 }
 0x190   :  { %1553 = vmatprep.subr.bf16.mxu0 %v7605_v61  ;;  %1596 = vmatprep.subr.bf16.mxu1 %v7611_v63 }
 0x193   :  { %1554 = vmatpush1.bf16.msra.mxu0 %v7617_v33  ;;  %1597 = vmatpush1.bf16.msra.mxu1 %v7623_v34 }
 0x194   :  { %1555 = vmatprep.subr.bf16.mxu0 %v7629_v35  ;;  %1598 = vmatprep.subr.bf16.mxu1 %v7635_v36 }
 0x195   :  { %v823_v10 = vpop.f32.mrb[20].mxu0  ;;  %v866_v11 = vpop.f32.mrb[20].mxu1 }
 0x196   :  { %v825_v14 = vpop.f32.mrb[21].mxu0  ;;  %v868_v15 = vpop.f32.mrb[21].mxu1 }
 0x197   :  { %v875_v17 = vmax.f32 %v823_v10, %v825_v14  ;;  %v877_v18 = vmax.f32 %v866_v11, %v868_v15  ;;  %v827_v19 = vpop.f32.mrb[22].mxu0  ;;  %v870_v22 = vpop.f32.mrb[22].mxu1  ;;  %1556 = vmatpush1.bf16.msra.mxu0 %v7641_v45  ;;  %1599 = vmatpush1.bf16.msra.mxu1 %v7647_v46  ;;  %v7921_v10 = vld [vmem:[%s11572_s3 + $0x68] ss:$16 sps:$4 sm:$0xff]   ;;  %v7926_v11 = vld [vmem:[%s11572_s3 + $0x84] ss:$16 sps:$4 sm:$0xff]  }
 0x198   :  { %v829_v23 = vpop.f32.mrb[23].mxu0  ;;  %v872_v37 = vpop.f32.mrb[23].mxu1  ;;  %1557 = vmatprep.subr.bf16.mxu0 %v7653_v50  ;;  %1600 = vmatprep.subr.bf16.mxu1 %v7659_v51  ;;  %v7932_v14 = vld [vmem:[%s11572_s3 + $0x8c] ss:$16 sps:$4 sm:$0xff]   ;;  %v7938_v15 = vld [vmem:[%s11572_s3 + $0x80] ss:$16 sps:$4 sm:$0xff]  }
 0x199   :  { %v879_v38 = vmax.f32 %v875_v17, %v877_v18  ;;  %v876_v39 = vmax.f32 %v827_v19, %v829_v23  ;;  %v878_v40 = vmax.f32 %v870_v22, %v872_v37  ;;  %v7945_v17 = vld [vmem:[%s11572_s3 + $0x88] ss:$16 sps:$4 sm:$0xff]   ;;  %v7950_v18 = vld [vmem:[%s11572_s3 + $0xa4] ss:$16 sps:$4 sm:$0xff]   ;;  %v7956_v19 = vld [vmem:[%s11572_s3 + $0xac] ss:$16 sps:$4 sm:$0xff]  }
 0x19a   :  { %v7962_v22 = vld [vmem:[%s11572_s3 + $0xa0] ss:$16 sps:$4 sm:$0xff]   ;;  %v7969_v23 = vld [vmem:[%s11572_s3 + $0xa8] ss:$16 sps:$4 sm:$0xff]   ;;  %v7974_v37 = vld [vmem:[%s11572_s3 + $0xc4] ss:$16 sps:$4 sm:$0xff]  }
 0x19b   :  { %v881_v41 = vadd.f32 %v7405_v48, %v879_v38  ;;  %v880_v42 = vmax.f32 %v876_v39, %v878_v40  ;;  %1558 = vmatpush1.bf16.msra.mxu0 %v7666_v4  ;;  %1601 = vmatpush1.bf16.msra.mxu1 %v7672_v5  ;;  %v7980_v40 = vld [vmem:[%s11572_s3 + $0xcc] ss:$16 sps:$4 sm:$0xff]  }
 0x19c   :  { %1559 = vmatprep.subr.bf16.mxu0 %v7678_v6  ;;  %1602 = vmatprep.subr.bf16.mxu1 %v7684_v7 }
 0x19d   :  { %v883_v43 = vmul.f32 0.01, %v881_v41  ;;  %v882_v44 = vadd.f32 %v7405_v48, %v880_v42 }
 0x19f   :  { %v884_v49 = vmul.f32 0.01, %v882_v44  ;;  %1560 = vmatpush1.bf16.msra.mxu0 %v7694_v12  ;;  %1603 = vmatpush1.bf16.msra.mxu1 %v7700_v13  ;;  %v885_v52 = vmax.f32 %v881_v41, %v883_v43 }
 0x1a0   :  { %1653 = vmatprep.subr.bf16.mxu0 %v7505_v20  ;;  %1696 = vmatprep.subr.bf16.mxu1 %v7511_v21 }
 0x1a1   :  { %v886_v53 = vmax.f32 %v882_v44, %v884_v49 }
 0x1a2   :  { %1578 = vmatmul.mubr.bf16.vlgmr.msra.gmra.mrb[48].mxu0 %v6186_v47  ;;  %1621 = vmatmul.mubr.bf16.vlgmr.msra.gmra.mrb[48].mxu1 %v6186_v47 }
 0x1a3   :  { %1654 = vmatpush1.bf16.msra.mxu0 %v7517_v24  ;;  %1697 = vmatpush1.bf16.msra.mxu1 %v7523_v25  ;;  %v7789_v0 = vpack.c.bf16 %v886_v53, %v885_v52  ;;  %v7986_v52 = vld [vmem:[%s11572_s3 + $0xc0] ss:$16 sps:$4 sm:$0xff]  }
 0x1a4   :  { %1655 = vmatprep.subr.bf16.mxu0 %v7531_v27  ;;  %1698 = vmatprep.subr.bf16.mxu1 %v7537_v28 }
 0x1a5   :  { %12113 = vst [vmem:[#allocation7_spill] sm:$0xff] %v7789_v0  ;;  %1685 = vmatprep.mubr.bf16.mxu0 %v11581_v1  ;;  %1728 = vmatprep.mubr.bf16.mxu1 %v11581_v1  ;;  %v8170_v1 = vld [vmem:[%s11572_s3 + $0x1a8] ss:$16 sps:$4 sm:$0xff]  }
 0x1a6   :  { %12127 = vst [vmem:[#allocation21_spill] sm:$0xff] %v8170_v1 }
 0x1a7   :  { %1656 = vmatpush1.bf16.msra.mxu0 %v7545_v29  ;;  %1699 = vmatpush1.bf16.msra.mxu1 %v7551_v30 }
 0x1a8   :  { %1657 = vmatprep.subr.bf16.mxu0 %v7557_v31  ;;  %1700 = vmatprep.subr.bf16.mxu1 %v7563_v32 }
 0x1ab   :  { %1658 = vmatpush1.bf16.msra.mxu0 %v7569_v55  ;;  %1701 = vmatpush1.bf16.msra.mxu1 %v7575_v56 }
 0x1ac   :  { %1659 = vmatprep.subr.bf16.mxu0 %v7581_v57  ;;  %1702 = vmatprep.subr.bf16.mxu1 %v7587_v58 }
 0x1af   :  { %1660 = vmatpush1.bf16.msra.mxu0 %v7593_v59  ;;  %1703 = vmatpush1.bf16.msra.mxu1 %v7599_v60  ;;  %v7823_v60 = vld [vmem:[%s11572_s3 + $0x4] ss:$16 sps:$4 sm:$0xff]  }
 0x1b0   :  { %1661 = vmatprep.subr.bf16.mxu0 %v7605_v61  ;;  %1704 = vmatprep.subr.bf16.mxu1 %v7611_v63  ;;  %v7828_v61 = vld [vmem:[%s11572_s3 + $0xc] ss:$16 sps:$4 sm:$0xff]  }
 0x1b3   :  { %1662 = vmatpush1.bf16.msra.mxu0 %v7617_v33  ;;  %1705 = vmatpush1.bf16.msra.mxu1 %v7623_v34  ;;  %v6187_v34 = vld [vmem:[%s11570_s0 + $0x34] ss:$56 sps:$4 sm:$0xff]  }
 0x1b4   :  { %1663 = vmatprep.subr.bf16.mxu0 %v7629_v35  ;;  %1706 = vmatprep.subr.bf16.mxu1 %v7635_v36  ;;  %v7839_v36 = vld [vmem:[%s11572_s3] ss:$16 sps:$4 sm:$0xff]  }
 0x1b5   :  { %v931_v20 = vpop.f32.mrb[24].mxu0  ;;  %v974_v21 = vpop.f32.mrb[24].mxu1 }
 0x1b6   :  { %v933_v24 = vpop.f32.mrb[25].mxu0  ;;  %v976_v25 = vpop.f32.mrb[25].mxu1 }
 0x1b7   :  { %v983_v27 = vmax.f32 %v931_v20, %v933_v24  ;;  %v985_v28 = vmax.f32 %v974_v21, %v976_v25  ;;  %v935_v29 = vpop.f32.mrb[26].mxu0  ;;  %v978_v30 = vpop.f32.mrb[26].mxu1  ;;  %1664 = vmatpush1.bf16.msra.mxu0 %v7641_v45  ;;  %1707 = vmatpush1.bf16.msra.mxu1 %v7647_v46  ;;  %v7993_v21 = vld [vmem:[%s11572_s3 + $0xc8] ss:$16 sps:$4 sm:$0xff]   ;;  %v7998_v24 = vld [vmem:[%s11572_s3 + $0xe4] ss:$16 sps:$4 sm:$0xff]  }
 0x1b8   :  { %v937_v31 = vpop.f32.mrb[27].mxu0  ;;  %v980_v32 = vpop.f32.mrb[27].mxu1  ;;  %1665 = vmatprep.subr.bf16.mxu0 %v7653_v50  ;;  %1708 = vmatprep.subr.bf16.mxu1 %v7659_v51  ;;  %v7851_v50 = vld [vmem:[%s11572_s3 + $0x24] ss:$16 sps:$4 sm:$0xff]   ;;  %v7856_v51 = vld [vmem:[%s11572_s3 + $0x2c] ss:$16 sps:$4 sm:$0xff]  }
 0x1b9   :  { %v987_v55 = vmax.f32 %v983_v27, %v985_v28  ;;  %v984_v56 = vmax.f32 %v935_v29, %v937_v31  ;;  %v986_v57 = vmax.f32 %v978_v30, %v980_v32  ;;  %v8004_v29 = vld [vmem:[%s11572_s3 + $0xec] ss:$16 sps:$4 sm:$0xff]   ;;  %v8009_v30 = vld [vmem:[%s11571_s2] ss:$0 sm:$0xff] }
 0x1bb   :  { %v989_v58 = vadd.f32 %v7405_v48, %v987_v55  ;;  %v988_v59 = vmax.f32 %v984_v56, %v986_v57  ;;  %1666 = vmatpush1.bf16.msra.mxu0 %v7666_v4  ;;  %1709 = vmatpush1.bf16.msra.mxu1 %v7672_v5  ;;  %v7863_v4 = vld [vmem:[%s11572_s3 + $0x20] ss:$16 sps:$4 sm:$0xff]   ;;  %v8023_v56 = vld [vmem:[%s11572_s3 + $0xe8] ss:$16 sps:$4 sm:$0xff]   ;;  %v8028_v57 = vld [vmem:[%s11572_s3 + $0x104] ss:$16 sps:$4 sm:$0xff]  }
 0x1bc   :  { %1667 = vmatprep.subr.bf16.mxu0 %v7678_v6  ;;  %1710 = vmatprep.subr.bf16.mxu1 %v7684_v7  ;;  %v7872_v6 = vld [vmem:[%s11572_s3 + $0x28] ss:$16 sps:$4 sm:$0xff]   ;;  %v7877_v7 = vld [vmem:[%s11572_s3 + $0x44] ss:$16 sps:$4 sm:$0xff]   ;;  %v8016_v55 = vld [vmem:[%s11572_s3 + $0xe0] ss:$16 sps:$4 sm:$0xff]  }
 0x1bd   :  { %v991_v63 = vmul.f32 0.01, %v989_v58  ;;  %v990_v33 = vadd.f32 %v7405_v48, %v988_v59  ;;  %v7846_v48 = vld [vmem:[%s11572_s3 + $0x8] ss:$16 sps:$4 sm:$0xff]  }
 0x1bf   :  { %v992_v35 = vmul.f32 0.01, %v990_v33  ;;  %1668 = vmatpush1.bf16.msra.mxu0 %v7694_v12  ;;  %1711 = vmatpush1.bf16.msra.mxu1 %v7700_v13  ;;  %v993_v45 = vmax.f32 %v989_v58, %v991_v63  ;;  %v7884_v12 = vld [vmem:[%s11572_s3 + $0x4c] ss:$16 sps:$4 sm:$0xff]   ;;  %v7897_v13 = vld [vmem:[%s11572_s3 + $0x48] ss:$16 sps:$4 sm:$0xff]  }
 0x1c0   :  { %2532 = vmatprep.subr.bf16.mxu0 %v7823_v60  ;;  %2618 = vmatprep.subr.bf16.mxu1 %v7828_v61  ;;  %v8035_v63 = vld [vmem:[%s11572_s3 + $0x10c] ss:$16 sps:$4 sm:$0xff]  }
 0x1c1   :  { %v994_v46 = vmax.f32 %v990_v33, %v992_v35  ;;  %v8048_v35 = vld [vmem:[%s11572_s3 + $0x108] ss:$16 sps:$4 sm:$0xff]  }
 0x1c2   :  { %1686 = vmatmul.mubr.bf16.vlgmr.msra.gmra.mrb[52].mxu0 %v6187_v34  ;;  %1729 = vmatmul.mubr.bf16.vlgmr.msra.gmra.mrb[52].mxu1 %v6187_v34  ;;  %v8041_v34 = vld [vmem:[%s11572_s3 + $0x100] ss:$16 sps:$4 sm:$0xff]  }
 0x1c3   :  { %2533 = vmatpush1.bf16.msra.mxu0 %v7839_v36  ;;  %2564 = vmatprep.mubr.bf16.mxu0 %v7424_v62  ;;  %v7865_v5 = vpack.c.bf16 %v994_v46, %v993_v45  ;;  %v8053_v45 = vld [vmem:[%s11572_s3 + $0x124] ss:$16 sps:$4 sm:$0xff]  }
 0x1c4   :  { %2619 = vmatpush1.bf16.msra.mxu1 %v7846_v48  ;;  %2650 = vmatprep.mubr.bf16.mxu1 %v7424_v62  ;;  %v7890_v62 = vld [vmem:[%s11572_s3 + $0x40] ss:$16 sps:$4 sm:$0xff]  }
 0x1c5   :  { %12114 = vst [vmem:[#allocation8_spill] sm:$0xff] %v7865_v5  ;;  %2534 = vmatprep.subr.bf16.mxu0 %v7851_v50  ;;  %2620 = vmatprep.subr.bf16.mxu1 %v7856_v51 }
 0x1c7   :  { %2535 = vmatpush1.bf16.msra.mxu0 %v7863_v4 }
 0x1c8   :  { %2621 = vmatpush1.bf16.msra.mxu1 %v7872_v6  ;;  %2536 = vmatprep.subr.bf16.mxu0 %v7877_v7 }
 0x1c9   :  { %2622 = vmatprep.subr.bf16.mxu1 %v7884_v12 }
 0x1cb   :  { %2537 = vmatpush1.bf16.msra.mxu0 %v7890_v62 }
 0x1cc   :  { %2623 = vmatpush1.bf16.msra.mxu1 %v7897_v13  ;;  %2538 = vmatprep.subr.bf16.mxu0 %v7902_v2 }
 0x1cd   :  { %2624 = vmatprep.subr.bf16.mxu1 %v7908_v3 }
 0x1cf   :  { %2539 = vmatpush1.bf16.msra.mxu0 %v7914_v8 }
 0x1d0   :  { %2625 = vmatpush1.bf16.msra.mxu1 %v7921_v10  ;;  %2540 = vmatprep.subr.bf16.mxu0 %v7926_v11 }
 0x1d1   :  { %2626 = vmatprep.subr.bf16.mxu1 %v7932_v14 }
 0x1d3   :  { %2541 = vmatpush1.bf16.msra.mxu0 %v7938_v15 }
 0x1d4   :  { %2627 = vmatpush1.bf16.msra.mxu1 %v7945_v17  ;;  %2542 = vmatprep.subr.bf16.mxu0 %v7950_v18 }
 0x1d5   :  { %v1039_v38 = vpop.f32.mrb[28].mxu0  ;;  %v1082_v39 = vpop.f32.mrb[28].mxu1  ;;  %2628 = vmatprep.subr.bf16.mxu1 %v7956_v19 }
 0x1d6   :  { %v1041_v41 = vpop.f32.mrb[29].mxu0  ;;  %v1084_v42 = vpop.f32.mrb[29].mxu1 }
 0x1d7   :  { %v1091_v43 = vmax.f32 %v1039_v38, %v1041_v41  ;;  %v1093_v44 = vmax.f32 %v1082_v39, %v1084_v42  ;;  %v1043_v47 = vpop.f32.mrb[30].mxu0  ;;  %v1086_v49 = vpop.f32.mrb[30].mxu1  ;;  %2543 = vmatpush1.bf16.msra.mxu0 %v7962_v22  ;;  %v8059_v39 = vld [vmem:[%s11572_s3 + $0x12c] ss:$16 sps:$4 sm:$0xff]   ;;  %v8065_v41 = vld [vmem:[%s11572_s3 + $0x120] ss:$16 sps:$4 sm:$0xff]  }
 0x1d8   :  { %2629 = vmatpush1.bf16.msra.mxu1 %v7969_v23  ;;  %v1045_v53 = vpop.f32.mrb[31].mxu0  ;;  %v1088_v20 = vpop.f32.mrb[31].mxu1  ;;  %2544 = vmatprep.subr.bf16.mxu0 %v7974_v37 }
 0x1d9   :  { %v1095_v25 = vmax.f32 %v1091_v43, %v1093_v44  ;;  %v1092_v27 = vmax.f32 %v1043_v47, %v1045_v53  ;;  %v1094_v28 = vmax.f32 %v1086_v49, %v1088_v20  ;;  %2630 = vmatprep.subr.bf16.mxu1 %v7980_v40  ;;  %v8074_v43 = vld [vmem:[%s11572_s3 + $0x128] ss:$16 sps:$4 sm:$0xff]   ;;  %v8079_v44 = vld [vmem:[%s11572_s3 + $0x144] ss:$16 sps:$4 sm:$0xff]   ;;  %v8085_v47 = vld [vmem:[%s11572_s3 + $0x14c] ss:$16 sps:$4 sm:$0xff]  }
 0x1da   :  { %v8091_v49 = vld [vmem:[%s11572_s3 + $0x140] ss:$16 sps:$4 sm:$0xff]   ;;  %v8098_v53 = vld [vmem:[%s11572_s3 + $0x148] ss:$16 sps:$4 sm:$0xff]   ;;  %v8103_v20 = vld [vmem:[%s11572_s3 + $0x164] ss:$16 sps:$4 sm:$0xff]  }
 0x1db   :  { %v1097_v31 = vadd.f32 %v8009_v30, %v1095_v25  ;;  %v1096_v32 = vmax.f32 %v1092_v27, %v1094_v28  ;;  %2545 = vmatpush1.bf16.msra.mxu0 %v7986_v52  ;;  %12116 = vst [vmem:[#allocation10_spill] sm:$0xff] %v8103_v20  ;;  %v8109_v25 = vld [vmem:[%s11572_s3 + $0x16c] ss:$16 sps:$4 sm:$0xff]   ;;  %v8115_v27 = vld [vmem:[%s11572_s3 + $0x160] ss:$16 sps:$4 sm:$0xff]  }
 0x1dc   :  { %2631 = vmatpush1.bf16.msra.mxu1 %v7993_v21  ;;  %2546 = vmatprep.subr.bf16.mxu0 %v7998_v24  ;;  %12117 = vst [vmem:[#allocation11_spill] sm:$0xff] %v8109_v25  ;;  %12118 = vst [vmem:[#allocation12_spill] sm:$0xff] %v8115_v27  ;;  %v8122_v28 = vld [vmem:[%s11572_s3 + $0x168] ss:$16 sps:$4 sm:$0xff]  }
 0x1dd   :  { %v1099_v58 = vmul.f32 0.01, %v1097_v31  ;;  %v1098_v59 = vadd.f32 %v8009_v30, %v1096_v32  ;;  %2632 = vmatprep.subr.bf16.mxu1 %v8004_v29  ;;  %12119 = vst [vmem:[#allocation13_spill] sm:$0xff] %v8122_v28  ;;  %v8133_v32 = vld [vmem:[%s11572_s3 + $0x18c] ss:$16 sps:$4 sm:$0xff]  }
 0x1de   :  { %12121 = vst [vmem:[#allocation15_spill] sm:$0xff] %v8133_v32 }
 0x1df   :  { %v1100_v33 = vmul.f32 0.01, %v1098_v59  ;;  %2547 = vmatpush1.bf16.msra.mxu0 %v8016_v55  ;;  %v1101_v46 = vmax.f32 %v1097_v31, %v1099_v58  ;;  %v8127_v31 = vld [vmem:[%s11572_s3 + $0x184] ss:$16 sps:$4 sm:$0xff]   ;;  %v8139_v58 = vld [vmem:[%s11572_s3 + $0x180] ss:$16 sps:$4 sm:$0xff]  }
 0x1e0   :  { %2633 = vmatpush1.bf16.msra.mxu1 %v8023_v56  ;;  %2548 = vmatprep.subr.bf16.mxu0 %v8028_v57  ;;  %12120 = vst [vmem:[#allocation14_spill] sm:$0xff] %v8127_v31  ;;  %12122 = vst [vmem:[#allocation16_spill] sm:$0xff] %v8139_v58 }
 0x1e1   :  { %v1102_v38 = vmax.f32 %v1098_v59, %v1100_v33  ;;  %2634 = vmatprep.subr.bf16.mxu1 %v8035_v63  ;;  %v8146_v59 = vld [vmem:[%s11572_s3 + $0x188] ss:$16 sps:$4 sm:$0xff]   ;;  %v8151_v33 = vld [vmem:[%s11572_s3 + $0x1a4] ss:$16 sps:$4 sm:$0xff]  }
 0x1e2   :  { %12123 = vst [vmem:[#allocation17_spill] sm:$0xff] %v8146_v59  ;;  %12124 = vst [vmem:[#allocation18_spill] sm:$0xff] %v8151_v33 }
 0x1e3   :  { %2549 = vmatpush1.bf16.msra.mxu0 %v8041_v34  ;;  %v8067_v42 = vpack.c.bf16 %v1102_v38, %v1101_v46  ;;  %v8157_v46 = vld [vmem:[%s11572_s3 + $0x1ac] ss:$16 sps:$4 sm:$0xff]   ;;  %v8163_v38 = vld [vmem:[%s11572_s3 + $0x1a0] ss:$16 sps:$4 sm:$0xff]  }
 0x1e4   :  { %2635 = vmatpush1.bf16.msra.mxu1 %v8048_v35  ;;  %2550 = vmatprep.subr.bf16.mxu0 %v8053_v45  ;;  %12125 = vst [vmem:[#allocation19_spill] sm:$0xff] %v8157_v46  ;;  %12126 = vst [vmem:[#allocation20_spill] sm:$0xff] %v8163_v38 }
 0x1e5   :  { %12115 = vst [vmem:[#allocation9_spill] sm:$0xff] %v8067_v42  ;;  %2636 = vmatprep.subr.bf16.mxu1 %v8059_v39  ;;  %v8175_v42 = vld [vmem:[%s11572_s3 + $0x1c4] ss:$16 sps:$4 sm:$0xff]  }
 0x1e6   :  { %12128 = vst [vmem:[#allocation22_spill] sm:$0xff] %v8175_v42 }
 0x1e7   :  { %2551 = vmatpush1.bf16.msra.mxu0 %v8065_v41 }
 0x1e8   :  { %2637 = vmatpush1.bf16.msra.mxu1 %v8074_v43  ;;  %2552 = vmatprep.subr.bf16.mxu0 %v8079_v44 }
 0x1e9   :  { %2638 = vmatprep.subr.bf16.mxu1 %v8085_v47 }
 0x1eb   :  { %2553 = vmatpush1.bf16.msra.mxu0 %v8091_v49 }
 0x1ec   :  { %2639 = vmatpush1.bf16.msra.mxu1 %v8098_v53  ;;  %2554 = vmatprep.subr.bf16.mxu0 %v8103_v20  ;;  %v8212_v20 = vld [vmem:[%s11572_s3 + $0x1e0] ss:$16 sps:$4 sm:$0xff]  }
 0x1ed   :  { %2640 = vmatprep.subr.bf16.mxu1 %v8109_v25  ;;  %12134 = vst [vmem:[#allocation28_spill] sm:$0xff] %v8212_v20 }
 0x1ef   :  { %2555 = vmatpush1.bf16.msra.mxu0 %v8115_v27 }
 0x1f0   :  { %2641 = vmatpush1.bf16.msra.mxu1 %v8122_v28  ;;  %2556 = vmatprep.subr.bf16.mxu0 %v8127_v31  ;;  %v8187_v28 = vld [vmem:[%s11572_s3 + $0x1c0] ss:$16 sps:$4 sm:$0xff]  }
 0x1f1   :  { %2642 = vmatprep.subr.bf16.mxu1 %v8133_v32  ;;  %12130 = vst [vmem:[#allocation24_spill] sm:$0xff] %v8187_v28 }
 0x1f3   :  { %2557 = vmatpush1.bf16.msra.mxu0 %v8139_v58 }
 0x1f4   :  { %2643 = vmatpush1.bf16.msra.mxu1 %v8146_v59  ;;  %2558 = vmatprep.subr.bf16.mxu0 %v8151_v33 }
 0x1f5   :  { %v1147_v0 = vpop.f32.mrb[32].mxu0  ;;  %v1190_v5 = vpop.f32.mrb[32].mxu1  ;;  %2644 = vmatprep.subr.bf16.mxu1 %v8157_v46 }
 0x1f6   :  { %v1149_v9 = vpop.f32.mrb[33].mxu0  ;;  %v1192_v33 = vpop.f32.mrb[33].mxu1 }
 0x1f7   :  { %v1199_v59 = vmax.f32 %v1147_v0, %v1149_v9  ;;  %v1201_v58 = vmax.f32 %v1190_v5, %v1192_v33  ;;  %v1151_v32 = vpop.f32.mrb[34].mxu0  ;;  %v1194_v31 = vpop.f32.mrb[34].mxu1  ;;  %2559 = vmatpush1.bf16.msra.mxu0 %v8163_v38  ;;  %v8194_v9 = vld [vmem:[%s11572_s3 + $0x1c8] ss:$16 sps:$4 sm:$0xff]   ;;  %v8199_v0 = vld [vmem:[%s11572_s3 + $0x1e4] ss:$16 sps:$4 sm:$0xff]  }
 0x1f8   :  { %2645 = vmatpush1.bf16.msra.mxu1 %v8170_v1  ;;  %v1153_v46 = vpop.f32.mrb[35].mxu0  ;;  %v1196_v27 = vpop.f32.mrb[35].mxu1  ;;  %2560 = vmatprep.subr.bf16.mxu0 %v8175_v42  ;;  %12131 = vst [vmem:[#allocation25_spill] sm:$0xff] %v8194_v9  ;;  %12132 = vst [vmem:[#allocation26_spill] sm:$0xff] %v8199_v0  ;;  %v8205_v1 = vld [vmem:[%s11572_s3 + $0x1ec] ss:$16 sps:$4 sm:$0xff]  }
 0x1f9   :  { %v1203_v5 = vmax.f32 %v1199_v59, %v1201_v58  ;;  %v1200_v33 = vmax.f32 %v1151_v32, %v1153_v46  ;;  %v1202_v38 = vmax.f32 %v1194_v31, %v1196_v27  ;;  %2646 = vmatprep.subr.bf16.mxu1 %v8181_v16  ;;  %12133 = vst [vmem:[#allocation27_spill] sm:$0xff] %v8205_v1  ;;  %v8219_v27 = vld [vmem:[%s11572_s3 + $0x1e8] ss:$16 sps:$4 sm:$0xff]   ;;  %v8224_v31 = vld [vmem:[%s11572_s3 + $0x204] ss:$16 sps:$4 sm:$0xff]  }
 0x1fa   :  { %12135 = vst [vmem:[#allocation29_spill] sm:$0xff] %v8219_v27  ;;  %12136 = vst [vmem:[#allocation30_spill] sm:$0xff] %v8224_v31  ;;  %v8231_v59 = vld [vmem:[%s11572_s3 + $0x20c] ss:$16 sps:$4 sm:$0xff]   ;;  %v8412_v16 = vld [vmem:[%s11572_s3 + $0x2e0] ss:$16 sps:$4 sm:$0xff]  }
 0x1fb   :  { %v1205_v42 = vadd.f32 %v8009_v30, %v1203_v5  ;;  %v1204_v25 = vmax.f32 %v1200_v33, %v1202_v38  ;;  %2561 = vmatpush1.bf16.msra.mxu0 %v8187_v28  ;;  %12137 = vst [vmem:[#allocation31_spill] sm:$0xff] %v8231_v59  ;;  %v8237_v38 = vld [vmem:[%s11572_s3 + $0x200] ss:$16 sps:$4 sm:$0xff]   ;;  %12168 = vst [vmem:[#allocation61_spill] sm:$0xff] %v8412_v16 }
 0x1fc   :  { %2647 = vmatpush1.bf16.msra.mxu1 %v8194_v9  ;;  %2562 = vmatprep.subr.bf16.mxu0 %v8199_v0  ;;  %12138 = vst [vmem:[#allocation32_spill] sm:$0xff] %v8237_v38  ;;  %v8387_v0 = vld [vmem:[%s11572_s3 + $0x2c0] ss:$16 sps:$4 sm:$0xff]  }
 0x1fd   :  { %v1207_v32 = vmul.f32 0.01, %v1205_v42  ;;  %v1206_v58 = vadd.f32 %v8009_v30, %v1204_v25  ;;  %2648 = vmatprep.subr.bf16.mxu1 %v8205_v1  ;;  %v8244_v25 = vld [vmem:[%s11572_s3 + $0x208] ss:$16 sps:$4 sm:$0xff]   ;;  %v12141_v1 = vmov 0   ;;  %12164 = vst [vmem:[#allocation57_spill] sm:$0xff] %v8387_v0 }
 0x1fe   :  { %12139 = vst [vmem:[#allocation33_spill] sm:$0xff] %v8244_v25 }
 0x1ff   :  { %v1208_v46 = vmul.f32 0.01, %v1206_v58  ;;  %2563 = vmatpush1.bf16.msra.mxu0 %v8212_v20  ;;  %v1209_v5 = vmax.f32 %v1205_v42, %v1207_v32  ;;  %v8250_v20 = vld [vmem:[%s11572_s3 + $0x224] ss:$16 sps:$4 sm:$0xff]   ;;  %v8263_v42 = vld [vmem:[%s11572_s3 + $0x220] ss:$16 sps:$4 sm:$0xff]  }
 0x200   :  { %2649 = vmatpush1.bf16.msra.mxu1 %v8219_v27  ;;  %2575 = vmatprep.subr.bf16.mxu0 %v8224_v31  ;;  %12140 = vst [vmem:[#allocation34_spill] sm:$0xff] %v8250_v20  ;;  %v8256_v31 = vld [vmem:[%s11572_s3 + $0x22c] ss:$16 sps:$4 sm:$0xff]   ;;  %12143 = vst [vmem:[#allocation36_spill] sm:$0xff] %v8263_v42 }
 0x201   :  { %v1210_v33 = vmax.f32 %v1206_v58, %v1208_v46  ;;  %2661 = vmatprep.subr.bf16.mxu1 %v8231_v59  ;;  %12142 = vst [vmem:[#allocation35_spill] sm:$0xff] %v8256_v31  ;;  %v8272_v58 = vld [vmem:[%s11572_s3 + $0x228] ss:$16 sps:$4 sm:$0xff]   ;;  %v8277_v46 = vld [vmem:[%s11572_s3 + $0x244] ss:$16 sps:$4 sm:$0xff]  }
 0x202   :  { %2565 = vmatmul.mubr.bf16.vlgmr.msra.gmra.mrb[56].mxu0 %v12141_v1  ;;  %12145 = vst [vmem:[#allocation38_spill] sm:$0xff] %v8272_v58  ;;  %12146 = vst [vmem:[#allocation39_spill] sm:$0xff] %v8277_v46 }
 0x203   :  { %2651 = vmatmul.mubr.bf16.vlgmr.msra.gmra.mrb[56].mxu1 %v12141_v1  ;;  %2576 = vmatpush1.bf16.msra.mxu0 %v8237_v38  ;;  %v8265_v32 = vpack.c.bf16 %v1210_v33, %v1209_v5  ;;  %v8284_v5 = vld [vmem:[%s11572_s3 + $0x24c] ss:$16 sps:$4 sm:$0xff]   ;;  %v8291_v33 = vld [vmem:[%s11572_s3 + $0x240] ss:$16 sps:$4 sm:$0xff]   ;;  %v8298_v1 = vld [vmem:[%s11572_s3 + $0x248] ss:$16 sps:$4 sm:$0xff]  }
 0x204   :  { %2607 = vmatprep.mubr.bf16.mxu0 %v7526_v26  ;;  %2662 = vmatpush1.bf16.msra.mxu1 %v8244_v25  ;;  %12147 = vst [vmem:[#allocation40_spill] sm:$0xff] %v8284_v5  ;;  %12148 = vst [vmem:[#allocation41_spill] sm:$0xff] %v8291_v33 }
 0x205   :  { %12144 = vst [vmem:[#allocation37_spill] sm:$0xff] %v8265_v32  ;;  %2693 = vmatprep.mubr.bf16.mxu1 %v7526_v26  ;;  %2577 = vmatprep.subr.bf16.mxu0 %v8250_v20  ;;  %12149 = vst [vmem:[#allocation42_spill] sm:$0xff] %v8298_v1  ;;  %v8303_v32 = vld [vmem:[%s11572_s3 + $0x264] ss:$16 sps:$4 sm:$0xff]  }
 0x206   :  { %2663 = vmatprep.subr.bf16.mxu1 %v8256_v31  ;;  %12150 = vst [vmem:[#allocation43_spill] sm:$0xff] %v8303_v32 }
 0x207   :  { %2578 = vmatpush1.bf16.msra.mxu0 %v8263_v42  ;;  %v8309_v42 = vld [vmem:[%s11572_s3 + $0x26c] ss:$16 sps:$4 sm:$0xff]  }
 0x208   :  { %2664 = vmatpush1.bf16.msra.mxu1 %v8272_v58  ;;  %2579 = vmatprep.subr.bf16.mxu0 %v8277_v46  ;;  %12151 = vst [vmem:[#allocation44_spill] sm:$0xff] %v8309_v42  ;;  %v8315_v46 = vld [vmem:[%s11572_s3 + $0x260] ss:$16 sps:$4 sm:$0xff]   ;;  %v8327_v58 = vld [vmem:[%s11572_s3 + $0x284] ss:$16 sps:$4 sm:$0xff]  }
 0x209   :  { %2665 = vmatprep.subr.bf16.mxu1 %v8284_v5  ;;  %12152 = vst [vmem:[#allocation45_spill] sm:$0xff] %v8315_v46  ;;  %v8322_v5 = vld [vmem:[%s11572_s3 + $0x268] ss:$16 sps:$4 sm:$0xff]   ;;  %12154 = vst [vmem:[#allocation47_spill] sm:$0xff] %v8327_v58 }
 0x20a   :  { %12153 = vst [vmem:[#allocation46_spill] sm:$0xff] %v8322_v5 }
 0x20b   :  { %2580 = vmatpush1.bf16.msra.mxu0 %v8291_v33  ;;  %v8333_v33 = vld [vmem:[%s11572_s3 + $0x28c] ss:$16 sps:$4 sm:$0xff]  }
 0x20c   :  { %2666 = vmatpush1.bf16.msra.mxu1 %v8298_v1  ;;  %2581 = vmatprep.subr.bf16.mxu0 %v8303_v32  ;;  %12155 = vst [vmem:[#allocation48_spill] sm:$0xff] %v8333_v33  ;;  %v8339_v32 = vld [vmem:[%s11572_s3 + $0x280] ss:$16 sps:$4 sm:$0xff]   ;;  %v8351_v1 = vld [vmem:[%s11572_s3 + $0x2a4] ss:$16 sps:$4 sm:$0xff]  }
 0x20d   :  { %2667 = vmatprep.subr.bf16.mxu1 %v8309_v42  ;;  %12156 = vst [vmem:[#allocation49_spill] sm:$0xff] %v8339_v32  ;;  %v8346_v42 = vld [vmem:[%s11572_s3 + $0x288] ss:$16 sps:$4 sm:$0xff]   ;;  %12158 = vst [vmem:[#allocation51_spill] sm:$0xff] %v8351_v1 }
 0x20e   :  { %12157 = vst [vmem:[#allocation50_spill] sm:$0xff] %v8346_v42 }
 0x20f   :  { %2582 = vmatpush1.bf16.msra.mxu0 %v8315_v46  ;;  %v8357_v46 = vld [vmem:[%s11572_s3 + $0x2ac] ss:$16 sps:$4 sm:$0xff]  }
 0x210   :  { %2668 = vmatpush1.bf16.msra.mxu1 %v8322_v5  ;;  %2583 = vmatprep.subr.bf16.mxu0 %v8327_v58  ;;  %12159 = vst [vmem:[#allocation52_spill] sm:$0xff] %v8357_v46  ;;  %v8363_v58 = vld [vmem:[%s11572_s3 + $0x2a0] ss:$16 sps:$4 sm:$0xff]   ;;  %v8375_v5 = vld [vmem:[%s11572_s3 + $0x2c4] ss:$16 sps:$4 sm:$0xff]  }
 0x211   :  { %2669 = vmatprep.subr.bf16.mxu1 %v8333_v33  ;;  %12160 = vst [vmem:[#allocation53_spill] sm:$0xff] %v8363_v58  ;;  %v8370_v33 = vld [vmem:[%s11572_s3 + $0x2a8] ss:$16 sps:$4 sm:$0xff]   ;;  %12162 = vst [vmem:[#allocation55_spill] sm:$0xff] %v8375_v5 }
 0x212   :  { %12161 = vst [vmem:[#allocation54_spill] sm:$0xff] %v8370_v33 }
 0x213   :  { %2584 = vmatpush1.bf16.msra.mxu0 %v8339_v32 }
 0x214   :  { %2670 = vmatpush1.bf16.msra.mxu1 %v8346_v42  ;;  %2585 = vmatprep.subr.bf16.mxu0 %v8351_v1  ;;  %v8381_v42 = vld [vmem:[%s11572_s3 + $0x2cc] ss:$16 sps:$4 sm:$0xff]  }
 0x215   :  { %v1255_v32 = vpop.f32.mrb[36].mxu0  ;;  %v1298_v31 = vpop.f32.mrb[36].mxu1  ;;  %2671 = vmatprep.subr.bf16.mxu1 %v8357_v46  ;;  %12163 = vst [vmem:[#allocation56_spill] sm:$0xff] %v8381_v42 }
 0x216   :  { %v1257_v1 = vpop.f32.mrb[37].mxu0  ;;  %v1300_v20 = vpop.f32.mrb[37].mxu1 }
 0x217   :  { %v1307_v25 = vmax.f32 %v1255_v32, %v1257_v1  ;;  %v1309_v38 = vmax.f32 %v1298_v31, %v1300_v20  ;;  %v1259_v59 = vpop.f32.mrb[38].mxu0  ;;  %v1302_v27 = vpop.f32.mrb[38].mxu1  ;;  %2586 = vmatpush1.bf16.msra.mxu0 %v8363_v58  ;;  %v8394_v1 = vld [vmem:[%s11572_s3 + $0x2c8] ss:$16 sps:$4 sm:$0xff]   ;;  %v8399_v20 = vld [vmem:[%s11572_s3 + $0x2e4] ss:$16 sps:$4 sm:$0xff]  }
 0x218   :  { %2672 = vmatpush1.bf16.msra.mxu1 %v8370_v33  ;;  %v1261_v46 = vpop.f32.mrb[39].mxu0  ;;  %v1304_v9 = vpop.f32.mrb[39].mxu1  ;;  %2587 = vmatprep.subr.bf16.mxu0 %v8375_v5  ;;  %12165 = vst [vmem:[#allocation58_spill] sm:$0xff] %v8394_v1  ;;  %12166 = vst [vmem:[#allocation59_spill] sm:$0xff] %v8399_v20  ;;  %v8405_v33 = vld [vmem:[%s11572_s3 + $0x2ec] ss:$16 sps:$4 sm:$0xff]  }
 0x219   :  { %v1311_v31 = vmax.f32 %v1307_v25, %v1309_v38  ;;  %v1308_v32 = vmax.f32 %v1259_v59, %v1261_v46  ;;  %v1310_v58 = vmax.f32 %v1302_v27, %v1304_v9  ;;  %2673 = vmatprep.subr.bf16.mxu1 %v8381_v42  ;;  %12167 = vst [vmem:[#allocation60_spill] sm:$0xff] %v8405_v33  ;;  %v8419_v9 = vld [vmem:[%s11572_s3 + $0x2e8] ss:$16 sps:$4 sm:$0xff]   ;;  %v8424_v27 = vld [vmem:[%s11572_s3 + $0x304] ss:$16 sps:$4 sm:$0xff]  }
 0x21a   :  { %12169 = vst [vmem:[#allocation62_spill] sm:$0xff] %v8419_v9  ;;  %12170 = vst [vmem:[#allocation63_spill] sm:$0xff] %v8424_v27  ;;  %v8431_v25 = vld [vmem:[%s11572_s3 + $0x30c] ss:$16 sps:$4 sm:$0xff]   ;;  %v8437_v46 = vld [vmem:[%s11572_s3 + $0x300] ss:$16 sps:$4 sm:$0xff]  }
 0x21b   :  { %v1313_v5 = vadd.f32 %v8009_v30, %v1311_v31  ;;  %v1312_v28 = vmax.f32 %v1308_v32, %v1310_v58  ;;  %2588 = vmatpush1.bf16.msra.mxu0 %v8387_v0  ;;  %12171 = vst [vmem:[#allocation64_spill] sm:$0xff] %v8431_v25  ;;  %12172 = vst [vmem:[#allocation65_spill] sm:$0xff] %v8437_v46  ;;  %v8449_v31 = vld [vmem:[%s11572_s3 + $0x324] ss:$16 sps:$4 sm:$0xff]   ;;  %v8608_v42 = vld [vmem:[%s11572_s3 + $0x3e0] ss:$16 sps:$4 sm:$0xff]  }
 0x21c   :  { %2674 = vmatpush1.bf16.msra.mxu1 %v8394_v1  ;;  %2589 = vmatprep.subr.bf16.mxu0 %v8399_v20  ;;  %12174 = vst [vmem:[#allocation67_spill] sm:$0xff] %v8449_v31  ;;  %v8583_v20 = vld [vmem:[%s11572_s3 + $0x3c0] ss:$16 sps:$4 sm:$0xff]  }
 0x21d   :  { %v1315_v59 = vmul.f32 0.01, %v1313_v5  ;;  %v1314_v38 = vadd.f32 %v8009_v30, %v1312_v28  ;;  %2675 = vmatprep.subr.bf16.mxu1 %v8405_v33  ;;  %v8444_v28 = vld [vmem:[%s11572_s3 + $0x308] ss:$16 sps:$4 sm:$0xff]   ;;  %12196 = vst [vmem:[#allocation89_spill] sm:$0xff] %v8583_v20 }
 0x21e   :  { %12173 = vst [vmem:[#allocation66_spill] sm:$0xff] %v8444_v28 }
 0x21f   :  { %v1316_v58 = vmul.f32 0.01, %v1314_v38  ;;  %2590 = vmatpush1.bf16.msra.mxu0 %v8412_v16  ;;  %v1317_v32 = vmax.f32 %v1313_v5, %v1315_v59  ;;  %v8470_v5 = vld [vmem:[%s11572_s3 + $0x328] ss:$16 sps:$4 sm:$0xff]   ;;  %v8475_v59 = vld [vmem:[%s11572_s3 + $0x344] ss:$16 sps:$4 sm:$0xff]  }
 0x220   :  { %2676 = vmatpush1.bf16.msra.mxu1 %v8419_v9  ;;  %2591 = vmatprep.subr.bf16.mxu0 %v8424_v27  ;;  %v8455_v9 = vld [vmem:[%s11572_s3 + $0x32c] ss:$16 sps:$4 sm:$0xff]   ;;  %v8461_v27 = vld [vmem:[%s11572_s3 + $0x320] ss:$16 sps:$4 sm:$0xff]   ;;  %12178 = vst [vmem:[#allocation71_spill] sm:$0xff] %v8470_v5  ;;  %12179 = vst [vmem:[#allocation72_spill] sm:$0xff] %v8475_v59 }
 0x221   :  { %v1318_v16 = vmax.f32 %v1314_v38, %v1316_v58  ;;  %2677 = vmatprep.subr.bf16.mxu1 %v8431_v25  ;;  %12175 = vst [vmem:[#allocation68_spill] sm:$0xff] %v8455_v9  ;;  %12176 = vst [vmem:[#allocation69_spill] sm:$0xff] %v8461_v27  ;;  %v8487_v38 = vld [vmem:[%s11572_s3 + $0x340] ss:$16 sps:$4 sm:$0xff]   ;;  %v8494_v58 = vld [vmem:[%s11572_s3 + $0x348] ss:$16 sps:$4 sm:$0xff]  }
 0x222   :  { %12181 = vst [vmem:[#allocation74_spill] sm:$0xff] %v8487_v38  ;;  %12182 = vst [vmem:[#allocation75_spill] sm:$0xff] %v8494_v58 }
 0x223   :  { %2592 = vmatpush1.bf16.msra.mxu0 %v8437_v46  ;;  %v8463_v33 = vpack.c.bf16 %v1318_v16, %v1317_v32  ;;  %v8481_v16 = vld [vmem:[%s11572_s3 + $0x34c] ss:$16 sps:$4 sm:$0xff]   ;;  %v8499_v32 = vld [vmem:[%s11572_s3 + $0x364] ss:$16 sps:$4 sm:$0xff]  }
 0x224   :  { %2678 = vmatpush1.bf16.msra.mxu1 %v8444_v28  ;;  %2593 = vmatprep.subr.bf16.mxu0 %v8449_v31  ;;  %12180 = vst [vmem:[#allocation73_spill] sm:$0xff] %v8481_v16  ;;  %12183 = vst [vmem:[#allocation76_spill] sm:$0xff] %v8499_v32 }
 0x225   :  { %12177 = vst [vmem:[#allocation70_spill] sm:$0xff] %v8463_v33  ;;  %2679 = vmatprep.subr.bf16.mxu1 %v8455_v9  ;;  %v8505_v33 = vld [vmem:[%s11572_s3 + $0x36c] ss:$16 sps:$4 sm:$0xff]  }
 0x226   :  { %12184 = vst [vmem:[#allocation77_spill] sm:$0xff] %v8505_v33 }
 0x227   :  { %2594 = vmatpush1.bf16.msra.mxu0 %v8461_v27 }
 0x228   :  { %2680 = vmatpush1.bf16.msra.mxu1 %v8470_v5  ;;  %2595 = vmatprep.subr.bf16.mxu0 %v8475_v59  ;;  %v8511_v59 = vld [vmem:[%s11572_s3 + $0x360] ss:$16 sps:$4 sm:$0xff]   ;;  %v8523_v5 = vld [vmem:[%s11572_s3 + $0x384] ss:$16 sps:$4 sm:$0xff]  }
 0x229   :  { %2681 = vmatprep.subr.bf16.mxu1 %v8481_v16  ;;  %12185 = vst [vmem:[#allocation78_spill] sm:$0xff] %v8511_v59  ;;  %v8518_v16 = vld [vmem:[%s11572_s3 + $0x368] ss:$16 sps:$4 sm:$0xff]   ;;  %12187 = vst [vmem:[#allocation80_spill] sm:$0xff] %v8523_v5 }
 0x22a   :  { %12186 = vst [vmem:[#allocation79_spill] sm:$0xff] %v8518_v16 }
 0x22b   :  { %2596 = vmatpush1.bf16.msra.mxu0 %v8487_v38  ;;  %v8529_v38 = vld [vmem:[%s11572_s3 + $0x38c] ss:$16 sps:$4 sm:$0xff]  }
 0x22c   :  { %2682 = vmatpush1.bf16.msra.mxu1 %v8494_v58  ;;  %2597 = vmatprep.subr.bf16.mxu0 %v8499_v32  ;;  %12188 = vst [vmem:[#allocation81_spill] sm:$0xff] %v8529_v38  ;;  %v8535_v32 = vld [vmem:[%s11572_s3 + $0x380] ss:$16 sps:$4 sm:$0xff]   ;;  %v8547_v58 = vld [vmem:[%s11572_s3 + $0x3a4] ss:$16 sps:$4 sm:$0xff]  }
 0x22d   :  { %2683 = vmatprep.subr.bf16.mxu1 %v8505_v33  ;;  %12189 = vst [vmem:[#allocation82_spill] sm:$0xff] %v8535_v32  ;;  %v8542_v33 = vld [vmem:[%s11572_s3 + $0x388] ss:$16 sps:$4 sm:$0xff]   ;;  %12191 = vst [vmem:[#allocation84_spill] sm:$0xff] %v8547_v58 }
 0x22e   :  { %12190 = vst [vmem:[#allocation83_spill] sm:$0xff] %v8542_v33 }
 0x22f   :  { %2598 = vmatpush1.bf16.msra.mxu0 %v8511_v59  ;;  %v8553_v59 = vld [vmem:[%s11572_s3 + $0x3ac] ss:$16 sps:$4 sm:$0xff]  }
 0x230   :  { %2684 = vmatpush1.bf16.msra.mxu1 %v8518_v16  ;;  %2599 = vmatprep.subr.bf16.mxu0 %v8523_v5  ;;  %12192 = vst [vmem:[#allocation85_spill] sm:$0xff] %v8553_v59  ;;  %v8559_v5 = vld [vmem:[%s11572_s3 + $0x3a0] ss:$16 sps:$4 sm:$0xff]   ;;  %v8571_v16 = vld [vmem:[%s11572_s3 + $0x3c4] ss:$16 sps:$4 sm:$0xff]  }
 0x231   :  { %2685 = vmatprep.subr.bf16.mxu1 %v8529_v38  ;;  %12193 = vst [vmem:[#allocation86_spill] sm:$0xff] %v8559_v5  ;;  %v8566_v38 = vld [vmem:[%s11572_s3 + $0x3a8] ss:$16 sps:$4 sm:$0xff]   ;;  %12195 = vst [vmem:[#allocation88_spill] sm:$0xff] %v8571_v16 }
 0x232   :  { %12194 = vst [vmem:[#allocation87_spill] sm:$0xff] %v8566_v38 }
 0x233   :  { %2600 = vmatpush1.bf16.msra.mxu0 %v8535_v32 }
 0x234   :  { %2686 = vmatpush1.bf16.msra.mxu1 %v8542_v33  ;;  %2601 = vmatprep.subr.bf16.mxu0 %v8547_v58  ;;  %v8577_v33 = vld [vmem:[%s11572_s3 + $0x3cc] ss:$16 sps:$4 sm:$0xff]  }
 0x235   :  { %v1363_v32 = vpop.f32.mrb[40].mxu0  ;;  %v1406_v27 = vpop.f32.mrb[40].mxu1  ;;  %2687 = vmatprep.subr.bf16.mxu1 %v8553_v59 }
 0x236   :  { %v1365_v58 = vpop.f32.mrb[41].mxu0  ;;  %v1408_v9 = vpop.f32.mrb[41].mxu1 }
 0x237   :  { %v1415_v31 = vmax.f32 %v1363_v32, %v1365_v58  ;;  %v1417_v28 = vmax.f32 %v1406_v27, %v1408_v9  ;;  %v1367_v46 = vpop.f32.mrb[42].mxu0  ;;  %v1410_v25 = vpop.f32.mrb[42].mxu1  ;;  %2602 = vmatpush1.bf16.msra.mxu0 %v8559_v5  ;;  %v8590_v58 = vld [vmem:[%s11572_s3 + $0x3c8] ss:$16 sps:$4 sm:$0xff]   ;;  %v8595_v9 = vld [vmem:[%s11572_s3 + $0x3e4] ss:$16 sps:$4 sm:$0xff]  }
 0x238   :  { %2688 = vmatpush1.bf16.msra.mxu1 %v8566_v38  ;;  %v1369_v59 = vpop.f32.mrb[43].mxu0  ;;  %v1412_v1 = vpop.f32.mrb[43].mxu1  ;;  %2603 = vmatprep.subr.bf16.mxu0 %v8571_v16  ;;  %12197 = vst [vmem:[#allocation90_spill] sm:$0xff] %v8595_v9  ;;  %v8601_v38 = vld [vmem:[%s11572_s3 + $0x3ec] ss:$16 sps:$4 sm:$0xff]  }
 0x239   :  { %v1419_v27 = vmax.f32 %v1415_v31, %v1417_v28  ;;  %v1416_v32 = vmax.f32 %v1367_v46, %v1369_v59  ;;  %v1418_v5 = vmax.f32 %v1410_v25, %v1412_v1  ;;  %2689 = vmatprep.subr.bf16.mxu1 %v8577_v33  ;;  %v8615_v1 = vld [vmem:[%s11572_s3 + $0x3e8] ss:$16 sps:$4 sm:$0xff]  }
 0x23a   :  { %12198 = vst [vmem:[#allocation91_spill] sm:$0xff] %v8615_v1 }
 0x23b   :  { %v1421_v16 = vadd.f32 %v8009_v30, %v1419_v27  ;;  %v1420_v0 = vmax.f32 %v1416_v32, %v1418_v5  ;;  %2604 = vmatpush1.bf16.msra.mxu0 %v8583_v20  ;;  %v12210_v27 = vld [vmem:[#allocation19_spill] sm:$0xff] }
 0x23c   :  { %2690 = vmatpush1.bf16.msra.mxu1 %v8590_v58  ;;  %2605 = vmatprep.subr.bf16.mxu0 %v8595_v9 }
 0x23d   :  { %v1423_v25 = vmul.f32 0.01, %v1421_v16  ;;  %v1422_v46 = vadd.f32 %v8009_v30, %v1420_v0  ;;  %2691 = vmatprep.subr.bf16.mxu1 %v8601_v38 }
 0x23f   :  { %v1424_v28 = vmul.f32 0.01, %v1422_v46  ;;  %2606 = vmatpush1.bf16.msra.mxu0 %v8608_v42  ;;  %v1425_v31 = vmax.f32 %v1421_v16, %v1423_v25 }
 0x240   :  { %2692 = vmatpush1.bf16.msra.mxu1 %v8615_v1  ;;  %2722 = vmatprep.subr.bf16.mxu0 %v7823_v60 }
 0x241   :  { %v1426_v5 = vmax.f32 %v1422_v46, %v1424_v28  ;;  %2808 = vmatprep.subr.bf16.mxu1 %v7828_v61 }
 0x242   :  { %2608 = vmatmul.mubr.bf16.vlgmr.msra.gmra.mrb[56].mxu0 %v7465_v54 }
 0x243   :  { %2694 = vmatmul.mubr.bf16.vlgmr.msra.gmra.mrb[56].mxu1 %v7465_v54  ;;  %2723 = vmatpush1.bf16.msra.mxu0 %v7839_v36  ;;  %v8626_v0 = vpack.c.bf16 %v1426_v5, %v1425_v31 }
 0x244   :  { %2754 = vmatprep.mubr.bf16.mxu0 %v7526_v26  ;;  %2809 = vmatpush1.bf16.msra.mxu1 %v7846_v48 }
 0x245   :  { %12199 = vst [vmem:[#allocation92_spill] sm:$0xff] %v8626_v0  ;;  %2840 = vmatprep.mubr.bf16.mxu1 %v7526_v26  ;;  %2724 = vmatprep.subr.bf16.mxu0 %v7851_v50  ;;  %v12242_v0 = vld [vmem:[#allocation50_spill] sm:$0xff] }
 0x246   :  { %2810 = vmatprep.subr.bf16.mxu1 %v7856_v51 }
 0x247   :  { %2725 = vmatpush1.bf16.msra.mxu0 %v7863_v4 }
 0x248   :  { %2811 = vmatpush1.bf16.msra.mxu1 %v7872_v6  ;;  %2726 = vmatprep.subr.bf16.mxu0 %v7877_v7 }
 0x249   :  { %2812 = vmatprep.subr.bf16.mxu1 %v7884_v12 }
 0x24b   :  { %2727 = vmatpush1.bf16.msra.mxu0 %v7890_v62 }
 0x24c   :  { %2813 = vmatpush1.bf16.msra.mxu1 %v7897_v13  ;;  %2728 = vmatprep.subr.bf16.mxu0 %v7902_v2 }
 0x24d   :  { %2814 = vmatprep.subr.bf16.mxu1 %v7908_v3 }
 0x24f   :  { %2729 = vmatpush1.bf16.msra.mxu0 %v7914_v8 }
 0x250   :  { %2815 = vmatpush1.bf16.msra.mxu1 %v7921_v10  ;;  %2730 = vmatprep.subr.bf16.mxu0 %v7926_v11 }
 0x251   :  { %2816 = vmatprep.subr.bf16.mxu1 %v7932_v14 }
 0x253   :  { %2731 = vmatpush1.bf16.msra.mxu0 %v7938_v15 }
 0x254   :  { %2817 = vmatpush1.bf16.msra.mxu1 %v7945_v17  ;;  %2732 = vmatprep.subr.bf16.mxu0 %v7950_v18  ;;  %v12201_v18 = vld [vmem:[#allocation10_spill] sm:$0xff] }
 0x255   :  { %v1471_v26 = vpop.f32.mrb[44].mxu0  ;;  %v1514_v60 = vpop.f32.mrb[44].mxu1  ;;  %2818 = vmatprep.subr.bf16.mxu1 %v7956_v19  ;;  %v12202_v19 = vld [vmem:[#allocation11_spill] sm:$0xff] }
 0x256   :  { %v1473_v61 = vpop.f32.mrb[45].mxu0  ;;  %v1516_v36 = vpop.f32.mrb[45].mxu1 }
 0x257   :  { %v1523_v48 = vmax.f32 %v1471_v26, %v1473_v61  ;;  %v1525_v50 = vmax.f32 %v1514_v60, %v1516_v36  ;;  %v1475_v51 = vpop.f32.mrb[46].mxu0  ;;  %v1518_v4 = vpop.f32.mrb[46].mxu1  ;;  %2733 = vmatpush1.bf16.msra.mxu0 %v7962_v22  ;;  %v12203_v22 = vld [vmem:[#allocation12_spill] sm:$0xff]  ;;  %v12212_v60 = vld [vmem:[#allocation21_spill] sm:$0xff] }
 0x258   :  { %2819 = vmatpush1.bf16.msra.mxu1 %v7969_v23  ;;  %v1477_v6 = vpop.f32.mrb[47].mxu0  ;;  %v1520_v7 = vpop.f32.mrb[47].mxu1  ;;  %2734 = vmatprep.subr.bf16.mxu0 %v7974_v37  ;;  %v12204_v23 = vld [vmem:[#allocation13_spill] sm:$0xff]  ;;  %v12205_v37 = vld [vmem:[#allocation14_spill] sm:$0xff]  ;;  %v12211_v26 = vld [vmem:[#allocation20_spill] sm:$0xff] }
 0x259   :  { %v1527_v12 = vmax.f32 %v1523_v48, %v1525_v50  ;;  %v1524_v62 = vmax.f32 %v1475_v51, %v1477_v6  ;;  %v1526_v13 = vmax.f32 %v1518_v4, %v1520_v7  ;;  %2820 = vmatprep.subr.bf16.mxu1 %v7980_v40  ;;  %v12206_v40 = vld [vmem:[#allocation15_spill] sm:$0xff]  ;;  %v12213_v48 = vld [vmem:[#allocation22_spill] sm:$0xff] }
 0x25a   :  { %v12214_v6 = vld [vmem:[#allocation23_spill] sm:$0xff] }
 0x25b   :  { %v1529_v2 = vadd.f32 %v8009_v30, %v1527_v12  ;;  %v1528_v3 = vmax.f32 %v1524_v62, %v1526_v13  ;;  %2735 = vmatpush1.bf16.msra.mxu0 %v7986_v52  ;;  %v12207_v52 = vld [vmem:[#allocation16_spill] sm:$0xff]  ;;  %v12216_v13 = vld [vmem:[#allocation25_spill] sm:$0xff] }
 0x25c   :  { %2821 = vmatpush1.bf16.msra.mxu1 %v7993_v21  ;;  %2736 = vmatprep.subr.bf16.mxu0 %v7998_v24  ;;  %v12208_v21 = vld [vmem:[#allocation17_spill] sm:$0xff]  ;;  %v12209_v24 = vld [vmem:[#allocation18_spill] sm:$0xff]  ;;  %v12215_v62 = vld [vmem:[#allocation24_spill] sm:$0xff] }
 0x25d   :  { %v1531_v8 = vmul.f32 0.01, %v1529_v2  ;;  %v1530_v10 = vadd.f32 %v8009_v30, %v1528_v3  ;;  %2822 = vmatprep.subr.bf16.mxu1 %v8004_v29 }
 0x25f   :  { %v1532_v11 = vmul.f32 0.01, %v1530_v10  ;;  %2737 = vmatpush1.bf16.msra.mxu0 %v8016_v55  ;;  %v1533_v14 = vmax.f32 %v1529_v2, %v1531_v8  ;;  %v12217_v2 = vld [vmem:[#allocation26_spill] sm:$0xff] }
 0x260   :  { %2823 = vmatpush1.bf16.msra.mxu1 %v8023_v56  ;;  %2738 = vmatprep.subr.bf16.mxu0 %v8028_v57 }
 0x261   :  { %v1534_v15 = vmax.f32 %v1530_v10, %v1532_v11  ;;  %2824 = vmatprep.subr.bf16.mxu1 %v8035_v63  ;;  %v12218_v10 = vld [vmem:[#allocation27_spill] sm:$0xff] }
 0x263   :  { %2739 = vmatpush1.bf16.msra.mxu0 %v8041_v34  ;;  %v8664_v17 = vpack.c.bf16 %v1534_v15, %v1533_v14  ;;  %v12219_v14 = vld [vmem:[#allocation28_spill] sm:$0xff]  ;;  %v12220_v15 = vld [vmem:[#allocation29_spill] sm:$0xff] }
 0x264   :  { %2825 = vmatpush1.bf16.msra.mxu1 %v8048_v35  ;;  %2740 = vmatprep.subr.bf16.mxu0 %v8053_v45 }
 0x265   :  { %12200 = vst [vmem:[#allocation93_spill] sm:$0xff] %v8664_v17  ;;  %2826 = vmatprep.subr.bf16.mxu1 %v8059_v39  ;;  %v12240_v17 = vld [vmem:[#allocation48_spill] sm:$0xff] }
 0x267   :  { %2741 = vmatpush1.bf16.msra.mxu0 %v8065_v41 }
 0x268   :  { %2827 = vmatpush1.bf16.msra.mxu1 %v8074_v43  ;;  %2742 = vmatprep.subr.bf16.mxu0 %v8079_v44 }
 0x269   :  { %2828 = vmatprep.subr.bf16.mxu1 %v8085_v47 }
 0x26b   :  { %2743 = vmatpush1.bf16.msra.mxu0 %v8091_v49 }
 0x26c   :  { %2829 = vmatpush1.bf16.msra.mxu1 %v8098_v53  ;;  %2744 = vmatprep.subr.bf16.mxu0 %v12201_v18 }
 0x26d   :  { %2830 = vmatprep.subr.bf16.mxu1 %v12202_v19 }
 0x26f   :  { %2745 = vmatpush1.bf16.msra.mxu0 %v12203_v22 }
 0x270   :  { %2831 = vmatpush1.bf16.msra.mxu1 %v12204_v23  ;;  %2746 = vmatprep.subr.bf16.mxu0 %v12205_v37 }
 0x271   :  { %2832 = vmatprep.subr.bf16.mxu1 %v12206_v40 }
 0x273   :  { %2747 = vmatpush1.bf16.msra.mxu0 %v12207_v52 }
 0x274   :  { %2833 = vmatpush1.bf16.msra.mxu1 %v12208_v21  ;;  %2748 = vmatprep.subr.bf16.mxu0 %v12209_v24 }
 0x275   :  { %v1579_v59 = vpop.f32.mrb[48].mxu0  ;;  %v1622_v16 = vpop.f32.mrb[48].mxu1  ;;  %2834 = vmatprep.subr.bf16.mxu1 %v12210_v27 }
 0x276   :  { %v1581_v32 = vpop.f32.mrb[49].mxu0  ;;  %v1624_v25 = vpop.f32.mrb[49].mxu1 }
 0x277   :  { %v1631_v46 = vmax.f32 %v1579_v59, %v1581_v32  ;;  %v1633_v28 = vmax.f32 %v1622_v16, %v1624_v25  ;;  %v1583_v31 = vpop.f32.mrb[50].mxu0  ;;  %v1626_v5 = vpop.f32.mrb[50].mxu1  ;;  %2749 = vmatpush1.bf16.msra.mxu0 %v12211_v26  ;;  %v12221_v59 = vld [vmem:[#allocation30_spill] sm:$0xff]  ;;  %v12222_v25 = vld [vmem:[#allocation31_spill] sm:$0xff] }
 0x278   :  { %2835 = vmatpush1.bf16.msra.mxu1 %v12212_v60  ;;  %v1585_v61 = vpop.f32.mrb[51].mxu0  ;;  %v1628_v36 = vpop.f32.mrb[51].mxu1  ;;  %2750 = vmatprep.subr.bf16.mxu0 %v12213_v48 }
 0x279   :  { %v1635_v50 = vmax.f32 %v1631_v46, %v1633_v28  ;;  %v1632_v51 = vmax.f32 %v1583_v31, %v1585_v61  ;;  %v1634_v4 = vmax.f32 %v1626_v5, %v1628_v36  ;;  %2836 = vmatprep.subr.bf16.mxu1 %v12214_v6  ;;  %v12223_v46 = vld [vmem:[#allocation32_spill] sm:$0xff]  ;;  %v12225_v31 = vld [vmem:[#allocation6_spill] sm:$0xff]  ;;  %v12226_v5 = vld [vmem:[#allocation33_spill] sm:$0xff] }
 0x27a   :  { %v12227_v61 = vld [vmem:[#allocation34_spill] sm:$0xff]  ;;  %v12228_v36 = vld [vmem:[#allocation35_spill] sm:$0xff] }
 0x27b   :  { %v1637_v7 = vadd.f32 %v8009_v30, %v1635_v50  ;;  %v1636_v12 = vmax.f32 %v1632_v51, %v1634_v4  ;;  %2751 = vmatpush1.bf16.msra.mxu0 %v12215_v62  ;;  %v12229_v50 = vld [vmem:[#allocation36_spill] sm:$0xff]  ;;  %v12230_v51 = vld [vmem:[#allocation38_spill] sm:$0xff]  ;;  %v12231_v4 = vld [vmem:[#allocation39_spill] sm:$0xff] }
 0x27c   :  { %2837 = vmatpush1.bf16.msra.mxu1 %v12216_v13  ;;  %2752 = vmatprep.subr.bf16.mxu0 %v12217_v2 }
 0x27d   :  { %v1639_v3 = vmul.f32 0.01, %v1637_v7  ;;  %v1638_v8 = vadd.f32 %v8009_v30, %v1636_v12  ;;  %2838 = vmatprep.subr.bf16.mxu1 %v12218_v10  ;;  %v12234_v12 = vld [vmem:[#allocation42_spill] sm:$0xff] }
 0x27f   :  { %v1640_v11 = vmul.f32 0.01, %v1638_v8  ;;  %2753 = vmatpush1.bf16.msra.mxu0 %v12219_v14  ;;  %v1641_v16 = vmax.f32 %v1637_v7, %v1639_v3  ;;  %v12233_v7 = vld [vmem:[#allocation41_spill] sm:$0xff]  ;;  %v12235_v3 = vld [vmem:[#allocation43_spill] sm:$0xff] }
 0x280   :  { %2839 = vmatpush1.bf16.msra.mxu1 %v12220_v15  ;;  %2765 = vmatprep.subr.bf16.mxu0 %v12221_v59 }
 0x281   :  { %v1642_v32 = vmax.f32 %v1638_v8, %v1640_v11  ;;  %2851 = vmatprep.subr.bf16.mxu1 %v12222_v25  ;;  %v12236_v8 = vld [vmem:[#allocation44_spill] sm:$0xff]  ;;  %v12237_v11 = vld [vmem:[#allocation45_spill] sm:$0xff] }
 0x282   :  { %2755 = vmatmul.mubr.bf16.vlgmr.msra.gmra.mrb[60].mxu0 %v7465_v54 }
 0x283   :  { %2841 = vmatmul.mubr.bf16.vlgmr.msra.gmra.mrb[60].mxu1 %v7465_v54  ;;  %2766 = vmatpush1.bf16.msra.mxu0 %v12223_v46  ;;  %v8702_v28 = vpack.c.bf16 %v1642_v32, %v1641_v16  ;;  %v12232_v54 = vld [vmem:[#allocation40_spill] sm:$0xff]  ;;  %v12238_v16 = vld [vmem:[#allocation46_spill] sm:$0xff]  ;;  %v12239_v32 = vld [vmem:[#allocation47_spill] sm:$0xff] }
 0x284   :  { %2797 = vmatprep.mubr.bf16.mxu0 %v12225_v31  ;;  %2852 = vmatpush1.bf16.msra.mxu1 %v12226_v5  ;;  %v12248_v46 = vld [vmem:[#allocation56_spill] sm:$0xff] }
 0x285   :  { %12224 = vst [vmem:[#allocation10_spill] sm:$0xff] %v8702_v28  ;;  %2883 = vmatprep.mubr.bf16.mxu1 %v12225_v31  ;;  %2767 = vmatprep.subr.bf16.mxu0 %v12227_v61  ;;  %v12241_v28 = vld [vmem:[#allocation49_spill] sm:$0xff]  ;;  %v12247_v61 = vld [vmem:[#allocation55_spill] sm:$0xff] }
 0x286   :  { %2853 = vmatprep.subr.bf16.mxu1 %v12228_v36  ;;  %v12245_v36 = vld [vmem:[#allocation53_spill] sm:$0xff] }
 0x287   :  { %2768 = vmatpush1.bf16.msra.mxu0 %v12229_v50 }
 0x288   :  { %2854 = vmatpush1.bf16.msra.mxu1 %v12230_v51  ;;  %2769 = vmatprep.subr.bf16.mxu0 %v12231_v4  ;;  %v12244_v4 = vld [vmem:[#allocation52_spill] sm:$0xff] }
 0x289   :  { %2855 = vmatprep.subr.bf16.mxu1 %v12232_v54  ;;  %v12243_v54 = vld [vmem:[#allocation51_spill] sm:$0xff] }
 0x28b   :  { %2770 = vmatpush1.bf16.msra.mxu0 %v12233_v7 }
 0x28c   :  { %2856 = vmatpush1.bf16.msra.mxu1 %v12234_v12  ;;  %2771 = vmatprep.subr.bf16.mxu0 %v12235_v3 }
 0x28d   :  { %2857 = vmatprep.subr.bf16.mxu1 %v12236_v8 }
 0x28f   :  { %2772 = vmatpush1.bf16.msra.mxu0 %v12237_v11 }
 0x290   :  { %2858 = vmatpush1.bf16.msra.mxu1 %v12238_v16  ;;  %2773 = vmatprep.subr.bf16.mxu0 %v12239_v32  ;;  %v12246_v32 = vld [vmem:[#allocation54_spill] sm:$0xff] }
 0x291   :  { %2859 = vmatprep.subr.bf16.mxu1 %v12240_v17 }
 0x293   :  { %2774 = vmatpush1.bf16.msra.mxu0 %v12241_v28 }
 0x294   :  { %2860 = vmatpush1.bf16.msra.mxu1 %v12242_v0  ;;  %2775 = vmatprep.subr.bf16.mxu0 %v12243_v54 }
 0x295   :  { %v1687_v7 = vpop.f32.mrb[52].mxu0  ;;  %v1730_v12 = vpop.f32.mrb[52].mxu1  ;;  %2861 = vmatprep.subr.bf16.mxu1 %v12244_v4 }
 0x296   :  { %v1689_v3 = vpop.f32.mrb[53].mxu0  ;;  %v1732_v8 = vpop.f32.mrb[53].mxu1 }
 0x297   :  { %v1739_v51 = vmax.f32 %v1687_v7, %v1689_v3  ;;  %v1741_v11 = vmax.f32 %v1730_v12, %v1732_v8  ;;  %v1691_v50 = vpop.f32.mrb[54].mxu0  ;;  %v1734_v16 = vpop.f32.mrb[54].mxu1  ;;  %2776 = vmatpush1.bf16.msra.mxu0 %v12245_v36  ;;  %v12249_v7 = vld [vmem:[#allocation57_spill] sm:$0xff]  ;;  %v12250_v12 = vld [vmem:[#allocation58_spill] sm:$0xff]  ;;  %v12251_v3 = vld [vmem:[#allocation59_spill] sm:$0xff] }
 0x298   :  { %2862 = vmatpush1.bf16.msra.mxu1 %v12246_v32  ;;  %v1693_v17 = vpop.f32.mrb[55].mxu0  ;;  %v1736_v28 = vpop.f32.mrb[55].mxu1  ;;  %2777 = vmatprep.subr.bf16.mxu0 %v12247_v61  ;;  %v12252_v36 = vld [vmem:[#allocation60_spill] sm:$0xff] }
 0x299   :  { %v1743_v0 = vmax.f32 %v1739_v51, %v1741_v11  ;;  %v1740_v54 = vmax.f32 %v1691_v50, %v1693_v17  ;;  %v1742_v5 = vmax.f32 %v1734_v16, %v1736_v28  ;;  %2863 = vmatprep.subr.bf16.mxu1 %v12248_v46  ;;  %v12253_v51 = vld [vmem:[#allocation61_spill] sm:$0xff]  ;;  %v12254_v17 = vld [vmem:[#allocation62_spill] sm:$0xff]  ;;  %v12255_v28 = vld [vmem:[#allocation63_spill] sm:$0xff] }
 0x29a   :  { %v12256_v50 = vld [vmem:[#allocation64_spill] sm:$0xff]  ;;  %v12259_v16 = vld [vmem:[#allocation66_spill] sm:$0xff] }
 0x29b   :  { %v1745_v4 = vadd.f32 %v8009_v30, %v1743_v0  ;;  %v1744_v25 = vmax.f32 %v1740_v54, %v1742_v5  ;;  %2778 = vmatpush1.bf16.msra.mxu0 %v12249_v7  ;;  %v12257_v54 = vld [vmem:[#allocation65_spill] sm:$0xff] }
 0x29c   :  { %2864 = vmatpush1.bf16.msra.mxu1 %v12250_v12  ;;  %2779 = vmatprep.subr.bf16.mxu0 %v12251_v3 }
 0x29d   :  { %v1747_v8 = vmul.f32 0.01, %v1745_v4  ;;  %v1746_v32 = vadd.f32 %v8009_v30, %v1744_v25  ;;  %2865 = vmatprep.subr.bf16.mxu1 %v12252_v36  ;;  %v12260_v30 = vld [vmem:[#allocation67_spill] sm:$0xff]  ;;  %v12261_v25 = vld [vmem:[#allocation68_spill] sm:$0xff]  ;;  %v12262_v36 = vld [vmem:[#allocation69_spill] sm:$0xff] }
 0x29f   :  { %v1748_v61 = vmul.f32 0.01, %v1746_v32  ;;  %2780 = vmatpush1.bf16.msra.mxu0 %v12253_v51  ;;  %v1749_v0 = vmax.f32 %v1745_v4, %v1747_v8  ;;  %v12263_v51 = vld [vmem:[#allocation71_spill] sm:$0xff]  ;;  %v12265_v4 = vld [vmem:[#allocation73_spill] sm:$0xff]  ;;  %v12268_v8 = vld [vmem:[#allocation76_spill] sm:$0xff] }
 0x2a0   :  { %2866 = vmatpush1.bf16.msra.mxu1 %v12254_v17  ;;  %2781 = vmatprep.subr.bf16.mxu0 %v12255_v28  ;;  %v12264_v17 = vld [vmem:[#allocation72_spill] sm:$0xff] }
 0x2a1   :  { %v1750_v5 = vmax.f32 %v1746_v32, %v1748_v61  ;;  %2867 = vmatprep.subr.bf16.mxu1 %v12256_v50  ;;  %v12266_v61 = vld [vmem:[#allocation74_spill] sm:$0xff]  ;;  %v12267_v32 = vld [vmem:[#allocation75_spill] sm:$0xff] }
 0x2a3   :  { %2782 = vmatpush1.bf16.msra.mxu0 %v12257_v54  ;;  %v8740_v11 = vpack.c.bf16 %v1750_v5, %v1749_v0  ;;  %v12269_v0 = vld [vmem:[#allocation77_spill] sm:$0xff]  ;;  %v12270_v5 = vld [vmem:[#allocation78_spill] sm:$0xff] }
 0x2a4   :  { %2868 = vmatpush1.bf16.msra.mxu1 %v12259_v16  ;;  %2783 = vmatprep.subr.bf16.mxu0 %v12260_v30 }
 0x2a5   :  { %12258 = vst [vmem:[#allocation11_spill] sm:$0xff] %v8740_v11  ;;  %2869 = vmatprep.subr.bf16.mxu1 %v12261_v25  ;;  %v12271_v11 = vld [vmem:[#allocation79_spill] sm:$0xff]  ;;  %v12272_v25 = vld [vmem:[#allocation80_spill] sm:$0xff] }
 0x2a7   :  { %2784 = vmatpush1.bf16.msra.mxu0 %v12262_v36  ;;  %v12273_v36 = vld [vmem:[#allocation81_spill] sm:$0xff] }
 0x2a8   :  { %2870 = vmatpush1.bf16.msra.mxu1 %v12263_v51  ;;  %2785 = vmatprep.subr.bf16.mxu0 %v12264_v17  ;;  %v12274_v51 = vld [vmem:[#allocation82_spill] sm:$0xff]  ;;  %v12275_v17 = vld [vmem:[#allocation83_spill] sm:$0xff] }
 0x2a9   :  { %2871 = vmatprep.subr.bf16.mxu1 %v12265_v4  ;;  %v12276_v4 = vld [vmem:[#allocation84_spill] sm:$0xff] }
 0x2ab   :  { %2786 = vmatpush1.bf16.msra.mxu0 %v12266_v61  ;;  %v12277_v61 = vld [vmem:[#allocation85_spill] sm:$0xff] }
 0x2ac   :  { %2872 = vmatpush1.bf16.msra.mxu1 %v12267_v32  ;;  %2787 = vmatprep.subr.bf16.mxu0 %v12268_v8  ;;  %v12278_v32 = vld [vmem:[#allocation86_spill] sm:$0xff]  ;;  %v12279_v8 = vld [vmem:[#allocation87_spill] sm:$0xff] }
 0x2ad   :  { %2873 = vmatprep.subr.bf16.mxu1 %v12269_v0  ;;  %v12280_v0 = vld [vmem:[#allocation88_spill] sm:$0xff] }
 0x2af   :  { %2788 = vmatpush1.bf16.msra.mxu0 %v12270_v5 }
 0x2b0   :  { %2874 = vmatpush1.bf16.msra.mxu1 %v12271_v11  ;;  %2789 = vmatprep.subr.bf16.mxu0 %v12272_v25 }
 0x2b1   :  { %2875 = vmatprep.subr.bf16.mxu1 %v12273_v36 }
 0x2b3   :  { %2790 = vmatpush1.bf16.msra.mxu0 %v12274_v51 }
 0x2b4   :  { %2876 = vmatpush1.bf16.msra.mxu1 %v12275_v17  ;;  %2791 = vmatprep.subr.bf16.mxu0 %v12276_v4 }
 0x2b5   :  { %2877 = vmatprep.subr.bf16.mxu1 %v12277_v61 }
 0x2b7   :  { %2792 = vmatpush1.bf16.msra.mxu0 %v12278_v32 }
 0x2b8   :  { %2878 = vmatpush1.bf16.msra.mxu1 %v12279_v8  ;;  %2793 = vmatprep.subr.bf16.mxu0 %v12280_v0  ;;  %v8774_v8 = vld [vmem:[%s11572_s3 + $0x4] ss:$16 sps:$4 sm:$0xff]  }
 0x2b9   :  { %2879 = vmatprep.subr.bf16.mxu1 %v8577_v33  ;;  %12281 = vst [vmem:[#allocation12_spill] sm:$0xff] %v8774_v8 }
 0x2bb   :  { %2794 = vmatpush1.bf16.msra.mxu0 %v8583_v20  ;;  %v8780_v20 = vld [vmem:[%s11572_s3 + $0xc] ss:$16 sps:$4 sm:$0xff]  }
 0x2bc   :  { %2880 = vmatpush1.bf16.msra.mxu1 %v8590_v58  ;;  %2795 = vmatprep.subr.bf16.mxu0 %v8595_v9  ;;  %12282 = vst [vmem:[#allocation13_spill] sm:$0xff] %v8780_v20  ;;  %v12283_v9 = vld [vmem:[#allocation5_spill] sm:$0xff] }
 0x2bd   :  { %2881 = vmatprep.subr.bf16.mxu1 %v8601_v38 }
 0x2bf   :  { %2796 = vmatpush1.bf16.msra.mxu0 %v8608_v42 }
 0x2c0   :  { %2882 = vmatpush1.bf16.msra.mxu1 %v8615_v1  ;;  %2912 = vmatprep.subr.bf16.mxu0 %v8774_v8  ;;  %v8788_v1 = vld [vmem:[%s11572_s3] ss:$16 sps:$4 sm:$0xff]   ;;  %v8795_v8 = vld [vmem:[%s11572_s3 + $0x8] ss:$16 sps:$4 sm:$0xff]  }
 0x2c1   :  { %2998 = vmatprep.subr.bf16.mxu1 %v8780_v20  ;;  %12284 = vst [vmem:[#allocation14_spill] sm:$0xff] %v8788_v1  ;;  %12285 = vst [vmem:[#allocation15_spill] sm:$0xff] %v8795_v8  ;;  %v8802_v20 = vld [vmem:[%s11572_s3 + $0x24] ss:$16 sps:$4 sm:$0xff]  }
 0x2c2   :  { %2798 = vmatmul.mubr.bf16.vlgmr.msra.gmra.mrb[60].mxu0 %v12283_v9  ;;  %12286 = vst [vmem:[#allocation16_spill] sm:$0xff] %v8802_v20 }
 0x2c3   :  { %2884 = vmatmul.mubr.bf16.vlgmr.msra.gmra.mrb[60].mxu1 %v12283_v9  ;;  %2913 = vmatpush1.bf16.msra.mxu0 %v8788_v1  ;;  %v8808_v1 = vld [vmem:[%s11572_s3 + $0x2c] ss:$16 sps:$4 sm:$0xff]  }
 0x2c4   :  { %2944 = vmatprep.mubr.bf16.mxu0 %v12225_v31  ;;  %2999 = vmatpush1.bf16.msra.mxu1 %v8795_v8  ;;  %12287 = vst [vmem:[#allocation17_spill] sm:$0xff] %v8808_v1  ;;  %v8814_v8 = vld [vmem:[%s11572_s3 + $0x20] ss:$16 sps:$4 sm:$0xff]  }
 0x2c5   :  { %3030 = vmatprep.mubr.bf16.mxu1 %v12225_v31  ;;  %2914 = vmatprep.subr.bf16.mxu0 %v8802_v20  ;;  %12288 = vst [vmem:[#allocation18_spill] sm:$0xff] %v8814_v8  ;;  %v8820_v31 = vld [vmem:[%s11572_s3 + $0x28] ss:$16 sps:$4 sm:$0xff]   ;;  %v8826_v20 = vld [vmem:[%s11572_s3 + $0x44] ss:$16 sps:$4 sm:$0xff]  }
 0x2c6   :  { %3000 = vmatprep.subr.bf16.mxu1 %v8808_v1  ;;  %12289 = vst [vmem:[#allocation19_spill] sm:$0xff] %v8820_v31  ;;  %12290 = vst [vmem:[#allocation20_spill] sm:$0xff] %v8826_v20  ;;  %v8832_v1 = vld [vmem:[%s11572_s3 + $0x4c] ss:$16 sps:$4 sm:$0xff]  }
 0x2c7   :  { %2915 = vmatpush1.bf16.msra.mxu0 %v8814_v8  ;;  %12291 = vst [vmem:[#allocation21_spill] sm:$0xff] %v8832_v1  ;;  %v8838_v8 = vld [vmem:[%s11572_s3 + $0x40] ss:$16 sps:$4 sm:$0xff]  }
 0x2c8   :  { %3001 = vmatpush1.bf16.msra.mxu1 %v8820_v31  ;;  %2916 = vmatprep.subr.bf16.mxu0 %v8826_v20  ;;  %12292 = vst [vmem:[#allocation22_spill] sm:$0xff] %v8838_v8  ;;  %v8844_v31 = vld [vmem:[%s11572_s3 + $0x48] ss:$16 sps:$4 sm:$0xff]   ;;  %v8850_v20 = vld [vmem:[%s11572_s3 + $0x64] ss:$16 sps:$4 sm:$0xff]  }
 0x2c9   :  { %3002 = vmatprep.subr.bf16.mxu1 %v8832_v1  ;;  %12293 = vst [vmem:[#allocation23_spill] sm:$0xff] %v8844_v31  ;;  %12294 = vst [vmem:[#allocation24_spill] sm:$0xff] %v8850_v20  ;;  %v8856_v1 = vld [vmem:[%s11572_s3 + $0x6c] ss:$16 sps:$4 sm:$0xff]  }
 0x2ca   :  { %12295 = vst [vmem:[#allocation25_spill] sm:$0xff] %v8856_v1 }
 0x2cb   :  { %2917 = vmatpush1.bf16.msra.mxu0 %v8838_v8  ;;  %v8862_v8 = vld [vmem:[%s11572_s3 + $0x60] ss:$16 sps:$4 sm:$0xff]  }
 0x2cc   :  { %3003 = vmatpush1.bf16.msra.mxu1 %v8844_v31  ;;  %2918 = vmatprep.subr.bf16.mxu0 %v8850_v20  ;;  %12296 = vst [vmem:[#allocation26_spill] sm:$0xff] %v8862_v8  ;;  %v8868_v31 = vld [vmem:[%s11572_s3 + $0x68] ss:$16 sps:$4 sm:$0xff]   ;;  %v8874_v20 = vld [vmem:[%s11572_s3 + $0x84] ss:$16 sps:$4 sm:$0xff]  }
 0x2cd   :  { %3004 = vmatprep.subr.bf16.mxu1 %v8856_v1  ;;  %12297 = vst [vmem:[#allocation27_spill] sm:$0xff] %v8868_v31  ;;  %12298 = vst [vmem:[#allocation28_spill] sm:$0xff] %v8874_v20  ;;  %v8880_v1 = vld [vmem:[%s11572_s3 + $0x8c] ss:$16 sps:$4 sm:$0xff]  }
 0x2ce   :  { %12299 = vst [vmem:[#allocation29_spill] sm:$0xff] %v8880_v1 }
 0x2cf   :  { %2919 = vmatpush1.bf16.msra.mxu0 %v8862_v8  ;;  %v8886_v8 = vld [vmem:[%s11572_s3 + $0x80] ss:$16 sps:$4 sm:$0xff]  }
 0x2d0   :  { %3005 = vmatpush1.bf16.msra.mxu1 %v8868_v31  ;;  %2920 = vmatprep.subr.bf16.mxu0 %v8874_v20  ;;  %12300 = vst [vmem:[#allocation30_spill] sm:$0xff] %v8886_v8  ;;  %v8892_v31 = vld [vmem:[%s11572_s3 + $0x88] ss:$16 sps:$4 sm:$0xff]   ;;  %v8898_v20 = vld [vmem:[%s11572_s3 + $0xa4] ss:$16 sps:$4 sm:$0xff]  }
 0x2d1   :  { %3006 = vmatprep.subr.bf16.mxu1 %v8880_v1  ;;  %12301 = vst [vmem:[#allocation6_spill] sm:$0xff] %v8892_v31  ;;  %12302 = vst [vmem:[#allocation56_spill] sm:$0xff] %v8898_v20  ;;  %v8904_v1 = vld [vmem:[%s11572_s3 + $0xac] ss:$16 sps:$4 sm:$0xff]  }
 0x2d2   :  { %12303 = vst [vmem:[#allocation57_spill] sm:$0xff] %v8904_v1 }
 0x2d3   :  { %2921 = vmatpush1.bf16.msra.mxu0 %v8886_v8  ;;  %v8910_v8 = vld [vmem:[%s11572_s3 + $0xa0] ss:$16 sps:$4 sm:$0xff]  }
 0x2d4   :  { %3007 = vmatpush1.bf16.msra.mxu1 %v8892_v31  ;;  %2922 = vmatprep.subr.bf16.mxu0 %v8898_v20  ;;  %12304 = vst [vmem:[#allocation58_spill] sm:$0xff] %v8910_v8  ;;  %v8916_v31 = vld [vmem:[%s11572_s3 + $0xa8] ss:$16 sps:$4 sm:$0xff]   ;;  %v8922_v20 = vld [vmem:[%s11572_s3 + $0xc4] ss:$16 sps:$4 sm:$0xff]  }
 0x2d5   :  { %3008 = vmatprep.subr.bf16.mxu1 %v8904_v1  ;;  %12305 = vst [vmem:[#allocation59_spill] sm:$0xff] %v8916_v31  ;;  %12306 = vst [vmem:[#allocation63_spill] sm:$0xff] %v8922_v20  ;;  %v8928_v1 = vld [vmem:[%s11572_s3 + $0xcc] ss:$16 sps:$4 sm:$0xff]  }
 0x2d7   :  { %2923 = vmatpush1.bf16.msra.mxu0 %v8910_v8  ;;  %v8934_v8 = vld [vmem:[%s11572_s3 + $0xc0] ss:$16 sps:$4 sm:$0xff]  }
 0x2d8   :  { %3009 = vmatpush1.bf16.msra.mxu1 %v8916_v31  ;;  %2924 = vmatprep.subr.bf16.mxu0 %v8922_v20  ;;  %v8940_v31 = vld [vmem:[%s11572_s3 + $0xc8] ss:$16 sps:$4 sm:$0xff]   ;;  %v8946_v20 = vld [vmem:[%s11572_s3 + $0xe4] ss:$16 sps:$4 sm:$0xff]  }
 0x2d9   :  { %3010 = vmatprep.subr.bf16.mxu1 %v8928_v1 }
 0x2db   :  { %2925 = vmatpush1.bf16.msra.mxu0 %v8934_v8 }
 0x2dc   :  { %3011 = vmatpush1.bf16.msra.mxu1 %v8940_v31  ;;  %2926 = vmatprep.subr.bf16.mxu0 %v8946_v20 }
 0x2dd   :  { %3012 = vmatprep.subr.bf16.mxu1 %v8004_v29  ;;  %v12307_v29 = vld [vmem:[#allocation31_spill] sm:$0xff] }
 0x2df   :  { %2927 = vmatpush1.bf16.msra.mxu0 %v8016_v55  ;;  %v12308_v55 = vld [vmem:[#allocation32_spill] sm:$0xff] }
 0x2e0   :  { %3013 = vmatpush1.bf16.msra.mxu1 %v8023_v56  ;;  %2928 = vmatprep.subr.bf16.mxu0 %v8028_v57  ;;  %v12309_v56 = vld [vmem:[#allocation8_spill] sm:$0xff]  ;;  %v12310_v57 = vld [vmem:[#allocation33_spill] sm:$0xff] }
 0x2e1   :  { %3014 = vmatprep.subr.bf16.mxu1 %v8035_v63  ;;  %v12311_v63 = vld [vmem:[#allocation34_spill] sm:$0xff] }
 0x2e3   :  { %2929 = vmatpush1.bf16.msra.mxu0 %v8041_v34  ;;  %v12312_v34 = vld [vmem:[#allocation35_spill] sm:$0xff] }
 0x2e4   :  { %3015 = vmatpush1.bf16.msra.mxu1 %v8048_v35  ;;  %2930 = vmatprep.subr.bf16.mxu0 %v8053_v45  ;;  %v12313_v35 = vld [vmem:[#allocation36_spill] sm:$0xff]  ;;  %v12314_v45 = vld [vmem:[#allocation38_spill] sm:$0xff] }
 0x2e5   :  { %3016 = vmatprep.subr.bf16.mxu1 %v8059_v39  ;;  %v12315_v39 = vld [vmem:[#allocation39_spill] sm:$0xff] }
 0x2e7   :  { %2931 = vmatpush1.bf16.msra.mxu0 %v8065_v41  ;;  %v12316_v41 = vld [vmem:[#allocation40_spill] sm:$0xff] }
 0x2e8   :  { %3017 = vmatpush1.bf16.msra.mxu1 %v8074_v43  ;;  %2932 = vmatprep.subr.bf16.mxu0 %v8079_v44  ;;  %v12317_v43 = vld [vmem:[#allocation41_spill] sm:$0xff]  ;;  %v12318_v44 = vld [vmem:[#allocation42_spill] sm:$0xff] }
 0x2e9   :  { %3018 = vmatprep.subr.bf16.mxu1 %v8085_v47  ;;  %v12319_v47 = vld [vmem:[#allocation43_spill] sm:$0xff] }
 0x2eb   :  { %2933 = vmatpush1.bf16.msra.mxu0 %v8091_v49  ;;  %v12320_v49 = vld [vmem:[#allocation44_spill] sm:$0xff] }
 0x2ec   :  { %3019 = vmatpush1.bf16.msra.mxu1 %v8098_v53  ;;  %2934 = vmatprep.subr.bf16.mxu0 %v12201_v18  ;;  %v12321_v53 = vld [vmem:[#allocation45_spill] sm:$0xff]  ;;  %v12323_v18 = vld [vmem:[#allocation47_spill] sm:$0xff] }
 0x2ed   :  { %3020 = vmatprep.subr.bf16.mxu1 %v12202_v19  ;;  %v12324_v19 = vld [vmem:[#allocation48_spill] sm:$0xff] }
 0x2ef   :  { %2935 = vmatpush1.bf16.msra.mxu0 %v12203_v22  ;;  %v12325_v22 = vld [vmem:[#allocation49_spill] sm:$0xff] }
 0x2f0   :  { %3021 = vmatpush1.bf16.msra.mxu1 %v12204_v23  ;;  %2936 = vmatprep.subr.bf16.mxu0 %v12205_v37  ;;  %v12326_v23 = vld [vmem:[#allocation50_spill] sm:$0xff]  ;;  %v12327_v37 = vld [vmem:[#allocation51_spill] sm:$0xff] }
 0x2f1   :  { %3022 = vmatprep.subr.bf16.mxu1 %v12206_v40 }
 0x2f3   :  { %2937 = vmatpush1.bf16.msra.mxu0 %v12207_v52  ;;  %v12328_v52 = vld [vmem:[#allocation52_spill] sm:$0xff] }
 0x2f4   :  { %3023 = vmatpush1.bf16.msra.mxu1 %v12208_v21  ;;  %2938 = vmatprep.subr.bf16.mxu0 %v12209_v24 }
 0x2f5   :  { %3024 = vmatprep.subr.bf16.mxu1 %v12210_v27 }
 0x2f7   :  { %2939 = vmatpush1.bf16.msra.mxu0 %v12211_v26 }
 0x2f8   :  { %3025 = vmatpush1.bf16.msra.mxu1 %v12212_v60  ;;  %2940 = vmatprep.subr.bf16.mxu0 %v12213_v48  ;;  %v12329_v48 = vld [vmem:[#allocation53_spill] sm:$0xff] }
 0x2f9   :  { %3026 = vmatprep.subr.bf16.mxu1 %v12214_v6 }
 0x2fb   :  { %2941 = vmatpush1.bf16.msra.mxu0 %v12215_v62 }
 0x2fc   :  { %3027 = vmatpush1.bf16.msra.mxu1 %v12216_v13  ;;  %2942 = vmatprep.subr.bf16.mxu0 %v12217_v2  ;;  %v12330_v13 = vld [vmem:[#allocation54_spill] sm:$0xff] }
 0x2fd   :  { %3028 = vmatprep.subr.bf16.mxu1 %v12218_v10  ;;  %v12331_v10 = vld [vmem:[#allocation55_spill] sm:$0xff] }
 0x2ff   :  { %2943 = vmatpush1.bf16.msra.mxu0 %v12219_v14  ;;  %v9016_v14 = vld [vmem:[%s11573_s4] ss:$0 sm:$0xff] }
 0x300   :  { %3029 = vmatpush1.bf16.msra.mxu1 %v12220_v15  ;;  %2955 = vmatprep.subr.bf16.mxu0 %v12221_v59 }
 0x301   :  { %3041 = vmatprep.subr.bf16.mxu1 %v12307_v29 }
 0x302   :  { %2945 = vmatmul.mubr.bf16.vlgmr.msra.gmra.mrb[64].mxu0 %v12283_v9 }
 0x303   :  { %3031 = vmatmul.mubr.bf16.vlgmr.msra.gmra.mrb[64].mxu1 %v12283_v9  ;;  %2956 = vmatpush1.bf16.msra.mxu0 %v12308_v55  ;;  %v12322_v9 = vld [vmem:[#allocation46_spill] sm:$0xff] }
 0x304   :  { %2987 = vmatprep.mubr.bf16.mxu0 %v12309_v56  ;;  %3042 = vmatpush1.bf16.msra.mxu1 %v12310_v57 }
 0x305   :  { %3073 = vmatprep.mubr.bf16.mxu1 %v12309_v56  ;;  %2957 = vmatprep.subr.bf16.mxu0 %v12311_v63 }
 0x306   :  { %3043 = vmatprep.subr.bf16.mxu1 %v12312_v34  ;;  %v12332_v34 = vld [vmem:[#allocation60_spill] sm:$0xff] }
 0x307   :  { %2958 = vmatpush1.bf16.msra.mxu0 %v12313_v35 }
 0x308   :  { %3044 = vmatpush1.bf16.msra.mxu1 %v12314_v45  ;;  %2959 = vmatprep.subr.bf16.mxu0 %v12315_v39  ;;  %v12333_v39 = vld [vmem:[#allocation61_spill] sm:$0xff] }
 0x309   :  { %3045 = vmatprep.subr.bf16.mxu1 %v12316_v41 }
 0x30b   :  { %2960 = vmatpush1.bf16.msra.mxu0 %v12317_v43 }
 0x30c   :  { %3046 = vmatpush1.bf16.msra.mxu1 %v12318_v44  ;;  %2961 = vmatprep.subr.bf16.mxu0 %v12319_v47  ;;  %v12337_v44 = vld [vmem:[#allocation69_spill] sm:$0xff]  ;;  %v12338_v47 = vld [vmem:[#allocation71_spill] sm:$0xff] }
 0x30d   :  { %3047 = vmatprep.subr.bf16.mxu1 %v12320_v49  ;;  %v12339_v49 = vld [vmem:[#allocation72_spill] sm:$0xff] }
 0x30f   :  { %2962 = vmatpush1.bf16.msra.mxu0 %v12321_v53  ;;  %v12342_v53 = vld [vmem:[#allocation75_spill] sm:$0xff] }
 0x310   :  { %3048 = vmatpush1.bf16.msra.mxu1 %v12322_v9  ;;  %2963 = vmatprep.subr.bf16.mxu0 %v12323_v18  ;;  %v12360_v9 = vld [vmem:[#allocation22_spill] sm:$0xff]  ;;  %v12361_v18 = vld [vmem:[#allocation23_spill] sm:$0xff] }
 0x311   :  { %3049 = vmatprep.subr.bf16.mxu1 %v12324_v19  ;;  %v12362_v19 = vld [vmem:[#allocation24_spill] sm:$0xff] }
 0x313   :  { %2964 = vmatpush1.bf16.msra.mxu0 %v12325_v22  ;;  %v12363_v22 = vld [vmem:[#allocation25_spill] sm:$0xff] }
 0x314   :  { %3050 = vmatpush1.bf16.msra.mxu1 %v12326_v23  ;;  %2965 = vmatprep.subr.bf16.mxu0 %v12327_v37  ;;  %v12365_v23 = vld [vmem:[#allocation27_spill] sm:$0xff]  ;;  %v12366_v37 = vld [vmem:[#allocation28_spill] sm:$0xff] }
 0x315   :  { %v2609_v40 = vpop.f32.mrb[56].mxu0  ;;  %3051 = vmatprep.subr.bf16.mxu1 %v12328_v52  ;;  %v12368_v52 = vld [vmem:[#allocation30_spill] sm:$0xff] }
 0x316   :  { %v2695_v21 = vpop.f32.mrb[56].mxu1  ;;  %v2611_v24 = vpop.f32.mrb[57].mxu0 }
 0x317   :  { %v2704_v27 = vmax.f32 %v2609_v40, %v2611_v24  ;;  %v2697_v26 = vpop.f32.mrb[57].mxu1  ;;  %v2613_v60 = vpop.f32.mrb[58].mxu0  ;;  %2966 = vmatpush1.bf16.msra.mxu0 %v12329_v48  ;;  %v12367_v40 = vld [vmem:[#allocation29_spill] sm:$0xff]  ;;  %v12370_v24 = vld [vmem:[#allocation56_spill] sm:$0xff]  ;;  %v12374_v48 = vld [vmem:[#allocation63_spill] sm:$0xff] }
 0x318   :  { %v2706_v6 = vmax.f32 %v2695_v21, %v2697_v26  ;;  %v2699_v62 = vpop.f32.mrb[58].mxu1  ;;  %3052 = vmatpush1.bf16.msra.mxu1 %v12330_v13  ;;  %v2615_v2 = vpop.f32.mrb[59].mxu0  ;;  %2967 = vmatprep.subr.bf16.mxu0 %v12331_v10  ;;  %v12369_v21 = vld [vmem:[#allocation6_spill] sm:$0xff] }
 0x319   :  { %v2705_v15 = vmax.f32 %v2613_v60, %v2615_v2  ;;  %v2701_v59 = vpop.f32.mrb[59].mxu1  ;;  %3053 = vmatprep.subr.bf16.mxu1 %v12248_v46  ;;  %v12334_v46 = vld [vmem:[#allocation62_spill] sm:$0xff]  ;;  %v12373_v60 = vld [vmem:[#allocation59_spill] sm:$0xff] }
 0x31a   :  { %v2708_v29 = vmax.f32 %v2704_v27, %v2706_v6  ;;  %v2707_v55 = vmax.f32 %v2699_v62, %v2701_v59  ;;  %v12371_v27 = vld [vmem:[#allocation57_spill] sm:$0xff]  ;;  %v12372_v26 = vld [vmem:[#allocation58_spill] sm:$0xff] }
 0x31b   :  { %2968 = vmatpush1.bf16.msra.mxu0 %v12249_v7  ;;  %v9097_v6 = vld [vmem:[%s11572_s3 + $0xec] ss:$16 sps:$4 sm:$0xff]   ;;  %v9103_v62 = vld [vmem:[%s11572_s3 + $0xe0] ss:$16 sps:$4 sm:$0xff]   ;;  %v9109_v13 = vld [vmem:[%s11572_s3 + $0xe8] ss:$16 sps:$4 sm:$0xff]  }
 0x31c   :  { %v2710_v57 = vadd.f32 %v9016_v14, %v2708_v29  ;;  %v2709_v63 = vmax.f32 %v2705_v15, %v2707_v55  ;;  %3054 = vmatpush1.bf16.msra.mxu1 %v12250_v12  ;;  %2969 = vmatprep.subr.bf16.mxu0 %v12251_v3  ;;  %v12336_v3 = vld [vmem:[#allocation68_spill] sm:$0xff]  ;;  %v9115_v2 = vld [vmem:[%s11572_s3 + $0x104] ss:$16 sps:$4 sm:$0xff]   ;;  %v9127_v15 = vld [vmem:[%s11572_s3 + $0x100] ss:$16 sps:$4 sm:$0xff]  }
 0x31d   :  { %3055 = vmatprep.subr.bf16.mxu1 %v12332_v34  ;;  %v9121_v10 = vld [vmem:[%s11572_s3 + $0x10c] ss:$16 sps:$4 sm:$0xff]   ;;  %v9133_v59 = vld [vmem:[%s11572_s3 + $0x108] ss:$16 sps:$4 sm:$0xff]   ;;  %v9139_v29 = vld [vmem:[%s11572_s3 + $0x124] ss:$16 sps:$4 sm:$0xff]  }
 0x31e   :  { %v2712_v35 = vmul.f32 0.01, %v2710_v57  ;;  %v2711_v45 = vadd.f32 %v9016_v14, %v2709_v63  ;;  %12375 = vst [vmem:[#allocation65_spill] sm:$0xff] %v9133_v59  ;;  %12376 = vst [vmem:[#allocation66_spill] sm:$0xff] %v9139_v29  ;;  %v9145_v55 = vld [vmem:[%s11572_s3 + $0x12c] ss:$16 sps:$4 sm:$0xff]  }
 0x31f   :  { %2970 = vmatpush1.bf16.msra.mxu0 %v12333_v39  ;;  %12377 = vst [vmem:[#allocation67_spill] sm:$0xff] %v9145_v55  ;;  %v9157_v63 = vld [vmem:[%s11572_s3 + $0x128] ss:$16 sps:$4 sm:$0xff]   ;;  %v9163_v34 = vld [vmem:[%s11572_s3 + $0x144] ss:$16 sps:$4 sm:$0xff]  }
 0x320   :  { %v2713_v41 = vmul.f32 0.01, %v2711_v45  ;;  %3056 = vmatpush1.bf16.msra.mxu1 %v12334_v46  ;;  %2971 = vmatprep.subr.bf16.mxu0 %v12255_v28  ;;  %v2714_v7 = vmax.f32 %v2710_v57, %v2712_v35  ;;  %v12340_v28 = vld [vmem:[#allocation73_spill] sm:$0xff]  ;;  %12379 = vst [vmem:[#allocation79_spill] sm:$0xff] %v9157_v63  ;;  %12380 = vst [vmem:[#allocation80_spill] sm:$0xff] %v9163_v34 }
 0x321   :  { %3057 = vmatprep.subr.bf16.mxu1 %v12256_v50  ;;  %v12341_v50 = vld [vmem:[#allocation74_spill] sm:$0xff]  ;;  %v9151_v57 = vld [vmem:[%s11572_s3 + $0x120] ss:$16 sps:$4 sm:$0xff]  }
 0x322   :  { %v2715_v43 = vmax.f32 %v2711_v45, %v2713_v41  ;;  %12378 = vst [vmem:[#allocation78_spill] sm:$0xff] %v9151_v57  ;;  %v9169_v35 = vld [vmem:[%s11572_s3 + $0x14c] ss:$16 sps:$4 sm:$0xff]   ;;  %v9175_v45 = vld [vmem:[%s11572_s3 + $0x140] ss:$16 sps:$4 sm:$0xff]  }
 0x323   :  { %2972 = vmatpush1.bf16.msra.mxu0 %v12257_v54  ;;  %v12343_v54 = vld [vmem:[#allocation76_spill] sm:$0xff]  ;;  %12381 = vst [vmem:[#allocation81_spill] sm:$0xff] %v9169_v35  ;;  %12382 = vst [vmem:[#allocation82_spill] sm:$0xff] %v9175_v45  ;;  %v9187_v41 = vld [vmem:[%s11572_s3 + $0x164] ss:$16 sps:$4 sm:$0xff]  }
 0x324   :  { %3058 = vmatpush1.bf16.msra.mxu1 %v12259_v16  ;;  %2973 = vmatprep.subr.bf16.mxu0 %v12260_v30  ;;  %v9032_v12 = vpack.c.bf16 %v2715_v43, %v2714_v7  ;;  %v12344_v16 = vld [vmem:[#allocation77_spill] sm:$0xff]  ;;  %v12345_v30 = vld [vmem:[#allocation87_spill] sm:$0xff]  ;;  %v9181_v39 = vld [vmem:[%s11572_s3 + $0x148] ss:$16 sps:$4 sm:$0xff]   ;;  %12384 = vst [vmem:[#allocation84_spill] sm:$0xff] %v9187_v41 }
 0x325   :  { %3059 = vmatprep.subr.bf16.mxu1 %v12336_v3  ;;  %12383 = vst [vmem:[#allocation83_spill] sm:$0xff] %v9181_v39  ;;  %v9193_v46 = vld [vmem:[%s11572_s3 + $0x16c] ss:$16 sps:$4 sm:$0xff]   ;;  %v9199_v7 = vld [vmem:[%s11572_s3 + $0x160] ss:$16 sps:$4 sm:$0xff]  }
 0x326   :  { %12335 = vst [vmem:[#allocation64_spill] sm:$0xff] %v9032_v12  ;;  %12385 = vst [vmem:[#allocation85_spill] sm:$0xff] %v9193_v46  ;;  %v9205_v43 = vld [vmem:[%s11572_s3 + $0x168] ss:$16 sps:$4 sm:$0xff]   ;;  %v9211_v3 = vld [vmem:[%s11572_s3 + $0x184] ss:$16 sps:$4 sm:$0xff]  }
 0x327   :  { %2974 = vmatpush1.bf16.msra.mxu0 %v12337_v44  ;;  %12386 = vst [vmem:[#allocation86_spill] sm:$0xff] %v9199_v7  ;;  %12387 = vst [vmem:[#allocation88_spill] sm:$0xff] %v9205_v43  ;;  %v9217_v44 = vld [vmem:[%s11572_s3 + $0x18c] ss:$16 sps:$4 sm:$0xff]  }
 0x328   :  { %3060 = vmatpush1.bf16.msra.mxu1 %v12338_v47  ;;  %2975 = vmatprep.subr.bf16.mxu0 %v12339_v49  ;;  %12388 = vst [vmem:[#allocation5_spill] sm:$0xff] %v9211_v3  ;;  %12389 = vst [vmem:[#allocation31_spill] sm:$0xff] %v9217_v44  ;;  %v9223_v47 = vld [vmem:[%s11572_s3 + $0x180] ss:$16 sps:$4 sm:$0xff]   ;;  %v9229_v49 = vld [vmem:[%s11572_s3 + $0x188] ss:$16 sps:$4 sm:$0xff]  }
 0x329   :  { %3061 = vmatprep.subr.bf16.mxu1 %v12340_v28  ;;  %12390 = vst [vmem:[#allocation32_spill] sm:$0xff] %v9223_v47  ;;  %12391 = vst [vmem:[#allocation8_spill] sm:$0xff] %v9229_v49  ;;  %v9235_v28 = vld [vmem:[%s11572_s3 + $0x1a4] ss:$16 sps:$4 sm:$0xff]   ;;  %v9289_v12 = vld [vmem:[%s11572_s3 + $0x1ec] ss:$16 sps:$4 sm:$0xff]  }
 0x32a   :  { %12392 = vst [vmem:[#allocation33_spill] sm:$0xff] %v9235_v28  ;;  %12401 = vst [vmem:[#allocation43_spill] sm:$0xff] %v9289_v12 }
 0x32b   :  { %2976 = vmatpush1.bf16.msra.mxu0 %v12341_v50  ;;  %v9241_v50 = vld [vmem:[%s11572_s3 + $0x1ac] ss:$16 sps:$4 sm:$0xff]  }
 0x32c   :  { %3062 = vmatpush1.bf16.msra.mxu1 %v12342_v53  ;;  %2977 = vmatprep.subr.bf16.mxu0 %v12343_v54  ;;  %12393 = vst [vmem:[#allocation34_spill] sm:$0xff] %v9241_v50  ;;  %v9247_v53 = vld [vmem:[%s11572_s3 + $0x1a0] ss:$16 sps:$4 sm:$0xff]   ;;  %v9253_v54 = vld [vmem:[%s11572_s3 + $0x1a8] ss:$16 sps:$4 sm:$0xff]  }
 0x32d   :  { %3063 = vmatprep.subr.bf16.mxu1 %v12344_v16  ;;  %12394 = vst [vmem:[#allocation35_spill] sm:$0xff] %v9247_v53  ;;  %12395 = vst [vmem:[#allocation36_spill] sm:$0xff] %v9253_v54  ;;  %v9259_v16 = vld [vmem:[%s11572_s3 + $0x1c4] ss:$16 sps:$4 sm:$0xff]  }
 0x32e   :  { %12396 = vst [vmem:[#allocation38_spill] sm:$0xff] %v9259_v16 }
 0x32f   :  { %2978 = vmatpush1.bf16.msra.mxu0 %v12270_v5  ;;  %v12359_v5 = vld [vmem:[#allocation21_spill] sm:$0xff] }
 0x330   :  { %3064 = vmatpush1.bf16.msra.mxu1 %v12271_v11  ;;  %2979 = vmatprep.subr.bf16.mxu0 %v12272_v25  ;;  %v12346_v11 = vld [vmem:[#allocation89_spill] sm:$0xff] }
 0x331   :  { %3065 = vmatprep.subr.bf16.mxu1 %v12273_v36  ;;  %v12347_v36 = vld [vmem:[#allocation90_spill] sm:$0xff]  ;;  %v12350_v25 = vld [vmem:[#allocation13_spill] sm:$0xff] }
 0x333   :  { %2980 = vmatpush1.bf16.msra.mxu0 %v12274_v51  ;;  %v12348_v51 = vld [vmem:[#allocation91_spill] sm:$0xff] }
 0x334   :  { %3066 = vmatpush1.bf16.msra.mxu1 %v12275_v17  ;;  %2981 = vmatprep.subr.bf16.mxu0 %v12276_v4  ;;  %v12349_v17 = vld [vmem:[#allocation12_spill] sm:$0xff]  ;;  %v12351_v4 = vld [vmem:[#allocation7_spill] sm:$0xff] }
 0x335   :  { %3067 = vmatprep.subr.bf16.mxu1 %v12277_v61  ;;  %v12356_v61 = vld [vmem:[#allocation18_spill] sm:$0xff] }
 0x337   :  { %2982 = vmatpush1.bf16.msra.mxu0 %v12278_v32  ;;  %v12357_v32 = vld [vmem:[#allocation19_spill] sm:$0xff] }
 0x338   :  { %3068 = vmatpush1.bf16.msra.mxu1 %v12345_v30  ;;  %2983 = vmatprep.subr.bf16.mxu0 %v12280_v0  ;;  %v12358_v0 = vld [vmem:[#allocation20_spill] sm:$0xff] }
 0x339   :  { %3069 = vmatprep.subr.bf16.mxu1 %v8577_v33  ;;  %v12352_v33 = vld [vmem:[#allocation14_spill] sm:$0xff] }
 0x33a   :  { %v9265_v30 = vld [vmem:[%s11572_s3 + $0x1cc] ss:$16 sps:$4 sm:$0xff]  }
 0x33b   :  { %2984 = vmatpush1.bf16.msra.mxu0 %v12346_v11  ;;  %12397 = vst [vmem:[#allocation39_spill] sm:$0xff] %v9265_v30  ;;  %v9271_v11 = vld [vmem:[%s11572_s3 + $0x1c0] ss:$16 sps:$4 sm:$0xff]  }
 0x33c   :  { %3070 = vmatpush1.bf16.msra.mxu1 %v8590_v58  ;;  %2985 = vmatprep.subr.bf16.mxu0 %v12347_v36  ;;  %v12353_v58 = vld [vmem:[#allocation15_spill] sm:$0xff]  ;;  %12398 = vst [vmem:[#allocation40_spill] sm:$0xff] %v9271_v11  ;;  %v9277_v36 = vld [vmem:[%s11572_s3 + $0x1c8] ss:$16 sps:$4 sm:$0xff]  }
 0x33d   :  { %3071 = vmatprep.subr.bf16.mxu1 %v8601_v38  ;;  %v12354_v38 = vld [vmem:[#allocation16_spill] sm:$0xff]  ;;  %12399 = vst [vmem:[#allocation41_spill] sm:$0xff] %v9277_v36 }
 0x33f   :  { %2986 = vmatpush1.bf16.msra.mxu0 %v8608_v42  ;;  %v12355_v42 = vld [vmem:[#allocation17_spill] sm:$0xff] }
 0x340   :  { %3072 = vmatpush1.bf16.msra.mxu1 %v12348_v51  ;;  %3102 = vmatprep.subr.bf16.mxu0 %v12349_v17  ;;  %v9283_v51 = vld [vmem:[%s11572_s3 + $0x1e4] ss:$16 sps:$4 sm:$0xff]  }
 0x341   :  { %3188 = vmatprep.subr.bf16.mxu1 %v12350_v25  ;;  %12400 = vst [vmem:[#allocation42_spill] sm:$0xff] %v9283_v51 }
 0x342   :  { %2988 = vmatmul.mubr.bf16.vlgmr.msra.gmra.mrb[64].mxu0 %v12351_v4 }
 0x343   :  { %3074 = vmatmul.mubr.bf16.vlgmr.msra.gmra.mrb[64].mxu1 %v12351_v4  ;;  %3103 = vmatpush1.bf16.msra.mxu0 %v12352_v33 }
 0x344   :  { %3134 = vmatprep.mubr.bf16.mxu0 %v12309_v56  ;;  %3189 = vmatpush1.bf16.msra.mxu1 %v12353_v58 }
 0x345   :  { %3220 = vmatprep.mubr.bf16.mxu1 %v12309_v56  ;;  %3104 = vmatprep.subr.bf16.mxu0 %v12354_v38  ;;  %v12364_v56 = vld [vmem:[#allocation26_spill] sm:$0xff] }
 0x346   :  { %3190 = vmatprep.subr.bf16.mxu1 %v12355_v42 }
 0x347   :  { %3105 = vmatpush1.bf16.msra.mxu0 %v12356_v61 }
 0x348   :  { %3191 = vmatpush1.bf16.msra.mxu1 %v12357_v32  ;;  %3106 = vmatprep.subr.bf16.mxu0 %v12358_v0 }
 0x349   :  { %3192 = vmatprep.subr.bf16.mxu1 %v12359_v5 }
 0x34b   :  { %3107 = vmatpush1.bf16.msra.mxu0 %v12360_v9 }
 0x34c   :  { %3193 = vmatpush1.bf16.msra.mxu1 %v12361_v18  ;;  %3108 = vmatprep.subr.bf16.mxu0 %v12362_v19 }
 0x34d   :  { %3194 = vmatprep.subr.bf16.mxu1 %v12363_v22 }
 0x34f   :  { %3109 = vmatpush1.bf16.msra.mxu0 %v12364_v56 }
 0x350   :  { %3195 = vmatpush1.bf16.msra.mxu1 %v12365_v23  ;;  %3110 = vmatprep.subr.bf16.mxu0 %v12366_v37 }
 0x351   :  { %3196 = vmatprep.subr.bf16.mxu1 %v12367_v40 }
 0x353   :  { %3111 = vmatpush1.bf16.msra.mxu0 %v12368_v52 }
 0x354   :  { %3197 = vmatpush1.bf16.msra.mxu1 %v12369_v21  ;;  %3112 = vmatprep.subr.bf16.mxu0 %v12370_v24 }
 0x355   :  { %3198 = vmatprep.subr.bf16.mxu1 %v12371_v27 }
 0x357   :  { %3113 = vmatpush1.bf16.msra.mxu0 %v12372_v26 }
 0x358   :  { %3199 = vmatpush1.bf16.msra.mxu1 %v12373_v60  ;;  %3114 = vmatprep.subr.bf16.mxu0 %v12374_v48 }
 0x359   :  { %3200 = vmatprep.subr.bf16.mxu1 %v8928_v1 }
 0x35b   :  { %3115 = vmatpush1.bf16.msra.mxu0 %v8934_v8 }
 0x35c   :  { %3201 = vmatpush1.bf16.msra.mxu1 %v8940_v31  ;;  %3116 = vmatprep.subr.bf16.mxu0 %v8946_v20 }
 0x35d   :  { %3202 = vmatprep.subr.bf16.mxu1 %v9097_v6 }
 0x35f   :  { %3117 = vmatpush1.bf16.msra.mxu0 %v9103_v62 }
 0x360   :  { %3203 = vmatpush1.bf16.msra.mxu1 %v9109_v13  ;;  %3118 = vmatprep.subr.bf16.mxu0 %v9115_v2 }
 0x361   :  { %3204 = vmatprep.subr.bf16.mxu1 %v9121_v10 }
 0x363   :  { %3119 = vmatpush1.bf16.msra.mxu0 %v9127_v15 }
 0x364   :  { %3205 = vmatpush1.bf16.msra.mxu1 %v9133_v59  ;;  %3120 = vmatprep.subr.bf16.mxu0 %v9139_v29 }
 0x365   :  { %3206 = vmatprep.subr.bf16.mxu1 %v9145_v55 }
 0x367   :  { %3121 = vmatpush1.bf16.msra.mxu0 %v9151_v57 }
 0x368   :  { %3207 = vmatpush1.bf16.msra.mxu1 %v9157_v63  ;;  %3122 = vmatprep.subr.bf16.mxu0 %v9163_v34 }
 0x369   :  { %3208 = vmatprep.subr.bf16.mxu1 %v9169_v35 }
 0x36b   :  { %3123 = vmatpush1.bf16.msra.mxu0 %v9175_v45 }
 0x36c   :  { %3209 = vmatpush1.bf16.msra.mxu1 %v9181_v39  ;;  %3124 = vmatprep.subr.bf16.mxu0 %v9187_v41 }
 0x36d   :  { %3210 = vmatprep.subr.bf16.mxu1 %v9193_v46 }
 0x36f   :  { %3125 = vmatpush1.bf16.msra.mxu0 %v9199_v7 }
 0x370   :  { %3211 = vmatpush1.bf16.msra.mxu1 %v9205_v43  ;;  %3126 = vmatprep.subr.bf16.mxu0 %v9211_v3 }
 0x371   :  { %3212 = vmatprep.subr.bf16.mxu1 %v9217_v44 }
 0x373   :  { %3127 = vmatpush1.bf16.msra.mxu0 %v9223_v47 }
 0x374   :  { %3213 = vmatpush1.bf16.msra.mxu1 %v9229_v49  ;;  %3128 = vmatprep.subr.bf16.mxu0 %v9235_v28  ;;  %v9449_v49 = vld [vmem:[%s11572_s3 + $0x2a8] ss:$16 sps:$4 sm:$0xff]  }
 0x375   :  { %3214 = vmatprep.subr.bf16.mxu1 %v9241_v50  ;;  %v9443_v50 = vld [vmem:[%s11572_s3 + $0x2a0] ss:$16 sps:$4 sm:$0xff]   ;;  %12428 = vst [vmem:[#allocation89_spill] sm:$0xff] %v9449_v49 }
 0x376   :  { %12427 = vst [vmem:[#allocation87_spill] sm:$0xff] %v9443_v50 }
 0x377   :  { %3129 = vmatpush1.bf16.msra.mxu0 %v9247_v53 }
 0x378   :  { %3215 = vmatpush1.bf16.msra.mxu1 %v9253_v54  ;;  %3130 = vmatprep.subr.bf16.mxu0 %v9259_v16 }
 0x379   :  { %3216 = vmatprep.subr.bf16.mxu1 %v9265_v30  ;;  %v9437_v30 = vld [vmem:[%s11572_s3 + $0x2ac] ss:$16 sps:$4 sm:$0xff]  }
 0x37a   :  { %12426 = vst [vmem:[#allocation77_spill] sm:$0xff] %v9437_v30 }
 0x37b   :  { %3131 = vmatpush1.bf16.msra.mxu0 %v9271_v11  ;;  %v9295_v11 = vld [vmem:[%s11572_s3 + $0x1e0] ss:$16 sps:$4 sm:$0xff]  }
 0x37c   :  { %3217 = vmatpush1.bf16.msra.mxu1 %v9277_v36  ;;  %3132 = vmatprep.subr.bf16.mxu0 %v9283_v51  ;;  %12402 = vst [vmem:[#allocation44_spill] sm:$0xff] %v9295_v11  ;;  %v9301_v36 = vld [vmem:[%s11572_s3 + $0x1e8] ss:$16 sps:$4 sm:$0xff]   ;;  %v9307_v51 = vld [vmem:[%s11572_s3 + $0x204] ss:$16 sps:$4 sm:$0xff]  }
 0x37d   :  { %3218 = vmatprep.subr.bf16.mxu1 %v9289_v12  ;;  %12403 = vst [vmem:[#allocation45_spill] sm:$0xff] %v9301_v36  ;;  %12404 = vst [vmem:[#allocation46_spill] sm:$0xff] %v9307_v51  ;;  %v9313_v12 = vld [vmem:[%s11572_s3 + $0x20c] ss:$16 sps:$4 sm:$0xff]  }
 0x37e   :  { %12405 = vst [vmem:[#allocation47_spill] sm:$0xff] %v9313_v12 }
 0x37f   :  { %3133 = vmatpush1.bf16.msra.mxu0 %v9295_v11  ;;  %v12407_v11 = vld [vmem:[#allocation37_spill] sm:$0xff] }
 0x380   :  { %3219 = vmatpush1.bf16.msra.mxu1 %v9301_v36  ;;  %3145 = vmatprep.subr.bf16.mxu0 %v9307_v51  ;;  %v9321_v36 = vld [vmem:[%s11572_s3 + $0x200] ss:$16 sps:$4 sm:$0xff]   ;;  %v9328_v51 = vld [vmem:[%s11572_s3 + $0x208] ss:$16 sps:$4 sm:$0xff]  }
 0x381   :  { %3231 = vmatprep.subr.bf16.mxu1 %v9313_v12  ;;  %12406 = vst [vmem:[#allocation48_spill] sm:$0xff] %v9321_v36  ;;  %12408 = vst [vmem:[#allocation49_spill] sm:$0xff] %v9328_v51  ;;  %v9353_v12 = vld [vmem:[%s11572_s3 + $0x228] ss:$16 sps:$4 sm:$0xff]  }
 0x382   :  { %3135 = vmatmul.mubr.bf16.vlgmr.msra.gmra.mrb[68].mxu0 %v12351_v4  ;;  %12412 = vst [vmem:[#allocation53_spill] sm:$0xff] %v9353_v12 }
 0x383   :  { %3221 = vmatmul.mubr.bf16.vlgmr.msra.gmra.mrb[68].mxu1 %v12351_v4  ;;  %3146 = vmatpush1.bf16.msra.mxu0 %v9321_v36  ;;  %v9335_v4 = vld [vmem:[%s11572_s3 + $0x224] ss:$16 sps:$4 sm:$0xff]   ;;  %v9341_v36 = vld [vmem:[%s11572_s3 + $0x22c] ss:$16 sps:$4 sm:$0xff]  }
 0x384   :  { %3177 = vmatprep.mubr.bf16.mxu0 %v12407_v11  ;;  %3232 = vmatpush1.bf16.msra.mxu1 %v9328_v51  ;;  %12409 = vst [vmem:[#allocation50_spill] sm:$0xff] %v9335_v4  ;;  %12410 = vst [vmem:[#allocation51_spill] sm:$0xff] %v9341_v36  ;;  %v9347_v51 = vld [vmem:[%s11572_s3 + $0x220] ss:$16 sps:$4 sm:$0xff]  }
 0x385   :  { %3263 = vmatprep.mubr.bf16.mxu1 %v12407_v11  ;;  %3147 = vmatprep.subr.bf16.mxu0 %v9335_v4  ;;  %12411 = vst [vmem:[#allocation52_spill] sm:$0xff] %v9347_v51  ;;  %v9359_v4 = vld [vmem:[%s11572_s3 + $0x244] ss:$16 sps:$4 sm:$0xff]  }
 0x386   :  { %3233 = vmatprep.subr.bf16.mxu1 %v9341_v36  ;;  %12413 = vst [vmem:[#allocation54_spill] sm:$0xff] %v9359_v4  ;;  %v9365_v36 = vld [vmem:[%s11572_s3 + $0x24c] ss:$16 sps:$4 sm:$0xff]  }
 0x387   :  { %3148 = vmatpush1.bf16.msra.mxu0 %v9347_v51  ;;  %12414 = vst [vmem:[#allocation55_spill] sm:$0xff] %v9365_v36  ;;  %v9371_v51 = vld [vmem:[%s11572_s3 + $0x240] ss:$16 sps:$4 sm:$0xff]  }
 0x388   :  { %3234 = vmatpush1.bf16.msra.mxu1 %v9353_v12  ;;  %3149 = vmatprep.subr.bf16.mxu0 %v9359_v4  ;;  %12415 = vst [vmem:[#allocation60_spill] sm:$0xff] %v9371_v51  ;;  %v9377_v12 = vld [vmem:[%s11572_s3 + $0x248] ss:$16 sps:$4 sm:$0xff]   ;;  %v9383_v4 = vld [vmem:[%s11572_s3 + $0x264] ss:$16 sps:$4 sm:$0xff]  }
 0x389   :  { %3235 = vmatprep.subr.bf16.mxu1 %v9365_v36  ;;  %12416 = vst [vmem:[#allocation61_spill] sm:$0xff] %v9377_v12  ;;  %12417 = vst [vmem:[#allocation62_spill] sm:$0xff] %v9383_v4  ;;  %v9389_v36 = vld [vmem:[%s11572_s3 + $0x26c] ss:$16 sps:$4 sm:$0xff]  }
 0x38a   :  { %12418 = vst [vmem:[#allocation68_spill] sm:$0xff] %v9389_v36 }
 0x38b   :  { %3150 = vmatpush1.bf16.msra.mxu0 %v9371_v51  ;;  %v9395_v51 = vld [vmem:[%s11572_s3 + $0x260] ss:$16 sps:$4 sm:$0xff]  }
 0x38c   :  { %3236 = vmatpush1.bf16.msra.mxu1 %v9377_v12  ;;  %3151 = vmatprep.subr.bf16.mxu0 %v9383_v4  ;;  %12419 = vst [vmem:[#allocation69_spill] sm:$0xff] %v9395_v51  ;;  %v9401_v12 = vld [vmem:[%s11572_s3 + $0x268] ss:$16 sps:$4 sm:$0xff]   ;;  %v9407_v4 = vld [vmem:[%s11572_s3 + $0x284] ss:$16 sps:$4 sm:$0xff]  }
 0x38d   :  { %3237 = vmatprep.subr.bf16.mxu1 %v9389_v36  ;;  %12420 = vst [vmem:[#allocation71_spill] sm:$0xff] %v9401_v12  ;;  %12421 = vst [vmem:[#allocation72_spill] sm:$0xff] %v9407_v4  ;;  %v9413_v36 = vld [vmem:[%s11572_s3 + $0x28c] ss:$16 sps:$4 sm:$0xff]  }
 0x38e   :  { %12422 = vst [vmem:[#allocation73_spill] sm:$0xff] %v9413_v36 }
 0x38f   :  { %3152 = vmatpush1.bf16.msra.mxu0 %v9395_v51  ;;  %v9419_v51 = vld [vmem:[%s11572_s3 + $0x280] ss:$16 sps:$4 sm:$0xff]  }
 0x390   :  { %3238 = vmatpush1.bf16.msra.mxu1 %v9401_v12  ;;  %3153 = vmatprep.subr.bf16.mxu0 %v9407_v4  ;;  %12423 = vst [vmem:[#allocation74_spill] sm:$0xff] %v9419_v51  ;;  %v9425_v12 = vld [vmem:[%s11572_s3 + $0x288] ss:$16 sps:$4 sm:$0xff]   ;;  %v9431_v4 = vld [vmem:[%s11572_s3 + $0x2a4] ss:$16 sps:$4 sm:$0xff]  }
 0x391   :  { %3239 = vmatprep.subr.bf16.mxu1 %v9413_v36  ;;  %12424 = vst [vmem:[#allocation75_spill] sm:$0xff] %v9425_v12  ;;  %12425 = vst [vmem:[#allocation76_spill] sm:$0xff] %v9431_v4 }
 0x393   :  { %3154 = vmatpush1.bf16.msra.mxu0 %v9419_v51 }
 0x394   :  { %3240 = vmatpush1.bf16.msra.mxu1 %v9425_v12  ;;  %3155 = vmatprep.subr.bf16.mxu0 %v9431_v4 }
 0x395   :  { %v2799_v36 = vpop.f32.mrb[60].mxu0  ;;  %3241 = vmatprep.subr.bf16.mxu1 %v9437_v30 }
 0x396   :  { %v2885_v51 = vpop.f32.mrb[60].mxu1  ;;  %v2801_v16 = vpop.f32.mrb[61].mxu0 }
 0x397   :  { %v2894_v54 = vmax.f32 %v2799_v36, %v2801_v16  ;;  %v2887_v53 = vpop.f32.mrb[61].mxu1  ;;  %v2803_v12 = vpop.f32.mrb[62].mxu0  ;;  %3156 = vmatpush1.bf16.msra.mxu0 %v9443_v50  ;;  %v9455_v16 = vld [vmem:[%s11572_s3 + $0x2c4] ss:$16 sps:$4 sm:$0xff]  }
 0x398   :  { %v2896_v4 = vmax.f32 %v2885_v51, %v2887_v53  ;;  %v2889_v28 = vpop.f32.mrb[62].mxu1  ;;  %3242 = vmatpush1.bf16.msra.mxu1 %v9449_v49  ;;  %v2805_v30 = vpop.f32.mrb[63].mxu0  ;;  %12429 = vst [vmem:[#allocation90_spill] sm:$0xff] %v9455_v16  ;;  %3157 = vmatprep.subr.bf16.mxu0 %v9455_v16  ;;  %v9461_v53 = vld [vmem:[%s11572_s3 + $0x2cc] ss:$16 sps:$4 sm:$0xff]  }
 0x399   :  { %v2895_v36 = vmax.f32 %v2803_v12, %v2805_v30  ;;  %v2891_v47 = vpop.f32.mrb[63].mxu1  ;;  %12430 = vst [vmem:[#allocation91_spill] sm:$0xff] %v9461_v53  ;;  %3243 = vmatprep.subr.bf16.mxu1 %v9461_v53  ;;  %v9467_v49 = vld [vmem:[%s11572_s3 + $0x2c0] ss:$16 sps:$4 sm:$0xff]   ;;  %v9474_v30 = vld [vmem:[%s11572_s3 + $0x2c8] ss:$16 sps:$4 sm:$0xff]  }
 0x39a   :  { %v2898_v51 = vmax.f32 %v2894_v54, %v2896_v4  ;;  %v2897_v50 = vmax.f32 %v2889_v28, %v2891_v47  ;;  %v9480_v47 = vld [vmem:[%s11572_s3 + $0x2e4] ss:$16 sps:$4 sm:$0xff]   ;;  %v9486_v28 = vld [vmem:[%s11572_s3 + $0x2ec] ss:$16 sps:$4 sm:$0xff]   ;;  %v9493_v4 = vld [vmem:[%s11572_s3 + $0x2e0] ss:$16 sps:$4 sm:$0xff]  }
 0x39b   :  { %3158 = vmatpush1.bf16.msra.mxu0 %v9467_v49  ;;  %12431 = vst [vmem:[#allocation12_spill] sm:$0xff] %v9480_v47  ;;  %12432 = vst [vmem:[#allocation13_spill] sm:$0xff] %v9486_v28 }
 0x39c   :  { %v2900_v16 = vadd.f32 %v9016_v14, %v2898_v51  ;;  %v2899_v12 = vmax.f32 %v2895_v36, %v2897_v50  ;;  %3244 = vmatpush1.bf16.msra.mxu1 %v9474_v30  ;;  %3159 = vmatprep.subr.bf16.mxu0 %v9480_v47  ;;  %12433 = vst [vmem:[#allocation7_spill] sm:$0xff] %v9493_v4  ;;  %v9499_v51 = vld [vmem:[%s11572_s3 + $0x2e8] ss:$16 sps:$4 sm:$0xff]  }
 0x39d   :  { %3245 = vmatprep.subr.bf16.mxu1 %v9486_v28  ;;  %12434 = vst [vmem:[#allocation14_spill] sm:$0xff] %v9499_v51  ;;  %v9505_v28 = vld [vmem:[%s11572_s3 + $0x304] ss:$16 sps:$4 sm:$0xff]  }
 0x39e   :  { %v2902_v50 = vmul.f32 0.01, %v2900_v16  ;;  %v2901_v54 = vadd.f32 %v9016_v14, %v2899_v12  ;;  %12435 = vst [vmem:[#allocation15_spill] sm:$0xff] %v9505_v28  ;;  %v9511_v12 = vld [vmem:[%s11572_s3 + $0x30c] ss:$16 sps:$4 sm:$0xff]  }
 0x39f   :  { %3160 = vmatpush1.bf16.msra.mxu0 %v9493_v4  ;;  %12436 = vst [vmem:[#allocation16_spill] sm:$0xff] %v9511_v12 }
 0x3a0   :  { %v2903_v36 = vmul.f32 0.01, %v2901_v54  ;;  %3246 = vmatpush1.bf16.msra.mxu1 %v9499_v51  ;;  %3161 = vmatprep.subr.bf16.mxu0 %v9505_v28  ;;  %v2904_v4 = vmax.f32 %v2900_v16, %v2902_v50  ;;  %v9517_v51 = vld [vmem:[%s11572_s3 + $0x300] ss:$16 sps:$4 sm:$0xff]   ;;  %v9523_v28 = vld [vmem:[%s11572_s3 + $0x308] ss:$16 sps:$4 sm:$0xff]  }
 0x3a1   :  { %3247 = vmatprep.subr.bf16.mxu1 %v9511_v12  ;;  %v9529_v12 = vld [vmem:[%s11572_s3 + $0x324] ss:$16 sps:$4 sm:$0xff]   ;;  %v9537_v50 = vld [vmem:[%s11572_s3 + $0x32c] ss:$16 sps:$4 sm:$0xff]  }
 0x3a2   :  { %v2905_v47 = vmax.f32 %v2901_v54, %v2903_v36  ;;  %v9543_v54 = vld [vmem:[%s11572_s3 + $0x320] ss:$16 sps:$4 sm:$0xff]   ;;  %v9549_v36 = vld [vmem:[%s11572_s3 + $0x328] ss:$16 sps:$4 sm:$0xff]  }
 0x3a3   :  { %3162 = vmatpush1.bf16.msra.mxu0 %v9517_v51  ;;  %12438 = vst [vmem:[#allocation18_spill] sm:$0xff] %v9543_v54  ;;  %12439 = vst [vmem:[#allocation19_spill] sm:$0xff] %v9549_v36 }
 0x3a4   :  { %3248 = vmatpush1.bf16.msra.mxu1 %v9523_v28  ;;  %3163 = vmatprep.subr.bf16.mxu0 %v9529_v12  ;;  %v9532_v16 = vpack.c.bf16 %v2905_v47, %v2904_v4  ;;  %v9555_v47 = vld [vmem:[%s11572_s3 + $0x344] ss:$16 sps:$4 sm:$0xff]   ;;  %v9561_v4 = vld [vmem:[%s11572_s3 + $0x34c] ss:$16 sps:$4 sm:$0xff]  }
 0x3a5   :  { %3249 = vmatprep.subr.bf16.mxu1 %v9537_v50  ;;  %12440 = vst [vmem:[#allocation20_spill] sm:$0xff] %v9555_v47  ;;  %12441 = vst [vmem:[#allocation21_spill] sm:$0xff] %v9561_v4 }
 0x3a6   :  { %12437 = vst [vmem:[#allocation17_spill] sm:$0xff] %v9532_v16  ;;  %v9567_v16 = vld [vmem:[%s11572_s3 + $0x340] ss:$16 sps:$4 sm:$0xff]  }
 0x3a7   :  { %3164 = vmatpush1.bf16.msra.mxu0 %v9543_v54  ;;  %12442 = vst [vmem:[#allocation22_spill] sm:$0xff] %v9567_v16 }
 0x3a8   :  { %3250 = vmatpush1.bf16.msra.mxu1 %v9549_v36  ;;  %3165 = vmatprep.subr.bf16.mxu0 %v9555_v47  ;;  %v9573_v36 = vld [vmem:[%s11572_s3 + $0x348] ss:$16 sps:$4 sm:$0xff]   ;;  %v9579_v47 = vld [vmem:[%s11572_s3 + $0x364] ss:$16 sps:$4 sm:$0xff]  }
 0x3a9   :  { %3251 = vmatprep.subr.bf16.mxu1 %v9561_v4  ;;  %12443 = vst [vmem:[#allocation23_spill] sm:$0xff] %v9573_v36  ;;  %12444 = vst [vmem:[#allocation24_spill] sm:$0xff] %v9579_v47  ;;  %v9585_v4 = vld [vmem:[%s11572_s3 + $0x36c] ss:$16 sps:$4 sm:$0xff]  }
 0x3aa   :  { %12445 = vst [vmem:[#allocation25_spill] sm:$0xff] %v9585_v4 }
 0x3ab   :  { %3166 = vmatpush1.bf16.msra.mxu0 %v9567_v16  ;;  %v9591_v16 = vld [vmem:[%s11572_s3 + $0x360] ss:$16 sps:$4 sm:$0xff]  }
 0x3ac   :  { %3252 = vmatpush1.bf16.msra.mxu1 %v9573_v36  ;;  %3167 = vmatprep.subr.bf16.mxu0 %v9579_v47  ;;  %12446 = vst [vmem:[#allocation26_spill] sm:$0xff] %v9591_v16  ;;  %v9597_v36 = vld [vmem:[%s11572_s3 + $0x368] ss:$16 sps:$4 sm:$0xff]   ;;  %v9603_v47 = vld [vmem:[%s11572_s3 + $0x384] ss:$16 sps:$4 sm:$0xff]  }
 0x3ad   :  { %3253 = vmatprep.subr.bf16.mxu1 %v9585_v4  ;;  %12447 = vst [vmem:[#allocation27_spill] sm:$0xff] %v9597_v36  ;;  %12448 = vst [vmem:[#allocation28_spill] sm:$0xff] %v9603_v47  ;;  %v9609_v4 = vld [vmem:[%s11572_s3 + $0x38c] ss:$16 sps:$4 sm:$0xff]  }
 0x3ae   :  { %12449 = vst [vmem:[#allocation29_spill] sm:$0xff] %v9609_v4 }
 0x3af   :  { %3168 = vmatpush1.bf16.msra.mxu0 %v9591_v16  ;;  %v9615_v16 = vld [vmem:[%s11572_s3 + $0x380] ss:$16 sps:$4 sm:$0xff]  }
 0x3b0   :  { %3254 = vmatpush1.bf16.msra.mxu1 %v9597_v36  ;;  %3169 = vmatprep.subr.bf16.mxu0 %v9603_v47  ;;  %12450 = vst [vmem:[#allocation30_spill] sm:$0xff] %v9615_v16  ;;  %v9621_v36 = vld [vmem:[%s11572_s3 + $0x388] ss:$16 sps:$4 sm:$0xff]   ;;  %v9627_v47 = vld [vmem:[%s11572_s3 + $0x3a4] ss:$16 sps:$4 sm:$0xff]  }
 0x3b1   :  { %3255 = vmatprep.subr.bf16.mxu1 %v9609_v4  ;;  %12451 = vst [vmem:[#allocation6_spill] sm:$0xff] %v9621_v36  ;;  %12452 = vst [vmem:[#allocation56_spill] sm:$0xff] %v9627_v47  ;;  %v9633_v4 = vld [vmem:[%s11572_s3 + $0x3ac] ss:$16 sps:$4 sm:$0xff]  }
 0x3b2   :  { %12453 = vst [vmem:[#allocation57_spill] sm:$0xff] %v9633_v4 }
 0x3b3   :  { %3170 = vmatpush1.bf16.msra.mxu0 %v9615_v16  ;;  %v9639_v16 = vld [vmem:[%s11572_s3 + $0x3a0] ss:$16 sps:$4 sm:$0xff]  }
 0x3b4   :  { %3256 = vmatpush1.bf16.msra.mxu1 %v9621_v36  ;;  %3171 = vmatprep.subr.bf16.mxu0 %v9627_v47  ;;  %12454 = vst [vmem:[#allocation58_spill] sm:$0xff] %v9639_v16  ;;  %v9645_v36 = vld [vmem:[%s11572_s3 + $0x3a8] ss:$16 sps:$4 sm:$0xff]   ;;  %v9651_v47 = vld [vmem:[%s11572_s3 + $0x3c4] ss:$16 sps:$4 sm:$0xff]  }
 0x3b5   :  { %3257 = vmatprep.subr.bf16.mxu1 %v9633_v4  ;;  %12455 = vst [vmem:[#allocation59_spill] sm:$0xff] %v9645_v36  ;;  %12456 = vst [vmem:[#allocation63_spill] sm:$0xff] %v9651_v47  ;;  %v9657_v4 = vld [vmem:[%s11572_s3 + $0x3cc] ss:$16 sps:$4 sm:$0xff]  }
 0x3b6   :  { %12457 = vst [vmem:[#allocation37_spill] sm:$0xff] %v9657_v4 }
 0x3b7   :  { %3172 = vmatpush1.bf16.msra.mxu0 %v9639_v16  ;;  %v9663_v16 = vld [vmem:[%s11572_s3 + $0x3c0] ss:$16 sps:$4 sm:$0xff]  }
 0x3b8   :  { %3258 = vmatpush1.bf16.msra.mxu1 %v9645_v36  ;;  %3173 = vmatprep.subr.bf16.mxu0 %v9651_v47  ;;  %12458 = vst [vmem:[#allocation94_spill] sm:$0xff] %v9663_v16  ;;  %v9669_v36 = vld [vmem:[%s11572_s3 + $0x3c8] ss:$16 sps:$4 sm:$0xff]   ;;  %v9675_v47 = vld [vmem:[%s11572_s3 + $0x3e4] ss:$16 sps:$4 sm:$0xff]  }
 0x3b9   :  { %3259 = vmatprep.subr.bf16.mxu1 %v9657_v4  ;;  %12459 = vst [vmem:[#allocation95_spill] sm:$0xff] %v9669_v36  ;;  %12460 = vst [vmem:[#allocation96_spill] sm:$0xff] %v9675_v47  ;;  %v9681_v4 = vld [vmem:[%s11572_s3 + $0x3ec] ss:$16 sps:$4 sm:$0xff]  }
 0x3bb   :  { %3174 = vmatpush1.bf16.msra.mxu0 %v9663_v16  ;;  %v9687_v16 = vld [vmem:[%s11572_s3 + $0x3e0] ss:$16 sps:$4 sm:$0xff]  }
 0x3bc   :  { %3260 = vmatpush1.bf16.msra.mxu1 %v9669_v36  ;;  %3175 = vmatprep.subr.bf16.mxu0 %v9675_v47  ;;  %v9693_v36 = vld [vmem:[%s11572_s3 + $0x3e8] ss:$16 sps:$4 sm:$0xff]   ;;  %v12461_v47 = vld [vmem:[#allocation9_spill] sm:$0xff] }
 0x3bd   :  { %3261 = vmatprep.subr.bf16.mxu1 %v9681_v4 }
 0x3bf   :  { %3176 = vmatpush1.bf16.msra.mxu0 %v9687_v16 }
 0x3c0   :  { %3262 = vmatpush1.bf16.msra.mxu1 %v9693_v36  ;;  %3292 = vmatprep.subr.bf16.mxu0 %v12349_v17 }
 0x3c1   :  { %3378 = vmatprep.subr.bf16.mxu1 %v12350_v25 }
 0x3c2   :  { %3178 = vmatmul.mubr.bf16.vlgmr.msra.gmra.mrb[68].mxu0 %v12461_v47 }
 0x3c3   :  { %3264 = vmatmul.mubr.bf16.vlgmr.msra.gmra.mrb[68].mxu1 %v12461_v47  ;;  %3293 = vmatpush1.bf16.msra.mxu0 %v12352_v33 }
 0x3c4   :  { %3324 = vmatprep.mubr.bf16.mxu0 %v12407_v11  ;;  %3379 = vmatpush1.bf16.msra.mxu1 %v12353_v58 }
 0x3c5   :  { %3410 = vmatprep.mubr.bf16.mxu1 %v12407_v11  ;;  %3294 = vmatprep.subr.bf16.mxu0 %v12354_v38  ;;  %v12462_v11 = vld [vmem:[#allocation32_spill] sm:$0xff] }
 0x3c6   :  { %3380 = vmatprep.subr.bf16.mxu1 %v12355_v42 }
 0x3c7   :  { %3295 = vmatpush1.bf16.msra.mxu0 %v12356_v61 }
 0x3c8   :  { %3381 = vmatpush1.bf16.msra.mxu1 %v12357_v32  ;;  %3296 = vmatprep.subr.bf16.mxu0 %v12358_v0 }
 0x3c9   :  { %3382 = vmatprep.subr.bf16.mxu1 %v12359_v5 }
 0x3cb   :  { %3297 = vmatpush1.bf16.msra.mxu0 %v12360_v9 }
 0x3cc   :  { %3383 = vmatpush1.bf16.msra.mxu1 %v12361_v18  ;;  %3298 = vmatprep.subr.bf16.mxu0 %v12362_v19 }
 0x3cd   :  { %3384 = vmatprep.subr.bf16.mxu1 %v12363_v22 }
 0x3cf   :  { %3299 = vmatpush1.bf16.msra.mxu0 %v12364_v56 }
 0x3d0   :  { %3385 = vmatpush1.bf16.msra.mxu1 %v12365_v23  ;;  %3300 = vmatprep.subr.bf16.mxu0 %v12366_v37 }
 0x3d1   :  { %3386 = vmatprep.subr.bf16.mxu1 %v12367_v40 }
 0x3d3   :  { %3301 = vmatpush1.bf16.msra.mxu0 %v12368_v52 }
 0x3d4   :  { %3387 = vmatpush1.bf16.msra.mxu1 %v12369_v21  ;;  %3302 = vmatprep.subr.bf16.mxu0 %v12370_v24 }
 0x3d5   :  { %3388 = vmatprep.subr.bf16.mxu1 %v12371_v27 }
 0x3d7   :  { %3303 = vmatpush1.bf16.msra.mxu0 %v12372_v26 }
 0x3d8   :  { %3389 = vmatpush1.bf16.msra.mxu1 %v12373_v60  ;;  %3304 = vmatprep.subr.bf16.mxu0 %v12374_v48 }
 0x3d9   :  { %3390 = vmatprep.subr.bf16.mxu1 %v8928_v1 }
 0x3db   :  { %3305 = vmatpush1.bf16.msra.mxu0 %v8934_v8 }
 0x3dc   :  { %3391 = vmatpush1.bf16.msra.mxu1 %v8940_v31  ;;  %3306 = vmatprep.subr.bf16.mxu0 %v8946_v20 }
 0x3dd   :  { %3392 = vmatprep.subr.bf16.mxu1 %v9097_v6 }
 0x3df   :  { %3307 = vmatpush1.bf16.msra.mxu0 %v9103_v62 }
 0x3e0   :  { %3393 = vmatpush1.bf16.msra.mxu1 %v9109_v13  ;;  %3308 = vmatprep.subr.bf16.mxu0 %v9115_v2 }
 0x3e1   :  { %3394 = vmatprep.subr.bf16.mxu1 %v9121_v10 }
 0x3e3   :  { %3309 = vmatpush1.bf16.msra.mxu0 %v9127_v15 }
 0x3e4   :  { %3395 = vmatpush1.bf16.msra.mxu1 %v9133_v59  ;;  %3310 = vmatprep.subr.bf16.mxu0 %v9139_v29  ;;  %v12500_v29 = vld [vmem:[#allocation89_spill] sm:$0xff] }
 0x3e5   :  { %3396 = vmatprep.subr.bf16.mxu1 %v9145_v55  ;;  %v12499_v55 = vld [vmem:[#allocation87_spill] sm:$0xff] }
 0x3e7   :  { %3311 = vmatpush1.bf16.msra.mxu0 %v9151_v57 }
 0x3e8   :  { %3397 = vmatpush1.bf16.msra.mxu1 %v9157_v63  ;;  %3312 = vmatprep.subr.bf16.mxu0 %v9163_v34  ;;  %v12463_v34 = vld [vmem:[#allocation8_spill] sm:$0xff] }
 0x3e9   :  { %3398 = vmatprep.subr.bf16.mxu1 %v9169_v35  ;;  %v12464_v35 = vld [vmem:[#allocation33_spill] sm:$0xff] }
 0x3eb   :  { %3313 = vmatpush1.bf16.msra.mxu0 %v9175_v45  ;;  %v12465_v45 = vld [vmem:[#allocation34_spill] sm:$0xff] }
 0x3ec   :  { %3399 = vmatpush1.bf16.msra.mxu1 %v9181_v39  ;;  %3314 = vmatprep.subr.bf16.mxu0 %v9187_v41  ;;  %v12466_v39 = vld [vmem:[#allocation35_spill] sm:$0xff]  ;;  %v12467_v41 = vld [vmem:[#allocation36_spill] sm:$0xff] }
 0x3ed   :  { %3400 = vmatprep.subr.bf16.mxu1 %v9193_v46  ;;  %v12468_v46 = vld [vmem:[#allocation38_spill] sm:$0xff] }
 0x3ef   :  { %3315 = vmatpush1.bf16.msra.mxu0 %v9199_v7  ;;  %v12469_v7 = vld [vmem:[#allocation39_spill] sm:$0xff] }
 0x3f0   :  { %3401 = vmatpush1.bf16.msra.mxu1 %v9205_v43  ;;  %3316 = vmatprep.subr.bf16.mxu0 %v9211_v3  ;;  %v12470_v43 = vld [vmem:[#allocation40_spill] sm:$0xff]  ;;  %v12471_v3 = vld [vmem:[#allocation41_spill] sm:$0xff] }
 0x3f1   :  { %3402 = vmatprep.subr.bf16.mxu1 %v9217_v44  ;;  %v12472_v44 = vld [vmem:[#allocation42_spill] sm:$0xff] }
 0x3f3   :  { %3317 = vmatpush1.bf16.msra.mxu0 %v12462_v11  ;;  %v12473_v11 = vld [vmem:[#allocation43_spill] sm:$0xff] }
 0x3f4   :  { %3403 = vmatpush1.bf16.msra.mxu1 %v12463_v34  ;;  %3318 = vmatprep.subr.bf16.mxu0 %v12464_v35  ;;  %v12474_v34 = vld [vmem:[#allocation44_spill] sm:$0xff]  ;;  %v12475_v35 = vld [vmem:[#allocation45_spill] sm:$0xff] }
 0x3f5   :  { %3404 = vmatprep.subr.bf16.mxu1 %v12465_v45  ;;  %v12476_v45 = vld [vmem:[#allocation46_spill] sm:$0xff] }
 0x3f7   :  { %3319 = vmatpush1.bf16.msra.mxu0 %v12466_v39  ;;  %v12477_v39 = vld [vmem:[#allocation47_spill] sm:$0xff] }
 0x3f8   :  { %3405 = vmatpush1.bf16.msra.mxu1 %v12467_v41  ;;  %3320 = vmatprep.subr.bf16.mxu0 %v12468_v46  ;;  %v12489_v46 = vld [vmem:[#allocation62_spill] sm:$0xff]  ;;  %v12491_v41 = vld [vmem:[#allocation69_spill] sm:$0xff] }
 0x3f9   :  { %3406 = vmatprep.subr.bf16.mxu1 %v12469_v7  ;;  %v12478_v7 = vld [vmem:[#allocation48_spill] sm:$0xff] }
 0x3fb   :  { %3321 = vmatpush1.bf16.msra.mxu0 %v12470_v43  ;;  %v12479_v43 = vld [vmem:[#allocation92_spill] sm:$0xff] }
 0x3fc   :  { %3407 = vmatpush1.bf16.msra.mxu1 %v12471_v3  ;;  %3322 = vmatprep.subr.bf16.mxu0 %v12472_v44  ;;  %v12480_v3 = vld [vmem:[#allocation49_spill] sm:$0xff]  ;;  %v12486_v44 = vld [vmem:[#allocation55_spill] sm:$0xff] }
 0x3fd   :  { %3408 = vmatprep.subr.bf16.mxu1 %v12473_v11  ;;  %v12481_v11 = vld [vmem:[#allocation50_spill] sm:$0xff] }
 0x3ff   :  { %3323 = vmatpush1.bf16.msra.mxu0 %v12474_v34  ;;  %v12482_v34 = vld [vmem:[#allocation51_spill] sm:$0xff] }
 0x400   :  { %3409 = vmatpush1.bf16.msra.mxu1 %v12475_v35  ;;  %3335 = vmatprep.subr.bf16.mxu0 %v12476_v45  ;;  %v12483_v35 = vld [vmem:[#allocation52_spill] sm:$0xff]  ;;  %v12484_v45 = vld [vmem:[#allocation53_spill] sm:$0xff] }
 0x401   :  { %3421 = vmatprep.subr.bf16.mxu1 %v12477_v39  ;;  %v12485_v39 = vld [vmem:[#allocation54_spill] sm:$0xff] }
 0x402   :  { %3325 = vmatmul.mubr.bf16.vlgmr.msra.gmra.mrb[72].mxu0 %v12461_v47 }
 0x403   :  { %3411 = vmatmul.mubr.bf16.vlgmr.msra.gmra.mrb[72].mxu1 %v12461_v47  ;;  %3336 = vmatpush1.bf16.msra.mxu0 %v12478_v7  ;;  %v12487_v47 = vld [vmem:[#allocation60_spill] sm:$0xff]  ;;  %v12488_v7 = vld [vmem:[#allocation61_spill] sm:$0xff] }
 0x404   :  { %3367 = vmatprep.mubr.bf16.mxu0 %v12479_v43  ;;  %3422 = vmatpush1.bf16.msra.mxu1 %v12480_v3  ;;  %v12490_v3 = vld [vmem:[#allocation68_spill] sm:$0xff] }
 0x405   :  { %3453 = vmatprep.mubr.bf16.mxu1 %v12479_v43  ;;  %3337 = vmatprep.subr.bf16.mxu0 %v12481_v11  ;;  %v12492_v11 = vld [vmem:[#allocation71_spill] sm:$0xff] }
 0x406   :  { %3423 = vmatprep.subr.bf16.mxu1 %v12482_v34  ;;  %v12493_v34 = vld [vmem:[#allocation72_spill] sm:$0xff] }
 0x407   :  { %3338 = vmatpush1.bf16.msra.mxu0 %v12483_v35  ;;  %v12494_v35 = vld [vmem:[#allocation73_spill] sm:$0xff] }
 0x408   :  { %3424 = vmatpush1.bf16.msra.mxu1 %v12484_v45  ;;  %3339 = vmatprep.subr.bf16.mxu0 %v12485_v39  ;;  %v12495_v45 = vld [vmem:[#allocation74_spill] sm:$0xff]  ;;  %v12496_v39 = vld [vmem:[#allocation75_spill] sm:$0xff] }
 0x409   :  { %3425 = vmatprep.subr.bf16.mxu1 %v12486_v44  ;;  %v12497_v44 = vld [vmem:[#allocation76_spill] sm:$0xff] }
 0x40b   :  { %3340 = vmatpush1.bf16.msra.mxu0 %v12487_v47 }
 0x40c   :  { %3426 = vmatpush1.bf16.msra.mxu1 %v12488_v7  ;;  %3341 = vmatprep.subr.bf16.mxu0 %v12489_v46  ;;  %v12498_v7 = vld [vmem:[#allocation77_spill] sm:$0xff] }
 0x40d   :  { %3427 = vmatprep.subr.bf16.mxu1 %v12490_v3 }
 0x40f   :  { %3342 = vmatpush1.bf16.msra.mxu0 %v12491_v41 }
 0x410   :  { %3428 = vmatpush1.bf16.msra.mxu1 %v12492_v11  ;;  %3343 = vmatprep.subr.bf16.mxu0 %v12493_v34 }
 0x411   :  { %3429 = vmatprep.subr.bf16.mxu1 %v12494_v35 }
 0x413   :  { %3344 = vmatpush1.bf16.msra.mxu0 %v12495_v45  ;;  %v12501_v45 = vld [vmem:[#allocation90_spill] sm:$0xff] }
 0x414   :  { %3430 = vmatpush1.bf16.msra.mxu1 %v12496_v39  ;;  %3345 = vmatprep.subr.bf16.mxu0 %v12497_v44 }
 0x415   :  { %v2989_v47 = vpop.f32.mrb[64].mxu0  ;;  %3431 = vmatprep.subr.bf16.mxu1 %v12498_v7 }
 0x416   :  { %v3075_v46 = vpop.f32.mrb[64].mxu1  ;;  %v2991_v63 = vpop.f32.mrb[65].mxu0 }
 0x417   :  { %v3084_v3 = vmax.f32 %v2989_v47, %v2991_v63  ;;  %v3077_v57 = vpop.f32.mrb[65].mxu1  ;;  %v2993_v41 = vpop.f32.mrb[66].mxu0  ;;  %3346 = vmatpush1.bf16.msra.mxu0 %v12499_v55 }
 0x418   :  { %v3086_v11 = vmax.f32 %v3075_v46, %v3077_v57  ;;  %v3079_v34 = vpop.f32.mrb[66].mxu1  ;;  %3432 = vmatpush1.bf16.msra.mxu1 %v12500_v29  ;;  %v2995_v35 = vpop.f32.mrb[67].mxu0  ;;  %3347 = vmatprep.subr.bf16.mxu0 %v12501_v45  ;;  %v12502_v57 = vld [vmem:[#allocation12_spill] sm:$0xff]  ;;  %v12503_v46 = vld [vmem:[#allocation13_spill] sm:$0xff] }
 0x419   :  { %v3085_v39 = vmax.f32 %v2993_v41, %v2995_v35  ;;  %v3081_v59 = vpop.f32.mrb[67].mxu1  ;;  %3433 = vmatprep.subr.bf16.mxu1 %v9461_v53  ;;  %v12504_v35 = vld [vmem:[#allocation7_spill] sm:$0xff]  ;;  %v12505_v53 = vld [vmem:[#allocation14_spill] sm:$0xff] }
 0x41a   :  { %v3088_v44 = vmax.f32 %v3084_v3, %v3086_v11  ;;  %v3087_v7 = vmax.f32 %v3079_v34, %v3081_v59  ;;  %v12506_v59 = vld [vmem:[#allocation15_spill] sm:$0xff]  ;;  %v12507_v34 = vld [vmem:[#allocation16_spill] sm:$0xff] }
 0x41b   :  { %3348 = vmatpush1.bf16.msra.mxu0 %v9467_v49  ;;  %v12510_v11 = vld [vmem:[#allocation20_spill] sm:$0xff] }
 0x41c   :  { %v3090_v63 = vadd.f32 %v9016_v14, %v3088_v44  ;;  %v3089_v47 = vmax.f32 %v3085_v39, %v3087_v7  ;;  %3434 = vmatpush1.bf16.msra.mxu1 %v9474_v30  ;;  %3349 = vmatprep.subr.bf16.mxu0 %v12502_v57  ;;  %v12509_v44 = vld [vmem:[#allocation19_spill] sm:$0xff] }
 0x41d   :  { %3435 = vmatprep.subr.bf16.mxu1 %v12503_v46 }
 0x41e   :  { %v3092_v29 = vmul.f32 0.01, %v3090_v63  ;;  %v3091_v45 = vadd.f32 %v9016_v14, %v3089_v47  ;;  %v12511_v47 = vld [vmem:[#allocation21_spill] sm:$0xff] }
 0x41f   :  { %3350 = vmatpush1.bf16.msra.mxu0 %v12504_v35 }
 0x420   :  { %v3093_v41 = vmul.f32 0.01, %v3091_v45  ;;  %3436 = vmatpush1.bf16.msra.mxu1 %v12505_v53  ;;  %3351 = vmatprep.subr.bf16.mxu0 %v12506_v59  ;;  %v3094_v3 = vmax.f32 %v3090_v63, %v3092_v29  ;;  %v12512_v29 = vld [vmem:[#allocation22_spill] sm:$0xff]  ;;  %v12514_v63 = vld [vmem:[#allocation24_spill] sm:$0xff] }
 0x421   :  { %3437 = vmatprep.subr.bf16.mxu1 %v12507_v34 }
 0x422   :  { %v3095_v39 = vmax.f32 %v3091_v45, %v3093_v41  ;;  %v12513_v45 = vld [vmem:[#allocation23_spill] sm:$0xff]  ;;  %v12515_v41 = vld [vmem:[#allocation25_spill] sm:$0xff] }
 0x423   :  { %3352 = vmatpush1.bf16.msra.mxu0 %v9517_v51 }
 0x424   :  { %3438 = vmatpush1.bf16.msra.mxu1 %v9523_v28  ;;  %3353 = vmatprep.subr.bf16.mxu0 %v9529_v12  ;;  %v9807_v7 = vpack.c.bf16 %v3095_v39, %v3094_v3  ;;  %v12516_v3 = vld [vmem:[#allocation26_spill] sm:$0xff]  ;;  %v12517_v39 = vld [vmem:[#allocation27_spill] sm:$0xff] }
 0x425   :  { %3439 = vmatprep.subr.bf16.mxu1 %v9537_v50 }
 0x426   :  { %12508 = vst [vmem:[#allocation9_spill] sm:$0xff] %v9807_v7  ;;  %v12518_v7 = vld [vmem:[#allocation28_spill] sm:$0xff] }
 0x427   :  { %3354 = vmatpush1.bf16.msra.mxu0 %v9543_v54  ;;  %v12519_v54 = vld [vmem:[#allocation29_spill] sm:$0xff] }
 0x428   :  { %3440 = vmatpush1.bf16.msra.mxu1 %v12509_v44  ;;  %3355 = vmatprep.subr.bf16.mxu0 %v12510_v11  ;;  %v12520_v44 = vld [vmem:[#allocation30_spill] sm:$0xff] }
 0x429   :  { %3441 = vmatprep.subr.bf16.mxu1 %v12511_v47  ;;  %v12521_v11 = vld [vmem:[#allocation6_spill] sm:$0xff]  ;;  %v12522_v47 = vld [vmem:[#allocation56_spill] sm:$0xff] }
 0x42b   :  { %3356 = vmatpush1.bf16.msra.mxu0 %v12512_v29  ;;  %v12523_v29 = vld [vmem:[#allocation57_spill] sm:$0xff] }
 0x42c   :  { %3442 = vmatpush1.bf16.msra.mxu1 %v12513_v45  ;;  %3357 = vmatprep.subr.bf16.mxu0 %v12514_v63  ;;  %v12524_v45 = vld [vmem:[#allocation58_spill] sm:$0xff]  ;;  %v12525_v63 = vld [vmem:[#allocation59_spill] sm:$0xff] }
 0x42d   :  { %3443 = vmatprep.subr.bf16.mxu1 %v12515_v41  ;;  %v12526_v41 = vld [vmem:[#allocation63_spill] sm:$0xff] }
 0x42f   :  { %3358 = vmatpush1.bf16.msra.mxu0 %v12516_v3  ;;  %v12527_v3 = vld [vmem:[#allocation37_spill] sm:$0xff] }
 0x430   :  { %3444 = vmatpush1.bf16.msra.mxu1 %v12517_v39  ;;  %3359 = vmatprep.subr.bf16.mxu0 %v12518_v7  ;;  %v12528_v39 = vld [vmem:[#allocation94_spill] sm:$0xff]  ;;  %v12529_v7 = vld [vmem:[#allocation95_spill] sm:$0xff] }
 0x431   :  { %3445 = vmatprep.subr.bf16.mxu1 %v12519_v54  ;;  %v12530_v54 = vld [vmem:[#allocation96_spill] sm:$0xff] }
 0x433   :  { %3360 = vmatpush1.bf16.msra.mxu0 %v12520_v44 }
 0x434   :  { %3446 = vmatpush1.bf16.msra.mxu1 %v12521_v11  ;;  %3361 = vmatprep.subr.bf16.mxu0 %v12522_v47 }
 0x435   :  { %3447 = vmatprep.subr.bf16.mxu1 %v12523_v29 }
 0x437   :  { %3362 = vmatpush1.bf16.msra.mxu0 %v12524_v45 }
 0x438   :  { %3448 = vmatpush1.bf16.msra.mxu1 %v12525_v63  ;;  %3363 = vmatprep.subr.bf16.mxu0 %v12526_v41  ;;  %v12531_v63 = vld [vmem:[#allocation70_spill] sm:$0xff] }
 0x439   :  { %3449 = vmatprep.subr.bf16.mxu1 %v12527_v3 }
 0x43b   :  { %3364 = vmatpush1.bf16.msra.mxu0 %v12528_v39 }
 0x43c   :  { %3450 = vmatpush1.bf16.msra.mxu1 %v12529_v7  ;;  %3365 = vmatprep.subr.bf16.mxu0 %v12530_v54 }
 0x43d   :  { %3451 = vmatprep.subr.bf16.mxu1 %v9681_v4 }
 0x43f   :  { %3366 = vmatpush1.bf16.msra.mxu0 %v9687_v16 }
 0x440   :  { %3452 = vmatpush1.bf16.msra.mxu1 %v9693_v36  ;;  %3482 = vmatprep.subr.bf16.mxu0 %v12349_v17  ;;  %v12532_v17 = vld [vmem:[#allocation65_spill] sm:$0xff] }
 0x441   :  { %3568 = vmatprep.subr.bf16.mxu1 %v12350_v25  ;;  %v12537_v25 = vld [vmem:[#allocation80_spill] sm:$0xff] }
 0x442   :  { %3368 = vmatmul.mubr.bf16.vlgmr.msra.gmra.mrb[72].mxu0 %v12531_v63 }
 0x443   :  { %3454 = vmatmul.mubr.bf16.vlgmr.msra.gmra.mrb[72].mxu1 %v12531_v63  ;;  %3483 = vmatpush1.bf16.msra.mxu0 %v12352_v33  ;;  %v12538_v33 = vld [vmem:[#allocation81_spill] sm:$0xff] }
 0x444   :  { %3514 = vmatprep.mubr.bf16.mxu0 %v12479_v43  ;;  %3569 = vmatpush1.bf16.msra.mxu1 %v12353_v58  ;;  %v12539_v58 = vld [vmem:[#allocation82_spill] sm:$0xff] }
 0x445   :  { %3600 = vmatprep.mubr.bf16.mxu1 %v12479_v43  ;;  %3484 = vmatprep.subr.bf16.mxu0 %v12354_v38  ;;  %v12540_v38 = vld [vmem:[#allocation83_spill] sm:$0xff] }
 0x446   :  { %3570 = vmatprep.subr.bf16.mxu1 %v12355_v42  ;;  %v12541_v42 = vld [vmem:[#allocation84_spill] sm:$0xff]  ;;  %v12567_v43 = vld [vmem:[#allocation51_spill] sm:$0xff] }
 0x447   :  { %3485 = vmatpush1.bf16.msra.mxu0 %v12356_v61  ;;  %v12542_v61 = vld [vmem:[#allocation85_spill] sm:$0xff] }
 0x448   :  { %3571 = vmatpush1.bf16.msra.mxu1 %v12357_v32  ;;  %3486 = vmatprep.subr.bf16.mxu0 %v12358_v0  ;;  %v12543_v32 = vld [vmem:[#allocation86_spill] sm:$0xff]  ;;  %v12544_v0 = vld [vmem:[#allocation88_spill] sm:$0xff] }
 0x449   :  { %3572 = vmatprep.subr.bf16.mxu1 %v12359_v5  ;;  %v12545_v5 = vld [vmem:[#allocation5_spill] sm:$0xff] }
 0x44b   :  { %3487 = vmatpush1.bf16.msra.mxu0 %v12360_v9  ;;  %v12546_v9 = vld [vmem:[#allocation31_spill] sm:$0xff] }
 0x44c   :  { %3573 = vmatpush1.bf16.msra.mxu1 %v12361_v18  ;;  %3488 = vmatprep.subr.bf16.mxu0 %v12362_v19  ;;  %v12547_v18 = vld [vmem:[#allocation32_spill] sm:$0xff] }
 0x44d   :  { %3574 = vmatprep.subr.bf16.mxu1 %v12363_v22  ;;  %v12548_v19 = vld [vmem:[#allocation8_spill] sm:$0xff]  ;;  %v12549_v22 = vld [vmem:[#allocation33_spill] sm:$0xff] }
 0x44f   :  { %3489 = vmatpush1.bf16.msra.mxu0 %v12364_v56  ;;  %v12550_v56 = vld [vmem:[#allocation34_spill] sm:$0xff] }
 0x450   :  { %3575 = vmatpush1.bf16.msra.mxu1 %v12365_v23  ;;  %3490 = vmatprep.subr.bf16.mxu0 %v12366_v37  ;;  %v12551_v23 = vld [vmem:[#allocation35_spill] sm:$0xff]  ;;  %v12552_v37 = vld [vmem:[#allocation36_spill] sm:$0xff] }
 0x451   :  { %3576 = vmatprep.subr.bf16.mxu1 %v12367_v40  ;;  %v12553_v40 = vld [vmem:[#allocation38_spill] sm:$0xff] }
 0x453   :  { %3491 = vmatpush1.bf16.msra.mxu0 %v12368_v52  ;;  %v12554_v52 = vld [vmem:[#allocation39_spill] sm:$0xff] }
 0x454   :  { %3577 = vmatpush1.bf16.msra.mxu1 %v12369_v21  ;;  %3492 = vmatprep.subr.bf16.mxu0 %v12370_v24  ;;  %v12555_v21 = vld [vmem:[#allocation40_spill] sm:$0xff]  ;;  %v12556_v24 = vld [vmem:[#allocation41_spill] sm:$0xff] }
 0x455   :  { %3578 = vmatprep.subr.bf16.mxu1 %v12371_v27  ;;  %v12557_v27 = vld [vmem:[#allocation42_spill] sm:$0xff] }
 0x457   :  { %3493 = vmatpush1.bf16.msra.mxu0 %v12372_v26  ;;  %v12558_v26 = vld [vmem:[#allocation43_spill] sm:$0xff] }
 0x458   :  { %3579 = vmatpush1.bf16.msra.mxu1 %v12373_v60  ;;  %3494 = vmatprep.subr.bf16.mxu0 %v12374_v48  ;;  %v12559_v60 = vld [vmem:[#allocation44_spill] sm:$0xff]  ;;  %v12560_v48 = vld [vmem:[#allocation45_spill] sm:$0xff] }
 0x459   :  { %3580 = vmatprep.subr.bf16.mxu1 %v8928_v1  ;;  %v12533_v1 = vld [vmem:[#allocation66_spill] sm:$0xff] }
 0x45b   :  { %3495 = vmatpush1.bf16.msra.mxu0 %v8934_v8  ;;  %v12534_v8 = vld [vmem:[#allocation67_spill] sm:$0xff] }
 0x45c   :  { %3581 = vmatpush1.bf16.msra.mxu1 %v8940_v31  ;;  %3496 = vmatprep.subr.bf16.mxu0 %v8946_v20  ;;  %v12535_v31 = vld [vmem:[#allocation78_spill] sm:$0xff]  ;;  %v12536_v20 = vld [vmem:[#allocation79_spill] sm:$0xff] }
 0x45d   :  { %3582 = vmatprep.subr.bf16.mxu1 %v9097_v6  ;;  %v12561_v6 = vld [vmem:[#allocation46_spill] sm:$0xff] }
 0x45f   :  { %3497 = vmatpush1.bf16.msra.mxu0 %v9103_v62  ;;  %v12562_v62 = vld [vmem:[#allocation47_spill] sm:$0xff] }
 0x460   :  { %3583 = vmatpush1.bf16.msra.mxu1 %v9109_v13  ;;  %3498 = vmatprep.subr.bf16.mxu0 %v9115_v2  ;;  %v12563_v13 = vld [vmem:[#allocation48_spill] sm:$0xff]  ;;  %v12564_v2 = vld [vmem:[#allocation10_spill] sm:$0xff] }
 0x461   :  { %3584 = vmatprep.subr.bf16.mxu1 %v9121_v10  ;;  %v12565_v10 = vld [vmem:[#allocation49_spill] sm:$0xff] }
 0x463   :  { %3499 = vmatpush1.bf16.msra.mxu0 %v9127_v15  ;;  %v12566_v15 = vld [vmem:[#allocation50_spill] sm:$0xff] }
 0x464   :  { %3585 = vmatpush1.bf16.msra.mxu1 %v12532_v17  ;;  %3500 = vmatprep.subr.bf16.mxu0 %v12533_v1  ;;  %v12568_v17 = vld [vmem:[#allocation52_spill] sm:$0xff]  ;;  %v12569_v1 = vld [vmem:[#allocation53_spill] sm:$0xff] }
 0x465   :  { %3586 = vmatprep.subr.bf16.mxu1 %v12534_v8  ;;  %v12570_v8 = vld [vmem:[#allocation54_spill] sm:$0xff] }
 0x467   :  { %3501 = vmatpush1.bf16.msra.mxu0 %v12535_v31  ;;  %v12571_v31 = vld [vmem:[#allocation55_spill] sm:$0xff] }
 0x468   :  { %3587 = vmatpush1.bf16.msra.mxu1 %v12536_v20  ;;  %3502 = vmatprep.subr.bf16.mxu0 %v12537_v25  ;;  %v12573_v20 = vld [vmem:[#allocation61_spill] sm:$0xff]  ;;  %v12574_v25 = vld [vmem:[#allocation62_spill] sm:$0xff] }
 0x469   :  { %3588 = vmatprep.subr.bf16.mxu1 %v12538_v33  ;;  %v12575_v33 = vld [vmem:[#allocation68_spill] sm:$0xff] }
 0x46b   :  { %3503 = vmatpush1.bf16.msra.mxu0 %v12539_v58  ;;  %v12576_v58 = vld [vmem:[#allocation69_spill] sm:$0xff] }
 0x46c   :  { %3589 = vmatpush1.bf16.msra.mxu1 %v12540_v38  ;;  %3504 = vmatprep.subr.bf16.mxu0 %v12541_v42  ;;  %v12577_v38 = vld [vmem:[#allocation71_spill] sm:$0xff]  ;;  %v12578_v42 = vld [vmem:[#allocation72_spill] sm:$0xff] }
 0x46d   :  { %3590 = vmatprep.subr.bf16.mxu1 %v12542_v61  ;;  %v12579_v61 = vld [vmem:[#allocation73_spill] sm:$0xff] }
 0x46f   :  { %3505 = vmatpush1.bf16.msra.mxu0 %v12543_v32  ;;  %v12580_v32 = vld [vmem:[#allocation74_spill] sm:$0xff] }
 0x470   :  { %3591 = vmatpush1.bf16.msra.mxu1 %v12544_v0  ;;  %3506 = vmatprep.subr.bf16.mxu0 %v12545_v5  ;;  %v12581_v0 = vld [vmem:[#allocation75_spill] sm:$0xff]  ;;  %v12582_v5 = vld [vmem:[#allocation76_spill] sm:$0xff] }
 0x471   :  { %3592 = vmatprep.subr.bf16.mxu1 %v12546_v9 }
 0x473   :  { %3507 = vmatpush1.bf16.msra.mxu0 %v12547_v18  ;;  %v12583_v18 = vld [vmem:[#allocation77_spill] sm:$0xff] }
 0x474   :  { %3593 = vmatpush1.bf16.msra.mxu1 %v12548_v19  ;;  %3508 = vmatprep.subr.bf16.mxu0 %v12549_v22 }
 0x475   :  { %3594 = vmatprep.subr.bf16.mxu1 %v12550_v56 }
 0x477   :  { %3509 = vmatpush1.bf16.msra.mxu0 %v12551_v23 }
 0x478   :  { %3595 = vmatpush1.bf16.msra.mxu1 %v12552_v37  ;;  %3510 = vmatprep.subr.bf16.mxu0 %v12553_v40 }
 0x479   :  { %3596 = vmatprep.subr.bf16.mxu1 %v12554_v52 }
 0x47b   :  { %3511 = vmatpush1.bf16.msra.mxu0 %v12555_v21  ;;  %v12584_v21 = vld [vmem:[#allocation89_spill] sm:$0xff] }
 0x47c   :  { %3597 = vmatpush1.bf16.msra.mxu1 %v12556_v24  ;;  %3512 = vmatprep.subr.bf16.mxu0 %v12557_v27  ;;  %v12585_v27 = vld [vmem:[#allocation90_spill] sm:$0xff] }
 0x47d   :  { %3598 = vmatprep.subr.bf16.mxu1 %v12558_v26 }
 0x47f   :  { %3513 = vmatpush1.bf16.msra.mxu0 %v12559_v60 }
 0x480   :  { %3599 = vmatpush1.bf16.msra.mxu1 %v12560_v48  ;;  %3525 = vmatprep.subr.bf16.mxu0 %v12561_v6  ;;  %v12586_v48 = vld [vmem:[#allocation91_spill] sm:$0xff] }
 0x481   :  { %3611 = vmatprep.subr.bf16.mxu1 %v12562_v62 }
 0x482   :  { %3515 = vmatmul.mubr.bf16.vlgmr.msra.gmra.mrb[76].mxu0 %v12531_v63 }
 0x483   :  { %3601 = vmatmul.mubr.bf16.vlgmr.msra.gmra.mrb[76].mxu1 %v12531_v63  ;;  %3526 = vmatpush1.bf16.msra.mxu0 %v12563_v13  ;;  %v12572_v63 = vld [vmem:[#allocation60_spill] sm:$0xff] }
 0x484   :  { %3557 = vmatprep.mubr.bf16.mxu0 %v12564_v2  ;;  %3612 = vmatpush1.bf16.msra.mxu1 %v12565_v10 }
 0x485   :  { %3643 = vmatprep.mubr.bf16.mxu1 %v12564_v2  ;;  %3527 = vmatprep.subr.bf16.mxu0 %v12566_v15 }
 0x486   :  { %3613 = vmatprep.subr.bf16.mxu1 %v12567_v43 }
 0x487   :  { %3528 = vmatpush1.bf16.msra.mxu0 %v12568_v17 }
 0x488   :  { %3614 = vmatpush1.bf16.msra.mxu1 %v12569_v1  ;;  %3529 = vmatprep.subr.bf16.mxu0 %v12570_v8  ;;  %v12599_v1 = vld [vmem:[#allocation29_spill] sm:$0xff]  ;;  %v12600_v8 = vld [vmem:[#allocation59_spill] sm:$0xff] }
 0x489   :  { %3615 = vmatprep.subr.bf16.mxu1 %v12571_v31  ;;  %v6778_v31 = vld [vmem:[%s11572_s3 + $0x6c] ss:$16 sps:$4 sm:$0xff]  }
 0x48b   :  { %3530 = vmatpush1.bf16.msra.mxu0 %v12572_v63  ;;  %v6779_v63 = vld [vmem:[%s11572_s3 + $0x60] ss:$16 sps:$4 sm:$0xff]  }
 0x48c   :  { %3616 = vmatpush1.bf16.msra.mxu1 %v12573_v20  ;;  %3531 = vmatprep.subr.bf16.mxu0 %v12574_v25  ;;  %v6780_v20 = vld [vmem:[%s11572_s3 + $0x68] ss:$16 sps:$4 sm:$0xff]   ;;  %v6781_v25 = vld [vmem:[%s11572_s3 + $0x84] ss:$16 sps:$4 sm:$0xff]  }
 0x48d   :  { %3617 = vmatprep.subr.bf16.mxu1 %v12575_v33  ;;  %v6782_v33 = vld [vmem:[%s11572_s3 + $0x8c] ss:$16 sps:$4 sm:$0xff]  }
 0x48f   :  { %3532 = vmatpush1.bf16.msra.mxu0 %v12576_v58  ;;  %v6783_v58 = vld [vmem:[%s11572_s3 + $0x80] ss:$16 sps:$4 sm:$0xff]  }
 0x490   :  { %3618 = vmatpush1.bf16.msra.mxu1 %v12577_v38  ;;  %3533 = vmatprep.subr.bf16.mxu0 %v12578_v42  ;;  %v6784_v38 = vld [vmem:[%s11572_s3 + $0x88] ss:$16 sps:$4 sm:$0xff]   ;;  %v6785_v42 = vld [vmem:[%s11572_s3 + $0xa4] ss:$16 sps:$4 sm:$0xff]  }
 0x491   :  { %3619 = vmatprep.subr.bf16.mxu1 %v12579_v61  ;;  %v6786_v61 = vld [vmem:[%s11572_s3 + $0xac] ss:$16 sps:$4 sm:$0xff]  }
 0x493   :  { %3534 = vmatpush1.bf16.msra.mxu0 %v12580_v32  ;;  %v6787_v32 = vld [vmem:[%s11572_s3 + $0xa0] ss:$16 sps:$4 sm:$0xff]  }
 0x494   :  { %3620 = vmatpush1.bf16.msra.mxu1 %v12581_v0  ;;  %3535 = vmatprep.subr.bf16.mxu0 %v12582_v5  ;;  %v6788_v0 = vld [vmem:[%s11572_s3 + $0xa8] ss:$16 sps:$4 sm:$0xff]   ;;  %v6789_v5 = vld [vmem:[%s11572_s3 + $0xc4] ss:$16 sps:$4 sm:$0xff]  }
 0x495   :  { %v3179_v9 = vpop.f32.mrb[68].mxu0  ;;  %3621 = vmatprep.subr.bf16.mxu1 %v12583_v18  ;;  %v6791_v18 = vld [vmem:[%s11572_s3 + $0xc0] ss:$16 sps:$4 sm:$0xff]  }
 0x496   :  { %v3265_v19 = vpop.f32.mrb[68].mxu1  ;;  %v3181_v22 = vpop.f32.mrb[69].mxu0 }
 0x497   :  { %v3274_v56 = vmax.f32 %v3179_v9, %v3181_v22  ;;  %v3267_v23 = vpop.f32.mrb[69].mxu1  ;;  %v3183_v37 = vpop.f32.mrb[70].mxu0  ;;  %3536 = vmatpush1.bf16.msra.mxu0 %v12499_v55  ;;  %v6790_v9 = vld [vmem:[%s11572_s3 + $0xcc] ss:$16 sps:$4 sm:$0xff]   ;;  %v6793_v22 = vld [vmem:[%s11572_s3 + $0xe4] ss:$16 sps:$4 sm:$0xff]  }
 0x498   :  { %v3276_v40 = vmax.f32 %v3265_v19, %v3267_v23  ;;  %v3269_v52 = vpop.f32.mrb[70].mxu1  ;;  %3622 = vmatpush1.bf16.msra.mxu1 %v12584_v21  ;;  %v3185_v24 = vpop.f32.mrb[71].mxu0  ;;  %3537 = vmatprep.subr.bf16.mxu0 %v12585_v27  ;;  %v6792_v19 = vld [vmem:[%s11572_s3 + $0xc8] ss:$16 sps:$4 sm:$0xff]   ;;  %v6795_v23 = vld [vmem:[%s11572_s3 + $0xe0] ss:$16 sps:$4 sm:$0xff]  }
 0x499   :  { %v3275_v26 = vmax.f32 %v3183_v37, %v3185_v24  ;;  %v3271_v60 = vpop.f32.mrb[71].mxu1  ;;  %3623 = vmatprep.subr.bf16.mxu1 %v12586_v48  ;;  %v6796_v37 = vld [vmem:[%s11572_s3 + $0xe8] ss:$16 sps:$4 sm:$0xff]   ;;  %v6799_v21 = vld [vmem:[%s11572_s3 + $0x100] ss:$16 sps:$4 sm:$0xff]  }
 0x49a   :  { %v3278_v6 = vmax.f32 %v3274_v56, %v3276_v40  ;;  %v3277_v62 = vmax.f32 %v3269_v52, %v3271_v60  ;;  %v6794_v56 = vld [vmem:[%s11572_s3 + $0xec] ss:$16 sps:$4 sm:$0xff]   ;;  %v6797_v40 = vld [vmem:[%s11572_s3 + $0x104] ss:$16 sps:$4 sm:$0xff]   ;;  %v6800_v24 = vld [vmem:[%s11572_s3 + $0x108] ss:$16 sps:$4 sm:$0xff]  }
 0x49b   :  { %3538 = vmatpush1.bf16.msra.mxu0 %v9467_v49  ;;  %v6798_v52 = vld [vmem:[%s11572_s3 + $0x10c] ss:$16 sps:$4 sm:$0xff]   ;;  %v6801_v27 = vld [vmem:[%s11572_s3 + $0x124] ss:$16 sps:$4 sm:$0xff]   ;;  %v6803_v60 = vld [vmem:[%s11572_s3 + $0x120] ss:$16 sps:$4 sm:$0xff]  }
 0x49c   :  { %v3280_v13 = vadd.f32 %v9016_v14, %v3278_v6  ;;  %v3279_v10 = vmax.f32 %v3275_v26, %v3277_v62  ;;  %3624 = vmatpush1.bf16.msra.mxu1 %v9474_v30  ;;  %3539 = vmatprep.subr.bf16.mxu0 %v12502_v57  ;;  %v12589_v57 = vld [vmem:[#allocation19_spill] sm:$0xff]  ;;  %v6802_v26 = vld [vmem:[%s11572_s3 + $0x12c] ss:$16 sps:$4 sm:$0xff]   ;;  %v6804_v48 = vld [vmem:[%s11572_s3 + $0x128] ss:$16 sps:$4 sm:$0xff]  }
 0x49d   :  { %3625 = vmatprep.subr.bf16.mxu1 %v12503_v46  ;;  %v12591_v46 = vld [vmem:[#allocation21_spill] sm:$0xff]  ;;  %v6806_v62 = vld [vmem:[%s11572_s3 + $0x14c] ss:$16 sps:$4 sm:$0xff]  }
 0x49e   :  { %v3282_v55 = vmul.f32 0.01, %v3280_v13  ;;  %v3281_v15 = vadd.f32 %v9016_v14, %v3279_v10  ;;  %v12588_v14 = vld [vmem:[#allocation18_spill] sm:$0xff]  ;;  %v6805_v6 = vld [vmem:[%s11572_s3 + $0x144] ss:$16 sps:$4 sm:$0xff]  }
 0x49f   :  { %3540 = vmatpush1.bf16.msra.mxu0 %v12504_v35  ;;  %v12592_v35 = vld [vmem:[#allocation22_spill] sm:$0xff] }
 0x4a0   :  { %v3283_v43 = vmul.f32 0.01, %v3281_v15  ;;  %3626 = vmatpush1.bf16.msra.mxu1 %v12505_v53  ;;  %3541 = vmatprep.subr.bf16.mxu0 %v12506_v59  ;;  %v3284_v49 = vmax.f32 %v3280_v13, %v3282_v55  ;;  %v12590_v53 = vld [vmem:[#allocation20_spill] sm:$0xff]  ;;  %v12593_v59 = vld [vmem:[#allocation23_spill] sm:$0xff] }
 0x4a1   :  { %3627 = vmatprep.subr.bf16.mxu1 %v12507_v34  ;;  %v12597_v34 = vld [vmem:[#allocation27_spill] sm:$0xff]  ;;  %v6808_v10 = vld [vmem:[%s11572_s3 + $0x148] ss:$16 sps:$4 sm:$0xff]  }
 0x4a2   :  { %v3285_v17 = vmax.f32 %v3281_v15, %v3283_v43  ;;  %v6807_v13 = vld [vmem:[%s11572_s3 + $0x140] ss:$16 sps:$4 sm:$0xff]   ;;  %v6809_v55 = vld [vmem:[%s11572_s3 + $0x164] ss:$16 sps:$4 sm:$0xff]   ;;  %v6810_v15 = vld [vmem:[%s11572_s3 + $0x16c] ss:$16 sps:$4 sm:$0xff]  }
 0x4a3   :  { %3542 = vmatpush1.bf16.msra.mxu0 %v9517_v51  ;;  %v12594_v51 = vld [vmem:[#allocation24_spill] sm:$0xff]  ;;  %v6811_v43 = vld [vmem:[%s11572_s3 + $0x160] ss:$16 sps:$4 sm:$0xff]  }
 0x4a4   :  { %3628 = vmatpush1.bf16.msra.mxu1 %v9523_v28  ;;  %3543 = vmatprep.subr.bf16.mxu0 %v9529_v12  ;;  %v9947_v30 = vpack.c.bf16 %v3285_v17, %v3284_v49  ;;  %v12595_v28 = vld [vmem:[#allocation25_spill] sm:$0xff]  ;;  %v12596_v12 = vld [vmem:[#allocation26_spill] sm:$0xff] }
 0x4a5   :  { %3629 = vmatprep.subr.bf16.mxu1 %v9537_v50  ;;  %v12598_v50 = vld [vmem:[#allocation28_spill] sm:$0xff]  ;;  %v6813_v17 = vld [vmem:[%s11572_s3 + $0x184] ss:$16 sps:$4 sm:$0xff]  }
 0x4a6   :  { %12587 = vst [vmem:[#allocation92_spill] sm:$0xff] %v9947_v30  ;;  %v6812_v49 = vld [vmem:[%s11572_s3 + $0x168] ss:$16 sps:$4 sm:$0xff]   ;;  %v10741_v30 = vld [vmem:[%s11574_s5 + $0x1e4] ss:$16 sps:$4 sm:$0xff]  }
 0x4a7   :  { %3544 = vmatpush1.bf16.msra.mxu0 %v12588_v14  ;;  %v6814_v14 = vld [vmem:[%s11572_s3 + $0x18c] ss:$16 sps:$4 sm:$0xff]   ;;  %12635 = vst [vmem:[#allocation88_spill] sm:$0xff] %v10741_v30 }
 0x4a8   :  { %3630 = vmatpush1.bf16.msra.mxu1 %v12589_v57  ;;  %3545 = vmatprep.subr.bf16.mxu0 %v12590_v53  ;;  %v6815_v57 = vld [vmem:[%s11572_s3 + $0x180] ss:$16 sps:$4 sm:$0xff]   ;;  %v6816_v53 = vld [vmem:[%s11572_s3 + $0x188] ss:$16 sps:$4 sm:$0xff]  }
 0x4a9   :  { %3631 = vmatprep.subr.bf16.mxu1 %v12591_v46  ;;  %v6817_v46 = vld [vmem:[%s11572_s3 + $0x1a4] ss:$16 sps:$4 sm:$0xff]  }
 0x4ab   :  { %3546 = vmatpush1.bf16.msra.mxu0 %v12592_v35  ;;  %v6818_v35 = vld [vmem:[%s11572_s3 + $0x1ac] ss:$16 sps:$4 sm:$0xff]  }
 0x4ac   :  { %3632 = vmatpush1.bf16.msra.mxu1 %v12593_v59  ;;  %3547 = vmatprep.subr.bf16.mxu0 %v12594_v51  ;;  %v6819_v59 = vld [vmem:[%s11572_s3 + $0x1a0] ss:$16 sps:$4 sm:$0xff]   ;;  %v6820_v51 = vld [vmem:[%s11572_s3 + $0x1a8] ss:$16 sps:$4 sm:$0xff]  }
 0x4ad   :  { %3633 = vmatprep.subr.bf16.mxu1 %v12595_v28  ;;  %v6821_v28 = vld [vmem:[%s11572_s3 + $0x1c4] ss:$16 sps:$4 sm:$0xff]  }
 0x4af   :  { %3548 = vmatpush1.bf16.msra.mxu0 %v12596_v12  ;;  %v6822_v12 = vld [vmem:[%s11572_s3 + $0x1cc] ss:$16 sps:$4 sm:$0xff]  }
 0x4b0   :  { %3634 = vmatpush1.bf16.msra.mxu1 %v12597_v34  ;;  %3549 = vmatprep.subr.bf16.mxu0 %v12598_v50  ;;  %v6823_v34 = vld [vmem:[%s11572_s3 + $0x1c0] ss:$16 sps:$4 sm:$0xff]   ;;  %v6824_v50 = vld [vmem:[%s11572_s3 + $0x1c8] ss:$16 sps:$4 sm:$0xff]  }
 0x4b1   :  { %3635 = vmatprep.subr.bf16.mxu1 %v12599_v1  ;;  %v6825_v1 = vld [vmem:[%s11572_s3 + $0x1e4] ss:$16 sps:$4 sm:$0xff]  }
 0x4b3   :  { %3550 = vmatpush1.bf16.msra.mxu0 %v12520_v44  ;;  %v6765_v44 = vld [vmem:[%s11572_s3 + $0x4] ss:$16 sps:$4 sm:$0xff]  }
 0x4b4   :  { %3636 = vmatpush1.bf16.msra.mxu1 %v12521_v11  ;;  %3551 = vmatprep.subr.bf16.mxu0 %v12522_v47  ;;  %v6766_v11 = vld [vmem:[%s11572_s3 + $0xc] ss:$16 sps:$4 sm:$0xff]   ;;  %v12601_v47 = vld [vmem:[#allocation93_spill] sm:$0xff] }
 0x4b5   :  { %3637 = vmatprep.subr.bf16.mxu1 %v12523_v29  ;;  %v6772_v29 = vld [vmem:[%s11572_s3 + $0x28] ss:$16 sps:$4 sm:$0xff]  }
 0x4b7   :  { %3552 = vmatpush1.bf16.msra.mxu0 %v12524_v45  ;;  %v6773_v45 = vld [vmem:[%s11572_s3 + $0x44] ss:$16 sps:$4 sm:$0xff]  }
 0x4b8   :  { %3638 = vmatpush1.bf16.msra.mxu1 %v12600_v8  ;;  %3553 = vmatprep.subr.bf16.mxu0 %v12526_v41  ;;  %v6774_v41 = vld [vmem:[%s11572_s3 + $0x4c] ss:$16 sps:$4 sm:$0xff]  }
 0x4b9   :  { %3639 = vmatprep.subr.bf16.mxu1 %v12527_v3  ;;  %v6775_v3 = vld [vmem:[%s11572_s3 + $0x40] ss:$16 sps:$4 sm:$0xff]   ;;  %v6826_v8 = vld [vmem:[%s11572_s3 + $0x1ec] ss:$16 sps:$4 sm:$0xff]  }
 0x4bb   :  { %3554 = vmatpush1.bf16.msra.mxu0 %v12528_v39  ;;  %v6776_v39 = vld [vmem:[%s11572_s3 + $0x48] ss:$16 sps:$4 sm:$0xff]  }
 0x4bc   :  { %3640 = vmatpush1.bf16.msra.mxu1 %v12529_v7  ;;  %3555 = vmatprep.subr.bf16.mxu0 %v12530_v54  ;;  %v6768_v54 = vld [vmem:[%s11572_s3 + $0x8] ss:$16 sps:$4 sm:$0xff]   ;;  %v6771_v7 = vld [vmem:[%s11572_s3 + $0x20] ss:$16 sps:$4 sm:$0xff]  }
 0x4bd   :  { %3641 = vmatprep.subr.bf16.mxu1 %v9681_v4  ;;  %v6770_v4 = vld [vmem:[%s11572_s3 + $0x2c] ss:$16 sps:$4 sm:$0xff]  }
 0x4bf   :  { %3556 = vmatpush1.bf16.msra.mxu0 %v9687_v16  ;;  %v6767_v16 = vld [vmem:[%s11572_s3] ss:$16 sps:$4 sm:$0xff]  }
 0x4c0   :  { %3642 = vmatpush1.bf16.msra.mxu1 %v9693_v36  ;;  %3672 = vmatprep.subr.bf16.mxu0 %v6765_v44  ;;  %v6769_v36 = vld [vmem:[%s11572_s3 + $0x24] ss:$16 sps:$4 sm:$0xff]   ;;  %v6827_v44 = vld [vmem:[%s11572_s3 + $0x1e0] ss:$16 sps:$4 sm:$0xff]  }
 0x4c1   :  { %3758 = vmatprep.subr.bf16.mxu1 %v6766_v11  ;;  %v6828_v11 = vld [vmem:[%s11572_s3 + $0x1e8] ss:$16 sps:$4 sm:$0xff]  }
 0x4c2   :  { %3558 = vmatmul.mubr.bf16.vlgmr.msra.gmra.mrb[76].mxu0 %v12601_v47 }
 0x4c3   :  { %3644 = vmatmul.mubr.bf16.vlgmr.msra.gmra.mrb[76].mxu1 %v12601_v47  ;;  %3673 = vmatpush1.bf16.msra.mxu0 %v6767_v16  ;;  %v6829_v16 = vld [vmem:[%s11572_s3 + $0x204] ss:$16 sps:$4 sm:$0xff]  }
 0x4c4   :  { %3704 = vmatprep.mubr.bf16.mxu0 %v12564_v2  ;;  %3759 = vmatpush1.bf16.msra.mxu1 %v6768_v54  ;;  %v6830_v54 = vld [vmem:[%s11572_s3 + $0x20c] ss:$16 sps:$4 sm:$0xff]  }
 0x4c5   :  { %3790 = vmatprep.mubr.bf16.mxu1 %v12564_v2  ;;  %3674 = vmatprep.subr.bf16.mxu0 %v6769_v36  ;;  %v6777_v2 = vld [vmem:[%s11572_s3 + $0x64] ss:$16 sps:$4 sm:$0xff]   ;;  %v6831_v36 = vld [vmem:[%s11572_s3 + $0x200] ss:$16 sps:$4 sm:$0xff]  }
 0x4c6   :  { %3760 = vmatprep.subr.bf16.mxu1 %v6770_v4  ;;  %v6832_v4 = vld [vmem:[%s11572_s3 + $0x208] ss:$16 sps:$4 sm:$0xff]  }
 0x4c7   :  { %3675 = vmatpush1.bf16.msra.mxu0 %v6771_v7  ;;  %v6833_v7 = vld [vmem:[%s11572_s3 + $0x224] ss:$16 sps:$4 sm:$0xff]  }
 0x4c8   :  { %3761 = vmatpush1.bf16.msra.mxu1 %v6772_v29  ;;  %3676 = vmatprep.subr.bf16.mxu0 %v6773_v45  ;;  %v6834_v29 = vld [vmem:[%s11572_s3 + $0x22c] ss:$16 sps:$4 sm:$0xff]   ;;  %v6835_v45 = vld [vmem:[%s11572_s3 + $0x220] ss:$16 sps:$4 sm:$0xff]  }
 0x4c9   :  { %3762 = vmatprep.subr.bf16.mxu1 %v6774_v41  ;;  %v6836_v41 = vld [vmem:[%s11572_s3 + $0x228] ss:$16 sps:$4 sm:$0xff]  }
 0x4cb   :  { %3677 = vmatpush1.bf16.msra.mxu0 %v6775_v3  ;;  %v6837_v3 = vld [vmem:[%s11572_s3 + $0x244] ss:$16 sps:$4 sm:$0xff]  }
 0x4cc   :  { %3763 = vmatpush1.bf16.msra.mxu1 %v6776_v39  ;;  %3678 = vmatprep.subr.bf16.mxu0 %v6777_v2  ;;  %v6838_v39 = vld [vmem:[%s11572_s3 + $0x24c] ss:$16 sps:$4 sm:$0xff]   ;;  %v6839_v2 = vld [vmem:[%s11572_s3 + $0x240] ss:$16 sps:$4 sm:$0xff]  }
 0x4cd   :  { %3764 = vmatprep.subr.bf16.mxu1 %v6778_v31  ;;  %v6840_v31 = vld [vmem:[%s11572_s3 + $0x248] ss:$16 sps:$4 sm:$0xff]  }
 0x4cf   :  { %3679 = vmatpush1.bf16.msra.mxu0 %v6779_v63  ;;  %v6841_v63 = vld [vmem:[%s11572_s3 + $0x264] ss:$16 sps:$4 sm:$0xff]  }
 0x4d0   :  { %3765 = vmatpush1.bf16.msra.mxu1 %v6780_v20  ;;  %3680 = vmatprep.subr.bf16.mxu0 %v6781_v25  ;;  %v6842_v20 = vld [vmem:[%s11572_s3 + $0x26c] ss:$16 sps:$4 sm:$0xff]   ;;  %v6843_v25 = vld [vmem:[%s11572_s3 + $0x260] ss:$16 sps:$4 sm:$0xff]  }
 0x4d1   :  { %3766 = vmatprep.subr.bf16.mxu1 %v6782_v33  ;;  %v6844_v33 = vld [vmem:[%s11572_s3 + $0x268] ss:$16 sps:$4 sm:$0xff]  }
 0x4d3   :  { %3681 = vmatpush1.bf16.msra.mxu0 %v6783_v58  ;;  %v6845_v58 = vld [vmem:[%s11572_s3 + $0x284] ss:$16 sps:$4 sm:$0xff]  }
 0x4d4   :  { %3767 = vmatpush1.bf16.msra.mxu1 %v6784_v38  ;;  %3682 = vmatprep.subr.bf16.mxu0 %v6785_v42  ;;  %v6846_v38 = vld [vmem:[%s11572_s3 + $0x28c] ss:$16 sps:$4 sm:$0xff]   ;;  %v6847_v42 = vld [vmem:[%s11572_s3 + $0x280] ss:$16 sps:$4 sm:$0xff]  }
 0x4d5   :  { %3768 = vmatprep.subr.bf16.mxu1 %v6786_v61  ;;  %v6848_v61 = vld [vmem:[%s11572_s3 + $0x288] ss:$16 sps:$4 sm:$0xff]  }
 0x4d7   :  { %3683 = vmatpush1.bf16.msra.mxu0 %v6787_v32  ;;  %v6849_v32 = vld [vmem:[%s11572_s3 + $0x2a4] ss:$16 sps:$4 sm:$0xff]  }
 0x4d8   :  { %3769 = vmatpush1.bf16.msra.mxu1 %v6788_v0  ;;  %3684 = vmatprep.subr.bf16.mxu0 %v6789_v5  ;;  %v6850_v5 = vld [vmem:[%s11572_s3 + $0x2ac] ss:$16 sps:$4 sm:$0xff]  }
 0x4d9   :  { %3770 = vmatprep.subr.bf16.mxu1 %v6790_v9 }
 0x4db   :  { %3685 = vmatpush1.bf16.msra.mxu0 %v6791_v18 }
 0x4dc   :  { %3771 = vmatpush1.bf16.msra.mxu1 %v6792_v19  ;;  %3686 = vmatprep.subr.bf16.mxu0 %v6793_v22 }
 0x4dd   :  { %3772 = vmatprep.subr.bf16.mxu1 %v6794_v56 }
 0x4df   :  { %3687 = vmatpush1.bf16.msra.mxu0 %v6795_v23  ;;  %v6851_v23 = vld [vmem:[%s11572_s3 + $0x2a0] ss:$16 sps:$4 sm:$0xff]  }
 0x4e0   :  { %3773 = vmatpush1.bf16.msra.mxu1 %v6796_v37  ;;  %3688 = vmatprep.subr.bf16.mxu0 %v6797_v40 }
 0x4e1   :  { %3774 = vmatprep.subr.bf16.mxu1 %v6798_v52  ;;  %v6852_v52 = vld [vmem:[%s11572_s3 + $0x2a8] ss:$16 sps:$4 sm:$0xff]  }
 0x4e3   :  { %3689 = vmatpush1.bf16.msra.mxu0 %v6799_v21 }
 0x4e4   :  { %3775 = vmatpush1.bf16.msra.mxu1 %v6800_v24  ;;  %3690 = vmatprep.subr.bf16.mxu0 %v6801_v27  ;;  %v6853_v24 = vld [vmem:[%s11572_s3 + $0x2c4] ss:$16 sps:$4 sm:$0xff]  }
 0x4e5   :  { %3776 = vmatprep.subr.bf16.mxu1 %v6802_v26 }
 0x4e7   :  { %3691 = vmatpush1.bf16.msra.mxu0 %v6803_v60  ;;  %v6854_v60 = vld [vmem:[%s11572_s3 + $0x2cc] ss:$16 sps:$4 sm:$0xff]  }
 0x4e8   :  { %3777 = vmatpush1.bf16.msra.mxu1 %v6804_v48  ;;  %3692 = vmatprep.subr.bf16.mxu0 %v6805_v6 }
 0x4e9   :  { %3778 = vmatprep.subr.bf16.mxu1 %v6806_v62  ;;  %v6855_v62 = vld [vmem:[%s11572_s3 + $0x2c0] ss:$16 sps:$4 sm:$0xff]  }
 0x4eb   :  { %3693 = vmatpush1.bf16.msra.mxu0 %v6807_v13  ;;  %v10260_v13 = vld [vmem:[%s11573_s4] ss:$0 sm:$0xff] }
 0x4ec   :  { %3779 = vmatpush1.bf16.msra.mxu1 %v6808_v10  ;;  %3694 = vmatprep.subr.bf16.mxu0 %v6809_v55 }
 0x4ed   :  { %3780 = vmatprep.subr.bf16.mxu1 %v6810_v15  ;;  %v6857_v15 = vld [vmem:[%s11572_s3 + $0x2c8] ss:$16 sps:$4 sm:$0xff]  }
 0x4ef   :  { %3695 = vmatpush1.bf16.msra.mxu0 %v6811_v43  ;;  %v6858_v43 = vld [vmem:[%s11572_s3 + $0x2e4] ss:$16 sps:$4 sm:$0xff]  }
 0x4f0   :  { %3781 = vmatpush1.bf16.msra.mxu1 %v6812_v49  ;;  %3696 = vmatprep.subr.bf16.mxu0 %v6813_v17  ;;  %v6859_v49 = vld [vmem:[%s11572_s3 + $0x2ec] ss:$16 sps:$4 sm:$0xff]  }
 0x4f1   :  { %3782 = vmatprep.subr.bf16.mxu1 %v6814_v14 }
 0x4f3   :  { %3697 = vmatpush1.bf16.msra.mxu0 %v6815_v57  ;;  %v6860_v57 = vld [vmem:[%s11572_s3 + $0x2e0] ss:$16 sps:$4 sm:$0xff]  }
 0x4f4   :  { %3783 = vmatpush1.bf16.msra.mxu1 %v6816_v53  ;;  %3698 = vmatprep.subr.bf16.mxu0 %v6817_v46  ;;  %v6861_v46 = vld [vmem:[%s11572_s3 + $0x2e8] ss:$16 sps:$4 sm:$0xff]  }
 0x4f5   :  { %3784 = vmatprep.subr.bf16.mxu1 %v6818_v35  ;;  %v6862_v35 = vld [vmem:[%s11572_s3 + $0x304] ss:$16 sps:$4 sm:$0xff]  }
 0x4f7   :  { %3699 = vmatpush1.bf16.msra.mxu0 %v6819_v59  ;;  %v6863_v59 = vld [vmem:[%s11572_s3 + $0x30c] ss:$16 sps:$4 sm:$0xff]  }
 0x4f8   :  { %3785 = vmatpush1.bf16.msra.mxu1 %v6820_v51  ;;  %3700 = vmatprep.subr.bf16.mxu0 %v6821_v28 }
 0x4f9   :  { %3786 = vmatprep.subr.bf16.mxu1 %v6822_v12  ;;  %v6864_v12 = vld [vmem:[%s11572_s3 + $0x300] ss:$16 sps:$4 sm:$0xff]  }
 0x4fb   :  { %3701 = vmatpush1.bf16.msra.mxu0 %v6823_v34  ;;  %v6865_v34 = vld [vmem:[%s11572_s3 + $0x308] ss:$16 sps:$4 sm:$0xff]  }
 0x4fc   :  { %3787 = vmatpush1.bf16.msra.mxu1 %v6824_v50  ;;  %3702 = vmatprep.subr.bf16.mxu0 %v6825_v1  ;;  %v6866_v50 = vld [vmem:[%s11572_s3 + $0x324] ss:$16 sps:$4 sm:$0xff]  }
 0x4fd   :  { %3788 = vmatprep.subr.bf16.mxu1 %v6826_v8  ;;  %v6867_v8 = vld [vmem:[%s11572_s3 + $0x32c] ss:$16 sps:$4 sm:$0xff]  }
 0x4ff   :  { %3703 = vmatpush1.bf16.msra.mxu0 %v6827_v44  ;;  %v6868_v44 = vld [vmem:[%s11572_s3 + $0x320] ss:$16 sps:$4 sm:$0xff]  }
 0x500   :  { %3789 = vmatpush1.bf16.msra.mxu1 %v6828_v11  ;;  %3715 = vmatprep.subr.bf16.mxu0 %v6829_v16  ;;  %v6869_v11 = vld [vmem:[%s11572_s3 + $0x328] ss:$16 sps:$4 sm:$0xff]   ;;  %v6870_v16 = vld [vmem:[%s11572_s3 + $0x344] ss:$16 sps:$4 sm:$0xff]  }
 0x501   :  { %3801 = vmatprep.subr.bf16.mxu1 %v6830_v54  ;;  %v6871_v54 = vld [vmem:[%s11572_s3 + $0x34c] ss:$16 sps:$4 sm:$0xff]  }
 0x502   :  { %3705 = vmatmul.mubr.bf16.vlgmr.msra.gmra.mrb[80].mxu0 %v12601_v47 }
 0x503   :  { %3791 = vmatmul.mubr.bf16.vlgmr.msra.gmra.mrb[80].mxu1 %v12601_v47  ;;  %3716 = vmatpush1.bf16.msra.mxu0 %v6831_v36  ;;  %v12602_v47 = vmov 0   ;;  %v6872_v36 = vld [vmem:[%s11572_s3 + $0x340] ss:$16 sps:$4 sm:$0xff]  }
 0x504   :  { %3802 = vmatpush1.bf16.msra.mxu1 %v6832_v4  ;;  %3717 = vmatprep.subr.bf16.mxu0 %v6833_v7  ;;  %v6873_v4 = vld [vmem:[%s11572_s3 + $0x348] ss:$16 sps:$4 sm:$0xff]   ;;  %v6874_v7 = vld [vmem:[%s11572_s3 + $0x364] ss:$16 sps:$4 sm:$0xff]  }
 0x505   :  { %3803 = vmatprep.subr.bf16.mxu1 %v6834_v29  ;;  %3747 = vmatprep.mubr.bf16.mxu0 %v12602_v47  ;;  %v6875_v29 = vld [vmem:[%s11572_s3 + $0x36c] ss:$16 sps:$4 sm:$0xff]  }
 0x506   :  { %3833 = vmatprep.mubr.bf16.mxu1 %v12602_v47 }
 0x507   :  { %3718 = vmatpush1.bf16.msra.mxu0 %v6835_v45  ;;  %v6876_v45 = vld [vmem:[%s11572_s3 + $0x360] ss:$16 sps:$4 sm:$0xff]  }
 0x508   :  { %3804 = vmatpush1.bf16.msra.mxu1 %v6836_v41  ;;  %3719 = vmatprep.subr.bf16.mxu0 %v6837_v3  ;;  %v6877_v41 = vld [vmem:[%s11572_s3 + $0x368] ss:$16 sps:$4 sm:$0xff]   ;;  %v6878_v3 = vld [vmem:[%s11572_s3 + $0x384] ss:$16 sps:$4 sm:$0xff]  }
 0x509   :  { %3805 = vmatprep.subr.bf16.mxu1 %v6838_v39  ;;  %v6879_v39 = vld [vmem:[%s11572_s3 + $0x38c] ss:$16 sps:$4 sm:$0xff]  }
 0x50b   :  { %3720 = vmatpush1.bf16.msra.mxu0 %v6839_v2  ;;  %v6880_v2 = vld [vmem:[%s11572_s3 + $0x380] ss:$16 sps:$4 sm:$0xff]  }
 0x50c   :  { %3806 = vmatpush1.bf16.msra.mxu1 %v6840_v31  ;;  %3721 = vmatprep.subr.bf16.mxu0 %v6841_v63  ;;  %v6881_v31 = vld [vmem:[%s11572_s3 + $0x388] ss:$16 sps:$4 sm:$0xff]   ;;  %v6882_v63 = vld [vmem:[%s11572_s3 + $0x3a4] ss:$16 sps:$4 sm:$0xff]  }
 0x50d   :  { %3807 = vmatprep.subr.bf16.mxu1 %v6842_v20  ;;  %v6883_v20 = vld [vmem:[%s11572_s3 + $0x3ac] ss:$16 sps:$4 sm:$0xff]  }
 0x50f   :  { %3722 = vmatpush1.bf16.msra.mxu0 %v6843_v25  ;;  %v6884_v25 = vld [vmem:[%s11572_s3 + $0x3a0] ss:$16 sps:$4 sm:$0xff]  }
 0x510   :  { %3808 = vmatpush1.bf16.msra.mxu1 %v6844_v33  ;;  %3723 = vmatprep.subr.bf16.mxu0 %v6845_v58  ;;  %v6885_v33 = vld [vmem:[%s11572_s3 + $0x3a8] ss:$16 sps:$4 sm:$0xff]   ;;  %v6886_v58 = vld [vmem:[%s11572_s3 + $0x3c4] ss:$16 sps:$4 sm:$0xff]  }
 0x511   :  { %3809 = vmatprep.subr.bf16.mxu1 %v6846_v38  ;;  %v6887_v38 = vld [vmem:[%s11572_s3 + $0x3cc] ss:$16 sps:$4 sm:$0xff]  }
 0x513   :  { %3724 = vmatpush1.bf16.msra.mxu0 %v6847_v42  ;;  %v6888_v42 = vld [vmem:[%s11572_s3 + $0x3c0] ss:$16 sps:$4 sm:$0xff]  }
 0x514   :  { %3810 = vmatpush1.bf16.msra.mxu1 %v6848_v61  ;;  %3725 = vmatprep.subr.bf16.mxu0 %v6849_v32  ;;  %v6889_v61 = vld [vmem:[%s11572_s3 + $0x3c8] ss:$16 sps:$4 sm:$0xff]   ;;  %v6890_v32 = vld [vmem:[%s11572_s3 + $0x3e4] ss:$16 sps:$4 sm:$0xff]  }
 0x515   :  { %v3369_v0 = vpop.f32.mrb[72].mxu0  ;;  %3811 = vmatprep.subr.bf16.mxu1 %v6850_v5  ;;  %v6891_v5 = vld [vmem:[%s11572_s3 + $0x3ec] ss:$16 sps:$4 sm:$0xff]  }
 0x516   :  { %v3455_v9 = vpop.f32.mrb[72].mxu1  ;;  %v3371_v18 = vpop.f32.mrb[73].mxu0 }
 0x517   :  { %v3464_v19 = vmax.f32 %v3369_v0, %v3371_v18  ;;  %v3457_v22 = vpop.f32.mrb[73].mxu1  ;;  %v3373_v56 = vpop.f32.mrb[74].mxu0  ;;  %3726 = vmatpush1.bf16.msra.mxu0 %v6851_v23  ;;  %v10371_v0 = vld [vmem:[%s11574_s5 + $0x4] ss:$16 sps:$4 sm:$0xff]   ;;  %v6892_v18 = vld [vmem:[%s11572_s3 + $0x3e0] ss:$16 sps:$4 sm:$0xff]  }
 0x518   :  { %v3466_v37 = vmax.f32 %v3455_v9, %v3457_v22  ;;  %v3459_v40 = vpop.f32.mrb[74].mxu1  ;;  %3812 = vmatpush1.bf16.msra.mxu1 %v6852_v52  ;;  %v3375_v21 = vpop.f32.mrb[75].mxu0  ;;  %3727 = vmatprep.subr.bf16.mxu0 %v6853_v24  ;;  %v10379_v9 = vld [vmem:[%s11574_s5 + $0xc] ss:$16 sps:$4 sm:$0xff]   ;;  %v6893_v22 = vld [vmem:[%s11572_s3 + $0x3e8] ss:$16 sps:$4 sm:$0xff]  }
 0x519   :  { %v3465_v27 = vmax.f32 %v3373_v56, %v3375_v21  ;;  %v3461_v26 = vpop.f32.mrb[75].mxu1  ;;  %3813 = vmatprep.subr.bf16.mxu1 %v6854_v60  ;;  %v10396_v56 = vld [vmem:[%s11574_s5 + $0x8] ss:$16 sps:$4 sm:$0xff]   ;;  %v10402_v23 = vld [vmem:[%s11574_s5 + $0x24] ss:$16 sps:$4 sm:$0xff]  }
 0x51a   :  { %v3468_v48 = vmax.f32 %v3464_v19, %v3466_v37  ;;  %v3467_v6 = vmax.f32 %v3459_v40, %v3461_v26  ;;  %v10387_v19 = vld [vmem:[%s11574_s5] ss:$16 sps:$4 sm:$0xff]   ;;  %v10408_v40 = vld [vmem:[%s11574_s5 + $0x2c] ss:$16 sps:$4 sm:$0xff]   ;;  %v10422_v24 = vld [vmem:[%s11574_s5 + $0x28] ss:$16 sps:$4 sm:$0xff]  }
 0x51b   :  { %3728 = vmatpush1.bf16.msra.mxu0 %v6855_v62  ;;  %v12604_v37 = vld [vmem:[#allocation11_spill] sm:$0xff]  ;;  %v12605_v21 = vld [vmem:[#allocation64_spill] sm:$0xff] }
 0x51c   :  { %v3470_v10 = vadd.f32 %v10260_v13, %v3468_v48  ;;  %v3469_v55 = vmax.f32 %v3465_v27, %v3467_v6  ;;  %3814 = vmatpush1.bf16.msra.mxu1 %v6857_v15  ;;  %3729 = vmatprep.subr.bf16.mxu0 %v6858_v43  ;;  %v10415_v52 = vld [vmem:[%s11574_s5 + $0x20] ss:$16 sps:$4 sm:$0xff]   ;;  %v10427_v27 = vld [vmem:[%s11574_s5 + $0x44] ss:$16 sps:$4 sm:$0xff]   ;;  %v10434_v26 = vld [vmem:[%s11574_s5 + $0x4c] ss:$16 sps:$4 sm:$0xff]  }
 0x51d   :  { %3815 = vmatprep.subr.bf16.mxu1 %v6859_v49  ;;  %v10441_v60 = vld [vmem:[%s11574_s5 + $0x40] ss:$16 sps:$4 sm:$0xff]   ;;  %v10448_v48 = vld [vmem:[%s11574_s5 + $0x48] ss:$16 sps:$4 sm:$0xff]   ;;  %v10453_v6 = vld [vmem:[%s11574_s5 + $0x64] ss:$16 sps:$4 sm:$0xff]  }
 0x51e   :  { %v3472_v17 = vmul.f32 0.01, %v3470_v10  ;;  %v3471_v14 = vadd.f32 %v10260_v13, %v3469_v55  ;;  %v10459_v62 = vld [vmem:[%s11574_s5 + $0x6c] ss:$16 sps:$4 sm:$0xff]   ;;  %v10472_v55 = vld [vmem:[%s11574_s5 + $0x68] ss:$16 sps:$4 sm:$0xff]  }
 0x51f   :  { %3730 = vmatpush1.bf16.msra.mxu0 %v6860_v57  ;;  %v10477_v15 = vld [vmem:[%s11574_s5 + $0x84] ss:$16 sps:$4 sm:$0xff]   ;;  %v10483_v43 = vld [vmem:[%s11574_s5 + $0x8c] ss:$16 sps:$4 sm:$0xff]   ;;  %v10489_v49 = vld [vmem:[%s11574_s5 + $0x80] ss:$16 sps:$4 sm:$0xff]  }
 0x520   :  { %v3473_v53 = vmul.f32 0.01, %v3471_v14  ;;  %3816 = vmatpush1.bf16.msra.mxu1 %v6861_v46  ;;  %3731 = vmatprep.subr.bf16.mxu0 %v6862_v35  ;;  %v3474_v51 = vmax.f32 %v3470_v10, %v3472_v17  ;;  %v10465_v10 = vld [vmem:[%s11574_s5 + $0x60] ss:$16 sps:$4 sm:$0xff]   ;;  %v10496_v17 = vld [vmem:[%s11574_s5 + $0x88] ss:$16 sps:$4 sm:$0xff]  }
 0x521   :  { %3817 = vmatprep.subr.bf16.mxu1 %v6863_v59  ;;  %v10507_v57 = vld [vmem:[%s11574_s5 + $0xac] ss:$16 sps:$4 sm:$0xff]   ;;  %v10520_v46 = vld [vmem:[%s11574_s5 + $0xa8] ss:$16 sps:$4 sm:$0xff]   ;;  %v10525_v35 = vld [vmem:[%s11574_s5 + $0xc4] ss:$16 sps:$4 sm:$0xff]  }
 0x522   :  { %v3475_v28 = vmax.f32 %v3471_v14, %v3473_v53  ;;  %v10501_v14 = vld [vmem:[%s11574_s5 + $0xa4] ss:$16 sps:$4 sm:$0xff]   ;;  %v10513_v53 = vld [vmem:[%s11574_s5 + $0xa0] ss:$16 sps:$4 sm:$0xff]   ;;  %v10531_v59 = vld [vmem:[%s11574_s5 + $0xcc] ss:$16 sps:$4 sm:$0xff]  }
 0x523   :  { %3732 = vmatpush1.bf16.msra.mxu0 %v6864_v12  ;;  %v10549_v12 = vld [vmem:[%s11574_s5 + $0xe4] ss:$16 sps:$4 sm:$0xff]  }
 0x524   :  { %3818 = vmatpush1.bf16.msra.mxu1 %v6865_v34  ;;  %3733 = vmatprep.subr.bf16.mxu0 %v6866_v50  ;;  %v10294_v1 = vpack.c.bf16 %v3475_v28, %v3474_v51  ;;  %v10537_v51 = vld [vmem:[%s11574_s5 + $0xc0] ss:$16 sps:$4 sm:$0xff]   ;;  %v10544_v28 = vld [vmem:[%s11574_s5 + $0xc8] ss:$16 sps:$4 sm:$0xff]   ;;  %v10555_v34 = vld [vmem:[%s11574_s5 + $0xec] ss:$16 sps:$4 sm:$0xff]  }
 0x525   :  { %3819 = vmatprep.subr.bf16.mxu1 %v6867_v8  ;;  %v10561_v50 = vld [vmem:[%s11574_s5 + $0xe0] ss:$16 sps:$4 sm:$0xff]   ;;  %v10568_v8 = vld [vmem:[%s11574_s5 + $0xe8] ss:$16 sps:$4 sm:$0xff]  }
 0x526   :  { %12603 = vst [vmem:[#allocation87_spill] sm:$0xff] %v10294_v1  ;;  %12606 = vst [vmem:[#allocation12_spill] sm:$0xff] %v10568_v8  ;;  %v10747_v1 = vld [vmem:[%s11574_s5 + $0x1ec] ss:$16 sps:$4 sm:$0xff]  }
 0x527   :  { %3734 = vmatpush1.bf16.msra.mxu0 %v6868_v44  ;;  %v10573_v44 = vld [vmem:[%s11574_s5 + $0x104] ss:$16 sps:$4 sm:$0xff]   ;;  %12636 = vst [vmem:[#allocation5_spill] sm:$0xff] %v10747_v1 }
 0x528   :  { %3820 = vmatpush1.bf16.msra.mxu1 %v6869_v11  ;;  %3735 = vmatprep.subr.bf16.mxu0 %v6870_v16  ;;  %12607 = vst [vmem:[#allocation13_spill] sm:$0xff] %v10573_v44  ;;  %v10579_v11 = vld [vmem:[%s11574_s5 + $0x10c] ss:$16 sps:$4 sm:$0xff]   ;;  %v10585_v16 = vld [vmem:[%s11574_s5 + $0x100] ss:$16 sps:$4 sm:$0xff]  }
 0x529   :  { %3821 = vmatprep.subr.bf16.mxu1 %v6871_v54  ;;  %12608 = vst [vmem:[#allocation7_spill] sm:$0xff] %v10579_v11  ;;  %12609 = vst [vmem:[#allocation14_spill] sm:$0xff] %v10585_v16  ;;  %v10592_v54 = vld [vmem:[%s11574_s5 + $0x108] ss:$16 sps:$4 sm:$0xff]  }
 0x52a   :  { %12610 = vst [vmem:[#allocation15_spill] sm:$0xff] %v10592_v54 }
 0x52b   :  { %3736 = vmatpush1.bf16.msra.mxu0 %v6872_v36  ;;  %v10597_v36 = vld [vmem:[%s11574_s5 + $0x124] ss:$16 sps:$4 sm:$0xff]  }
 0x52c   :  { %3822 = vmatpush1.bf16.msra.mxu1 %v6873_v4  ;;  %3737 = vmatprep.subr.bf16.mxu0 %v6874_v7  ;;  %12611 = vst [vmem:[#allocation16_spill] sm:$0xff] %v10597_v36  ;;  %v10603_v4 = vld [vmem:[%s11574_s5 + $0x12c] ss:$16 sps:$4 sm:$0xff]   ;;  %v10609_v7 = vld [vmem:[%s11574_s5 + $0x120] ss:$16 sps:$4 sm:$0xff]  }
 0x52d   :  { %3823 = vmatprep.subr.bf16.mxu1 %v6875_v29  ;;  %12612 = vst [vmem:[#allocation30_spill] sm:$0xff] %v10603_v4  ;;  %12613 = vst [vmem:[#allocation6_spill] sm:$0xff] %v10609_v7  ;;  %v10616_v29 = vld [vmem:[%s11574_s5 + $0x128] ss:$16 sps:$4 sm:$0xff]  }
 0x52e   :  { %12614 = vst [vmem:[#allocation56_spill] sm:$0xff] %v10616_v29 }
 0x52f   :  { %3738 = vmatpush1.bf16.msra.mxu0 %v6876_v45  ;;  %v10621_v45 = vld [vmem:[%s11574_s5 + $0x144] ss:$16 sps:$4 sm:$0xff]  }
 0x530   :  { %3824 = vmatpush1.bf16.msra.mxu1 %v6877_v41  ;;  %3739 = vmatprep.subr.bf16.mxu0 %v6878_v3  ;;  %12615 = vst [vmem:[#allocation57_spill] sm:$0xff] %v10621_v45  ;;  %v10627_v41 = vld [vmem:[%s11574_s5 + $0x14c] ss:$16 sps:$4 sm:$0xff]   ;;  %v10633_v3 = vld [vmem:[%s11574_s5 + $0x140] ss:$16 sps:$4 sm:$0xff]  }
 0x531   :  { %3825 = vmatprep.subr.bf16.mxu1 %v6879_v39  ;;  %12616 = vst [vmem:[#allocation58_spill] sm:$0xff] %v10627_v41  ;;  %12617 = vst [vmem:[#allocation63_spill] sm:$0xff] %v10633_v3  ;;  %v10640_v39 = vld [vmem:[%s11574_s5 + $0x148] ss:$16 sps:$4 sm:$0xff]  }
 0x532   :  { %12618 = vst [vmem:[#allocation37_spill] sm:$0xff] %v10640_v39 }
 0x533   :  { %3740 = vmatpush1.bf16.msra.mxu0 %v6880_v2  ;;  %v10645_v2 = vld [vmem:[%s11574_s5 + $0x164] ss:$16 sps:$4 sm:$0xff]  }
 0x534   :  { %3826 = vmatpush1.bf16.msra.mxu1 %v6881_v31  ;;  %3741 = vmatprep.subr.bf16.mxu0 %v6882_v63  ;;  %12619 = vst [vmem:[#allocation94_spill] sm:$0xff] %v10645_v2  ;;  %v10651_v31 = vld [vmem:[%s11574_s5 + $0x16c] ss:$16 sps:$4 sm:$0xff]   ;;  %v10657_v63 = vld [vmem:[%s11574_s5 + $0x160] ss:$16 sps:$4 sm:$0xff]  }
 0x535   :  { %3827 = vmatprep.subr.bf16.mxu1 %v6883_v20  ;;  %12620 = vst [vmem:[#allocation95_spill] sm:$0xff] %v10651_v31  ;;  %12621 = vst [vmem:[#allocation96_spill] sm:$0xff] %v10657_v63  ;;  %v10664_v20 = vld [vmem:[%s11574_s5 + $0x168] ss:$16 sps:$4 sm:$0xff]  }
 0x536   :  { %12622 = vst [vmem:[#allocation70_spill] sm:$0xff] %v10664_v20 }
 0x537   :  { %3742 = vmatpush1.bf16.msra.mxu0 %v6884_v25  ;;  %v10669_v25 = vld [vmem:[%s11574_s5 + $0x184] ss:$16 sps:$4 sm:$0xff]  }
 0x538   :  { %3828 = vmatpush1.bf16.msra.mxu1 %v6885_v33  ;;  %3743 = vmatprep.subr.bf16.mxu0 %v6886_v58  ;;  %12623 = vst [vmem:[#allocation65_spill] sm:$0xff] %v10669_v25  ;;  %v10675_v33 = vld [vmem:[%s11574_s5 + $0x18c] ss:$16 sps:$4 sm:$0xff]   ;;  %v10681_v58 = vld [vmem:[%s11574_s5 + $0x180] ss:$16 sps:$4 sm:$0xff]  }
 0x539   :  { %3829 = vmatprep.subr.bf16.mxu1 %v6887_v38  ;;  %12624 = vst [vmem:[#allocation66_spill] sm:$0xff] %v10675_v33  ;;  %12625 = vst [vmem:[#allocation67_spill] sm:$0xff] %v10681_v58  ;;  %v10688_v38 = vld [vmem:[%s11574_s5 + $0x188] ss:$16 sps:$4 sm:$0xff]  }
 0x53a   :  { %12626 = vst [vmem:[#allocation78_spill] sm:$0xff] %v10688_v38 }
 0x53b   :  { %3744 = vmatpush1.bf16.msra.mxu0 %v6888_v42  ;;  %v10693_v42 = vld [vmem:[%s11574_s5 + $0x1a4] ss:$16 sps:$4 sm:$0xff]  }
 0x53c   :  { %3830 = vmatpush1.bf16.msra.mxu1 %v6889_v61  ;;  %3745 = vmatprep.subr.bf16.mxu0 %v6890_v32  ;;  %12627 = vst [vmem:[#allocation79_spill] sm:$0xff] %v10693_v42  ;;  %v10699_v61 = vld [vmem:[%s11574_s5 + $0x1ac] ss:$16 sps:$4 sm:$0xff]   ;;  %v10705_v32 = vld [vmem:[%s11574_s5 + $0x1a0] ss:$16 sps:$4 sm:$0xff]  }
 0x53d   :  { %3831 = vmatprep.subr.bf16.mxu1 %v6891_v5  ;;  %12628 = vst [vmem:[#allocation80_spill] sm:$0xff] %v10699_v61  ;;  %12629 = vst [vmem:[#allocation81_spill] sm:$0xff] %v10705_v32  ;;  %v10712_v5 = vld [vmem:[%s11574_s5 + $0x1a8] ss:$16 sps:$4 sm:$0xff]  }
 0x53e   :  { %12630 = vst [vmem:[#allocation82_spill] sm:$0xff] %v10712_v5 }
 0x53f   :  { %3746 = vmatpush1.bf16.msra.mxu0 %v6892_v18  ;;  %v10717_v18 = vld [vmem:[%s11574_s5 + $0x1c4] ss:$16 sps:$4 sm:$0xff]  }
 0x540   :  { %3832 = vmatpush1.bf16.msra.mxu1 %v6893_v22  ;;  %4637 = vmatprep.subr.bf16.mxu0 %v10371_v0  ;;  %12631 = vst [vmem:[#allocation83_spill] sm:$0xff] %v10717_v18  ;;  %v10723_v22 = vld [vmem:[%s11574_s5 + $0x1cc] ss:$16 sps:$4 sm:$0xff]  }
 0x541   :  { %4723 = vmatprep.subr.bf16.mxu1 %v10379_v9  ;;  %12632 = vst [vmem:[#allocation84_spill] sm:$0xff] %v10723_v22 }
 0x542   :  { %3748 = vmatmul.mubr.bf16.vlgmr.msra.gmra.mrb[80].mxu0 %v12604_v37 }
 0x543   :  { %3834 = vmatmul.mubr.bf16.vlgmr.msra.gmra.mrb[80].mxu1 %v12604_v37  ;;  %4638 = vmatpush1.bf16.msra.mxu0 %v10387_v19  ;;  %v10729_v37 = vld [vmem:[%s11574_s5 + $0x1c0] ss:$16 sps:$4 sm:$0xff]  }
 0x544   :  { %4669 = vmatprep.mubr.bf16.mxu0 %v12605_v21  ;;  %4724 = vmatpush1.bf16.msra.mxu1 %v10396_v56  ;;  %12633 = vst [vmem:[#allocation85_spill] sm:$0xff] %v10729_v37 }
 0x545   :  { %4755 = vmatprep.mubr.bf16.mxu1 %v12605_v21  ;;  %4639 = vmatprep.subr.bf16.mxu0 %v10402_v23  ;;  %v10736_v21 = vld [vmem:[%s11574_s5 + $0x1c8] ss:$16 sps:$4 sm:$0xff]  }
 0x546   :  { %4725 = vmatprep.subr.bf16.mxu1 %v10408_v40  ;;  %12634 = vst [vmem:[#allocation86_spill] sm:$0xff] %v10736_v21 }
 0x547   :  { %4640 = vmatpush1.bf16.msra.mxu0 %v10415_v52 }
 0x548   :  { %4726 = vmatpush1.bf16.msra.mxu1 %v10422_v24  ;;  %4641 = vmatprep.subr.bf16.mxu0 %v10427_v27 }
 0x549   :  { %4727 = vmatprep.subr.bf16.mxu1 %v10434_v26 }
 0x54b   :  { %4642 = vmatpush1.bf16.msra.mxu0 %v10441_v60 }
 0x54c   :  { %4728 = vmatpush1.bf16.msra.mxu1 %v10448_v48  ;;  %4643 = vmatprep.subr.bf16.mxu0 %v10453_v6 }
 0x54d   :  { %4729 = vmatprep.subr.bf16.mxu1 %v10459_v62 }
 0x54f   :  { %4644 = vmatpush1.bf16.msra.mxu0 %v10465_v10 }
 0x550   :  { %4730 = vmatpush1.bf16.msra.mxu1 %v10472_v55  ;;  %4645 = vmatprep.subr.bf16.mxu0 %v10477_v15 }
 0x551   :  { %4731 = vmatprep.subr.bf16.mxu1 %v10483_v43 }
 0x553   :  { %4646 = vmatpush1.bf16.msra.mxu0 %v10489_v49 }
 0x554   :  { %4732 = vmatpush1.bf16.msra.mxu1 %v10496_v17  ;;  %4647 = vmatprep.subr.bf16.mxu0 %v10501_v14 }
 0x555   :  { %4733 = vmatprep.subr.bf16.mxu1 %v10507_v57 }
 0x557   :  { %4648 = vmatpush1.bf16.msra.mxu0 %v10513_v53 }
 0x558   :  { %4734 = vmatpush1.bf16.msra.mxu1 %v10520_v46  ;;  %4649 = vmatprep.subr.bf16.mxu0 %v10525_v35 }
 0x559   :  { %4735 = vmatprep.subr.bf16.mxu1 %v10531_v59 }
 0x55b   :  { %4650 = vmatpush1.bf16.msra.mxu0 %v10537_v51 }
 0x55c   :  { %4736 = vmatpush1.bf16.msra.mxu1 %v10544_v28  ;;  %4651 = vmatprep.subr.bf16.mxu0 %v10549_v12 }
 0x55d   :  { %4737 = vmatprep.subr.bf16.mxu1 %v10555_v34 }
 0x55f   :  { %4652 = vmatpush1.bf16.msra.mxu0 %v10561_v50 }
 0x560   :  { %4738 = vmatpush1.bf16.msra.mxu1 %v10568_v8  ;;  %4653 = vmatprep.subr.bf16.mxu0 %v10573_v44 }
 0x561   :  { %4739 = vmatprep.subr.bf16.mxu1 %v10579_v11 }
 0x563   :  { %4654 = vmatpush1.bf16.msra.mxu0 %v10585_v16 }
 0x564   :  { %4740 = vmatpush1.bf16.msra.mxu1 %v10592_v54  ;;  %4655 = vmatprep.subr.bf16.mxu0 %v10597_v36 }
 0x565   :  { %4741 = vmatprep.subr.bf16.mxu1 %v10603_v4 }
 0x567   :  { %4656 = vmatpush1.bf16.msra.mxu0 %v10609_v7 }
 0x568   :  { %4742 = vmatpush1.bf16.msra.mxu1 %v10616_v29  ;;  %4657 = vmatprep.subr.bf16.mxu0 %v10621_v45 }
 0x569   :  { %4743 = vmatprep.subr.bf16.mxu1 %v10627_v41 }
 0x56b   :  { %4658 = vmatpush1.bf16.msra.mxu0 %v10633_v3 }
 0x56c   :  { %4744 = vmatpush1.bf16.msra.mxu1 %v10640_v39  ;;  %4659 = vmatprep.subr.bf16.mxu0 %v10645_v2 }
 0x56d   :  { %4745 = vmatprep.subr.bf16.mxu1 %v10651_v31 }
 0x56f   :  { %4660 = vmatpush1.bf16.msra.mxu0 %v10657_v63 }
 0x570   :  { %4746 = vmatpush1.bf16.msra.mxu1 %v10664_v20  ;;  %4661 = vmatprep.subr.bf16.mxu0 %v10669_v25 }
 0x571   :  { %4747 = vmatprep.subr.bf16.mxu1 %v10675_v33 }
 0x573   :  { %4662 = vmatpush1.bf16.msra.mxu0 %v10681_v58  ;;  %v10925_v58 = vld [vmem:[%s11574_s5 + $0x2c0] ss:$16 sps:$4 sm:$0xff]  }
 0x574   :  { %4748 = vmatpush1.bf16.msra.mxu1 %v10688_v38  ;;  %4663 = vmatprep.subr.bf16.mxu0 %v10693_v42 }
 0x575   :  { %4749 = vmatprep.subr.bf16.mxu1 %v10699_v61 }
 0x577   :  { %4664 = vmatpush1.bf16.msra.mxu0 %v10705_v32  ;;  %v10919_v32 = vld [vmem:[%s11574_s5 + $0x2cc] ss:$16 sps:$4 sm:$0xff]  }
 0x578   :  { %4750 = vmatpush1.bf16.msra.mxu1 %v10712_v5  ;;  %4665 = vmatprep.subr.bf16.mxu0 %v10717_v18  ;;  %v10753_v18 = vld [vmem:[%s11574_s5 + $0x1e0] ss:$16 sps:$4 sm:$0xff]   ;;  %v10765_v5 = vld [vmem:[%s11574_s5 + $0x204] ss:$16 sps:$4 sm:$0xff]   ;;  %12665 = vst [vmem:[#allocation61_spill] sm:$0xff] %v10919_v32 }
 0x579   :  { %4751 = vmatprep.subr.bf16.mxu1 %v10723_v22  ;;  %12637 = vst [vmem:[#allocation31_spill] sm:$0xff] %v10753_v18  ;;  %v10760_v22 = vld [vmem:[%s11574_s5 + $0x1e8] ss:$16 sps:$4 sm:$0xff]   ;;  %12639 = vst [vmem:[#allocation8_spill] sm:$0xff] %v10765_v5 }
 0x57a   :  { %12638 = vst [vmem:[#allocation32_spill] sm:$0xff] %v10760_v22 }
 0x57b   :  { %4666 = vmatpush1.bf16.msra.mxu0 %v10729_v37  ;;  %v10771_v37 = vld [vmem:[%s11574_s5 + $0x20c] ss:$16 sps:$4 sm:$0xff]  }
 0x57c   :  { %4752 = vmatpush1.bf16.msra.mxu1 %v10736_v21  ;;  %4667 = vmatprep.subr.bf16.mxu0 %v10741_v30  ;;  %12640 = vst [vmem:[#allocation33_spill] sm:$0xff] %v10771_v37  ;;  %v10777_v30 = vld [vmem:[%s11574_s5 + $0x200] ss:$16 sps:$4 sm:$0xff]   ;;  %v10810_v21 = vld [vmem:[%s11574_s5 + $0x228] ss:$16 sps:$4 sm:$0xff]  }
 0x57d   :  { %4753 = vmatprep.subr.bf16.mxu1 %v10747_v1  ;;  %12641 = vst [vmem:[#allocation34_spill] sm:$0xff] %v10777_v30  ;;  %v10784_v1 = vld [vmem:[%s11574_s5 + $0x208] ss:$16 sps:$4 sm:$0xff]   ;;  %12647 = vst [vmem:[#allocation40_spill] sm:$0xff] %v10810_v21 }
 0x57e   :  { %12642 = vst [vmem:[#allocation35_spill] sm:$0xff] %v10784_v1 }
 0x57f   :  { %4668 = vmatpush1.bf16.msra.mxu0 %v10753_v18  ;;  %v10790_v18 = vld [vmem:[%s11574_s5 + $0x224] ss:$16 sps:$4 sm:$0xff]  }
 0x580   :  { %4754 = vmatpush1.bf16.msra.mxu1 %v10760_v22  ;;  %4680 = vmatprep.subr.bf16.mxu0 %v10765_v5  ;;  %12643 = vst [vmem:[#allocation36_spill] sm:$0xff] %v10790_v18  ;;  %v10796_v22 = vld [vmem:[%s11574_s5 + $0x22c] ss:$16 sps:$4 sm:$0xff]   ;;  %v12646_v5 = vld [vmem:[#allocation9_spill] sm:$0xff] }
 0x581   :  { %4766 = vmatprep.subr.bf16.mxu1 %v10771_v37  ;;  %12644 = vst [vmem:[#allocation38_spill] sm:$0xff] %v10796_v22  ;;  %v10803_v37 = vld [vmem:[%s11574_s5 + $0x220] ss:$16 sps:$4 sm:$0xff]  }
 0x582   :  { %4670 = vmatmul.mubr.bf16.vlgmr.msra.gmra.mrb[84].mxu0 %v12602_v47  ;;  %12645 = vst [vmem:[#allocation39_spill] sm:$0xff] %v10803_v37 }
 0x583   :  { %4756 = vmatmul.mubr.bf16.vlgmr.msra.gmra.mrb[84].mxu1 %v12602_v47  ;;  %4681 = vmatpush1.bf16.msra.mxu0 %v10777_v30  ;;  %v10815_v47 = vld [vmem:[%s11574_s5 + $0x244] ss:$16 sps:$4 sm:$0xff]   ;;  %v10822_v30 = vld [vmem:[%s11574_s5 + $0x24c] ss:$16 sps:$4 sm:$0xff]  }
 0x584   :  { %4712 = vmatprep.mubr.bf16.mxu0 %v12646_v5  ;;  %4767 = vmatpush1.bf16.msra.mxu1 %v10784_v1  ;;  %12648 = vst [vmem:[#allocation41_spill] sm:$0xff] %v10815_v47  ;;  %12649 = vst [vmem:[#allocation42_spill] sm:$0xff] %v10822_v30  ;;  %v10829_v1 = vld [vmem:[%s11574_s5 + $0x240] ss:$16 sps:$4 sm:$0xff]  }
 0x585   :  { %4798 = vmatprep.mubr.bf16.mxu1 %v12646_v5  ;;  %4682 = vmatprep.subr.bf16.mxu0 %v10790_v18  ;;  %12650 = vst [vmem:[#allocation43_spill] sm:$0xff] %v10829_v1  ;;  %v10836_v18 = vld [vmem:[%s11574_s5 + $0x248] ss:$16 sps:$4 sm:$0xff]  }
 0x586   :  { %4768 = vmatprep.subr.bf16.mxu1 %v10796_v22  ;;  %12651 = vst [vmem:[#allocation44_spill] sm:$0xff] %v10836_v18  ;;  %v10841_v22 = vld [vmem:[%s11574_s5 + $0x264] ss:$16 sps:$4 sm:$0xff]  }
 0x587   :  { %4683 = vmatpush1.bf16.msra.mxu0 %v10803_v37  ;;  %12652 = vst [vmem:[#allocation45_spill] sm:$0xff] %v10841_v22  ;;  %v10847_v37 = vld [vmem:[%s11574_s5 + $0x26c] ss:$16 sps:$4 sm:$0xff]  }
 0x588   :  { %4769 = vmatpush1.bf16.msra.mxu1 %v10810_v21  ;;  %4684 = vmatprep.subr.bf16.mxu0 %v10815_v47  ;;  %12653 = vst [vmem:[#allocation46_spill] sm:$0xff] %v10847_v37  ;;  %v10853_v47 = vld [vmem:[%s11574_s5 + $0x260] ss:$16 sps:$4 sm:$0xff]   ;;  %v10865_v21 = vld [vmem:[%s11574_s5 + $0x284] ss:$16 sps:$4 sm:$0xff]  }
 0x589   :  { %4770 = vmatprep.subr.bf16.mxu1 %v10822_v30  ;;  %12654 = vst [vmem:[#allocation47_spill] sm:$0xff] %v10853_v47  ;;  %v10860_v30 = vld [vmem:[%s11574_s5 + $0x268] ss:$16 sps:$4 sm:$0xff]   ;;  %12656 = vst [vmem:[#allocation10_spill] sm:$0xff] %v10865_v21 }
 0x58a   :  { %12655 = vst [vmem:[#allocation48_spill] sm:$0xff] %v10860_v30 }
 0x58b   :  { %4685 = vmatpush1.bf16.msra.mxu0 %v10829_v1  ;;  %v10871_v1 = vld [vmem:[%s11574_s5 + $0x28c] ss:$16 sps:$4 sm:$0xff]  }
 0x58c   :  { %4771 = vmatpush1.bf16.msra.mxu1 %v10836_v18  ;;  %4686 = vmatprep.subr.bf16.mxu0 %v10841_v22  ;;  %12657 = vst [vmem:[#allocation49_spill] sm:$0xff] %v10871_v1  ;;  %v10877_v22 = vld [vmem:[%s11574_s5 + $0x280] ss:$16 sps:$4 sm:$0xff]   ;;  %v10889_v18 = vld [vmem:[%s11574_s5 + $0x2a4] ss:$16 sps:$4 sm:$0xff]  }
 0x58d   :  { %4772 = vmatprep.subr.bf16.mxu1 %v10847_v37  ;;  %12658 = vst [vmem:[#allocation50_spill] sm:$0xff] %v10877_v22  ;;  %v10884_v37 = vld [vmem:[%s11574_s5 + $0x288] ss:$16 sps:$4 sm:$0xff]   ;;  %12660 = vst [vmem:[#allocation52_spill] sm:$0xff] %v10889_v18 }
 0x58e   :  { %12659 = vst [vmem:[#allocation51_spill] sm:$0xff] %v10884_v37 }
 0x58f   :  { %4687 = vmatpush1.bf16.msra.mxu0 %v10853_v47  ;;  %v10895_v47 = vld [vmem:[%s11574_s5 + $0x2ac] ss:$16 sps:$4 sm:$0xff]  }
 0x590   :  { %4773 = vmatpush1.bf16.msra.mxu1 %v10860_v30  ;;  %4688 = vmatprep.subr.bf16.mxu0 %v10865_v21  ;;  %12661 = vst [vmem:[#allocation53_spill] sm:$0xff] %v10895_v47  ;;  %v10901_v21 = vld [vmem:[%s11574_s5 + $0x2a0] ss:$16 sps:$4 sm:$0xff]   ;;  %v10913_v30 = vld [vmem:[%s11574_s5 + $0x2c4] ss:$16 sps:$4 sm:$0xff]  }
 0x591   :  { %4774 = vmatprep.subr.bf16.mxu1 %v10871_v1  ;;  %12662 = vst [vmem:[#allocation54_spill] sm:$0xff] %v10901_v21  ;;  %v10908_v1 = vld [vmem:[%s11574_s5 + $0x2a8] ss:$16 sps:$4 sm:$0xff]   ;;  %12664 = vst [vmem:[#allocation60_spill] sm:$0xff] %v10913_v30 }
 0x592   :  { %12663 = vst [vmem:[#allocation55_spill] sm:$0xff] %v10908_v1 }
 0x593   :  { %4689 = vmatpush1.bf16.msra.mxu0 %v10877_v22 }
 0x594   :  { %4775 = vmatpush1.bf16.msra.mxu1 %v10884_v37  ;;  %4690 = vmatprep.subr.bf16.mxu0 %v10889_v18 }
 0x595   :  { %v3559_v22 = vpop.f32.mrb[76].mxu0  ;;  %4776 = vmatprep.subr.bf16.mxu1 %v10895_v47 }
 0x596   :  { %v3645_v37 = vpop.f32.mrb[76].mxu1  ;;  %v3561_v18 = vpop.f32.mrb[77].mxu0 }
 0x597   :  { %v3654_v61 = vmax.f32 %v3559_v22, %v3561_v18  ;;  %v3647_v42 = vpop.f32.mrb[77].mxu1  ;;  %v3563_v38 = vpop.f32.mrb[78].mxu0  ;;  %4691 = vmatpush1.bf16.msra.mxu0 %v10901_v21  ;;  %v10932_v18 = vld [vmem:[%s11574_s5 + $0x2c8] ss:$16 sps:$4 sm:$0xff]   ;;  %v10937_v22 = vld [vmem:[%s11574_s5 + $0x2e4] ss:$16 sps:$4 sm:$0xff]  }
 0x598   :  { %v3656_v33 = vmax.f32 %v3645_v37, %v3647_v42  ;;  %v3649_v25 = vpop.f32.mrb[78].mxu1  ;;  %4777 = vmatpush1.bf16.msra.mxu1 %v10908_v1  ;;  %v3565_v47 = vpop.f32.mrb[79].mxu0  ;;  %4692 = vmatprep.subr.bf16.mxu0 %v10913_v30  ;;  %v10943_v42 = vld [vmem:[%s11574_s5 + $0x2ec] ss:$16 sps:$4 sm:$0xff]   ;;  %v10949_v1 = vld [vmem:[%s11574_s5 + $0x2e0] ss:$16 sps:$4 sm:$0xff]  }
 0x599   :  { %v3655_v21 = vmax.f32 %v3563_v38, %v3565_v47  ;;  %v3651_v20 = vpop.f32.mrb[79].mxu1  ;;  %4778 = vmatprep.subr.bf16.mxu1 %v10919_v32  ;;  %12666 = vst [vmem:[#allocation62_spill] sm:$0xff] %v10943_v42  ;;  %12667 = vst [vmem:[#allocation68_spill] sm:$0xff] %v10949_v1  ;;  %v10957_v47 = vld [vmem:[%s11574_s5 + $0x2e8] ss:$16 sps:$4 sm:$0xff]  }
 0x59a   :  { %v3658_v37 = vmax.f32 %v3654_v61, %v3656_v33  ;;  %v3657_v30 = vmax.f32 %v3649_v25, %v3651_v20  ;;  %12668 = vst [vmem:[#allocation69_spill] sm:$0xff] %v10957_v47  ;;  %v10962_v20 = vld [vmem:[%s11574_s5 + $0x304] ss:$16 sps:$4 sm:$0xff]   ;;  %v10975_v61 = vld [vmem:[%s11574_s5 + $0x300] ss:$16 sps:$4 sm:$0xff]  }
 0x59b   :  { %4693 = vmatpush1.bf16.msra.mxu0 %v10925_v58  ;;  %12669 = vst [vmem:[#allocation71_spill] sm:$0xff] %v10962_v20 }
 0x59c   :  { %v3660_v63 = vadd.f32 %v10260_v13, %v3658_v37  ;;  %v3659_v38 = vmax.f32 %v3655_v21, %v3657_v30  ;;  %4779 = vmatpush1.bf16.msra.mxu1 %v10932_v18  ;;  %4694 = vmatprep.subr.bf16.mxu0 %v10937_v22  ;;  %v10968_v30 = vld [vmem:[%s11574_s5 + $0x30c] ss:$16 sps:$4 sm:$0xff]   ;;  %v10982_v37 = vld [vmem:[%s11574_s5 + $0x308] ss:$16 sps:$4 sm:$0xff]  }
 0x59d   :  { %4780 = vmatprep.subr.bf16.mxu1 %v10943_v42  ;;  %12670 = vst [vmem:[#allocation72_spill] sm:$0xff] %v10968_v30 }
 0x59e   :  { %v3662_v25 = vmul.f32 0.01, %v3660_v63  ;;  %v3661_v33 = vadd.f32 %v10260_v13, %v3659_v38  ;;  %v10987_v38 = vld [vmem:[%s11574_s5 + $0x324] ss:$16 sps:$4 sm:$0xff]  }
 0x59f   :  { %4695 = vmatpush1.bf16.msra.mxu0 %v10949_v1  ;;  %v10993_v1 = vld [vmem:[%s11574_s5 + $0x32c] ss:$16 sps:$4 sm:$0xff]  }
 0x5a0   :  { %v3663_v21 = vmul.f32 0.01, %v3661_v33  ;;  %4781 = vmatpush1.bf16.msra.mxu1 %v10957_v47  ;;  %4696 = vmatprep.subr.bf16.mxu0 %v10962_v20  ;;  %v3664_v47 = vmax.f32 %v3660_v63, %v3662_v25  ;;  %v10999_v20 = vld [vmem:[%s11574_s5 + $0x320] ss:$16 sps:$4 sm:$0xff]   ;;  %v11011_v63 = vld [vmem:[%s11574_s5 + $0x344] ss:$16 sps:$4 sm:$0xff]  }
 0x5a1   :  { %4782 = vmatprep.subr.bf16.mxu1 %v10968_v30  ;;  %12671 = vst [vmem:[#allocation73_spill] sm:$0xff] %v10999_v20  ;;  %v11006_v30 = vld [vmem:[%s11574_s5 + $0x328] ss:$16 sps:$4 sm:$0xff]   ;;  %12673 = vst [vmem:[#allocation75_spill] sm:$0xff] %v11011_v63 }
 0x5a2   :  { %v3665_v42 = vmax.f32 %v3661_v33, %v3663_v21  ;;  %12672 = vst [vmem:[#allocation74_spill] sm:$0xff] %v11006_v30  ;;  %v11019_v33 = vld [vmem:[%s11574_s5 + $0x34c] ss:$16 sps:$4 sm:$0xff]   ;;  %v11025_v21 = vld [vmem:[%s11574_s5 + $0x340] ss:$16 sps:$4 sm:$0xff]  }
 0x5a3   :  { %4697 = vmatpush1.bf16.msra.mxu0 %v10975_v61  ;;  %12675 = vst [vmem:[#allocation77_spill] sm:$0xff] %v11019_v33  ;;  %12676 = vst [vmem:[#allocation89_spill] sm:$0xff] %v11025_v21 }
 0x5a4   :  { %4783 = vmatpush1.bf16.msra.mxu1 %v10982_v37  ;;  %4698 = vmatprep.subr.bf16.mxu0 %v10987_v38  ;;  %v11013_v25 = vpack.c.bf16 %v3665_v42, %v3664_v47  ;;  %v11032_v42 = vld [vmem:[%s11574_s5 + $0x348] ss:$16 sps:$4 sm:$0xff]   ;;  %v11037_v47 = vld [vmem:[%s11574_s5 + $0x364] ss:$16 sps:$4 sm:$0xff]  }
 0x5a5   :  { %4784 = vmatprep.subr.bf16.mxu1 %v10993_v1  ;;  %12677 = vst [vmem:[#allocation90_spill] sm:$0xff] %v11032_v42  ;;  %12678 = vst [vmem:[#allocation91_spill] sm:$0xff] %v11037_v47 }
 0x5a6   :  { %12674 = vst [vmem:[#allocation76_spill] sm:$0xff] %v11013_v25  ;;  %v11043_v25 = vld [vmem:[%s11574_s5 + $0x36c] ss:$16 sps:$4 sm:$0xff]  }
 0x5a7   :  { %4699 = vmatpush1.bf16.msra.mxu0 %v10999_v20  ;;  %12679 = vst [vmem:[#allocation18_spill] sm:$0xff] %v11043_v25 }
 0x5a8   :  { %4785 = vmatpush1.bf16.msra.mxu1 %v11006_v30  ;;  %4700 = vmatprep.subr.bf16.mxu0 %v11011_v63  ;;  %v11049_v63 = vld [vmem:[%s11574_s5 + $0x360] ss:$16 sps:$4 sm:$0xff]   ;;  %v11061_v30 = vld [vmem:[%s11574_s5 + $0x384] ss:$16 sps:$4 sm:$0xff]  }
 0x5a9   :  { %4786 = vmatprep.subr.bf16.mxu1 %v11019_v33  ;;  %12680 = vst [vmem:[#allocation19_spill] sm:$0xff] %v11049_v63  ;;  %v11056_v33 = vld [vmem:[%s11574_s5 + $0x368] ss:$16 sps:$4 sm:$0xff]   ;;  %12682 = vst [vmem:[#allocation21_spill] sm:$0xff] %v11061_v30 }
 0x5aa   :  { %12681 = vst [vmem:[#allocation20_spill] sm:$0xff] %v11056_v33 }
 0x5ab   :  { %4701 = vmatpush1.bf16.msra.mxu0 %v11025_v21  ;;  %v11067_v21 = vld [vmem:[%s11574_s5 + $0x38c] ss:$16 sps:$4 sm:$0xff]  }
 0x5ac   :  { %4787 = vmatpush1.bf16.msra.mxu1 %v11032_v42  ;;  %4702 = vmatprep.subr.bf16.mxu0 %v11037_v47  ;;  %12683 = vst [vmem:[#allocation22_spill] sm:$0xff] %v11067_v21  ;;  %v11073_v47 = vld [vmem:[%s11574_s5 + $0x380] ss:$16 sps:$4 sm:$0xff]   ;;  %v11085_v42 = vld [vmem:[%s11574_s5 + $0x3a4] ss:$16 sps:$4 sm:$0xff]  }
 0x5ad   :  { %4788 = vmatprep.subr.bf16.mxu1 %v11043_v25  ;;  %12684 = vst [vmem:[#allocation23_spill] sm:$0xff] %v11073_v47  ;;  %v11080_v25 = vld [vmem:[%s11574_s5 + $0x388] ss:$16 sps:$4 sm:$0xff]   ;;  %12686 = vst [vmem:[#allocation25_spill] sm:$0xff] %v11085_v42 }
 0x5ae   :  { %12685 = vst [vmem:[#allocation24_spill] sm:$0xff] %v11080_v25 }
 0x5af   :  { %4703 = vmatpush1.bf16.msra.mxu0 %v11049_v63  ;;  %v11091_v63 = vld [vmem:[%s11574_s5 + $0x3ac] ss:$16 sps:$4 sm:$0xff]  }
 0x5b0   :  { %4789 = vmatpush1.bf16.msra.mxu1 %v11056_v33  ;;  %4704 = vmatprep.subr.bf16.mxu0 %v11061_v30  ;;  %12687 = vst [vmem:[#allocation26_spill] sm:$0xff] %v11091_v63  ;;  %v11097_v30 = vld [vmem:[%s11574_s5 + $0x3a0] ss:$16 sps:$4 sm:$0xff]   ;;  %v11109_v33 = vld [vmem:[%s11574_s5 + $0x3c4] ss:$16 sps:$4 sm:$0xff]  }
 0x5b1   :  { %4790 = vmatprep.subr.bf16.mxu1 %v11067_v21  ;;  %12688 = vst [vmem:[#allocation27_spill] sm:$0xff] %v11097_v30  ;;  %v11104_v21 = vld [vmem:[%s11574_s5 + $0x3a8] ss:$16 sps:$4 sm:$0xff]   ;;  %12690 = vst [vmem:[#allocation29_spill] sm:$0xff] %v11109_v33 }
 0x5b2   :  { %12689 = vst [vmem:[#allocation28_spill] sm:$0xff] %v11104_v21 }
 0x5b3   :  { %4705 = vmatpush1.bf16.msra.mxu0 %v11073_v47  ;;  %v11115_v47 = vld [vmem:[%s11574_s5 + $0x3cc] ss:$16 sps:$4 sm:$0xff]  }
 0x5b4   :  { %4791 = vmatpush1.bf16.msra.mxu1 %v11080_v25  ;;  %4706 = vmatprep.subr.bf16.mxu0 %v11085_v42  ;;  %12691 = vst [vmem:[#allocation59_spill] sm:$0xff] %v11115_v47  ;;  %v11121_v42 = vld [vmem:[%s11574_s5 + $0x3c0] ss:$16 sps:$4 sm:$0xff]   ;;  %v11133_v25 = vld [vmem:[%s11574_s5 + $0x3e4] ss:$16 sps:$4 sm:$0xff]  }
 0x5b5   :  { %4792 = vmatprep.subr.bf16.mxu1 %v11091_v63  ;;  %12692 = vst [vmem:[#allocation93_spill] sm:$0xff] %v11121_v42  ;;  %v11128_v63 = vld [vmem:[%s11574_s5 + $0x3c8] ss:$16 sps:$4 sm:$0xff]  }
 0x5b7   :  { %4707 = vmatpush1.bf16.msra.mxu0 %v11097_v30  ;;  %v11139_v30 = vld [vmem:[%s11574_s5 + $0x3ec] ss:$16 sps:$4 sm:$0xff]  }
 0x5b8   :  { %4793 = vmatpush1.bf16.msra.mxu1 %v11104_v21  ;;  %4708 = vmatprep.subr.bf16.mxu0 %v11109_v33  ;;  %v11145_v33 = vld [vmem:[%s11574_s5 + $0x3e0] ss:$16 sps:$4 sm:$0xff]  }
 0x5b9   :  { %4794 = vmatprep.subr.bf16.mxu1 %v11115_v47  ;;  %v11152_v47 = vld [vmem:[%s11574_s5 + $0x3e8] ss:$16 sps:$4 sm:$0xff]  }
 0x5bb   :  { %4709 = vmatpush1.bf16.msra.mxu0 %v11121_v42  ;;  %v12693_v42 = vld [vmem:[#allocation17_spill] sm:$0xff] }
 0x5bc   :  { %4795 = vmatpush1.bf16.msra.mxu1 %v11128_v63  ;;  %4710 = vmatprep.subr.bf16.mxu0 %v11133_v25 }
 0x5bd   :  { %4796 = vmatprep.subr.bf16.mxu1 %v11139_v30 }
 0x5bf   :  { %4711 = vmatpush1.bf16.msra.mxu0 %v11145_v33 }
 0x5c0   :  { %4797 = vmatpush1.bf16.msra.mxu1 %v11152_v47  ;;  %4827 = vmatprep.subr.bf16.mxu0 %v10371_v0 }
 0x5c1   :  { %4913 = vmatprep.subr.bf16.mxu1 %v10379_v9 }
 0x5c2   :  { %4713 = vmatmul.mubr.bf16.vlgmr.msra.gmra.mrb[84].mxu0 %v12693_v42 }
 0x5c3   :  { %4799 = vmatmul.mubr.bf16.vlgmr.msra.gmra.mrb[84].mxu1 %v12693_v42  ;;  %4828 = vmatpush1.bf16.msra.mxu0 %v10387_v19 }
 0x5c4   :  { %4859 = vmatprep.mubr.bf16.mxu0 %v12646_v5  ;;  %4914 = vmatpush1.bf16.msra.mxu1 %v10396_v56 }
 0x5c5   :  { %4945 = vmatprep.mubr.bf16.mxu1 %v12646_v5  ;;  %4829 = vmatprep.subr.bf16.mxu0 %v10402_v23  ;;  %v12694_v5 = vld [vmem:[#allocation96_spill] sm:$0xff] }
 0x5c6   :  { %4915 = vmatprep.subr.bf16.mxu1 %v10408_v40 }
 0x5c7   :  { %4830 = vmatpush1.bf16.msra.mxu0 %v10415_v52 }
 0x5c8   :  { %4916 = vmatpush1.bf16.msra.mxu1 %v10422_v24  ;;  %4831 = vmatprep.subr.bf16.mxu0 %v10427_v27 }
 0x5c9   :  { %4917 = vmatprep.subr.bf16.mxu1 %v10434_v26 }
 0x5cb   :  { %4832 = vmatpush1.bf16.msra.mxu0 %v10441_v60 }
 0x5cc   :  { %4918 = vmatpush1.bf16.msra.mxu1 %v10448_v48  ;;  %4833 = vmatprep.subr.bf16.mxu0 %v10453_v6 }
 0x5cd   :  { %4919 = vmatprep.subr.bf16.mxu1 %v10459_v62 }
 0x5cf   :  { %4834 = vmatpush1.bf16.msra.mxu0 %v10465_v10 }
 0x5d0   :  { %4920 = vmatpush1.bf16.msra.mxu1 %v10472_v55  ;;  %4835 = vmatprep.subr.bf16.mxu0 %v10477_v15 }
 0x5d1   :  { %4921 = vmatprep.subr.bf16.mxu1 %v10483_v43 }
 0x5d3   :  { %4836 = vmatpush1.bf16.msra.mxu0 %v10489_v49 }
 0x5d4   :  { %4922 = vmatpush1.bf16.msra.mxu1 %v10496_v17  ;;  %4837 = vmatprep.subr.bf16.mxu0 %v10501_v14 }
 0x5d5   :  { %4923 = vmatprep.subr.bf16.mxu1 %v10507_v57 }
 0x5d7   :  { %4838 = vmatpush1.bf16.msra.mxu0 %v10513_v53 }
 0x5d8   :  { %4924 = vmatpush1.bf16.msra.mxu1 %v10520_v46  ;;  %4839 = vmatprep.subr.bf16.mxu0 %v10525_v35 }
 0x5d9   :  { %4925 = vmatprep.subr.bf16.mxu1 %v10531_v59 }
 0x5db   :  { %4840 = vmatpush1.bf16.msra.mxu0 %v10537_v51 }
 0x5dc   :  { %4926 = vmatpush1.bf16.msra.mxu1 %v10544_v28  ;;  %4841 = vmatprep.subr.bf16.mxu0 %v10549_v12 }
 0x5dd   :  { %4927 = vmatprep.subr.bf16.mxu1 %v10555_v34 }
 0x5df   :  { %4842 = vmatpush1.bf16.msra.mxu0 %v10561_v50 }
 0x5e0   :  { %4928 = vmatpush1.bf16.msra.mxu1 %v10568_v8  ;;  %4843 = vmatprep.subr.bf16.mxu0 %v10573_v44  ;;  %v12736_v44 = vld [vmem:[#allocation55_spill] sm:$0xff] }
 0x5e1   :  { %4929 = vmatprep.subr.bf16.mxu1 %v10579_v11  ;;  %v12735_v11 = vld [vmem:[#allocation54_spill] sm:$0xff] }
 0x5e3   :  { %4844 = vmatpush1.bf16.msra.mxu0 %v10585_v16 }
 0x5e4   :  { %4930 = vmatpush1.bf16.msra.mxu1 %v10592_v54  ;;  %4845 = vmatprep.subr.bf16.mxu0 %v10597_v36  ;;  %v12695_v36 = vld [vmem:[#allocation70_spill] sm:$0xff] }
 0x5e5   :  { %4931 = vmatprep.subr.bf16.mxu1 %v10603_v4  ;;  %v12696_v4 = vld [vmem:[#allocation65_spill] sm:$0xff] }
 0x5e7   :  { %4846 = vmatpush1.bf16.msra.mxu0 %v10609_v7  ;;  %v12697_v7 = vld [vmem:[#allocation66_spill] sm:$0xff] }
 0x5e8   :  { %4932 = vmatpush1.bf16.msra.mxu1 %v10616_v29  ;;  %4847 = vmatprep.subr.bf16.mxu0 %v10621_v45  ;;  %v12698_v29 = vld [vmem:[#allocation67_spill] sm:$0xff]  ;;  %v12699_v45 = vld [vmem:[#allocation78_spill] sm:$0xff] }
 0x5e9   :  { %4933 = vmatprep.subr.bf16.mxu1 %v10627_v41  ;;  %v12700_v41 = vld [vmem:[#allocation79_spill] sm:$0xff] }
 0x5eb   :  { %4848 = vmatpush1.bf16.msra.mxu0 %v10633_v3  ;;  %v12701_v3 = vld [vmem:[#allocation80_spill] sm:$0xff] }
 0x5ec   :  { %4934 = vmatpush1.bf16.msra.mxu1 %v10640_v39  ;;  %4849 = vmatprep.subr.bf16.mxu0 %v10645_v2  ;;  %v12702_v39 = vld [vmem:[#allocation81_spill] sm:$0xff]  ;;  %v12703_v2 = vld [vmem:[#allocation82_spill] sm:$0xff] }
 0x5ed   :  { %4935 = vmatprep.subr.bf16.mxu1 %v10651_v31  ;;  %v12704_v31 = vld [vmem:[#allocation83_spill] sm:$0xff] }
 0x5ef   :  { %4850 = vmatpush1.bf16.msra.mxu0 %v12694_v5  ;;  %v12705_v5 = vld [vmem:[#allocation84_spill] sm:$0xff] }
 0x5f0   :  { %4936 = vmatpush1.bf16.msra.mxu1 %v12695_v36  ;;  %4851 = vmatprep.subr.bf16.mxu0 %v12696_v4  ;;  %v12706_v36 = vld [vmem:[#allocation85_spill] sm:$0xff]  ;;  %v12707_v4 = vld [vmem:[#allocation86_spill] sm:$0xff] }
 0x5f1   :  { %4937 = vmatprep.subr.bf16.mxu1 %v12697_v7  ;;  %v12708_v7 = vld [vmem:[#allocation88_spill] sm:$0xff] }
 0x5f3   :  { %4852 = vmatpush1.bf16.msra.mxu0 %v12698_v29  ;;  %v12709_v29 = vld [vmem:[#allocation5_spill] sm:$0xff] }
 0x5f4   :  { %4938 = vmatpush1.bf16.msra.mxu1 %v12699_v45  ;;  %4853 = vmatprep.subr.bf16.mxu0 %v12700_v41  ;;  %v12710_v45 = vld [vmem:[#allocation31_spill] sm:$0xff]  ;;  %v12711_v41 = vld [vmem:[#allocation32_spill] sm:$0xff] }
 0x5f5   :  { %4939 = vmatprep.subr.bf16.mxu1 %v12701_v3  ;;  %v12712_v3 = vld [vmem:[#allocation8_spill] sm:$0xff] }
 0x5f7   :  { %4854 = vmatpush1.bf16.msra.mxu0 %v12702_v39  ;;  %v12713_v39 = vld [vmem:[#allocation33_spill] sm:$0xff] }
 0x5f8   :  { %4940 = vmatpush1.bf16.msra.mxu1 %v12703_v2  ;;  %4855 = vmatprep.subr.bf16.mxu0 %v12704_v31  ;;  %v12725_v31 = vld [vmem:[#allocation45_spill] sm:$0xff]  ;;  %v12727_v2 = vld [vmem:[#allocation47_spill] sm:$0xff] }
 0x5f9   :  { %4941 = vmatprep.subr.bf16.mxu1 %v12705_v5  ;;  %v12714_v5 = vld [vmem:[#allocation34_spill] sm:$0xff] }
 0x5fb   :  { %4856 = vmatpush1.bf16.msra.mxu0 %v12706_v36  ;;  %v12715_v36 = vld [vmem:[#allocation87_spill] sm:$0xff] }
 0x5fc   :  { %4942 = vmatpush1.bf16.msra.mxu1 %v12707_v4  ;;  %4857 = vmatprep.subr.bf16.mxu0 %v12708_v7  ;;  %v12716_v4 = vld [vmem:[#allocation35_spill] sm:$0xff]  ;;  %v12722_v7 = vld [vmem:[#allocation42_spill] sm:$0xff] }
 0x5fd   :  { %4943 = vmatprep.subr.bf16.mxu1 %v12709_v29  ;;  %v12717_v29 = vld [vmem:[#allocation36_spill] sm:$0xff] }
 0x5ff   :  { %4858 = vmatpush1.bf16.msra.mxu0 %v12710_v45  ;;  %v12718_v45 = vld [vmem:[#allocation38_spill] sm:$0xff] }
 0x600   :  { %4944 = vmatpush1.bf16.msra.mxu1 %v12711_v41  ;;  %4870 = vmatprep.subr.bf16.mxu0 %v12712_v3  ;;  %v12719_v41 = vld [vmem:[#allocation39_spill] sm:$0xff]  ;;  %v12720_v3 = vld [vmem:[#allocation40_spill] sm:$0xff] }
 0x601   :  { %4956 = vmatprep.subr.bf16.mxu1 %v12713_v39  ;;  %v12721_v39 = vld [vmem:[#allocation41_spill] sm:$0xff] }
 0x602   :  { %4860 = vmatmul.mubr.bf16.vlgmr.msra.gmra.mrb[88].mxu0 %v12693_v42 }
 0x603   :  { %4946 = vmatmul.mubr.bf16.vlgmr.msra.gmra.mrb[88].mxu1 %v12693_v42  ;;  %4871 = vmatpush1.bf16.msra.mxu0 %v12714_v5  ;;  %v12723_v42 = vld [vmem:[#allocation43_spill] sm:$0xff]  ;;  %v12724_v5 = vld [vmem:[#allocation44_spill] sm:$0xff] }
 0x604   :  { %4902 = vmatprep.mubr.bf16.mxu0 %v12715_v36  ;;  %4957 = vmatpush1.bf16.msra.mxu1 %v12716_v4  ;;  %v12726_v4 = vld [vmem:[#allocation46_spill] sm:$0xff] }
 0x605   :  { %4988 = vmatprep.mubr.bf16.mxu1 %v12715_v36  ;;  %4872 = vmatprep.subr.bf16.mxu0 %v12717_v29  ;;  %v12728_v29 = vld [vmem:[#allocation48_spill] sm:$0xff] }
 0x606   :  { %4958 = vmatprep.subr.bf16.mxu1 %v12718_v45  ;;  %v12729_v45 = vld [vmem:[#allocation10_spill] sm:$0xff] }
 0x607   :  { %4873 = vmatpush1.bf16.msra.mxu0 %v12719_v41  ;;  %v12730_v41 = vld [vmem:[#allocation49_spill] sm:$0xff] }
 0x608   :  { %4959 = vmatpush1.bf16.msra.mxu1 %v12720_v3  ;;  %4874 = vmatprep.subr.bf16.mxu0 %v12721_v39  ;;  %v12731_v3 = vld [vmem:[#allocation50_spill] sm:$0xff]  ;;  %v12732_v39 = vld [vmem:[#allocation51_spill] sm:$0xff] }
 0x609   :  { %4960 = vmatprep.subr.bf16.mxu1 %v12722_v7  ;;  %v12733_v7 = vld [vmem:[#allocation52_spill] sm:$0xff] }
 0x60b   :  { %4875 = vmatpush1.bf16.msra.mxu0 %v12723_v42 }
 0x60c   :  { %4961 = vmatpush1.bf16.msra.mxu1 %v12724_v5  ;;  %4876 = vmatprep.subr.bf16.mxu0 %v12725_v31  ;;  %v12734_v5 = vld [vmem:[#allocation53_spill] sm:$0xff] }
 0x60d   :  { %4962 = vmatprep.subr.bf16.mxu1 %v12726_v4 }
 0x60f   :  { %4877 = vmatpush1.bf16.msra.mxu0 %v12727_v2 }
 0x610   :  { %4963 = vmatpush1.bf16.msra.mxu1 %v12728_v29  ;;  %4878 = vmatprep.subr.bf16.mxu0 %v12729_v45 }
 0x611   :  { %4964 = vmatprep.subr.bf16.mxu1 %v12730_v41 }
 0x613   :  { %4879 = vmatpush1.bf16.msra.mxu0 %v12731_v3  ;;  %v12737_v3 = vld [vmem:[#allocation60_spill] sm:$0xff] }
 0x614   :  { %4965 = vmatpush1.bf16.msra.mxu1 %v12732_v39  ;;  %4880 = vmatprep.subr.bf16.mxu0 %v12733_v7 }
 0x615   :  { %v3749_v42 = vpop.f32.mrb[80].mxu0  ;;  %4966 = vmatprep.subr.bf16.mxu1 %v12734_v5 }
 0x616   :  { %v3835_v31 = vpop.f32.mrb[80].mxu1  ;;  %v3751_v54 = vpop.f32.mrb[81].mxu0 }
 0x617   :  { %v3844_v4 = vmax.f32 %v3749_v42, %v3751_v54  ;;  %v3837_v16 = vpop.f32.mrb[81].mxu1  ;;  %v3753_v2 = vpop.f32.mrb[82].mxu0  ;;  %4881 = vmatpush1.bf16.msra.mxu0 %v12735_v11 }
 0x618   :  { %v3846_v29 = vmax.f32 %v3835_v31, %v3837_v16  ;;  %v3839_v45 = vpop.f32.mrb[82].mxu1  ;;  %4967 = vmatpush1.bf16.msra.mxu1 %v12736_v44  ;;  %v3755_v41 = vpop.f32.mrb[83].mxu0  ;;  %4882 = vmatprep.subr.bf16.mxu0 %v12737_v3  ;;  %v12738_v16 = vld [vmem:[#allocation62_spill] sm:$0xff] }
 0x619   :  { %v3845_v39 = vmax.f32 %v3753_v2, %v3755_v41  ;;  %v3841_v8 = vpop.f32.mrb[83].mxu1  ;;  %4968 = vmatprep.subr.bf16.mxu1 %v10919_v32  ;;  %v12739_v41 = vld [vmem:[#allocation68_spill] sm:$0xff]  ;;  %v12740_v32 = vld [vmem:[#allocation69_spill] sm:$0xff] }
 0x61a   :  { %v3848_v7 = vmax.f32 %v3844_v4, %v3846_v29  ;;  %v3847_v5 = vmax.f32 %v3839_v45, %v3841_v8  ;;  %v12741_v8 = vld [vmem:[#allocation71_spill] sm:$0xff]  ;;  %v12742_v4 = vld [vmem:[#allocation72_spill] sm:$0xff] }
 0x61b   :  { %4883 = vmatpush1.bf16.msra.mxu0 %v10925_v58 }
 0x61c   :  { %v3850_v54 = vadd.f32 %v10260_v13, %v3848_v7  ;;  %v3849_v42 = vmax.f32 %v3845_v39, %v3847_v5  ;;  %4969 = vmatpush1.bf16.msra.mxu1 %v10932_v18  ;;  %4884 = vmatprep.subr.bf16.mxu0 %v10937_v22  ;;  %v12744_v39 = vld [vmem:[#allocation75_spill] sm:$0xff]  ;;  %v12745_v5 = vld [vmem:[#allocation77_spill] sm:$0xff] }
 0x61d   :  { %4970 = vmatprep.subr.bf16.mxu1 %v12738_v16 }
 0x61e   :  { %v3852_v31 = vmul.f32 0.01, %v3850_v54  ;;  %v3851_v3 = vadd.f32 %v10260_v13, %v3849_v42  ;;  %v12743_v13 = vld [vmem:[#allocation74_spill] sm:$0xff]  ;;  %v12748_v42 = vld [vmem:[#allocation91_spill] sm:$0xff] }
 0x61f   :  { %4885 = vmatpush1.bf16.msra.mxu0 %v12739_v41 }
 0x620   :  { %v3853_v2 = vmul.f32 0.01, %v3851_v3  ;;  %4971 = vmatpush1.bf16.msra.mxu1 %v12740_v32  ;;  %4886 = vmatprep.subr.bf16.mxu0 %v12741_v8  ;;  %v3854_v7 = vmax.f32 %v3850_v54, %v3852_v31  ;;  %v12746_v54 = vld [vmem:[#allocation89_spill] sm:$0xff]  ;;  %v12749_v31 = vld [vmem:[#allocation18_spill] sm:$0xff] }
 0x621   :  { %4972 = vmatprep.subr.bf16.mxu1 %v12742_v4 }
 0x622   :  { %v3855_v29 = vmax.f32 %v3851_v3, %v3853_v2  ;;  %v12747_v3 = vld [vmem:[#allocation90_spill] sm:$0xff]  ;;  %v12750_v2 = vld [vmem:[#allocation19_spill] sm:$0xff] }
 0x623   :  { %4887 = vmatpush1.bf16.msra.mxu0 %v10975_v61 }
 0x624   :  { %4973 = vmatpush1.bf16.msra.mxu1 %v10982_v37  ;;  %4888 = vmatprep.subr.bf16.mxu0 %v10987_v38  ;;  %v11268_v45 = vpack.c.bf16 %v3855_v29, %v3854_v7  ;;  %v12751_v7 = vld [vmem:[#allocation20_spill] sm:$0xff]  ;;  %v12752_v29 = vld [vmem:[#allocation21_spill] sm:$0xff] }
 0x625   :  { %4974 = vmatprep.subr.bf16.mxu1 %v10993_v1 }
 0x627   :  { %4889 = vmatpush1.bf16.msra.mxu0 %v10999_v20  ;;  %v12753_v20 = vld [vmem:[#allocation22_spill] sm:$0xff] }
 0x628   :  { %4975 = vmatpush1.bf16.msra.mxu1 %v12743_v13  ;;  %4890 = vmatprep.subr.bf16.mxu0 %v12744_v39  ;;  %v12754_v13 = vld [vmem:[#allocation23_spill] sm:$0xff]  ;;  %v12755_v39 = vld [vmem:[#allocation24_spill] sm:$0xff] }
 0x629   :  { %4976 = vmatprep.subr.bf16.mxu1 %v12745_v5  ;;  %v12756_v5 = vld [vmem:[#allocation25_spill] sm:$0xff] }
 0x62b   :  { %4891 = vmatpush1.bf16.msra.mxu0 %v12746_v54  ;;  %v12757_v54 = vld [vmem:[#allocation26_spill] sm:$0xff] }
 0x62c   :  { %4977 = vmatpush1.bf16.msra.mxu1 %v12747_v3  ;;  %4892 = vmatprep.subr.bf16.mxu0 %v12748_v42  ;;  %v12758_v3 = vld [vmem:[#allocation27_spill] sm:$0xff] }
 0x62d   :  { %4978 = vmatprep.subr.bf16.mxu1 %v12749_v31  ;;  %v12759_v31 = vld [vmem:[#allocation29_spill] sm:$0xff] }
 0x62f   :  { %4893 = vmatpush1.bf16.msra.mxu0 %v12750_v2  ;;  %v12760_v2 = vld [vmem:[#allocation59_spill] sm:$0xff] }
 0x630   :  { %4979 = vmatpush1.bf16.msra.mxu1 %v12751_v7  ;;  %4894 = vmatprep.subr.bf16.mxu0 %v12752_v29  ;;  %v12761_v7 = vld [vmem:[#allocation93_spill] sm:$0xff] }
 0x631   :  { %4980 = vmatprep.subr.bf16.mxu1 %v12753_v20 }
 0x633   :  { %4895 = vmatpush1.bf16.msra.mxu0 %v12754_v13 }
 0x634   :  { %4981 = vmatpush1.bf16.msra.mxu1 %v12755_v39  ;;  %4896 = vmatprep.subr.bf16.mxu0 %v12756_v5 }
 0x635   :  { %4982 = vmatprep.subr.bf16.mxu1 %v12757_v54 }
 0x637   :  { %4897 = vmatpush1.bf16.msra.mxu0 %v12758_v3 }
 0x638   :  { %4983 = vmatpush1.bf16.msra.mxu1 %v11104_v21  ;;  %4898 = vmatprep.subr.bf16.mxu0 %v12759_v31  ;;  %v12762_v21 = vld [vmem:[#allocation92_spill] sm:$0xff] }
 0x639   :  { %4984 = vmatprep.subr.bf16.mxu1 %v12760_v2 }
 0x63b   :  { %4899 = vmatpush1.bf16.msra.mxu0 %v12761_v7 }
 0x63c   :  { %4985 = vmatpush1.bf16.msra.mxu1 %v11128_v63  ;;  %4900 = vmatprep.subr.bf16.mxu0 %v11133_v25 }
 0x63d   :  { %4986 = vmatprep.subr.bf16.mxu1 %v11139_v30 }
 0x63f   :  { %4901 = vmatpush1.bf16.msra.mxu0 %v11145_v33 }
 0x640   :  { %4987 = vmatpush1.bf16.msra.mxu1 %v11152_v47  ;;  %5017 = vmatprep.subr.bf16.mxu0 %v10371_v0  ;;  %v12763_v0 = vld [vmem:[#allocation12_spill] sm:$0xff] }
 0x641   :  { %5103 = vmatprep.subr.bf16.mxu1 %v10379_v9  ;;  %v12764_v9 = vld [vmem:[#allocation13_spill] sm:$0xff] }
 0x642   :  { %4903 = vmatmul.mubr.bf16.vlgmr.msra.gmra.mrb[88].mxu0 %v12762_v21 }
 0x643   :  { %4989 = vmatmul.mubr.bf16.vlgmr.msra.gmra.mrb[88].mxu1 %v12762_v21  ;;  %5018 = vmatpush1.bf16.msra.mxu0 %v10387_v19  ;;  %v12765_v19 = vld [vmem:[#allocation7_spill] sm:$0xff] }
 0x644   :  { %5049 = vmatprep.mubr.bf16.mxu0 %v12715_v36  ;;  %5104 = vmatpush1.bf16.msra.mxu1 %v10396_v56  ;;  %v12766_v56 = vld [vmem:[#allocation14_spill] sm:$0xff] }
 0x645   :  { %5135 = vmatprep.mubr.bf16.mxu1 %v12715_v36  ;;  %5019 = vmatprep.subr.bf16.mxu0 %v10402_v23  ;;  %v12767_v23 = vld [vmem:[#allocation15_spill] sm:$0xff] }
 0x646   :  { %5105 = vmatprep.subr.bf16.mxu1 %v10408_v40  ;;  %v12768_v40 = vld [vmem:[#allocation16_spill] sm:$0xff]  ;;  %v12794_v36 = vld [vmem:[#allocation31_spill] sm:$0xff] }
 0x647   :  { %5020 = vmatpush1.bf16.msra.mxu0 %v10415_v52  ;;  %v12769_v52 = vld [vmem:[#allocation30_spill] sm:$0xff] }
 0x648   :  { %5106 = vmatpush1.bf16.msra.mxu1 %v10422_v24  ;;  %5021 = vmatprep.subr.bf16.mxu0 %v10427_v27  ;;  %v12770_v24 = vld [vmem:[#allocation6_spill] sm:$0xff]  ;;  %v12771_v27 = vld [vmem:[#allocation56_spill] sm:$0xff] }
 0x649   :  { %5107 = vmatprep.subr.bf16.mxu1 %v10434_v26  ;;  %v12772_v26 = vld [vmem:[#allocation57_spill] sm:$0xff] }
 0x64b   :  { %5022 = vmatpush1.bf16.msra.mxu0 %v10441_v60  ;;  %v12773_v60 = vld [vmem:[#allocation58_spill] sm:$0xff] }
 0x64c   :  { %5108 = vmatpush1.bf16.msra.mxu1 %v10448_v48  ;;  %5023 = vmatprep.subr.bf16.mxu0 %v10453_v6  ;;  %v12774_v48 = vld [vmem:[#allocation63_spill] sm:$0xff]  ;;  %v12775_v6 = vld [vmem:[#allocation37_spill] sm:$0xff] }
 0x64d   :  { %5109 = vmatprep.subr.bf16.mxu1 %v10459_v62  ;;  %v12776_v62 = vld [vmem:[#allocation94_spill] sm:$0xff] }
 0x64f   :  { %5024 = vmatpush1.bf16.msra.mxu0 %v10465_v10  ;;  %v12777_v10 = vld [vmem:[#allocation95_spill] sm:$0xff] }
 0x650   :  { %5110 = vmatpush1.bf16.msra.mxu1 %v10472_v55  ;;  %5025 = vmatprep.subr.bf16.mxu0 %v10477_v15  ;;  %v12778_v55 = vld [vmem:[#allocation96_spill] sm:$0xff]  ;;  %v12779_v15 = vld [vmem:[#allocation70_spill] sm:$0xff] }
 0x651   :  { %5111 = vmatprep.subr.bf16.mxu1 %v10483_v43  ;;  %v12780_v43 = vld [vmem:[#allocation65_spill] sm:$0xff] }
 0x653   :  { %5026 = vmatpush1.bf16.msra.mxu0 %v10489_v49  ;;  %v12781_v49 = vld [vmem:[#allocation66_spill] sm:$0xff] }
 0x654   :  { %5112 = vmatpush1.bf16.msra.mxu1 %v10496_v17  ;;  %5027 = vmatprep.subr.bf16.mxu0 %v10501_v14  ;;  %v12782_v17 = vld [vmem:[#allocation67_spill] sm:$0xff]  ;;  %v12783_v14 = vld [vmem:[#allocation78_spill] sm:$0xff] }
 0x655   :  { %5113 = vmatprep.subr.bf16.mxu1 %v10507_v57  ;;  %v12784_v57 = vld [vmem:[#allocation79_spill] sm:$0xff] }
 0x657   :  { %5028 = vmatpush1.bf16.msra.mxu0 %v10513_v53  ;;  %v12785_v53 = vld [vmem:[#allocation80_spill] sm:$0xff] }
 0x658   :  { %5114 = vmatpush1.bf16.msra.mxu1 %v10520_v46  ;;  %5029 = vmatprep.subr.bf16.mxu0 %v10525_v35  ;;  %v12786_v46 = vld [vmem:[#allocation81_spill] sm:$0xff]  ;;  %v12787_v35 = vld [vmem:[#allocation82_spill] sm:$0xff] }
 0x659   :  { %5115 = vmatprep.subr.bf16.mxu1 %v10531_v59  ;;  %v12788_v59 = vld [vmem:[#allocation83_spill] sm:$0xff] }
 0x65b   :  { %5030 = vmatpush1.bf16.msra.mxu0 %v10537_v51  ;;  %v12789_v51 = vld [vmem:[#allocation84_spill] sm:$0xff] }
 0x65c   :  { %5116 = vmatpush1.bf16.msra.mxu1 %v10544_v28  ;;  %5031 = vmatprep.subr.bf16.mxu0 %v10549_v12  ;;  %v12790_v28 = vld [vmem:[#allocation85_spill] sm:$0xff]  ;;  %v12791_v12 = vld [vmem:[#allocation86_spill] sm:$0xff] }
 0x65d   :  { %5117 = vmatprep.subr.bf16.mxu1 %v10555_v34  ;;  %v12792_v34 = vld [vmem:[#allocation88_spill] sm:$0xff] }
 0x65f   :  { %5032 = vmatpush1.bf16.msra.mxu0 %v10561_v50  ;;  %v12793_v50 = vld [vmem:[#allocation5_spill] sm:$0xff] }
 0x660   :  { %5118 = vmatpush1.bf16.msra.mxu1 %v12763_v0  ;;  %5033 = vmatprep.subr.bf16.mxu0 %v12764_v9  ;;  %v12795_v0 = vld [vmem:[#allocation32_spill] sm:$0xff] }
 0x661   :  { %5119 = vmatprep.subr.bf16.mxu1 %v12765_v19  ;;  %v12796_v9 = vld [vmem:[#allocation8_spill] sm:$0xff]  ;;  %v12797_v19 = vld [vmem:[#allocation33_spill] sm:$0xff] }
 0x663   :  { %5034 = vmatpush1.bf16.msra.mxu0 %v12766_v56  ;;  %v12798_v56 = vld [vmem:[#allocation34_spill] sm:$0xff] }
 0x664   :  { %5120 = vmatpush1.bf16.msra.mxu1 %v12767_v23  ;;  %5035 = vmatprep.subr.bf16.mxu0 %v12768_v40  ;;  %v12799_v23 = vld [vmem:[#allocation35_spill] sm:$0xff]  ;;  %v12800_v40 = vld [vmem:[#allocation36_spill] sm:$0xff] }
 0x665   :  { %5121 = vmatprep.subr.bf16.mxu1 %v12769_v52  ;;  %v12801_v52 = vld [vmem:[#allocation38_spill] sm:$0xff] }
 0x667   :  { %5036 = vmatpush1.bf16.msra.mxu0 %v12770_v24  ;;  %v12802_v24 = vld [vmem:[#allocation39_spill] sm:$0xff] }
 0x668   :  { %5122 = vmatpush1.bf16.msra.mxu1 %v12771_v27  ;;  %5037 = vmatprep.subr.bf16.mxu0 %v12772_v26  ;;  %v12803_v27 = vld [vmem:[#allocation40_spill] sm:$0xff]  ;;  %v12804_v26 = vld [vmem:[#allocation41_spill] sm:$0xff] }
 0x669   :  { %5123 = vmatprep.subr.bf16.mxu1 %v12773_v60  ;;  %v12805_v60 = vld [vmem:[#allocation42_spill] sm:$0xff] }
 0x66b   :  { %5038 = vmatpush1.bf16.msra.mxu0 %v12774_v48  ;;  %v12807_v48 = vld [vmem:[#allocation44_spill] sm:$0xff] }
 0x66c   :  { %5124 = vmatpush1.bf16.msra.mxu1 %v12775_v6  ;;  %5039 = vmatprep.subr.bf16.mxu0 %v12776_v62  ;;  %v12808_v6 = vld [vmem:[#allocation45_spill] sm:$0xff]  ;;  %v12809_v62 = vld [vmem:[#allocation46_spill] sm:$0xff] }
 0x66d   :  { %5125 = vmatprep.subr.bf16.mxu1 %v12777_v10  ;;  %v12811_v10 = vld [vmem:[#allocation48_spill] sm:$0xff] }
 0x66f   :  { %5040 = vmatpush1.bf16.msra.mxu0 %v12778_v55  ;;  %v12812_v55 = vld [vmem:[#allocation10_spill] sm:$0xff] }
 0x670   :  { %5126 = vmatpush1.bf16.msra.mxu1 %v12779_v15  ;;  %5041 = vmatprep.subr.bf16.mxu0 %v12780_v43  ;;  %v12813_v15 = vld [vmem:[#allocation49_spill] sm:$0xff]  ;;  %v12814_v43 = vld [vmem:[#allocation50_spill] sm:$0xff] }
 0x671   :  { %5127 = vmatprep.subr.bf16.mxu1 %v12781_v49  ;;  %v12815_v49 = vld [vmem:[#allocation51_spill] sm:$0xff] }
 0x673   :  { %5042 = vmatpush1.bf16.msra.mxu0 %v12782_v17  ;;  %v12816_v17 = vld [vmem:[#allocation52_spill] sm:$0xff] }
 0x674   :  { %5128 = vmatpush1.bf16.msra.mxu1 %v12783_v14  ;;  %5043 = vmatprep.subr.bf16.mxu0 %v12784_v57  ;;  %v12817_v57 = vld [vmem:[#allocation53_spill] sm:$0xff] }
 0x675   :  { %5129 = vmatprep.subr.bf16.mxu1 %v12785_v53 }
 0x677   :  { %5044 = vmatpush1.bf16.msra.mxu0 %v12786_v46 }
 0x678   :  { %5130 = vmatpush1.bf16.msra.mxu1 %v12787_v35  ;;  %5045 = vmatprep.subr.bf16.mxu0 %v12788_v59 }
 0x679   :  { %5131 = vmatprep.subr.bf16.mxu1 %v12789_v51 }
 0x67b   :  { %5046 = vmatpush1.bf16.msra.mxu0 %v12790_v28 }
 0x67c   :  { %5132 = vmatpush1.bf16.msra.mxu1 %v12791_v12  ;;  %5047 = vmatprep.subr.bf16.mxu0 %v12792_v34 }
 0x67d   :  { %5133 = vmatprep.subr.bf16.mxu1 %v12793_v50  ;;  %v12818_v50 = vld [vmem:[#allocation60_spill] sm:$0xff] }
 0x67f   :  { %5048 = vmatpush1.bf16.msra.mxu0 %v12794_v36  ;;  %v11397_v36 = vld [vmem:[%s11576_s6] ss:$0 sm:$0xff] }
 0x680   :  { %5134 = vmatpush1.bf16.msra.mxu1 %v12795_v0  ;;  %5060 = vmatprep.subr.bf16.mxu0 %v12796_v9 }
 0x681   :  { %5146 = vmatprep.subr.bf16.mxu1 %v12797_v19  ;;  %v12819_v19 = vld [vmem:[#allocation61_spill] sm:$0xff] }
 0x682   :  { %5050 = vmatmul.mubr.bf16.vlgmr.msra.gmra.mrb[92].mxu0 %v12762_v21 }
 0x683   :  { %5136 = vmatmul.mubr.bf16.vlgmr.msra.gmra.mrb[92].mxu1 %v12762_v21  ;;  %5061 = vmatpush1.bf16.msra.mxu0 %v12798_v56  ;;  %v12806_v21 = vld [vmem:[#allocation43_spill] sm:$0xff] }
 0x684   :  { %5092 = vmatprep.mubr.bf16.mxu0 %v11268_v45  ;;  %5147 = vmatpush1.bf16.msra.mxu1 %v12799_v23 }
 0x685   :  { %5178 = vmatprep.mubr.bf16.mxu1 %v11268_v45  ;;  %5062 = vmatprep.subr.bf16.mxu0 %v12800_v40  ;;  %v12810_v45 = vld [vmem:[#allocation47_spill] sm:$0xff] }
 0x686   :  { %5148 = vmatprep.subr.bf16.mxu1 %v12801_v52 }
 0x687   :  { %5063 = vmatpush1.bf16.msra.mxu0 %v12802_v24 }
 0x688   :  { %5149 = vmatpush1.bf16.msra.mxu1 %v12803_v27  ;;  %5064 = vmatprep.subr.bf16.mxu0 %v12804_v26  ;;  %v6582_v26 = vld [vmem:[%s11575_s7 + $0x68] sm:$0xff]  }
 0x689   :  { %5150 = vmatprep.subr.bf16.mxu1 %v12805_v60  ;;  %v6583_v60 = vld [vmem:[%s11575_s7 + $0x28] sm:$0xff]  }
 0x68b   :  { %5065 = vmatpush1.bf16.msra.mxu0 %v12806_v21  ;;  %v6584_v21 = vld [vmem:[%s11575_s7 + $0x70] sm:$0xff]  }
 0x68c   :  { %5151 = vmatpush1.bf16.msra.mxu1 %v12807_v48  ;;  %5066 = vmatprep.subr.bf16.mxu0 %v12808_v6  ;;  %v6585_v48 = vld [vmem:[%s11575_s7 + $0x30] sm:$0xff]   ;;  %v6586_v6 = vld [vmem:[%s11575_s7 + $0x78] sm:$0xff]  }
 0x68d   :  { %5152 = vmatprep.subr.bf16.mxu1 %v12809_v62  ;;  %v6587_v62 = vld [vmem:[%s11575_s7 + $0x38] sm:$0xff]  }
 0x68f   :  { %5067 = vmatpush1.bf16.msra.mxu0 %v12810_v45 }
 0x690   :  { %5153 = vmatpush1.bf16.msra.mxu1 %v12811_v10  ;;  %5068 = vmatprep.subr.bf16.mxu0 %v12812_v55 }
 0x691   :  { %5154 = vmatprep.subr.bf16.mxu1 %v12813_v15  ;;  %v6592_v15 = vld [vmem:[%s11575_s7 + $0xa0] sm:$0xff]  }
 0x693   :  { %5069 = vmatpush1.bf16.msra.mxu0 %v12814_v43 }
 0x694   :  { %5155 = vmatpush1.bf16.msra.mxu1 %v12815_v49  ;;  %5070 = vmatprep.subr.bf16.mxu0 %v12816_v17 }
 0x695   :  { %v4714_v14 = vpop.f32.mrb[84].mxu0  ;;  %5156 = vmatprep.subr.bf16.mxu1 %v12817_v57 }
 0x696   :  { %v4800_v53 = vpop.f32.mrb[84].mxu1  ;;  %v4716_v46 = vpop.f32.mrb[85].mxu0 }
 0x697   :  { %v4809_v35 = vmax.f32 %v4714_v14, %v4716_v46  ;;  %v4802_v59 = vpop.f32.mrb[85].mxu1  ;;  %v4718_v51 = vpop.f32.mrb[86].mxu0  ;;  %5071 = vmatpush1.bf16.msra.mxu0 %v12735_v11 }
 0x698   :  { %v4811_v28 = vmax.f32 %v4800_v53, %v4802_v59  ;;  %v4804_v12 = vpop.f32.mrb[86].mxu1  ;;  %5157 = vmatpush1.bf16.msra.mxu1 %v12736_v44  ;;  %v4720_v34 = vpop.f32.mrb[87].mxu0  ;;  %5072 = vmatprep.subr.bf16.mxu0 %v12818_v50 }
 0x699   :  { %v4810_v0 = vmax.f32 %v4718_v51, %v4720_v34  ;;  %v4806_v9 = vpop.f32.mrb[87].mxu1  ;;  %5158 = vmatprep.subr.bf16.mxu1 %v12819_v19 }
 0x69a   :  { %v4813_v56 = vmax.f32 %v4809_v35, %v4811_v28  ;;  %v4812_v23 = vmax.f32 %v4804_v12, %v4806_v9  ;;  %v6593_v28 = vld [vmem:[%s11575_s7 + $0xa8] sm:$0xff]   ;;  %v6594_v9 = vld [vmem:[%s11575_s7 + $0xb0] sm:$0xff]  }
 0x69b   :  { %5073 = vmatpush1.bf16.msra.mxu0 %v10925_v58 }
 0x69c   :  { %v4815_v11 = vadd.f32 %v11397_v36, %v4813_v56  ;;  %v4814_v40 = vmax.f32 %v4810_v0, %v4812_v23  ;;  %5159 = vmatpush1.bf16.msra.mxu1 %v10932_v18  ;;  %5074 = vmatprep.subr.bf16.mxu0 %v10937_v22  ;;  %v12820_v22 = vld [vmem:[#allocation73_spill] sm:$0xff] }
 0x69d   :  { %5160 = vmatprep.subr.bf16.mxu1 %v12738_v16  ;;  %v12821_v16 = vld [vmem:[#allocation74_spill] sm:$0xff] }
 0x69e   :  { %v4817_v44 = vmul.f32 0.01, %v4815_v11  ;;  %v4816_v52 = vadd.f32 %v11397_v36, %v4814_v40 }
 0x69f   :  { %5075 = vmatpush1.bf16.msra.mxu0 %v12739_v41  ;;  %v12823_v41 = vld [vmem:[#allocation77_spill] sm:$0xff] }
 0x6a0   :  { %v4818_v24 = vmul.f32 0.01, %v4816_v52  ;;  %5161 = vmatpush1.bf16.msra.mxu1 %v12740_v32  ;;  %5076 = vmatprep.subr.bf16.mxu0 %v12741_v8  ;;  %v4819_v58 = vmax.f32 %v4815_v11, %v4817_v44  ;;  %v12822_v32 = vld [vmem:[#allocation75_spill] sm:$0xff]  ;;  %v12824_v8 = vld [vmem:[#allocation89_spill] sm:$0xff]  ;;  %v6595_v11 = vld [vmem:[%s11575_s7 + $0xb8] sm:$0xff]  }
 0x6a1   :  { %5162 = vmatprep.subr.bf16.mxu1 %v12742_v4  ;;  %v12825_v4 = vld [vmem:[#allocation90_spill] sm:$0xff]  ;;  %v5489_v44 = vld [vmem:[%s11577_s9] sm:$0xff] }
 0x6a2   :  { %v4820_v27 = vmax.f32 %v4816_v52, %v4818_v24  ;;  %v5490_v52 = vld [vmem:[%s11577_s9 + $0x8] sm:$0xff]  ;;  %v5491_v24 = vld [vmem:[%s11577_s9 + $0x10] sm:$0xff] }
 0x6a3   :  { %5077 = vmatpush1.bf16.msra.mxu0 %v10975_v61  ;;  %v12826_v61 = vld [vmem:[#allocation18_spill] sm:$0xff] }
 0x6a4   :  { %5163 = vmatpush1.bf16.msra.mxu1 %v10982_v37  ;;  %5078 = vmatprep.subr.bf16.mxu0 %v10987_v38  ;;  %v11413_v18 = vpack.c.bf16 %v4820_v27, %v4819_v58  ;;  %v12827_v37 = vld [vmem:[#allocation19_spill] sm:$0xff]  ;;  %v12828_v38 = vld [vmem:[#allocation20_spill] sm:$0xff]  ;;  %v6031_v58 = vpack.c.bf16 %v5490_v52, %v5489_v44 }
 0x6a5   :  { %5164 = vmatprep.subr.bf16.mxu1 %v10993_v1  ;;  %v12829_v1 = vld [vmem:[#allocation28_spill] sm:$0xff] }
 0x6a6   :  { %v5492_v27 = vld [vmem:[%s11577_s9 + $0x18] sm:$0xff] }
 0x6a7   :  { %5079 = vmatpush1.bf16.msra.mxu0 %v12820_v22  ;;  %v6035_v22 = vpack.c.bf16 %v5492_v27, %v5491_v24 }
 0x6a8   :  { %5165 = vmatpush1.bf16.msra.mxu1 %v12821_v16  ;;  %5080 = vmatprep.subr.bf16.mxu0 %v12822_v32 }
 0x6a9   :  { %5166 = vmatprep.subr.bf16.mxu1 %v12823_v41 }
 0x6ab   :  { %5081 = vmatpush1.bf16.msra.mxu0 %v12824_v8 }
 0x6ac   :  { %5167 = vmatpush1.bf16.msra.mxu1 %v12825_v4  ;;  %5082 = vmatprep.subr.bf16.mxu0 %v12748_v42  ;;  %v6590_v42 = vld [vmem:[%s11575_s7 + $0x90] sm:$0xff]  }
 0x6ad   :  { %5168 = vmatprep.subr.bf16.mxu1 %v12826_v61 }
 0x6af   :  { %5083 = vmatpush1.bf16.msra.mxu0 %v12827_v37 }
 0x6b0   :  { %5169 = vmatpush1.bf16.msra.mxu1 %v12828_v38  ;;  %5084 = vmatprep.subr.bf16.mxu0 %v12752_v29  ;;  %v6581_v29 = vld [vmem:[%s11575_s7 + $0x20] sm:$0xff]  }
 0x6b1   :  { %5170 = vmatprep.subr.bf16.mxu1 %v12753_v20  ;;  %v6572_v20 = vld [vmem:[%s11575_s7 + $0x40] sm:$0xff]  }
 0x6b3   :  { %5085 = vmatpush1.bf16.msra.mxu0 %v12754_v13  ;;  %v6573_v13 = vld [vmem:[%s11575_s7] sm:$0xff]  }
 0x6b4   :  { %5171 = vmatpush1.bf16.msra.mxu1 %v12755_v39  ;;  %5086 = vmatprep.subr.bf16.mxu0 %v12756_v5  ;;  %v6895_v39 = vmov 0.0   ;;  %v6589_v5 = vld [vmem:[%s11575_s7 + $0x88] sm:$0xff]  }
 0x6b5   :  { %5172 = vmatprep.subr.bf16.mxu1 %v12757_v54  ;;  %v6577_v54 = vld [vmem:[%s11575_s7 + $0x10] sm:$0xff]  }
 0x6b7   :  { %5087 = vmatpush1.bf16.msra.mxu0 %v12758_v3  ;;  %v6578_v3 = vld [vmem:[%s11575_s7 + $0x58] sm:$0xff]  }
 0x6b8   :  { %5173 = vmatpush1.bf16.msra.mxu1 %v12829_v1  ;;  %5088 = vmatprep.subr.bf16.mxu0 %v12759_v31  ;;  %v6579_v31 = vld [vmem:[%s11575_s7 + $0x18] sm:$0xff]  }
 0x6b9   :  { %5174 = vmatprep.subr.bf16.mxu1 %v12760_v2  ;;  %v6580_v2 = vld [vmem:[%s11575_s7 + $0x60] sm:$0xff]  }
 0x6bb   :  { %5089 = vmatpush1.bf16.msra.mxu0 %v12761_v7  ;;  %v6591_v7 = vld [vmem:[%s11575_s7 + $0x98] sm:$0xff]  }
 0x6bc   :  { %5175 = vmatpush1.bf16.msra.mxu1 %v11128_v63  ;;  %5090 = vmatprep.subr.bf16.mxu0 %v11133_v25  ;;  %v6574_v63 = vld [vmem:[%s11575_s7 + $0x48] sm:$0xff]   ;;  %v6588_v25 = vld [vmem:[%s11575_s7 + $0x80] sm:$0xff]  }
 0x6bd   :  { %5176 = vmatprep.subr.bf16.mxu1 %v11139_v30  ;;  %v12830_v30 = vld [vmem:[#allocation76_spill] sm:$0xff] }
 0x6bf   :  { %5091 = vmatpush1.bf16.msra.mxu0 %v11145_v33  ;;  %v6575_v33 = vld [vmem:[%s11575_s7 + $0x8] sm:$0xff]  }
 0x6c0   :  { %5177 = vmatpush1.bf16.msra.mxu1 %v11152_v47  ;;  %5954 = vmatprep.subr.bf16.mxu0 %v6572_v20  ;;  %v6576_v47 = vld [vmem:[%s11575_s7 + $0x50] sm:$0xff]  }
 0x6c1   :  { %5994 = vmatprep.subr.bf16.mxu1 %v6895_v39 }
 0x6c2   :  { %5093 = vmatmul.mubr.bf16.vlgmr.msra.gmra.mrb[92].mxu0 %v12830_v30 }
 0x6c3   :  { %5179 = vmatmul.mubr.bf16.vlgmr.msra.gmra.mrb[92].mxu1 %v12830_v30  ;;  %5955 = vmatpush3.bf16.msra.mxu0 %v6573_v13 }
 0x6c4   :  { %5956 = vmatprep.subr.bf16.mxu0 %v6574_v63  ;;  %5995 = vmatpush3.bf16.msra.mxu1 %v6588_v25 }
 0x6c5   :  { %5996 = vmatprep.subr.bf16.mxu1 %v6895_v39  ;;  %6010 = vmatprep.mubr.msk.bf16.mxu1 %vm6896_vm0, %v6895_v39 }
 0x6c7   :  { %5957 = vmatpush3.bf16.msra.mxu0 %v6575_v33 }
 0x6c8   :  { %5958 = vmatprep.subr.bf16.mxu0 %v6576_v47  ;;  %5997 = vmatpush3.bf16.msra.mxu1 %v6589_v5 }
 0x6c9   :  { %5998 = vmatprep.subr.bf16.mxu1 %v6895_v39 }
 0x6cb   :  { %5959 = vmatpush3.bf16.msra.mxu0 %v6577_v54 }
 0x6cc   :  { %5960 = vmatprep.subr.bf16.mxu0 %v6578_v3  ;;  %5999 = vmatpush3.bf16.msra.mxu1 %v6590_v42  ;;  %v5493_v42 = vld [vmem:[%s11577_s9 + $0x20] sm:$0xff] }
 0x6cd   :  { %6000 = vmatprep.subr.bf16.mxu1 %v6895_v39 }
 0x6cf   :  { %5961 = vmatpush3.bf16.msra.mxu0 %v6579_v31  ;;  %v5494_v31 = vld [vmem:[%s11577_s9 + $0x28] sm:$0xff] }
 0x6d0   :  { %5962 = vmatprep.subr.bf16.mxu0 %v6580_v2  ;;  %6001 = vmatpush3.bf16.msra.mxu1 %v6591_v7  ;;  %v6039_v2 = vpack.c.bf16 %v5494_v31, %v5493_v42 }
 0x6d1   :  { %6002 = vmatprep.subr.bf16.mxu1 %v6895_v39 }
 0x6d3   :  { %5963 = vmatpush3.bf16.msra.mxu0 %v6581_v29 }
 0x6d4   :  { %5964 = vmatprep.subr.bf16.mxu0 %v6582_v26  ;;  %6003 = vmatpush3.bf16.msra.mxu1 %v6592_v15 }
 0x6d5   :  { %6004 = vmatprep.subr.bf16.mxu1 %v6895_v39 }
 0x6d7   :  { %5965 = vmatpush3.bf16.msra.mxu0 %v6583_v60 }
 0x6d8   :  { %5966 = vmatprep.subr.bf16.mxu0 %v6584_v21  ;;  %6005 = vmatpush3.bf16.msra.mxu1 %v6593_v28 }
 0x6d9   :  { %6006 = vmatprep.subr.bf16.mxu1 %v6895_v39 }
 0x6db   :  { %5967 = vmatpush3.bf16.msra.mxu0 %v6585_v48  ;;  %v5495_v48 = vld [vmem:[%s11577_s9 + $0x30] sm:$0x3] }
 0x6dc   :  { %5968 = vmatprep.subr.bf16.mxu0 %v6586_v6  ;;  %6007 = vmatpush3.bf16.msra.mxu1 %v6594_v9  ;;  %v5925_v6 = vld [vmem:[%s11578_s8] ss:$0 sm:$0xff] }
 0x6dd   :  { %6008 = vmatprep.subr.bf16.mxu1 %v6895_v39 }
 0x6df   :  { %5969 = vmatpush3.bf16.msra.mxu0 %v6587_v62 }
 0x6e0   :  { %6009 = vmatpush3.bf16.msra.mxu1 %v6595_v11  ;;  %6032 = vmatprep.subr.bf16.mxu0 %v6031_v58 }
 0x715   :  { %v4904_v45 = vpop.f32.mrb[88].mxu0 }
 0x716   :  { %v4990_v10 = vpop.f32.mrb[88].mxu1  ;;  %v4906_v55 = vpop.f32.mrb[89].mxu0 }
 0x717   :  { %v4999_v43 = vmax.f32 %v4904_v45, %v4906_v55  ;;  %v4992_v49 = vpop.f32.mrb[89].mxu1  ;;  %v4908_v17 = vpop.f32.mrb[90].mxu0 }
 0x718   :  { %v5001_v14 = vmax.f32 %v4990_v10, %v4992_v49  ;;  %v4994_v57 = vpop.f32.mrb[90].mxu1  ;;  %v4910_v53 = vpop.f32.mrb[91].mxu0 }
 0x719   :  { %v5000_v46 = vmax.f32 %v4908_v17, %v4910_v53  ;;  %v4996_v35 = vpop.f32.mrb[91].mxu1  ;;  %v5950_v53 = vld [vmem:[%s11579_s10] ss:$0 sm:$0xff] }
 0x71a   :  { %v5003_v59 = vmax.f32 %v4999_v43, %v5001_v14  ;;  %v5002_v51 = vmax.f32 %v4994_v57, %v4996_v35 }
 0x71c   :  { %v5005_v12 = vadd.f32 %v11397_v36, %v5003_v59  ;;  %v5004_v34 = vmax.f32 %v5000_v46, %v5002_v51 }
 0x71e   :  { %v5007_v50 = vmul.f32 0.01, %v5005_v12  ;;  %v5006_v0 = vadd.f32 %v11397_v36, %v5004_v34 }
 0x720   :  { %v5008_v19 = vmul.f32 0.01, %v5006_v0  ;;  %v5009_v56 = vmax.f32 %v5005_v12, %v5007_v50 }
 0x722   :  { %v5010_v23 = vmax.f32 %v5006_v0, %v5008_v19 }
 0x724   :  { %v5011_v40 = vpack.c.bf16 %v5010_v23, %v5009_v56 }
 0x726   :  { %5437 = vmatprep.mubr.bf16.mxu0 %v5011_v40 }
 0x727   :  { %5438 = vmatmul.mubr.bf16.vlgmr.msra.gmra.mrb[96].mxu0 %v11413_v18 }
 0x728   :  { %6034 = vmatpush3.bf16.msra.mxu0 %v6031_v58 }
 0x729   :  { %6036 = vmatprep.subr.bf16.mxu0 %v6035_v22 }
 0x72c   :  { %6038 = vmatpush3.bf16.msra.mxu0 %v6035_v22 }
 0x72d   :  { %6040 = vmatprep.subr.bf16.mxu0 %v6039_v2 }
 0x730   :  { %6042 = vmatpush3.bf16.msra.mxu0 %v6039_v2 }
 0x731   :  { %6026 = vmatprep.subr.msk.mxu0 %vm5510_vm1, %v5495_v48 }
 0x734   :  { %6027 = vmatpush3.msk.msra.mxu0 %vm5510_vm1, %v5495_v48 }
 0x795   :  { %v5094_v18 = vpop.f32.mrb[92].mxu0 }
 0x796   :  { %v5180_v16 = vpop.f32.mrb[92].mxu1  ;;  %v5096_v32 = vpop.f32.mrb[93].mxu0 }
 0x797   :  { %v5189_v41 = vmax.f32 %v5094_v18, %v5096_v32  ;;  %v5182_v8 = vpop.f32.mrb[93].mxu1  ;;  %v5098_v4 = vpop.f32.mrb[94].mxu0 }
 0x798   :  { %v5191_v61 = vmax.f32 %v5180_v16, %v5182_v8  ;;  %v5184_v37 = vpop.f32.mrb[94].mxu1  ;;  %v5100_v38 = vpop.f32.mrb[95].mxu0 }
 0x799   :  { %v5190_v1 = vmax.f32 %v5098_v4, %v5100_v38  ;;  %v5186_v20 = vpop.f32.mrb[95].mxu1 }
 0x79a   :  { %v5193_v13 = vmax.f32 %v5189_v41, %v5191_v61  ;;  %v5192_v63 = vmax.f32 %v5184_v37, %v5186_v20 }
 0x79c   :  { %v5195_v25 = vadd.f32 %v11397_v36, %v5193_v13  ;;  %v5194_v39 = vmax.f32 %v5190_v1, %v5192_v63 }
 0x79e   :  { %v5197_v30 = vmul.f32 0.01, %v5195_v25  ;;  %v5196_v33 = vadd.f32 %v11397_v36, %v5194_v39 }
 0x7a0   :  { %v5198_v47 = vmul.f32 0.01, %v5196_v33  ;;  %v5199_v5 = vmax.f32 %v5195_v25, %v5197_v30 }
 0x7a2   :  { %v5200_v54 = vmax.f32 %v5196_v33, %v5198_v47 }
 0x7a4   :  { %v5201_v3 = vpack.c.bf16 %v5200_v54, %v5199_v5 }
 0x7a6   :  { %6011 = vmatmul.mubr.bf16.vlgmr.msra.gmra.mrb[96].mxu1 %v5201_v3 }
 0x7fa   :  { %v5970_v7 = vpop.f32.mrb[96].mxu0 }
 0x7fb   :  { %v5971_v29 = vpop.f32.mrb[97].mxu0 }
 0x7fc   :  { %v5972_v26 = vadd.f32 %v5971_v29, %v5970_v7  ;;  %v5973_v60 = vpop.f32.mrb[98].mxu0 }
 0x7fd   :  { %v5974_v36 = vpop.f32.mrb[99].mxu0 }
 0x7fe   :  { %v5975_v21 = vadd.f32 %v5974_v36, %v5973_v60  ;;  %v5440_v62 = vadd.f32 %v5972_v26, %v5925_v6 }
 0x800   :  { %v5443_v15 = vadd.f32 %v5975_v21, %v5925_v6 }
 0x879   :  { %v5480_v45 = vpop.f32.mrb[96].mxu1 }
 0x87a   :  { %v5481_v10 = vadd.f32 %v5480_v45, %v5440_v62  ;;  %v6012_v55 = vpop.f32.mrb[97].mxu1 }
 0x87b   :  { %v5483_v43 = vpop.f32.mrb[98].mxu1 }
 0x87c   :  { %v5487_v49 = vmax.f32 %v5481_v10, 0.0  ;;  %v5484_v17 = vadd.f32 %v5483_v43, %v5443_v15  ;;  %v6013_v14 = vpop.f32.mrb[99].mxu1 }
 0x87e   :  { %v5488_v57 = vmax.f32 %v5484_v17, 0.0  ;;  %6028 = vmatprep.mubr.msk.f32.mxu0 %vm5503_vm2, %v5487_v49 }
 0x880   :  { %6029 = vmatmul.mubr.msk.f32.vlgmr.msra.gmra.mrb[100].mxu0 %vm5503_vm2, %v5488_v57 }
 0x953   :  { %v6030_v46 = vpop.f32.mrb[100].mxu0 }
 0x954   :  { %v5580_v35 = vpop.f32.mrb[101].mxu0  ;;  %v5586_v51 = vadd.f32 %v6030_v46, %v5950_v53 }
 0x955   :  { %v5581_v59 = vadd.f32 %v5950_v53, %v5580_v35 }
 0x956   :  { %v5593_v12 = vsel %vm5589_vm3, %v5586_v51, -inf }
 0x957   :  { %v5590_v28 = vsel %vm5589_vm3, %v5581_v59, -inf }
 0x958   :  { %5591 = vmax.xlane.f32.xlu0 %v5590_v28 }
 0x95c   :  { %5594 = vmax.xlane.f32.xlu0 %v5593_v12 }
 0x9e5   :  { %v5592_v34 = vpop.xlane.xlu0 %5591 }
 0x9e6   :  { %v5596_v50 = vsub.f32 %v5581_v59, %v5592_v34 }
 0x9e8   :  { %v5598_v0 = vmul.f32 1.442695, %v5596_v50 }
 0x9e9   :  { %v5595_v9 = vpop.xlane.xlu0 %5594 }
 0x9ea   :  { %6596 = vpow2.f32 %v5598_v0  ;;  %v5597_v19 = vsub.f32 %v5586_v51, %v5595_v9 }
 0x9ec   :  { %v5600_v56 = vmul.f32 1.442695, %v5597_v19 }
 0x9ee   :  { %6598 = vpow2.f32 %v5600_v56 }
 0x9f4   :  { %v6597_v23 = vpop.eup %6596 }
 0x9f5   :  { %v5602_v11 = vsel %vm5589_vm3, %v6597_v23, 0.0 }
 0x9f6   :  { %5603 = vadd.xlane.f32.xlu1 %v5602_v11 }
 0x9f8   :  { %v6599_v40 = vpop.eup %6598 }
 0x9f9   :  { %v5605_v44 = vsel %vm5589_vm3, %v6599_v40, 0.0 }
 0x9fa   :  { %5606 = vadd.xlane.f32.xlu1 %v5605_v44 }
 0xa83   :  { %v5604_v52 = vpop.xlane.xlu1 %5603 }
 0xa84   :  { %6600 = vlog2.f32 %v5604_v52 }
 0xa87   :  { %v5607_v24 = vpop.xlane.xlu1 %5606 }
 0xa88   :  { %6602 = vlog2.f32 %v5607_v24 }
 0xa8e   :  { %v6601_v58 = vpop.eup %6600 }
 0xa8f   :  { %v5609_v27 = vmul.f32 0.6931472, %v6601_v58 }
 0xa91   :  { %v5612_v22 = vsub.f32 %v5596_v50, %v5609_v27 }
 0xa92   :  { %v6603_v18 = vpop.eup %6602 }
 0xa93   :  { %5614 = vst.msk [vmem:[%s11580_s11] sm:$0xff] %vm5589_vm3, %v5612_v22  ;;  %v5611_v16 = vmul.f32 0.6931472, %v6603_v18 }
 0xa95   :  { %v5613_v32 = vsub.f32 %v5597_v19, %v5611_v16 }
 0xa97   :  { %5615 = vst.msk [vmem:[%s11580_s11 + $0x8] sm:$0xff] %vm5589_vm3, %v5613_v32 }

</bundles_post_ra>
